<compile_context>
chip_gen: v6e
topology: v6e:2x2x1
jax: 0.10.0
libtpu: 0.0.40
codegen_flags: <defaults>
</compile_context>

<pallas_src>
import functools

import jax
import jax.numpy as jnp
from jax.experimental import pallas as pl
from jax.experimental.pallas import tpu as pltpu

_EPS = 1e-5
_TR = 256  # output rows per grid step (multiple of 8)


def _round_up(x, m):
    return (x + m - 1) // m * m


# ----------------------------------------------------------------------------
# Fused conv3d(3x3x3, stride 1, "same") [+ optional BN+ReLU prologue] kernel.
# Also emits per-tile masked per-channel sum / sum-of-squares (BatchNorm stats).
# ----------------------------------------------------------------------------
def _conv_bn_kernel(scale_ref, shift_ref, x_ref, w_ref,        # inputs
                    o_ref, st_ref,                             # outputs
                    awin_ref, acc_ref,                         # VMEM scratch
                    *, TR, WIN, HALO, WP, HPWP, CP, fuse_prologue):
    t = pl.program_id(1)
    row0 = pl.multiple_of(t * TR, TR)      # window start (input storage rows)

    # -- prologue: load the input row-window once; optionally apply previous
    #    layer's BN scale/shift + ReLU; cast to bf16 into VMEM scratch.
    #    Channel CP-1 carries the 0/1 voxel-validity mask.
    win = x_ref[0, pl.ds(row0, WIN), :]                  # (WIN, CP)
    if fuse_prologue:
        winf = win.astype(jnp.float32)
        vmask = winf[:, CP - 1:CP]                       # (WIN, 1), 1.0 inside
        y = winf * scale_ref[...] + shift_ref[...]       # f32 scale/shift
        act = jnp.maximum(y, 0.0) * vmask                # zero outside volume
        awin_ref[...] = act.astype(jnp.bfloat16)
    else:
        awin_ref[...] = win.astype(jnp.bfloat16)

    # -- 27 kernel taps: shifted row-windows, lane-dense (TR,CP)x(CP,CP) bf16
    #    matmuls, accumulated in an f32 VMEM scratch.
    acc_ref[...] = jnp.zeros_like(acc_ref)
    k = 0
    for kd in range(3):
        for kh in range(3):
            for kw in range(3):
                off = (kd - 1) * HPWP + (kh - 1) * WP + (kw - 1)
                s0 = HALO + off                          # static, in [0, 2*HALO]
                lhs = awin_ref[s0:s0 + TR, :]            # (TR, CP) bf16
                acc_ref[...] += jnp.dot(lhs, w_ref[k],
                                        preferred_element_type=jnp.float32)
                k += 1

    # -- epilogue: zero rows outside the volume, emit BN statistics, carry the
    #    validity mask in channel CP-1 of the output (consumed by the next conv).
    omask = awin_ref[HALO:HALO + TR, CP - 1:CP].astype(jnp.float32)   # (TR, 1)
    acc = acc_ref[...] * omask

    ssum = jnp.sum(acc, axis=0, keepdims=True)           # (1, CP)
    ssq = jnp.sum(acc * acc, axis=0, keepdims=True)      # (1, CP)
    rid = jax.lax.broadcasted_iota(jnp.int32, (8, CP), 0)
    st = jnp.where(rid == 0, ssum, jnp.where(rid == 1, ssq, 0.0))
    st_ref[...] = st.reshape(1, 1, 8, CP)

    lid = jax.lax.broadcasted_iota(jnp.int32, (TR, CP), 1)
    out = jnp.where(lid == CP - 1, omask, acc)
    o_ref[...] = out.reshape(1, TR, CP).astype(o_ref.dtype)


def _conv_layer(x_store, w27, scale, shift, *, out_rows, fuse_prologue,
                TR, WIN, HALO, WP, HPWP, CP):
    N, S_in, _ = x_store.shape
    n_t = out_rows // TR
    kernel = functools.partial(
        _conv_bn_kernel, TR=TR, WIN=WIN, HALO=HALO, WP=WP, HPWP=HPWP, CP=CP,
        fuse_prologue=fuse_prologue)
    y, stats = pl.pallas_call(
        kernel,
        out_shape=(jax.ShapeDtypeStruct((N, out_rows, CP), jnp.bfloat16),
                   jax.ShapeDtypeStruct((N, n_t, 8, CP), jnp.float32)),
        grid_spec=pltpu.PrefetchScalarGridSpec(
            num_scalar_prefetch=0,
            grid=(N, n_t),
            in_specs=[
                pl.BlockSpec((1, CP), lambda n, t: (0, 0)),            # scale
                pl.BlockSpec((1, CP), lambda n, t: (0, 0)),            # shift
                pl.BlockSpec((1, S_in, CP), lambda n, t: (n, 0, 0)),   # acts
                pl.BlockSpec((27, CP, CP), lambda n, t: (0, 0, 0)),    # weights
            ],
            out_specs=[
                pl.BlockSpec((1, TR, CP), lambda n, t: (n, t, 0)),
                pl.BlockSpec((1, 1, 8, CP), lambda n, t: (n, t, 0, 0)),
            ],
            scratch_shapes=[
                pltpu.VMEM((WIN, CP), jnp.bfloat16),   # activated window
                pltpu.VMEM((TR, CP), jnp.float32),     # f32 accumulator
            ],
        ),
        compiler_params=pltpu.CompilerParams(
            dimension_semantics=("parallel", "arbitrary")),
    )(scale, shift, x_store, w27)
    return y, stats


# ----------------------------------------------------------------------------
# Final BN scale/shift + ReLU (lane-dense elementwise kernel).
# ----------------------------------------------------------------------------
def _bn_relu_kernel(scale_ref, shift_ref, x_ref, o_ref):
    x = x_ref[...].astype(jnp.float32)
    y = x * scale_ref[...] + shift_ref[...]
    o_ref[...] = jnp.maximum(y, 0.0).astype(o_ref.dtype)


def _bn_relu_apply(y, scale, shift, *, TR, CP):
    N, rows, _ = y.shape
    n_t = rows // TR
    return pl.pallas_call(
        _bn_relu_kernel,
        out_shape=jax.ShapeDtypeStruct((N, rows, CP), jnp.float32),
        grid_spec=pltpu.PrefetchScalarGridSpec(
            num_scalar_prefetch=0,
            grid=(N, n_t),
            in_specs=[
                pl.BlockSpec((1, CP), lambda n, t: (0, 0)),
                pl.BlockSpec((1, CP), lambda n, t: (0, 0)),
                pl.BlockSpec((1, TR, CP), lambda n, t: (n, t, 0)),
            ],
            out_specs=pl.BlockSpec((1, TR, CP), lambda n, t: (n, t, 0)),
        ),
        compiler_params=pltpu.CompilerParams(
            dimension_semantics=("parallel", "parallel")),
    )(scale, shift, y)


# ----------------------------------------------------------------------------
# Host-side glue.
# ----------------------------------------------------------------------------
def _pad_weights(w, CP):
    _, _, _, ci, co = w.shape
    wf = w.reshape(27, ci, co).astype(jnp.float32)
    wp = jnp.zeros((27, CP, CP), jnp.float32).at[:, :ci, :co].set(wf)
    return wp.astype(jnp.bfloat16)


def _bn_scale_shift(stats, gamma, beta, count, CP, eps=_EPS):
    s = jnp.sum(stats[:, :, 0, :], axis=(0, 1))
    q = jnp.sum(stats[:, :, 1, :], axis=(0, 1))
    mean = s / count
    var = q / count - mean * mean                      # biased batch variance
    g = jnp.zeros((CP,), jnp.float32).at[:gamma.shape[0]].set(gamma)
    b = jnp.zeros((CP,), jnp.float32).at[:beta.shape[0]].set(beta)
    scale = g * jax.lax.rsqrt(var + eps)
    shift = b - mean * scale
    return scale.reshape(1, CP), shift.reshape(1, CP)


def double_conv_forward(x_ncdhw, params):
    N, Cin, D, H, W = x_ncdhw.shape
    Cout = params["w1"].shape[-1]
    Dp, Hp, Wp = D + 2, H + 2, W + 2
    R = Dp * Hp * Wp                      # flattened padded-volume rows
    HALO = Hp * Wp + Wp + 1               # max |tap offset| in flattened rows
    CP = _round_up(max(Cin, Cout) + 1, 128)
    MC = CP - 1                           # validity-mask channel
    TR = _TR
    EXT = _round_up(2 * HALO, 16)
    WIN = TR + EXT                        # input rows per output tile
    R2 = _round_up(R, TR)                 # y2 rows  (storage row == padded row)
    R1 = _round_up(R2 + EXT, TR)          # y1 rows  (storage row == padded row + HALO)
    SX = R1 + EXT                         # x rows   (storage row == padded row + 2*HALO)
    conv_kw = dict(TR=TR, WIN=WIN, HALO=HALO, WP=Wp, HPWP=Hp * Wp, CP=CP)

    # ---- lane-dense flattened input storage (bf16); channel MC = 0/1 mask.
    x = jnp.transpose(x_ncdhw, (0, 2, 3, 4, 1)).astype(jnp.float32)  # NDHWC
    ones = jnp.ones((N, D, H, W, 1), jnp.float32)
    zc = jnp.zeros((N, D, H, W, CP - Cin - 1), jnp.float32)
    xa = jnp.concatenate([x, zc, ones], axis=-1)
    xa = jnp.pad(xa, ((0, 0), (1, 1), (1, 1), (1, 1), (0, 0)))
    xa = xa.reshape(N, R, CP)
    xa = jnp.pad(xa, ((0, 0), (2 * HALO, SX - R - 2 * HALO), (0, 0)))
    x_store = xa.astype(jnp.bfloat16)

    w1p = _pad_weights(params["w1"], CP)
    w2p = _pad_weights(params["w2"], CP)
    ident = jnp.ones((1, CP), jnp.float32)
    zshift = jnp.zeros((1, CP), jnp.float32)

    # ---- conv1 (no prologue) + fused BN1 batch statistics
    y1, st1 = _conv_layer(x_store, w1p, ident, zshift,
                          out_rows=R1, fuse_prologue=False, **conv_kw)
    count = float(N * D * H * W)
    scale1, shift1 = _bn_scale_shift(st1, params["g1"], params["b1"], count, CP)
    # keep the validity-mask channel alive through the fused prologue
    scale1 = scale1.at[0, MC].set(1.0)
    shift1 = shift1.at[0, MC].set(0.0)

    # ---- conv2 with fused BN1 scale/shift + ReLU prologue, + BN2 statistics
    y2, st2 = _conv_layer(y1, w2p, scale1, shift1,
                          out_rows=R2, fuse_prologue=True, **conv_kw)
    scale2, shift2 = _bn_scale_shift(st2, params["g2"], params["b2"], count, CP)

    # ---- BN2 scale/shift + ReLU (lane-dense elementwise kernel)
    a2 = _bn_relu_apply(y2, scale2, shift2, TR=TR, CP=CP)

    # ---- un-flatten: rows [0, R) of a2 are the padded-volume voxels
    a2 = a2[:, :R, :].reshape(N, Dp, Hp, Wp, CP)
    a2 = a2[:, 1:D + 1, 1:H + 1, 1:W + 1, :Cout]
    return jnp.transpose(a2, (0, 4, 1, 2, 3))


def init_params(key, in_channels, out_channels):
    k1, k2 = jax.random.split(key)
    fan1 = in_channels * 27
    fan2 = out_channels * 27
    w1 = jax.random.uniform(
        k1, (3, 3, 3, in_channels, out_channels), jnp.float32,
        minval=-1.0 / jnp.sqrt(fan1), maxval=1.0 / jnp.sqrt(fan1))
    w2 = jax.random.uniform(
        k2, (3, 3, 3, out_channels, out_channels), jnp.float32,
        minval=-1.0 / jnp.sqrt(fan2), maxval=1.0 / jnp.sqrt(fan2))
    return {
        "w1": w1,
        "w2": w2,
        "g1": jnp.ones((out_channels,), jnp.float32),
        "b1": jnp.zeros((out_channels,), jnp.float32),
        "g2": jnp.ones((out_channels,), jnp.float32),
        "b2": jnp.zeros((out_channels,), jnp.float32),
    }


# Pure-JAX f32 reference (numerical sanity check).
def _reference_forward(x_ncdhw, params, eps=_EPS):
    x = jnp.transpose(x_ncdhw, (0, 2, 3, 4, 1))

    def conv(z, w):
        return jax.lax.conv_general_dilated(
            z, w, window_strides=(1, 1, 1), padding="SAME",
            dimension_numbers=("NDHWC", "DHWIO", "NDHWC"))

    def bn_relu(z, g, b):
        m = jnp.mean(z, axis=(0, 1, 2, 3))
        v = jnp.mean((z - m) ** 2, axis=(0, 1, 2, 3))
        return jnp.maximum((z - m) / jnp.sqrt(v + eps) * g + b, 0.0)

    y = bn_relu(conv(x, params["w1"]), params["g1"], params["b1"])
    y = bn_relu(conv(y, params["w2"]), params["g2"], params["b2"])
    return jnp.transpose(y, (0, 4, 1, 2, 3))


if __name__ == "__main__":
    N, Cin, Cout, D, H, W = 2, 4, 8, 8, 8, 8
    key = jax.random.PRNGKey(0)
    kx, kp = jax.random.split(key)
    x = jax.random.normal(kx, (N, Cin, D, H, W), dtype=jnp.float32)  # NCDHW
    params = init_params(kp, Cin, Cout)

    out = jax.block_until_ready(double_conv_forward(x, params))
    assert out.shape == (N, Cout, D, H, W), out.shape
    assert bool(jnp.isfinite(out).all())

    ref = jax.block_until_ready(_reference_forward(x, params))
    rel = float(jnp.linalg.norm(out - ref) / (jnp.linalg.norm(ref) + 1e-12))
    mae = float(jnp.max(jnp.abs(out - ref)))
    # bf16 matmul operands / bf16 intermediate storage -> small expected drift.
    assert rel < 2e-2, rel
    assert mae < 1e-1, mae

    print("KERNEL_OK")
</pallas_src>

<mosaic_0001>
module attributes {stable_mosaic.version = 11 : i64} {
  func.func @_conv_bn_kernel(%arg0: i32, %arg1: i32, %arg2: memref<1x128xf32, #tpu.memory_space<vmem>>, %arg3: memref<1x128xf32, #tpu.memory_space<vmem>>, %arg4: memref<1x1504x128xbf16, #tpu.memory_space<vmem>>, %arg5: memref<27x128x128xbf16, #tpu.memory_space<vmem>>, %arg6: memref<1x256x128xbf16, #tpu.memory_space<vmem>>, %arg7: memref<1x1x8x128xf32, #tpu.memory_space<vmem>>, %arg8: memref<480x128xbf16, #tpu.memory_space<vmem>>, %arg9: memref<256x128xf32, #tpu.memory_space<vmem>>) attributes {dimension_semantics = [#tpu.dimension_semantics<parallel>, #tpu.dimension_semantics<arbitrary>], iteration_bounds = array<i64: 2, 5>, scalar_prefetch = 0 : i64, scratch_operands = 2 : i64, tpu.core_type = #tpu.core_type<tc>, window_params = [{pipeline_mode = #tpu.pipeline_mode<synchronous>, transform_indices = @transform_0, window_bounds = array<i64: 1, 128>}, {pipeline_mode = #tpu.pipeline_mode<synchronous>, transform_indices = @transform_1, window_bounds = array<i64: 1, 128>}, {transform_indices = @transform_2, window_bounds = array<i64: 1, 1504, 128>}, {pipeline_mode = #tpu.pipeline_mode<synchronous>, transform_indices = @transform_3, window_bounds = array<i64: 27, 128, 128>}, {transform_indices = @transform_4, window_bounds = array<i64: 1, 256, 128>}, {transform_indices = @transform_5, window_bounds = array<i64: 1, 1, 8, 128>}]} {
    %c256_i32 = arith.constant 256 : i32
    %0 = arith.muli %arg1, %c256_i32 : i32
    %1 = tpu.assume_multiple %0, 256 : i32
    %c0 = arith.constant 0 : index
    %2 = arith.index_cast %1 : i32 to index
    %c0_0 = arith.constant 0 : index
    %3 = vector.load %arg4[%c0, %2, %c0_0] : memref<1x1504x128xbf16, #tpu.memory_space<vmem>>, vector<1x480x128xbf16>
    %4 = vector.shape_cast %3 : vector<1x480x128xbf16> to vector<480x128xbf16>
    %c0_1 = arith.constant 0 : index
    %c0_2 = arith.constant 0 : index
    %5 = vector.load %arg8[%c0_1, %c0_2] : memref<480x128xbf16, #tpu.memory_space<vmem>>, vector<480x128xbf16>
    tpu.vector_store %arg8[%c0_1, %c0_2], %4 {strides = array<i32>} : memref<480x128xbf16, #tpu.memory_space<vmem>>, vector<480x128xbf16>,
    %cst = arith.constant 0.000000e+00 : f32
    %6 = vector.broadcast %cst : f32 to vector<256x128xf32>
    %c0_3 = arith.constant 0 : index
    %c0_4 = arith.constant 0 : index
    %7 = vector.load %arg9[%c0_3, %c0_4] : memref<256x128xf32, #tpu.memory_space<vmem>>, vector<256x128xf32>
    tpu.vector_store %arg9[%c0_3, %c0_4], %6 {strides = array<i32>} : memref<256x128xf32, #tpu.memory_space<vmem>>, vector<256x128xf32>,
    %c0_5 = arith.constant 0 : index
    %c0_6 = arith.constant 0 : index
    %8 = vector.load %arg8[%c0_5, %c0_6] : memref<480x128xbf16, #tpu.memory_space<vmem>>, vector<256x128xbf16>
    %c0_7 = arith.constant 0 : index
    %c0_8 = arith.constant 0 : index
    %9 = vector.load %arg9[%c0_7, %c0_8] : memref<256x128xf32, #tpu.memory_space<vmem>>, vector<256x128xf32>
    %c0_9 = arith.constant 0 : index
    %c0_10 = arith.constant 0 : index
    %c0_11 = arith.constant 0 : index
    %10 = vector.load %arg5[%c0_9, %c0_10, %c0_11] : memref<27x128x128xbf16, #tpu.memory_space<vmem>>, vector<1x128x128xbf16>
    %11 = vector.shape_cast %10 : vector<1x128x128xbf16> to vector<128x128xbf16>
    %cst_12 = arith.constant dense<0.000000e+00> : vector<256x128xf32>
    %12 = tpu.matmul %8, %11, %cst_12 {dimension_numbers = #tpu.dot_dimension_numbers<[1], [0], [0], [1], [0, 0, 1, 1], [], []>} : vector<256x128xbf16>, vector<128x128xbf16>, vector<256x128xf32> -> vector<256x128xf32>
    %13 = arith.addf %9, %12 : vector<256x128xf32>
    %c0_13 = arith.constant 0 : index
    %c0_14 = arith.constant 0 : index
    %14 = vector.load %arg9[%c0_13, %c0_14] : memref<256x128xf32, #tpu.memory_space<vmem>>, vector<256x128xf32>
    tpu.vector_store %arg9[%c0_13, %c0_14], %13 {strides = array<i32>} : memref<256x128xf32, #tpu.memory_space<vmem>>, vector<256x128xf32>,
    %c1 = arith.constant 1 : index
    %c0_15 = arith.constant 0 : index
    %15 = vector.load %arg8[%c1, %c0_15] : memref<480x128xbf16, #tpu.memory_space<vmem>>, vector<256x128xbf16>
    %c0_16 = arith.constant 0 : index
    %c0_17 = arith.constant 0 : index
    %16 = vector.load %arg9[%c0_16, %c0_17] : memref<256x128xf32, #tpu.memory_space<vmem>>, vector<256x128xf32>
    %c1_18 = arith.constant 1 : index
    %c0_19 = arith.constant 0 : index
    %c0_20 = arith.constant 0 : index
    %17 = vector.load %arg5[%c1_18, %c0_19, %c0_20] : memref<27x128x128xbf16, #tpu.memory_space<vmem>>, vector<1x128x128xbf16>
    %18 = vector.shape_cast %17 : vector<1x128x128xbf16> to vector<128x128xbf16>
    %cst_21 = arith.constant dense<0.000000e+00> : vector<256x128xf32>
    %19 = tpu.matmul %15, %18, %cst_21 {dimension_numbers = #tpu.dot_dimension_numbers<[1], [0], [0], [1], [0, 0, 1, 1], [], []>} : vector<256x128xbf16>, vector<128x128xbf16>, vector<256x128xf32> -> vector<256x128xf32>
    %20 = arith.addf %16, %19 : vector<256x128xf32>
    %c0_22 = arith.constant 0 : index
    %c0_23 = arith.constant 0 : index
    %21 = vector.load %arg9[%c0_22, %c0_23] : memref<256x128xf32, #tpu.memory_space<vmem>>, vector<256x128xf32>
    tpu.vector_store %arg9[%c0_22, %c0_23], %20 {strides = array<i32>} : memref<256x128xf32, #tpu.memory_space<vmem>>, vector<256x128xf32>,
    %c2 = arith.constant 2 : index
    %c0_24 = arith.constant 0 : index
    %22 = vector.load %arg8[%c2, %c0_24] : memref<480x128xbf16, #tpu.memory_space<vmem>>, vector<256x128xbf16>
    %c0_25 = arith.constant 0 : index
    %c0_26 = arith.constant 0 : index
    %23 = vector.load %arg9[%c0_25, %c0_26] : memref<256x128xf32, #tpu.memory_space<vmem>>, vector<256x128xf32>
    %c2_27 = arith.constant 2 : index
    %c0_28 = arith.constant 0 : index
    %c0_29 = arith.constant 0 : index
    %24 = vector.load %arg5[%c2_27, %c0_28, %c0_29] : memref<27x128x128xbf16, #tpu.memory_space<vmem>>, vector<1x128x128xbf16>
    %25 = vector.shape_cast %24 : vector<1x128x128xbf16> to vector<128x128xbf16>
    %cst_30 = arith.constant dense<0.000000e+00> : vector<256x128xf32>
    %26 = tpu.matmul %22, %25, %cst_30 {dimension_numbers = #tpu.dot_dimension_numbers<[1], [0], [0], [1], [0, 0, 1, 1], [], []>} : vector<256x128xbf16>, vector<128x128xbf16>, vector<256x128xf32> -> vector<256x128xf32>
    %27 = arith.addf %23, %26 : vector<256x128xf32>
    %c0_31 = arith.constant 0 : index
    %c0_32 = arith.constant 0 : index
    %28 = vector.load %arg9[%c0_31, %c0_32] : memref<256x128xf32, #tpu.memory_space<vmem>>, vector<256x128xf32>
    tpu.vector_store %arg9[%c0_31, %c0_32], %27 {strides = array<i32>} : memref<256x128xf32, #tpu.memory_space<vmem>>, vector<256x128xf32>,
    %c10 = arith.constant 10 : index
    %c0_33 = arith.constant 0 : index
    %29 = vector.load %arg8[%c10, %c0_33] : memref<480x128xbf16, #tpu.memory_space<vmem>>, vector<256x128xbf16>
    %c0_34 = arith.constant 0 : index
    %c0_35 = arith.constant 0 : index
    %30 = vector.load %arg9[%c0_34, %c0_35] : memref<256x128xf32, #tpu.memory_space<vmem>>, vector<256x128xf32>
    %c3 = arith.constant 3 : index
    %c0_36 = arith.constant 0 : index
    %c0_37 = arith.constant 0 : index
    %31 = vector.load %arg5[%c3, %c0_36, %c0_37] : memref<27x128x128xbf16, #tpu.memory_space<vmem>>, vector<1x128x128xbf16>
    %32 = vector.shape_cast %31 : vector<1x128x128xbf16> to vector<128x128xbf16>
    %cst_38 = arith.constant dense<0.000000e+00> : vector<256x128xf32>
    %33 = tpu.matmul %29, %32, %cst_38 {dimension_numbers = #tpu.dot_dimension_numbers<[1], [0], [0], [1], [0, 0, 1, 1], [], []>} : vector<256x128xbf16>, vector<128x128xbf16>, vector<256x128xf32> -> vector<256x128xf32>
    %34 = arith.addf %30, %33 : vector<256x128xf32>
    %c0_39 = arith.constant 0 : index
    %c0_40 = arith.constant 0 : index
    %35 = vector.load %arg9[%c0_39, %c0_40] : memref<256x128xf32, #tpu.memory_space<vmem>>, vector<256x128xf32>
    tpu.vector_store %arg9[%c0_39, %c0_40], %34 {strides = array<i32>} : memref<256x128xf32, #tpu.memory_space<vmem>>, vector<256x128xf32>,
    %c11 = arith.constant 11 : index
    %c0_41 = arith.constant 0 : index
    %36 = vector.load %arg8[%c11, %c0_41] : memref<480x128xbf16, #tpu.memory_space<vmem>>, vector<256x128xbf16>
    %c0_42 = arith.constant 0 : index
    %c0_43 = arith.constant 0 : index
    %37 = vector.load %arg9[%c0_42, %c0_43] : memref<256x128xf32, #tpu.memory_space<vmem>>, vector<256x128xf32>
    %c4 = arith.constant 4 : index
    %c0_44 = arith.constant 0 : index
    %c0_45 = arith.constant 0 : index
    %38 = vector.load %arg5[%c4, %c0_44, %c0_45] : memref<27x128x128xbf16, #tpu.memory_space<vmem>>, vector<1x128x128xbf16>
    %39 = vector.shape_cast %38 : vector<1x128x128xbf16> to vector<128x128xbf16>
    %cst_46 = arith.constant dense<0.000000e+00> : vector<256x128xf32>
    %40 = tpu.matmul %36, %39, %cst_46 {dimension_numbers = #tpu.dot_dimension_numbers<[1], [0], [0], [1], [0, 0, 1, 1], [], []>} : vector<256x128xbf16>, vector<128x128xbf16>, vector<256x128xf32> -> vector<256x128xf32>
    %41 = arith.addf %37, %40 : vector<256x128xf32>
    %c0_47 = arith.constant 0 : index
    %c0_48 = arith.constant 0 : index
    %42 = vector.load %arg9[%c0_47, %c0_48] : memref<256x128xf32, #tpu.memory_space<vmem>>, vector<256x128xf32>
    tpu.vector_store %arg9[%c0_47, %c0_48], %41 {strides = array<i32>} : memref<256x128xf32, #tpu.memory_space<vmem>>, vector<256x128xf32>,
    %c12 = arith.constant 12 : index
    %c0_49 = arith.constant 0 : index
    %43 = vector.load %arg8[%c12, %c0_49] : memref<480x128xbf16, #tpu.memory_space<vmem>>, vector<256x128xbf16>
    %c0_50 = arith.constant 0 : index
    %c0_51 = arith.constant 0 : index
    %44 = vector.load %arg9[%c0_50, %c0_51] : memref<256x128xf32, #tpu.memory_space<vmem>>, vector<256x128xf32>
    %c5 = arith.constant 5 : index
    %c0_52 = arith.constant 0 : index
    %c0_53 = arith.constant 0 : index
    %45 = vector.load %arg5[%c5, %c0_52, %c0_53] : memref<27x128x128xbf16, #tpu.memory_space<vmem>>, vector<1x128x128xbf16>
    %46 = vector.shape_cast %45 : vector<1x128x128xbf16> to vector<128x128xbf16>
    %cst_54 = arith.constant dense<0.000000e+00> : vector<256x128xf32>
    %47 = tpu.matmul %43, %46, %cst_54 {dimension_numbers = #tpu.dot_dimension_numbers<[1], [0], [0], [1], [0, 0, 1, 1], [], []>} : vector<256x128xbf16>, vector<128x128xbf16>, vector<256x128xf32> -> vector<256x128xf32>
    %48 = arith.addf %44, %47 : vector<256x128xf32>
    %c0_55 = arith.constant 0 : index
    %c0_56 = arith.constant 0 : index
    %49 = vector.load %arg9[%c0_55, %c0_56] : memref<256x128xf32, #tpu.memory_space<vmem>>, vector<256x128xf32>
    tpu.vector_store %arg9[%c0_55, %c0_56], %48 {strides = array<i32>} : memref<256x128xf32, #tpu.memory_space<vmem>>, vector<256x128xf32>,
    %c20 = arith.constant 20 : index
    %c0_57 = arith.constant 0 : index
    %50 = vector.load %arg8[%c20, %c0_57] : memref<480x128xbf16, #tpu.memory_space<vmem>>, vector<256x128xbf16>
    %c0_58 = arith.constant 0 : index
    %c0_59 = arith.constant 0 : index
    %51 = vector.load %arg9[%c0_58, %c0_59] : memref<256x128xf32, #tpu.memory_space<vmem>>, vector<256x128xf32>
    %c6 = arith.constant 6 : index
    %c0_60 = arith.constant 0 : index
    %c0_61 = arith.constant 0 : index
    %52 = vector.load %arg5[%c6, %c0_60, %c0_61] : memref<27x128x128xbf16, #tpu.memory_space<vmem>>, vector<1x128x128xbf16>
    %53 = vector.shape_cast %52 : vector<1x128x128xbf16> to vector<128x128xbf16>
    %cst_62 = arith.constant dense<0.000000e+00> : vector<256x128xf32>
    %54 = tpu.matmul %50, %53, %cst_62 {dimension_numbers = #tpu.dot_dimension_numbers<[1], [0], [0], [1], [0, 0, 1, 1], [], []>} : vector<256x128xbf16>, vector<128x128xbf16>, vector<256x128xf32> -> vector<256x128xf32>
    %55 = arith.addf %51, %54 : vector<256x128xf32>
    %c0_63 = arith.constant 0 : index
    %c0_64 = arith.constant 0 : index
    %56 = vector.load %arg9[%c0_63, %c0_64] : memref<256x128xf32, #tpu.memory_space<vmem>>, vector<256x128xf32>
    tpu.vector_store %arg9[%c0_63, %c0_64], %55 {strides = array<i32>} : memref<256x128xf32, #tpu.memory_space<vmem>>, vector<256x128xf32>,
    %c21 = arith.constant 21 : index
    %c0_65 = arith.constant 0 : index
    %57 = vector.load %arg8[%c21, %c0_65] : memref<480x128xbf16, #tpu.memory_space<vmem>>, vector<256x128xbf16>
    %c0_66 = arith.constant 0 : index
    %c0_67 = arith.constant 0 : index
    %58 = vector.load %arg9[%c0_66, %c0_67] : memref<256x128xf32, #tpu.memory_space<vmem>>, vector<256x128xf32>
    %c7 = arith.constant 7 : index
    %c0_68 = arith.constant 0 : index
    %c0_69 = arith.constant 0 : index
    %59 = vector.load %arg5[%c7, %c0_68, %c0_69] : memref<27x128x128xbf16, #tpu.memory_space<vmem>>, vector<1x128x128xbf16>
    %60 = vector.shape_cast %59 : vector<1x128x128xbf16> to vector<128x128xbf16>
    %cst_70 = arith.constant dense<0.000000e+00> : vector<256x128xf32>
    %61 = tpu.matmul %57, %60, %cst_70 {dimension_numbers = #tpu.dot_dimension_numbers<[1], [0], [0], [1], [0, 0, 1, 1], [], []>} : vector<256x128xbf16>, vector<128x128xbf16>, vector<256x128xf32> -> vector<256x128xf32>
    %62 = arith.addf %58, %61 : vector<256x128xf32>
    %c0_71 = arith.constant 0 : index
    %c0_72 = arith.constant 0 : index
    %63 = vector.load %arg9[%c0_71, %c0_72] : memref<256x128xf32, #tpu.memory_space<vmem>>, vector<256x128xf32>
    tpu.vector_store %arg9[%c0_71, %c0_72], %62 {strides = array<i32>} : memref<256x128xf32, #tpu.memory_space<vmem>>, vector<256x128xf32>,
    %c22 = arith.constant 22 : index
    %c0_73 = arith.constant 0 : index
    %64 = vector.load %arg8[%c22, %c0_73] : memref<480x128xbf16, #tpu.memory_space<vmem>>, vector<256x128xbf16>
    %c0_74 = arith.constant 0 : index
    %c0_75 = arith.constant 0 : index
    %65 = vector.load %arg9[%c0_74, %c0_75] : memref<256x128xf32, #tpu.memory_space<vmem>>, vector<256x128xf32>
    %c8 = arith.constant 8 : index
    %c0_76 = arith.constant 0 : index
    %c0_77 = arith.constant 0 : index
    %66 = vector.load %arg5[%c8, %c0_76, %c0_77] : memref<27x128x128xbf16, #tpu.memory_space<vmem>>, vector<1x128x128xbf16>
    %67 = vector.shape_cast %66 : vector<1x128x128xbf16> to vector<128x128xbf16>
    %cst_78 = arith.constant dense<0.000000e+00> : vector<256x128xf32>
    %68 = tpu.matmul %64, %67, %cst_78 {dimension_numbers = #tpu.dot_dimension_numbers<[1], [0], [0], [1], [0, 0, 1, 1], [], []>} : vector<256x128xbf16>, vector<128x128xbf16>, vector<256x128xf32> -> vector<256x128xf32>
    %69 = arith.addf %65, %68 : vector<256x128xf32>
    %c0_79 = arith.constant 0 : index
    %c0_80 = arith.constant 0 : index
    %70 = vector.load %arg9[%c0_79, %c0_80] : memref<256x128xf32, #tpu.memory_space<vmem>>, vector<256x128xf32>
    tpu.vector_store %arg9[%c0_79, %c0_80], %69 {strides = array<i32>} : memref<256x128xf32, #tpu.memory_space<vmem>>, vector<256x128xf32>,
    %c100 = arith.constant 100 : index
    %c0_81 = arith.constant 0 : index
    %71 = vector.load %arg8[%c100, %c0_81] : memref<480x128xbf16, #tpu.memory_space<vmem>>, vector<256x128xbf16>
    %c0_82 = arith.constant 0 : index
    %c0_83 = arith.constant 0 : index
    %72 = vector.load %arg9[%c0_82, %c0_83] : memref<256x128xf32, #tpu.memory_space<vmem>>, vector<256x128xf32>
    %c9 = arith.constant 9 : index
    %c0_84 = arith.constant 0 : index
    %c0_85 = arith.constant 0 : index
    %73 = vector.load %arg5[%c9, %c0_84, %c0_85] : memref<27x128x128xbf16, #tpu.memory_space<vmem>>, vector<1x128x128xbf16>
    %74 = vector.shape_cast %73 : vector<1x128x128xbf16> to vector<128x128xbf16>
    %cst_86 = arith.constant dense<0.000000e+00> : vector<256x128xf32>
    %75 = tpu.matmul %71, %74, %cst_86 {dimension_numbers = #tpu.dot_dimension_numbers<[1], [0], [0], [1], [0, 0, 1, 1], [], []>} : vector<256x128xbf16>, vector<128x128xbf16>, vector<256x128xf32> -> vector<256x128xf32>
    %76 = arith.addf %72, %75 : vector<256x128xf32>
    %c0_87 = arith.constant 0 : index
    %c0_88 = arith.constant 0 : index
    %77 = vector.load %arg9[%c0_87, %c0_88] : memref<256x128xf32, #tpu.memory_space<vmem>>, vector<256x128xf32>
    tpu.vector_store %arg9[%c0_87, %c0_88], %76 {strides = array<i32>} : memref<256x128xf32, #tpu.memory_space<vmem>>, vector<256x128xf32>,
    %c101 = arith.constant 101 : index
    %c0_89 = arith.constant 0 : index
    %78 = vector.load %arg8[%c101, %c0_89] : memref<480x128xbf16, #tpu.memory_space<vmem>>, vector<256x128xbf16>
    %c0_90 = arith.constant 0 : index
    %c0_91 = arith.constant 0 : index
    %79 = vector.load %arg9[%c0_90, %c0_91] : memref<256x128xf32, #tpu.memory_space<vmem>>, vector<256x128xf32>
    %c10_92 = arith.constant 10 : index
    %c0_93 = arith.constant 0 : index
    %c0_94 = arith.constant 0 : index
    %80 = vector.load %arg5[%c10_92, %c0_93, %c0_94] : memref<27x128x128xbf16, #tpu.memory_space<vmem>>, vector<1x128x128xbf16>
    %81 = vector.shape_cast %80 : vector<1x128x128xbf16> to vector<128x128xbf16>
    %cst_95 = arith.constant dense<0.000000e+00> : vector<256x128xf32>
    %82 = tpu.matmul %78, %81, %cst_95 {dimension_numbers = #tpu.dot_dimension_numbers<[1], [0], [0], [1], [0, 0, 1, 1], [], []>} : vector<256x128xbf16>, vector<128x128xbf16>, vector<256x128xf32> -> vector<256x128xf32>
    %83 = arith.addf %79, %82 : vector<256x128xf32>
    %c0_96 = arith.constant 0 : index
    %c0_97 = arith.constant 0 : index
    %84 = vector.load %arg9[%c0_96, %c0_97] : memref<256x128xf32, #tpu.memory_space<vmem>>, vector<256x128xf32>
    tpu.vector_store %arg9[%c0_96, %c0_97], %83 {strides = array<i32>} : memref<256x128xf32, #tpu.memory_space<vmem>>, vector<256x128xf32>,
    %c102 = arith.constant 102 : index
    %c0_98 = arith.constant 0 : index
    %85 = vector.load %arg8[%c102, %c0_98] : memref<480x128xbf16, #tpu.memory_space<vmem>>, vector<256x128xbf16>
    %c0_99 = arith.constant 0 : index
    %c0_100 = arith.constant 0 : index
    %86 = vector.load %arg9[%c0_99, %c0_100] : memref<256x128xf32, #tpu.memory_space<vmem>>, vector<256x128xf32>
    %c11_101 = arith.constant 11 : index
    %c0_102 = arith.constant 0 : index
    %c0_103 = arith.constant 0 : index
    %87 = vector.load %arg5[%c11_101, %c0_102, %c0_103] : memref<27x128x128xbf16, #tpu.memory_space<vmem>>, vector<1x128x128xbf16>
    %88 = vector.shape_cast %87 : vector<1x128x128xbf16> to vector<128x128xbf16>
    %cst_104 = arith.constant dense<0.000000e+00> : vector<256x128xf32>
    %89 = tpu.matmul %85, %88, %cst_104 {dimension_numbers = #tpu.dot_dimension_numbers<[1], [0], [0], [1], [0, 0, 1, 1], [], []>} : vector<256x128xbf16>, vector<128x128xbf16>, vector<256x128xf32> -> vector<256x128xf32>
    %90 = arith.addf %86, %89 : vector<256x128xf32>
    %c0_105 = arith.constant 0 : index
    %c0_106 = arith.constant 0 : index
    %91 = vector.load %arg9[%c0_105, %c0_106] : memref<256x128xf32, #tpu.memory_space<vmem>>, vector<256x128xf32>
    tpu.vector_store %arg9[%c0_105, %c0_106], %90 {strides = array<i32>} : memref<256x128xf32, #tpu.memory_space<vmem>>, vector<256x128xf32>,
    %c110 = arith.constant 110 : index
    %c0_107 = arith.constant 0 : index
    %92 = vector.load %arg8[%c110, %c0_107] : memref<480x128xbf16, #tpu.memory_space<vmem>>, vector<256x128xbf16>
    %c0_108 = arith.constant 0 : index
    %c0_109 = arith.constant 0 : index
    %93 = vector.load %arg9[%c0_108, %c0_109] : memref<256x128xf32, #tpu.memory_space<vmem>>, vector<256x128xf32>
    %c12_110 = arith.constant 12 : index
    %c0_111 = arith.constant 0 : index
    %c0_112 = arith.constant 0 : index
    %94 = vector.load %arg5[%c12_110, %c0_111, %c0_112] : memref<27x128x128xbf16, #tpu.memory_space<vmem>>, vector<1x128x128xbf16>
    %95 = vector.shape_cast %94 : vector<1x128x128xbf16> to vector<128x128xbf16>
    %cst_113 = arith.constant dense<0.000000e+00> : vector<256x128xf32>
    %96 = tpu.matmul %92, %95, %cst_113 {dimension_numbers = #tpu.dot_dimension_numbers<[1], [0], [0], [1], [0, 0, 1, 1], [], []>} : vector<256x128xbf16>, vector<128x128xbf16>, vector<256x128xf32> -> vector<256x128xf32>
    %97 = arith.addf %93, %96 : vector<256x128xf32>
    %c0_114 = arith.constant 0 : index
    %c0_115 = arith.constant 0 : index
    %98 = vector.load %arg9[%c0_114, %c0_115] : memref<256x128xf32, #tpu.memory_space<vmem>>, vector<256x128xf32>
    tpu.vector_store %arg9[%c0_114, %c0_115], %97 {strides = array<i32>} : memref<256x128xf32, #tpu.memory_space<vmem>>, vector<256x128xf32>,
    %c111 = arith.constant 111 : index
    %c0_116 = arith.constant 0 : index
    %99 = vector.load %arg8[%c111, %c0_116] : memref<480x128xbf16, #tpu.memory_space<vmem>>, vector<256x128xbf16>
    %c0_117 = arith.constant 0 : index
    %c0_118 = arith.constant 0 : index
    %100 = vector.load %arg9[%c0_117, %c0_118] : memref<256x128xf32, #tpu.memory_space<vmem>>, vector<256x128xf32>
    %c13 = arith.constant 13 : index
    %c0_119 = arith.constant 0 : index
    %c0_120 = arith.constant 0 : index
    %101 = vector.load %arg5[%c13, %c0_119, %c0_120] : memref<27x128x128xbf16, #tpu.memory_space<vmem>>, vector<1x128x128xbf16>
    %102 = vector.shape_cast %101 : vector<1x128x128xbf16> to vector<128x128xbf16>
    %cst_121 = arith.constant dense<0.000000e+00> : vector<256x128xf32>
    %103 = tpu.matmul %99, %102, %cst_121 {dimension_numbers = #tpu.dot_dimension_numbers<[1], [0], [0], [1], [0, 0, 1, 1], [], []>} : vector<256x128xbf16>, vector<128x128xbf16>, vector<256x128xf32> -> vector<256x128xf32>
    %104 = arith.addf %100, %103 : vector<256x128xf32>
    %c0_122 = arith.constant 0 : index
    %c0_123 = arith.constant 0 : index
    %105 = vector.load %arg9[%c0_122, %c0_123] : memref<256x128xf32, #tpu.memory_space<vmem>>, vector<256x128xf32>
    tpu.vector_store %arg9[%c0_122, %c0_123], %104 {strides = array<i32>} : memref<256x128xf32, #tpu.memory_space<vmem>>, vector<256x128xf32>,
    %c112 = arith.constant 112 : index
    %c0_124 = arith.constant 0 : index
    %106 = vector.load %arg8[%c112, %c0_124] : memref<480x128xbf16, #tpu.memory_space<vmem>>, vector<256x128xbf16>
    %c0_125 = arith.constant 0 : index
    %c0_126 = arith.constant 0 : index
    %107 = vector.load %arg9[%c0_125, %c0_126] : memref<256x128xf32, #tpu.memory_space<vmem>>, vector<256x128xf32>
    %c14 = arith.constant 14 : index
    %c0_127 = arith.constant 0 : index
    %c0_128 = arith.constant 0 : index
    %108 = vector.load %arg5[%c14, %c0_127, %c0_128] : memref<27x128x128xbf16, #tpu.memory_space<vmem>>, vector<1x128x128xbf16>
    %109 = vector.shape_cast %108 : vector<1x128x128xbf16> to vector<128x128xbf16>
    %cst_129 = arith.constant dense<0.000000e+00> : vector<256x128xf32>
    %110 = tpu.matmul %106, %109, %cst_129 {dimension_numbers = #tpu.dot_dimension_numbers<[1], [0], [0], [1], [0, 0, 1, 1], [], []>} : vector<256x128xbf16>, vector<128x128xbf16>, vector<256x128xf32> -> vector<256x128xf32>
    %111 = arith.addf %107, %110 : vector<256x128xf32>
    %c0_130 = arith.constant 0 : index
    %c0_131 = arith.constant 0 : index
    %112 = vector.load %arg9[%c0_130, %c0_131] : memref<256x128xf32, #tpu.memory_space<vmem>>, vector<256x128xf32>
    tpu.vector_store %arg9[%c0_130, %c0_131], %111 {strides = array<i32>} : memref<256x128xf32, #tpu.memory_space<vmem>>, vector<256x128xf32>,
    %c120 = arith.constant 120 : index
    %c0_132 = arith.constant 0 : index
    %113 = vector.load %arg8[%c120, %c0_132] : memref<480x128xbf16, #tpu.memory_space<vmem>>, vector<256x128xbf16>
    %c0_133 = arith.constant 0 : index
    %c0_134 = arith.constant 0 : index
    %114 = vector.load %arg9[%c0_133, %c0_134] : memref<256x128xf32, #tpu.memory_space<vmem>>, vector<256x128xf32>
    %c15 = arith.constant 15 : index
    %c0_135 = arith.constant 0 : index
    %c0_136 = arith.constant 0 : index
    %115 = vector.load %arg5[%c15, %c0_135, %c0_136] : memref<27x128x128xbf16, #tpu.memory_space<vmem>>, vector<1x128x128xbf16>
    %116 = vector.shape_cast %115 : vector<1x128x128xbf16> to vector<128x128xbf16>
    %cst_137 = arith.constant dense<0.000000e+00> : vector<256x128xf32>
    %117 = tpu.matmul %113, %116, %cst_137 {dimension_numbers = #tpu.dot_dimension_numbers<[1], [0], [0], [1], [0, 0, 1, 1], [], []>} : vector<256x128xbf16>, vector<128x128xbf16>, vector<256x128xf32> -> vector<256x128xf32>
    %118 = arith.addf %114, %117 : vector<256x128xf32>
    %c0_138 = arith.constant 0 : index
    %c0_139 = arith.constant 0 : index
    %119 = vector.load %arg9[%c0_138, %c0_139] : memref<256x128xf32, #tpu.memory_space<vmem>>, vector<256x128xf32>
    tpu.vector_store %arg9[%c0_138, %c0_139], %118 {strides = array<i32>} : memref<256x128xf32, #tpu.memory_space<vmem>>, vector<256x128xf32>,
    %c121 = arith.constant 121 : index
    %c0_140 = arith.constant 0 : index
    %120 = vector.load %arg8[%c121, %c0_140] : memref<480x128xbf16, #tpu.memory_space<vmem>>, vector<256x128xbf16>
    %c0_141 = arith.constant 0 : index
    %c0_142 = arith.constant 0 : index
    %121 = vector.load %arg9[%c0_141, %c0_142] : memref<256x128xf32, #tpu.memory_space<vmem>>, vector<256x128xf32>
    %c16 = arith.constant 16 : index
    %c0_143 = arith.constant 0 : index
    %c0_144 = arith.constant 0 : index
    %122 = vector.load %arg5[%c16, %c0_143, %c0_144] : memref<27x128x128xbf16, #tpu.memory_space<vmem>>, vector<1x128x128xbf16>
    %123 = vector.shape_cast %122 : vector<1x128x128xbf16> to vector<128x128xbf16>
    %cst_145 = arith.constant dense<0.000000e+00> : vector<256x128xf32>
    %124 = tpu.matmul %120, %123, %cst_145 {dimension_numbers = #tpu.dot_dimension_numbers<[1], [0], [0], [1], [0, 0, 1, 1], [], []>} : vector<256x128xbf16>, vector<128x128xbf16>, vector<256x128xf32> -> vector<256x128xf32>
    %125 = arith.addf %121, %124 : vector<256x128xf32>
    %c0_146 = arith.constant 0 : index
    %c0_147 = arith.constant 0 : index
    %126 = vector.load %arg9[%c0_146, %c0_147] : memref<256x128xf32, #tpu.memory_space<vmem>>, vector<256x128xf32>
    tpu.vector_store %arg9[%c0_146, %c0_147], %125 {strides = array<i32>} : memref<256x128xf32, #tpu.memory_space<vmem>>, vector<256x128xf32>,
    %c122 = arith.constant 122 : index
    %c0_148 = arith.constant 0 : index
    %127 = vector.load %arg8[%c122, %c0_148] : memref<480x128xbf16, #tpu.memory_space<vmem>>, vector<256x128xbf16>
    %c0_149 = arith.constant 0 : index
    %c0_150 = arith.constant 0 : index
    %128 = vector.load %arg9[%c0_149, %c0_150] : memref<256x128xf32, #tpu.memory_space<vmem>>, vector<256x128xf32>
    %c17 = arith.constant 17 : index
    %c0_151 = arith.constant 0 : index
    %c0_152 = arith.constant 0 : index
    %129 = vector.load %arg5[%c17, %c0_151, %c0_152] : memref<27x128x128xbf16, #tpu.memory_space<vmem>>, vector<1x128x128xbf16>
    %130 = vector.shape_cast %129 : vector<1x128x128xbf16> to vector<128x128xbf16>
    %cst_153 = arith.constant dense<0.000000e+00> : vector<256x128xf32>
    %131 = tpu.matmul %127, %130, %cst_153 {dimension_numbers = #tpu.dot_dimension_numbers<[1], [0], [0], [1], [0, 0, 1, 1], [], []>} : vector<256x128xbf16>, vector<128x128xbf16>, vector<256x128xf32> -> vector<256x128xf32>
    %132 = arith.addf %128, %131 : vector<256x128xf32>
    %c0_154 = arith.constant 0 : index
    %c0_155 = arith.constant 0 : index
    %133 = vector.load %arg9[%c0_154, %c0_155] : memref<256x128xf32, #tpu.memory_space<vmem>>, vector<256x128xf32>
    tpu.vector_store %arg9[%c0_154, %c0_155], %132 {strides = array<i32>} : memref<256x128xf32, #tpu.memory_space<vmem>>, vector<256x128xf32>,
    %c200 = arith.constant 200 : index
    %c0_156 = arith.constant 0 : index
    %134 = vector.load %arg8[%c200, %c0_156] : memref<480x128xbf16, #tpu.memory_space<vmem>>, vector<256x128xbf16>
    %c0_157 = arith.constant 0 : index
    %c0_158 = arith.constant 0 : index
    %135 = vector.load %arg9[%c0_157, %c0_158] : memref<256x128xf32, #tpu.memory_space<vmem>>, vector<256x128xf32>
    %c18 = arith.constant 18 : index
    %c0_159 = arith.constant 0 : index
    %c0_160 = arith.constant 0 : index
    %136 = vector.load %arg5[%c18, %c0_159, %c0_160] : memref<27x128x128xbf16, #tpu.memory_space<vmem>>, vector<1x128x128xbf16>
    %137 = vector.shape_cast %136 : vector<1x128x128xbf16> to vector<128x128xbf16>
    %cst_161 = arith.constant dense<0.000000e+00> : vector<256x128xf32>
    %138 = tpu.matmul %134, %137, %cst_161 {dimension_numbers = #tpu.dot_dimension_numbers<[1], [0], [0], [1], [0, 0, 1, 1], [], []>} : vector<256x128xbf16>, vector<128x128xbf16>, vector<256x128xf32> -> vector<256x128xf32>
    %139 = arith.addf %135, %138 : vector<256x128xf32>
    %c0_162 = arith.constant 0 : index
    %c0_163 = arith.constant 0 : index
    %140 = vector.load %arg9[%c0_162, %c0_163] : memref<256x128xf32, #tpu.memory_space<vmem>>, vector<256x128xf32>
    tpu.vector_store %arg9[%c0_162, %c0_163], %139 {strides = array<i32>} : memref<256x128xf32, #tpu.memory_space<vmem>>, vector<256x128xf32>,
    %c201 = arith.constant 201 : index
    %c0_164 = arith.constant 0 : index
    %141 = vector.load %arg8[%c201, %c0_164] : memref<480x128xbf16, #tpu.memory_space<vmem>>, vector<256x128xbf16>
    %c0_165 = arith.constant 0 : index
    %c0_166 = arith.constant 0 : index
    %142 = vector.load %arg9[%c0_165, %c0_166] : memref<256x128xf32, #tpu.memory_space<vmem>>, vector<256x128xf32>
    %c19 = arith.constant 19 : index
    %c0_167 = arith.constant 0 : index
    %c0_168 = arith.constant 0 : index
    %143 = vector.load %arg5[%c19, %c0_167, %c0_168] : memref<27x128x128xbf16, #tpu.memory_space<vmem>>, vector<1x128x128xbf16>
    %144 = vector.shape_cast %143 : vector<1x128x128xbf16> to vector<128x128xbf16>
    %cst_169 = arith.constant dense<0.000000e+00> : vector<256x128xf32>
    %145 = tpu.matmul %141, %144, %cst_169 {dimension_numbers = #tpu.dot_dimension_numbers<[1], [0], [0], [1], [0, 0, 1, 1], [], []>} : vector<256x128xbf16>, vector<128x128xbf16>, vector<256x128xf32> -> vector<256x128xf32>
    %146 = arith.addf %142, %145 : vector<256x128xf32>
    %c0_170 = arith.constant 0 : index
    %c0_171 = arith.constant 0 : index
    %147 = vector.load %arg9[%c0_170, %c0_171] : memref<256x128xf32, #tpu.memory_space<vmem>>, vector<256x128xf32>
    tpu.vector_store %arg9[%c0_170, %c0_171], %146 {strides = array<i32>} : memref<256x128xf32, #tpu.memory_space<vmem>>, vector<256x128xf32>,
    %c202 = arith.constant 202 : index
    %c0_172 = arith.constant 0 : index
    %148 = vector.load %arg8[%c202, %c0_172] : memref<480x128xbf16, #tpu.memory_space<vmem>>, vector<256x128xbf16>
    %c0_173 = arith.constant 0 : index
    %c0_174 = arith.constant 0 : index
    %149 = vector.load %arg9[%c0_173, %c0_174] : memref<256x128xf32, #tpu.memory_space<vmem>>, vector<256x128xf32>
    %c20_175 = arith.constant 20 : index
    %c0_176 = arith.constant 0 : index
    %c0_177 = arith.constant 0 : index
    %150 = vector.load %arg5[%c20_175, %c0_176, %c0_177] : memref<27x128x128xbf16, #tpu.memory_space<vmem>>, vector<1x128x128xbf16>
    %151 = vector.shape_cast %150 : vector<1x128x128xbf16> to vector<128x128xbf16>
    %cst_178 = arith.constant dense<0.000000e+00> : vector<256x128xf32>
    %152 = tpu.matmul %148, %151, %cst_178 {dimension_numbers = #tpu.dot_dimension_numbers<[1], [0], [0], [1], [0, 0, 1, 1], [], []>} : vector<256x128xbf16>, vector<128x128xbf16>, vector<256x128xf32> -> vector<256x128xf32>
    %153 = arith.addf %149, %152 : vector<256x128xf32>
    %c0_179 = arith.constant 0 : index
    %c0_180 = arith.constant 0 : index
    %154 = vector.load %arg9[%c0_179, %c0_180] : memref<256x128xf32, #tpu.memory_space<vmem>>, vector<256x128xf32>
    tpu.vector_store %arg9[%c0_179, %c0_180], %153 {strides = array<i32>} : memref<256x128xf32, #tpu.memory_space<vmem>>, vector<256x128xf32>,
    %c210 = arith.constant 210 : index
    %c0_181 = arith.constant 0 : index
    %155 = vector.load %arg8[%c210, %c0_181] : memref<480x128xbf16, #tpu.memory_space<vmem>>, vector<256x128xbf16>
    %c0_182 = arith.constant 0 : index
    %c0_183 = arith.constant 0 : index
    %156 = vector.load %arg9[%c0_182, %c0_183] : memref<256x128xf32, #tpu.memory_space<vmem>>, vector<256x128xf32>
    %c21_184 = arith.constant 21 : index
    %c0_185 = arith.constant 0 : index
    %c0_186 = arith.constant 0 : index
    %157 = vector.load %arg5[%c21_184, %c0_185, %c0_186] : memref<27x128x128xbf16, #tpu.memory_space<vmem>>, vector<1x128x128xbf16>
    %158 = vector.shape_cast %157 : vector<1x128x128xbf16> to vector<128x128xbf16>
    %cst_187 = arith.constant dense<0.000000e+00> : vector<256x128xf32>
    %159 = tpu.matmul %155, %158, %cst_187 {dimension_numbers = #tpu.dot_dimension_numbers<[1], [0], [0], [1], [0, 0, 1, 1], [], []>} : vector<256x128xbf16>, vector<128x128xbf16>, vector<256x128xf32> -> vector<256x128xf32>
    %160 = arith.addf %156, %159 : vector<256x128xf32>
    %c0_188 = arith.constant 0 : index
    %c0_189 = arith.constant 0 : index
    %161 = vector.load %arg9[%c0_188, %c0_189] : memref<256x128xf32, #tpu.memory_space<vmem>>, vector<256x128xf32>
    tpu.vector_store %arg9[%c0_188, %c0_189], %160 {strides = array<i32>} : memref<256x128xf32, #tpu.memory_space<vmem>>, vector<256x128xf32>,
    %c211 = arith.constant 211 : index
    %c0_190 = arith.constant 0 : index
    %162 = vector.load %arg8[%c211, %c0_190] : memref<480x128xbf16, #tpu.memory_space<vmem>>, vector<256x128xbf16>
    %c0_191 = arith.constant 0 : index
    %c0_192 = arith.constant 0 : index
    %163 = vector.load %arg9[%c0_191, %c0_192] : memref<256x128xf32, #tpu.memory_space<vmem>>, vector<256x128xf32>
    %c22_193 = arith.constant 22 : index
    %c0_194 = arith.constant 0 : index
    %c0_195 = arith.constant 0 : index
    %164 = vector.load %arg5[%c22_193, %c0_194, %c0_195] : memref<27x128x128xbf16, #tpu.memory_space<vmem>>, vector<1x128x128xbf16>
    %165 = vector.shape_cast %164 : vector<1x128x128xbf16> to vector<128x128xbf16>
    %cst_196 = arith.constant dense<0.000000e+00> : vector<256x128xf32>
    %166 = tpu.matmul %162, %165, %cst_196 {dimension_numbers = #tpu.dot_dimension_numbers<[1], [0], [0], [1], [0, 0, 1, 1], [], []>} : vector<256x128xbf16>, vector<128x128xbf16>, vector<256x128xf32> -> vector<256x128xf32>
    %167 = arith.addf %163, %166 : vector<256x128xf32>
    %c0_197 = arith.constant 0 : index
    %c0_198 = arith.constant 0 : index
    %168 = vector.load %arg9[%c0_197, %c0_198] : memref<256x128xf32, #tpu.memory_space<vmem>>, vector<256x128xf32>
    tpu.vector_store %arg9[%c0_197, %c0_198], %167 {strides = array<i32>} : memref<256x128xf32, #tpu.memory_space<vmem>>, vector<256x128xf32>,
    %c212 = arith.constant 212 : index
    %c0_199 = arith.constant 0 : index
    %169 = vector.load %arg8[%c212, %c0_199] : memref<480x128xbf16, #tpu.memory_space<vmem>>, vector<256x128xbf16>
    %c0_200 = arith.constant 0 : index
    %c0_201 = arith.constant 0 : index
    %170 = vector.load %arg9[%c0_200, %c0_201] : memref<256x128xf32, #tpu.memory_space<vmem>>, vector<256x128xf32>
    %c23 = arith.constant 23 : index
    %c0_202 = arith.constant 0 : index
    %c0_203 = arith.constant 0 : index
    %171 = vector.load %arg5[%c23, %c0_202, %c0_203] : memref<27x128x128xbf16, #tpu.memory_space<vmem>>, vector<1x128x128xbf16>
    %172 = vector.shape_cast %171 : vector<1x128x128xbf16> to vector<128x128xbf16>
    %cst_204 = arith.constant dense<0.000000e+00> : vector<256x128xf32>
    %173 = tpu.matmul %169, %172, %cst_204 {dimension_numbers = #tpu.dot_dimension_numbers<[1], [0], [0], [1], [0, 0, 1, 1], [], []>} : vector<256x128xbf16>, vector<128x128xbf16>, vector<256x128xf32> -> vector<256x128xf32>
    %174 = arith.addf %170, %173 : vector<256x128xf32>
    %c0_205 = arith.constant 0 : index
    %c0_206 = arith.constant 0 : index
    %175 = vector.load %arg9[%c0_205, %c0_206] : memref<256x128xf32, #tpu.memory_space<vmem>>, vector<256x128xf32>
    tpu.vector_store %arg9[%c0_205, %c0_206], %174 {strides = array<i32>} : memref<256x128xf32, #tpu.memory_space<vmem>>, vector<256x128xf32>,
    %c220 = arith.constant 220 : index
    %c0_207 = arith.constant 0 : index
    %176 = vector.load %arg8[%c220, %c0_207] : memref<480x128xbf16, #tpu.memory_space<vmem>>, vector<256x128xbf16>
    %c0_208 = arith.constant 0 : index
    %c0_209 = arith.constant 0 : index
    %177 = vector.load %arg9[%c0_208, %c0_209] : memref<256x128xf32, #tpu.memory_space<vmem>>, vector<256x128xf32>
    %c24 = arith.constant 24 : index
    %c0_210 = arith.constant 0 : index
    %c0_211 = arith.constant 0 : index
    %178 = vector.load %arg5[%c24, %c0_210, %c0_211] : memref<27x128x128xbf16, #tpu.memory_space<vmem>>, vector<1x128x128xbf16>
    %179 = vector.shape_cast %178 : vector<1x128x128xbf16> to vector<128x128xbf16>
    %cst_212 = arith.constant dense<0.000000e+00> : vector<256x128xf32>
    %180 = tpu.matmul %176, %179, %cst_212 {dimension_numbers = #tpu.dot_dimension_numbers<[1], [0], [0], [1], [0, 0, 1, 1], [], []>} : vector<256x128xbf16>, vector<128x128xbf16>, vector<256x128xf32> -> vector<256x128xf32>
    %181 = arith.addf %177, %180 : vector<256x128xf32>
    %c0_213 = arith.constant 0 : index
    %c0_214 = arith.constant 0 : index
    %182 = vector.load %arg9[%c0_213, %c0_214] : memref<256x128xf32, #tpu.memory_space<vmem>>, vector<256x128xf32>
    tpu.vector_store %arg9[%c0_213, %c0_214], %181 {strides = array<i32>} : memref<256x128xf32, #tpu.memory_space<vmem>>, vector<256x128xf32>,
    %c221 = arith.constant 221 : index
    %c0_215 = arith.constant 0 : index
    %183 = vector.load %arg8[%c221, %c0_215] : memref<480x128xbf16, #tpu.memory_space<vmem>>, vector<256x128xbf16>
    %c0_216 = arith.constant 0 : index
    %c0_217 = arith.constant 0 : index
    %184 = vector.load %arg9[%c0_216, %c0_217] : memref<256x128xf32, #tpu.memory_space<vmem>>, vector<256x128xf32>
    %c25 = arith.constant 25 : index
    %c0_218 = arith.constant 0 : index
    %c0_219 = arith.constant 0 : index
    %185 = vector.load %arg5[%c25, %c0_218, %c0_219] : memref<27x128x128xbf16, #tpu.memory_space<vmem>>, vector<1x128x128xbf16>
    %186 = vector.shape_cast %185 : vector<1x128x128xbf16> to vector<128x128xbf16>
    %cst_220 = arith.constant dense<0.000000e+00> : vector<256x128xf32>
    %187 = tpu.matmul %183, %186, %cst_220 {dimension_numbers = #tpu.dot_dimension_numbers<[1], [0], [0], [1], [0, 0, 1, 1], [], []>} : vector<256x128xbf16>, vector<128x128xbf16>, vector<256x128xf32> -> vector<256x128xf32>
    %188 = arith.addf %184, %187 : vector<256x128xf32>
    %c0_221 = arith.constant 0 : index
    %c0_222 = arith.constant 0 : index
    %189 = vector.load %arg9[%c0_221, %c0_222] : memref<256x128xf32, #tpu.memory_space<vmem>>, vector<256x128xf32>
    tpu.vector_store %arg9[%c0_221, %c0_222], %188 {strides = array<i32>} : memref<256x128xf32, #tpu.memory_space<vmem>>, vector<256x128xf32>,
    %c222 = arith.constant 222 : index
    %c0_223 = arith.constant 0 : index
    %190 = vector.load %arg8[%c222, %c0_223] : memref<480x128xbf16, #tpu.memory_space<vmem>>, vector<256x128xbf16>
    %c0_224 = arith.constant 0 : index
    %c0_225 = arith.constant 0 : index
    %191 = vector.load %arg9[%c0_224, %c0_225] : memref<256x128xf32, #tpu.memory_space<vmem>>, vector<256x128xf32>
    %c26 = arith.constant 26 : index
    %c0_226 = arith.constant 0 : index
    %c0_227 = arith.constant 0 : index
    %192 = vector.load %arg5[%c26, %c0_226, %c0_227] : memref<27x128x128xbf16, #tpu.memory_space<vmem>>, vector<1x128x128xbf16>
    %193 = vector.shape_cast %192 : vector<1x128x128xbf16> to vector<128x128xbf16>
    %cst_228 = arith.constant dense<0.000000e+00> : vector<256x128xf32>
    %194 = tpu.matmul %190, %193, %cst_228 {dimension_numbers = #tpu.dot_dimension_numbers<[1], [0], [0], [1], [0, 0, 1, 1], [], []>} : vector<256x128xbf16>, vector<128x128xbf16>, vector<256x128xf32> -> vector<256x128xf32>
    %195 = arith.addf %191, %194 : vector<256x128xf32>
    %c0_229 = arith.constant 0 : index
    %c0_230 = arith.constant 0 : index
    %196 = vector.load %arg9[%c0_229, %c0_230] : memref<256x128xf32, #tpu.memory_space<vmem>>, vector<256x128xf32>
    tpu.vector_store %arg9[%c0_229, %c0_230], %195 {strides = array<i32>} : memref<256x128xf32, #tpu.memory_space<vmem>>, vector<256x128xf32>,
    %c111_231 = arith.constant 111 : index
    %c127 = arith.constant 127 : index
    %197 = vector.load %arg8[%c111_231, %c127] : memref<480x128xbf16, #tpu.memory_space<vmem>>, vector<256x1xbf16>
    %198 = arith.extf %197 : vector<256x1xbf16> to vector<256x1xf32>
    %c0_232 = arith.constant 0 : index
    %c0_233 = arith.constant 0 : index
    %199 = vector.load %arg9[%c0_232, %c0_233] : memref<256x128xf32, #tpu.memory_space<vmem>>, vector<256x128xf32>
    %200 = vector.broadcast %198 : vector<256x1xf32> to vector<256x128xf32>
    %201 = arith.mulf %199, %200 : vector<256x128xf32>
    %cst_234 = arith.constant dense<0.000000e+00> : vector<128xf32>
    %202 = vector.multi_reduction <add>, %201, %cst_234 [0] : vector<256x128xf32> to vector<128xf32>
    %203 = vector.shape_cast %202 : vector<128xf32> to vector<1x128xf32>
    %204 = arith.mulf %201, %201 : vector<256x128xf32>
    %cst_235 = arith.constant dense<0.000000e+00> : vector<128xf32>
    %205 = vector.multi_reduction <add>, %204, %cst_235 [0] : vector<256x128xf32> to vector<128xf32>
    %206 = vector.shape_cast %205 : vector<128xf32> to vector<1x128xf32>
    %207 = tpu.iota {dimensions = array<i32: 0>} : vector<8x128xi32>
    %c0_i32 = arith.constant 0 : i32
    %208 = vector.broadcast %c0_i32 : i32 to vector<8x128xi32>
    %209 = arith.cmpi eq, %207, %208 : vector<8x128xi32>
    %c1_i32 = arith.constant 1 : i32
    %210 = vector.broadcast %c1_i32 : i32 to vector<8x128xi32>
    %211 = arith.cmpi eq, %207, %210 : vector<8x128xi32>
    %cst_236 = arith.constant 0.000000e+00 : f32
    %212 = vector.shape_cast %206 : vector<1x128xf32> to vector<1x128xf32>
    %213 = vector.broadcast %212 : vector<1x128xf32> to vector<8x128xf32>
    %214 = vector.broadcast %cst_236 : f32 to vector<8x128xf32>
    %215 = arith.select %211, %213, %214 : vector<8x128xi1>, vector<8x128xf32>
    %216 = vector.shape_cast %203 : vector<1x128xf32> to vector<1x128xf32>
    %217 = vector.broadcast %216 : vector<1x128xf32> to vector<8x128xf32>
    %218 = arith.select %209, %217, %215 : vector<8x128xi1>, vector<8x128xf32>
    %219 = vector.shape_cast %218 : vector<8x128xf32> to vector<1x1x8x128xf32>
    %c0_237 = arith.constant 0 : index
    %c0_238 = arith.constant 0 : index
    %c0_239 = arith.constant 0 : index
    %c0_240 = arith.constant 0 : index
    %220 = vector.load %arg7[%c0_237, %c0_238, %c0_239, %c0_240] : memref<1x1x8x128xf32, #tpu.memory_space<vmem>>, vector<1x1x8x128xf32>
    tpu.vector_store %arg7[%c0_237, %c0_238, %c0_239, %c0_240], %219 {strides = array<i32>} : memref<1x1x8x128xf32, #tpu.memory_space<vmem>>, vector<1x1x8x128xf32>,
    %221 = tpu.iota {dimensions = array<i32: 1>} : vector<256x128xi32>
    %c127_i32 = arith.constant 127 : i32
    %222 = vector.broadcast %c127_i32 : i32 to vector<256x128xi32>
    %223 = arith.cmpi eq, %221, %222 : vector<256x128xi32>
    %224 = vector.shape_cast %198 : vector<256x1xf32> to vector<256x1xf32>
    %225 = vector.broadcast %224 : vector<256x1xf32> to vector<256x128xf32>
    %226 = arith.select %223, %225, %201 : vector<256x128xi1>, vector<256x128xf32>
    %227 = vector.shape_cast %226 : vector<256x128xf32> to vector<1x256x128xf32>
    %228 = arith.truncf %227 : vector<1x256x128xf32> to vector<1x256x128xbf16>
    %c0_241 = arith.constant 0 : index
    %c0_242 = arith.constant 0 : index
    %c0_243 = arith.constant 0 : index
    %229 = vector.load %arg6[%c0_241, %c0_242, %c0_243] : memref<1x256x128xbf16, #tpu.memory_space<vmem>>, vector<1x256x128xbf16>
    tpu.vector_store %arg6[%c0_241, %c0_242, %c0_243], %228 {strides = array<i32>} : memref<1x256x128xbf16, #tpu.memory_space<vmem>>, vector<1x256x128xbf16>,
    return
  }
  func.func @transform_0(%arg0: i32, %arg1: i32) -> (i32, i32) {
    %c0_i32 = arith.constant 0 : i32
    %c0_i32_0 = arith.constant 0 : i32
    %c0_i32_1 = arith.constant 0 : i32
    return %c0_i32, %c0_i32_0 : i32, i32
  }
  func.func @transform_1(%arg0: i32, %arg1: i32) -> (i32, i32) {
    %c0_i32 = arith.constant 0 : i32
    %c0_i32_0 = arith.constant 0 : i32
    %c0_i32_1 = arith.constant 0 : i32
    return %c0_i32, %c0_i32_0 : i32, i32
  }
  func.func @transform_2(%arg0: i32, %arg1: i32) -> (i32, i32, i32) {
    %c0_i32 = arith.constant 0 : i32
    %c0_i32_0 = arith.constant 0 : i32
    %c0_i32_1 = arith.constant 0 : i32
    return %arg0, %c0_i32, %c0_i32_0 : i32, i32, i32
  }
  func.func @transform_3(%arg0: i32, %arg1: i32) -> (i32, i32, i32) {
    %c0_i32 = arith.constant 0 : i32
    %c0_i32_0 = arith.constant 0 : i32
    %c0_i32_1 = arith.constant 0 : i32
    %c0_i32_2 = arith.constant 0 : i32
    return %c0_i32, %c0_i32_0, %c0_i32_1 : i32, i32, i32
  }
  func.func @transform_4(%arg0: i32, %arg1: i32) -> (i32, i32, i32) {
    %c0_i32 = arith.constant 0 : i32
    %c0_i32_0 = arith.constant 0 : i32
    return %arg0, %arg1, %c0_i32 : i32, i32, i32
  }
  func.func @transform_5(%arg0: i32, %arg1: i32) -> (i32, i32, i32, i32) {
    %c0_i32 = arith.constant 0 : i32
    %c0_i32_0 = arith.constant 0 : i32
    %c0_i32_1 = arith.constant 0 : i32
    return %arg0, %arg1, %c0_i32, %c0_i32_0 : i32, i32, i32, i32
  }
}

</mosaic_0001>

<bundles_post_ra>
// kernel: tpu_custom_call.1
= control target key start
LH: loop header
LB: loop body
LE: loop exit
PB: predicated region body
PF: predicated region fallthrough
CT: control target
= control target key end

     0   :  { %s23166_s0 = inlined_call_operand.hbm [shape: f32[1,128], index: 0, kind: input, shape index: {}]   ;;  %s23167_s1 = inlined_call_operand.vmem [shape: f32[1,128], index: 1, kind: input, shape index: {}]   ;;  %s23168_s2 = inlined_call_operand.hbm [shape: bf16[2,1504,128], index: 2, kind: input, shape index: {}]   ;;  %s23169_s3 = inlined_call_operand.hbm [shape: bf16[27,128,128], index: 3, kind: input, shape index: {}]   ;;  %s23170_s4 = inlined_call_operand.hbm [shape: bf16[2,1280,128], index: 4, kind: output, shape index: {0}]   ;;  %s23171_s5 = inlined_call_operand.hbm [shape: f32[2,5,8,128], index: 5, kind: output, shape index: {1}]  }
   0x1   :  { %23216 = sst [smem:[#allocation76_spill]] %s23166_s0 }
   0x2   :  { %23217 = sst [smem:[#allocation77_spill]] %s23169_s3 }
   0x3   :  { %23218 = sst [smem:[#allocation78_spill]] %s23170_s4 }
   0x4   :  { %23219 = sst [smem:[#allocation79_spill]] %s23171_s5 }
   0x5   :  { %11 = vsyncpa [#allocation5], 0 }
   0x6   :  { %12 = vsyncpa [#allocation8], 0 }
   0x7   :  { %14 = vsyncpa [#allocation8 + $0x1], 0 }
   0x8   :  { %15 = vsyncpa [#allocation6], 0 }
   0x9   :  { %17 = vsyncpa [#allocation6 + $0x1], 0 }
   0xa   :  { %18 = vsyncpa [#allocation12], 0 }
   0xb   :  { %20 = vsyncpa [#allocation12 + $0x1], 0  ;;  %s19679_s1 = smov 0   ;;  %s19681_s18 = smov 0  }
   0xc   :  { %s19683_s19 = smov 0   ;;  %s19685_s20 = smov 0  }
   0xd   :  { %s19687_s21 = smov 0   ;;  %s19689_s22 = smov 0  }
   0xe   :  { %s19691_s23 = smov 0   ;;  %s19693_s24 = smov 0  }
   0xf   :  { %s19695_s25 = smov 0   ;;  %s19697_s26 = smov 0  }
  0x10   :  { %s19699_s27 = smov 0  }
  0x11 LB: > { %23220 = sst [smem:[#allocation18_spill]] %s19597_s1  ;;  %s19733_s28 = sadd.s32 4294967295, %s19637_s27   ;;  %s19637_s27 = sphi %s19699_s27, %s23478_s27   ;;  %s19633_s26 = sphi %s19697_s26, %s23477_s26   ;;  %s19629_s25 = sphi %s19695_s25, %s23476_s25   ;;  %s19625_s24 = sphi %s19693_s24, %s23475_s24   ;;  %s19621_s23 = sphi %s19691_s23, %s23474_s23   ;;  %s19617_s22 = sphi %s19689_s22, %s23473_s22   ;;  %s19613_s21 = sphi %s19687_s21, %s23472_s21   ;;  %s19609_s20 = sphi %s19685_s20, %s23471_s20   ;;  %s19605_s19 = sphi %s19683_s19, %s23470_s19   ;;  %s19601_s18 = sphi %s19681_s18, %s23469_s18   ;;  %s19597_s1 = sphi %s19679_s1, %s23468_s1  }
  0x12   : > { %23221 = sst [smem:[#allocation19_spill]] %s19637_s27  ;;  %p94_p0 = scmp.ne.s32.totalorder %s19617_s22, %s19613_s21 }
  0x13   : > { %p95_p1 = scmp.eq.s32.totalorder %s19637_s27, 0  ;;  %p100_p2 = scmp.ne.s32.totalorder %s19613_s21, %s19609_s20 }
  0x14   : > { %s15785_s29 = sadd.s32 4294967294, %s19637_s27   ;;  %p23172_p3 = scmp.eq.s32.totalorder %s19733_s28, 0 }
  0x15   : > { %p19741_p4 = por %p95_p1, %p94_p0  ;;  %p146_p5 = scmp.ne.s32.totalorder %s19605_s19, %s19601_s18 }
  0x16   : > { %p19749_p6 = por %p23172_p3, %p100_p2  ;;  %p147_p7 = scmp.eq.s32.totalorder %s19733_s28, 9 }
  0x17   : > { %p152_p8 = scmp.ne.s32.totalorder %s19601_s18, %s19597_s1  ;;  %p153_p9 = scmp.eq.s32.totalorder %s15785_s29, 9 }
  0x18   : > { %p19756_p10 = por %p147_p7, %p146_p5  ;;  %p15786_p11 = scmp.ge.s32.totalorder %s19637_s27, 1 }
  0x19   : > { %p19761_p12 = por %p153_p9, %p152_p8  ;;  %p188_p13 = scmp.lt.s32.totalorder %s19637_s27, 11 }
  0x1a   : > { %s23224_s7 = scalar_select %p19756_p10, 1, 0 }
  0x1b   : > { %s23226_s8 = scalar_select %p19761_p12, 1, 0 }
  0x1c   : > { %23225 = sst [smem:[#allocation20_spill]] %s23224_s7  ;;  %p19766_p0 = pnand %p15786_p11, %p188_p13 }
  0x1d   : > { %23227 = sst [smem:[#allocation21_spill]] %s23226_s8  ;;  %s19639_s10 = smov [#allocation9]  }
  0x1e   : > { %s214_s11 = sshll.u32 %s19639_s10, 4  ;;  %p18602_p1 = pneg %p19766_p0  ;;  %s215_s11 = int_to_ptr.vmem [resolvable:$true] %s214_s11 }
  0x1f   : > { %p18622_p2 = scmp.lt.s32.totalorder %s19637_s27, 10  ;;  %s19410_s14 = scalar_lea.vmem %s215_s11, 27648 }
  0x20   : > { %p19775_p5 = pnand %p18602_p1, %p23172_p3  ;;  %p19411_p9 = scmp.ne.s32.totalorder %s215_s11, %s19410_s14 }
  0x21   : > { %p19781_p7 = pnand %p18622_p2, %p19741_p4  ;;  %p19418_p12 = scmp.lt.s32.totalorder %s215_s11, %s215_s11 }
  0x22   : > { %p19401_p8 = pneg %p19775_p5  ;;  %p19419_p1 = scmp.lt.s32.totalorder %s19410_s14, %s19410_s14 }
  0x24   : > { %p19413_p11 = pnand %p19411_p9, %p19401_p8  ;;  %p19420_p3 = por %p19419_p1, %p19418_p12 }
  0x26   : > { %p19414_p13 = pneg %p19413_p11 }
  0x28   : > { %p19421_p10 = pnand %p19420_p3, %p19414_p13 }
  0x2a   : > { %19424 = shalt.err (!%p19421_p10)
}
  0x2b   : > { %s23175_s15 = smov 64   ;;  %s23176_s16 = smov 4  }
  0x2c   : > { %s23231_s3 = sld [smem:[#allocation77_spill]]  ;;  %s19642_s29 = smov [#allocation4]  }
  0x2d   : > { %s201_s30 = sshll.u32 %s19642_s29, 4  ;;  %s202_s30 = int_to_ptr.vmem [resolvable:$true] %s201_s30 }
  0x2e   : > { %s19436_s10 = scalar_lea.vmem %s202_s30, 16  ;;  %s19443_s14 = scalar_lea.vmem %s202_s30, 32 }
  0x2f   : > { %p19437_p4 = scmp.ne.s32.totalorder %s202_s30, %s19436_s10  ;;  %p19444_p12 = scmp.lt.s32.totalorder %s202_s30, %s202_s30 }
  0x30   : > { %p19445_p2 = scmp.lt.s32.totalorder %s19443_s14, %s19436_s10 }
  0x31   : > { %p19439_p3 = pnand %p19437_p4, %p19401_p8 }
  0x32   : > { %18608 = dma.hbm_to_vmem [thread:$0]  (!%p19775_p5), %s23231_s3, 27648, %s215_s11, [#allocation8], %s23175_s15, %s23175_s15, %s23176_s16  }
  0x33   : > { %p19440_p10 = pneg %p19439_p3  ;;  %p19446_p9 = por %p19445_p2, %p19444_p12 }
  0x35   : > { %p19447_p11 = pnand %p19446_p9, %p19440_p10 }
  0x37   : > { %19450 = shalt.err (!%p19447_p11)
}
  0x38   : > { %s23232_s0 = sld [smem:[#allocation76_spill]]  ;;  %s87_s11 = sadd.s32 1, %s19617_s22 }
  0x39   : > { %s35_s20 = sadd.s32 1, %s19629_s25  ;;  %s38_s29 = sadd.s32 1, %s19633_s26 }
  0x3a   : > { %p36_p8 = scmp.ge.s32.totalorder %s35_s20, 5  ;;  %s136_s10 = sadd.s32 1, %s19605_s19 }
  0x3b   : > { %s230_s12 = sand.u32 1, %s19617_s22   ;;  %s228_s8 = sand.u32 1, %s19637_s27  }
  0x3c   : > { %s23480_s20 = smov (%p36_p8, %s35_s20), 0  ;;  %s23482_s29 = smov (!%p36_p8, %s38_s29), %s19633_s26 }
  0x3d   : > { %23233 = sst [smem:[#allocation22_spill]] %s23480_s20  ;;  %s18583_s14 = smul.u32 752, %s230_s12 }
  0x3e   : > { %18605 = dma.hbm_to_vmem [thread:$0]  (!%p19775_p5), %s23232_s0, 16, %s202_s30, [#allocation5]  }
  0x3f   : > { %p40_p13 = scmp.ge.s32.totalorder %s23482_s29, 2  ;;  %s18584_s17 = smul.u32 12032, %s19633_s26 }
  0x40   : > { %s132_s15 = ssub.s32 %s19629_s25, %s23480_s20  ;;  %s232_s30 = scalar_lea.vmem [#allocation7], %s18583_s14 }
  0x41   : > { %s23484_s29 = smov (%p40_p13, %s23482_s29), 0  ;;  %s239_s16 = sshll.u32 %s232_s30, 4  ;;  %s240_s16 = int_to_ptr.vmem [resolvable:$true] %s239_s16 }
  0x42   : > { %s84_s0 = ssub.s32 %s19633_s26, %s23484_s29  ;;  %s238_s5 = scalar_lea.hbm %s23168_s2, %s18584_s17 }
  0x43   : > { %p85_p5 = scmp.eq.s32.totalorder %s84_s0, 0  ;;  %s133_s7 = sor.u32 %s132_s15, %s84_s0 }
  0x44   : > { %p134_p1 = scmp.eq.s32.totalorder %s133_s7, 0  ;;  %s229_s4 = scalar_lea.sflag [#allocation8], %s228_s8 }
  0x45   : > { %s19826_s27 = scalar_select %p85_p5, %s19617_s22, %s87_s11  }
  0x46   : > { %s19829_s12 = scalar_select %p134_p1, %s19605_s19, %s136_s10  }
  0x47   : > { %p19453_p4 = pneg %p19781_p7  ;;  %s19464_s20 = scalar_lea.vmem %s240_s16, 12032 }
  0x48   : > { %p19465_p3 = scmp.ne.s32.totalorder %s240_s16, %s19464_s20  ;;  %s19643_s14 = smov [#allocation7]  }
  0x49   : > { %s19469_s30 = sshll.u32 %s19643_s14, 4  ;;  %s19470_s30 = int_to_ptr.vmem [resolvable:$false] %s19469_s30 }
  0x4a   : > { %p19467_p10 = pnand %p19465_p3, %p19453_p4  ;;  %s19471_s3 = scalar_lea.vmem %s19470_s30, 24064 }
  0x4b   : > { %p19472_p2 = scmp.lt.s32.totalorder %s240_s16, %s19470_s30  ;;  %p19473_p9 = scmp.lt.s32.totalorder %s19471_s3, %s19464_s20 }
  0x4c   : > { %p19468_p12 = pneg %p19467_p10 }
  0x4d   : > { %p19474_p11 = por %p19473_p9, %p19472_p2 }
  0x4f   : > { %p19475_p8 = pnand %p19474_p11, %p19468_p12 }
  0x51   : > { %19478 = shalt.err (!%p19475_p8)
}
  0x52   : > { %s23234_s0 = smov 4   ;;  %s23235_s1 = smov 64  }
  0x53   : > { %18612 = dma.hbm_to_vmem [thread:$0]  (!%p19781_p7), %s238_s5, 12032, %s240_s16, %s229_s4, %s23235_s1, %s23235_s1, %s23234_s0  }
  0x54   : > { %251 = sbr.rel (%p19766_p0) target bundleno = 1314 (0x522), region = 36 }
  0x59   : > { %p23236_p13 = scmp.eq.s32.totalorder %s19733_s28, 0 }
  0x5b   : > { %19576 = dma.done.wait (%p23236_p13), [#allocation5], 16   ;;  %p23237_p5 = pmov %p23236_p13 }
  0x5c   : > { %s257_s7 = sand.u32 1, %s19733_s28   ;;  %s259_s15 = sand.u32 1, %s19613_s21  }
  0x5d   : > { %19578 = vsyncadd (%p23237_p5), [#allocation5], 4294967280  ;;  %s18585_s11 = smul.u32 752, %s259_s15  ;;  %s258_s13 = scalar_lea.sflag [#allocation8], %s257_s7 }
  0x5f   : > { %s261_s20 = scalar_lea.vmem [#allocation7], %s18585_s11 }
  0x60   : > { %19580 = dma.done.wait (%p19749_p6), %s258_s13, 12032  }
  0x61   : > { %19582 = vsyncadd (%p19749_p6), %s258_s13, 4294955264  ;;  %p23238_p0 = pmov %p23237_p5 }
  0x63   : > { %19584 = dma.done.wait (%p23238_p0), [#allocation8], 27648   ;;  %p23239_p7 = pmov %p23238_p0 }
  0x64   : > { %s15796_s4 = sshll.u32 %s19621_s23, 8  ;;  %v18728_v0 = vld [vmem:[#allocation9 + $0x38] sm:$0xff]   ;;  %v18729_v1 = vld [vmem:[#allocation9 + $0x30] sm:$0xff]   ;;  %v18730_v2 = vld [vmem:[#allocation9 + $0x28] sm:$0xff]   ;;  %vm1070_vm0 = vsmask.f32 7424 }
  0x65   : > { %19586 = vsyncadd (%p23239_p7), [#allocation8], 4294939648  ;;  %s300_s5 = sshra.s32 %s15796_s4, 3  ;;  %17271 = vmatprep.subr.bf16.mxu0 %v18728_v0  ;;  %18567 = vmatprep.subr.bf16.mxu1 %v18728_v0  ;;  %v18731_v3 = vld [vmem:[#allocation9 + $0x20] sm:$0xff]   ;;  %v18732_v8 = vld [vmem:[#allocation9 + $0x18] sm:$0xff]   ;;  %vm1657_vm1 = vcmask 1046528  }
  0x66   : > { %s15797_s9 = sshll.u32 %s300_s5, 2  ;;  %17272 = vmatpush3.bf16.msra.mxu0 %v18728_v0  ;;  %18575 = vmatpush3.bf16.msra.mxu1 %v18728_v0  ;;  %v18733_v13 = vld [vmem:[#allocation9 + $0x10] sm:$0xff]   ;;  %v18734_v16 = vld [vmem:[#allocation9 + $0x8] sm:$0xff]   ;;  %v18735_v17 = vld [vmem:[#allocation9] sm:$0xff]   ;;  %vm2632_vm2 = vsmask.f32 6400 }
  0x67   : > { %17273 = vmatprep.subr.bf16.mxu0 %v18729_v1  ;;  %18568 = vmatprep.subr.bf16.mxu1 %v18729_v1  ;;  %s19855_s6 = scalar_lea.vmem %s261_s20, %s15797_s9 [#allocation7]  ;;  %v18740_v18 = vld [vmem:[#allocation9 + $0x78] sm:$0xff]   ;;  %v18742_v26 = vld [vmem:[#allocation9 + $0x70] sm:$0xff]   ;;  %v18748_v34 = vld [vmem:[#allocation9 + $0x68] sm:$0xff]   ;;  %vm3239_vm3 = vcmask 1045504   ;;  %vm4821_vm4 = vcmask 1044480   ;;  %vm14737_vm7 = vcmask 1040384  }
  0x68   : > { %v304_v4 = vld [vmem:[%s19855_s6] sm:$0xff]   ;;  %v306_v6 = vld [vmem:[%s19855_s6 + $0x8] sm:$0xff]   ;;  %v308_v9 = vld [vmem:[%s19855_s6 + $0x10] sm:$0xff]   ;;  %vm4214_vm5 = vsmask.f32 5376  ;;  %s22606_s28 = sand.u32 1, %s19601_s18  }
  0x69   : > { %v320_v5 = vld [vmem:[%s19855_s6 + $0x40] sm:$0xff]   ;;  %364 = vst [vmem:[#allocation2] sm:$0xff] %v304_v4   ;;  %366 = vst [vmem:[#allocation2 + $0x8] sm:$0xff] %v306_v6   ;;  %v322_v7 = vld [vmem:[%s19855_s6 + $0x48] sm:$0xff]   ;;  %vm7376_vm6 = vsmask.f32 4352 }
  0x6a   : > { %17274 = vmatpush3.bf16.msra.mxu0 %v18729_v1  ;;  %18576 = vmatpush3.bf16.msra.mxu1 %v18729_v1  ;;  %380 = vst [vmem:[#allocation2 + $0x40] sm:$0xff] %v320_v5   ;;  %382 = vst [vmem:[#allocation2 + $0x48] sm:$0xff] %v322_v7   ;;  %v324_v10 = vld [vmem:[%s19855_s6 + $0x50] sm:$0xff]   ;;  %v310_v11 = vld [vmem:[%s19855_s6 + $0x18] sm:$0xff]   ;;  %vm15245_vm9 = vsmask.f32 256 }
  0x6b   : > { %17275 = vmatprep.subr.bf16.mxu0 %v18730_v2  ;;  %18569 = vmatprep.subr.bf16.mxu1 %v18730_v2  ;;  %368 = vst [vmem:[#allocation2 + $0x10] sm:$0xff] %v308_v9   ;;  %384 = vst [vmem:[#allocation2 + $0x50] sm:$0xff] %v324_v10   ;;  %v326_v12 = vld [vmem:[%s19855_s6 + $0x58] sm:$0xff]   ;;  %v312_v19 = vld [vmem:[%s19855_s6 + $0x20] sm:$0xff]   ;;  %vm15246_vm10 = vsmask.f32 4368 }
  0x6c   : > { %370 = vst [vmem:[#allocation2 + $0x18] sm:$0xff] %v310_v11   ;;  %386 = vst [vmem:[#allocation2 + $0x58] sm:$0xff] %v326_v12   ;;  %v328_v20 = vld [vmem:[%s19855_s6 + $0x60] sm:$0xff]   ;;  %v314_v21 = vld [vmem:[%s19855_s6 + $0x28] sm:$0xff]   ;;  %s15794_s16 = sshll.u32 %s22606_s28, 7  ;;  %s18586_s8 = smul.u32 160, %s19625_s24 }
  0x6d   : > { %372 = vst [vmem:[#allocation2 + $0x20] sm:$0xff] %v312_v19   ;;  %v330_v22 = vld [vmem:[%s19855_s6 + $0x68] sm:$0xff]   ;;  %388 = vst [vmem:[#allocation2 + $0x60] sm:$0xff] %v328_v20   ;;  %v316_v30 = vld [vmem:[%s19855_s6 + $0x30] sm:$0xff]   ;;  %s22647_s10 = scalar_lea.vmem [#allocation10], %s15794_s16  ;;  %s16505_s17 = sshll.u32 %s19621_s23, 5 }
  0x6e   : > { %17276 = vmatpush3.bf16.msra.mxu0 %v18730_v2  ;;  %18577 = vmatpush3.bf16.msra.mxu1 %v18730_v2  ;;  %v18741_v23 = vld [vmem:[#allocation9 + $0xb8] sm:$0xff]   ;;  %374 = vst [vmem:[#allocation2 + $0x28] sm:$0xff] %v314_v21   ;;  %390 = vst [vmem:[#allocation2 + $0x68] sm:$0xff] %v330_v22   ;;  %v18743_v27 = vld [vmem:[#allocation9 + $0xb0] sm:$0xff]   ;;  %s15622_s14 = sadd.s32 %s18586_s8, %s16505_s17  ;;  %s18587_s30 = smul.u32 5, %s19625_s24 }
  0x6f   : > { %17277 = vmatprep.subr.bf16.mxu0 %v18731_v3  ;;  %18570 = vmatprep.subr.bf16.mxu1 %v18731_v3  ;;  %v332_v31 = vld [vmem:[%s19855_s6 + $0x70] sm:$0xff]   ;;  %v318_v32 = vld [vmem:[%s19855_s6 + $0x38] sm:$0xff]   ;;  %376 = vst [vmem:[#allocation2 + $0x30] sm:$0xff] %v316_v30   ;;  %v18758_v46 = vld [vmem:[#allocation9 + $0x50] sm:$0xff]   ;;  %s15795_s3 = sshll.u32 %s22606_s28, 3  ;;  %s15625_s0 = sshll.u32 %s22647_s10, 4  ;;  %s23053_s0 = int_to_ptr.vmem [resolvable:$true] %s15625_s0 }
  0x70   : > { %v18736_v14 = vld [vmem:[#allocation2] sm:$0xff]   ;;  %v18738_v24 = vld [vmem:[#allocation2 + $0x8] sm:$0xff]   ;;  %392 = vst [vmem:[#allocation2 + $0x70] sm:$0xff] %v332_v31   ;;  %378 = vst [vmem:[#allocation2 + $0x38] sm:$0xff] %v318_v32   ;;  %s16506_s1 = sshll.u32 %s15622_s14, 6  ;;  %s23051_s24 = sadd.s32 %s19621_s23, %s18587_s30 }
  0x71   : > { %v18737_v15 = vld [vmem:[#allocation2 + $0x40] sm:$0xff]   ;;  %17287 = vmatprep.mubr.bf16.mxu0 %v18736_v14  ;;  %v18739_v25 = vld [vmem:[#allocation2 + $0x48] sm:$0xff]   ;;  %v334_v33 = vld [vmem:[%s19855_s6 + $0x78] sm:$0xff]   ;;  %s23459_s11 = sld [smem:[#allocation78_spill]]  ;;  %s16507_s20 = sshll.u32 %s23051_s24, 7 }
  0x72   : > { %17278 = vmatpush3.bf16.msra.mxu0 %v18731_v3  ;;  %18578 = vmatpush3.bf16.msra.mxu1 %v18731_v3  ;;  %v18744_v28 = vld [vmem:[#allocation2 + $0x10] sm:$0xff]   ;;  %394 = vst [vmem:[#allocation2 + $0x78] sm:$0xff] %v334_v33   ;;  %v18749_v35 = vld [vmem:[#allocation9 + $0xa8] sm:$0xff]   ;;  %v18759_v47 = vld [vmem:[#allocation9 + $0x90] sm:$0xff]   ;;  %s23460_s23 = sld [smem:[#allocation20_spill]]  ;;  %s23068_s4 = scalar_lea.vmem [#allocation11], %s15795_s3 }
  0x73   : > { %17279 = vmatprep.subr.bf16.mxu0 %v18732_v8  ;;  %18571 = vmatprep.subr.bf16.mxu1 %v18732_v8  ;;  %v18745_v29 = vld [vmem:[#allocation2 + $0x50] sm:$0xff]   ;;  %v18746_v36 = vld [vmem:[#allocation2 + $0x18] sm:$0xff]   ;;  %v18768_v48 = vld [vmem:[#allocation2] sm:$0xff]   ;;  %s15643_s5 = sshll.u32 %s23068_s4, 4  ;;  %s15605_s9 = scalar_lea.sflag [#allocation6], %s22606_s28  ;;  %s15644_s5 = int_to_ptr.vmem [resolvable:$true] %s15643_s5 }
  0x74   : > { %17303 = vmatprep.mubr.bf16.mxu1 %v18737_v15  ;;  %v18747_v37 = vld [vmem:[#allocation2 + $0x58] sm:$0xff]   ;;  %v18752_v40 = vld [vmem:[#allocation2 + $0x20] sm:$0xff]   ;;  %v18756_v42 = vld [vmem:[#allocation9 + $0x58] sm:$0xff]   ;;  %v1074_v52 = vshll.u32 %v18768_v48, 16  ;;  %v1072_v58 = vshrl.u32 %v18768_v48, 16  ;;  %s19645_s16 = smov [#allocation10]  }
  0x75   : > { %v18750_v38 = vld [vmem:[#allocation9 + $0x60] sm:$0xff]   ;;  %v18753_v41 = vld [vmem:[#allocation2 + $0x60] sm:$0xff]   ;;  %v18757_v43 = vld [vmem:[#allocation9 + $0x98] sm:$0xff]   ;;  %s19483_s8 = sshll.u32 %s19645_s16, 4  ;;  %s19484_s8 = int_to_ptr.vmem [resolvable:$false] %s19483_s8 }
  0x76   : > { %17280 = vmatpush3.bf16.msra.mxu0 %v18732_v8  ;;  %18579 = vmatpush3.bf16.msra.mxu1 %v18732_v8  ;;  %v18751_v39 = vld [vmem:[#allocation9 + $0xa0] sm:$0xff]   ;;  %v18754_v44 = vld [vmem:[#allocation2 + $0x28] sm:$0xff]   ;;  %v18770_v54 = vld [vmem:[#allocation2] sm:$0xfe]   ;;  %v1076_v59 = vrot.slane %v1074_v52, 1  ;;  %s19485_s17 = scalar_lea.vmem %s19484_s8, 4096  ;;  %p19486_p10 = scmp.lt.s32.totalorder %s23053_s0, %s19484_s8 }
  0x77   : > { %17281 = vmatprep.subr.bf16.mxu0 %v18733_v13  ;;  %18572 = vmatprep.subr.bf16.mxu1 %v18733_v13  ;;  %v18755_v45 = vld [vmem:[#allocation2 + $0x68] sm:$0xff]   ;;  %v18760_v49 = vld [vmem:[#allocation2 + $0x30] sm:$0xff]   ;;  %v18764_v57 = vld [vmem:[#allocation9 + $0x48] sm:$0xff]   ;;  %v1658_v1 = vrot.slane %v18770_v54, 1  ;;  %s23058_s13 = scalar_lea.hbm %s23459_s11, %s16506_s1 }
  0x78   : > { %v18769_v50 = vld [vmem:[#allocation2 + $0x8] sm:$0xff]   ;;  %v18761_v51 = vld [vmem:[#allocation2 + $0x70] sm:$0xff]   ;;  %v18765_v60 = vld [vmem:[#allocation9 + $0x88] sm:$0xff]   ;;  %v1077_v6 = vor.u32 %v1076_v59, %v1072_v58  ;;  %p23461_p1 = scmp.ne.s32.totalorder %s23460_s23, 0 }
  0x79   : > { %v1079_v53 = vshll.u32 %v18769_v50, 16  ;;  %v18771_v55 = vld [vmem:[#allocation2 + $0x8] sm:$0xff]   ;;  %v18772_v56 = vld [vmem:[#allocation2 + $0x10] sm:$0xff]   ;;  %v18762_v62 = vld [vmem:[#allocation2 + $0x38] sm:$0xff]   ;;  %v1083_v7 = vshrl.u32 %v18769_v50, 16 }
  0x7a   : > { %17282 = vmatpush3.bf16.msra.mxu0 %v18733_v13  ;;  %18580 = vmatpush3.bf16.msra.mxu1 %v18733_v13  ;;  %v18773_v61 = vld [vmem:[#allocation2 + $0x10] sm:$0xff]   ;;  %v18763_v63 = vld [vmem:[#allocation2 + $0x78] sm:$0xff]   ;;  %v1659_v2 = vrot.slane %v18771_v55, 1  ;;  %v1087_v3 = vshll.u32 %v18772_v56, 16  ;;  %v1091_v11 = vshrl.u32 %v18772_v56, 16  ;;  %v18778_v13 = vld [vmem:[#allocation2 + $0x20] sm:$0xff]  }
  0x7b   : > { %17283 = vmatprep.subr.bf16.mxu0 %v18734_v16  ;;  %18573 = vmatprep.subr.bf16.mxu1 %v18734_v16  ;;  %v1081_v0 = vrot.slane %v1079_v53, 1  ;;  %v18766_v4 = vld [vmem:[#allocation9 + $0x40] sm:$0xff]   ;;  %v1661_v10 = vrot.slane %v18773_v61, 1  ;;  %v18775_v19 = vld [vmem:[#allocation9 + $0x138] sm:$0xff]   ;;  %v18779_v22 = vld [vmem:[#allocation2 + $0x20] sm:$0xff]   ;;  %v1107_v31 = vshrl.u32 %v18778_v13, 16 }
  0x7c   : > { %v18767_v5 = vld [vmem:[#allocation9 + $0x80] sm:$0xff]   ;;  %v1660_v15 = vsel %vm1657_vm1, %v1658_v1, %v1659_v2  ;;  %v19880_v30 = vld [vmem:[#allocation2 + $0x28] sm:$0xff]   ;;  %v18790_v54 = vld [vmem:[#allocation2 + $0x40] sm:$0xff]  }
  0x7d   : > { %v18776_v8 = vld [vmem:[#allocation2 + $0x18] sm:$0xff]   ;;  %v1082_v14 = vsel %vm1070_vm0, %v1077_v6, %v1081_v0  ;;  %v18785_v48 = vld [vmem:[#allocation2 + $0x30] sm:$0xff]   ;;  %v18794_v1 = vld [vmem:[#allocation2 + $0x48] sm:$0xff]  }
  0x7e   : > { %17284 = vmatpush3.bf16.msra.mxu0 %v18734_v16  ;;  %18581 = vmatpush3.bf16.msra.mxu1 %v18734_v16  ;;  %v19873_v9 = vld [vmem:[#allocation2 + $0x18] sm:$0xff]   ;;  %v1095_v12 = vshll.u32 %v18776_v8, 16  ;;  %v1089_v16 = vrot.slane %v1087_v3, 1  ;;  %v1669_v61 = vrot.slane %v18785_v48, 1  ;;  %v18791_v3 = vld [vmem:[#allocation2 + $0x40] sm:$0xff]   ;;  %vm22627_vm11 = vmor %vm15245_vm9, %vm15246_vm10 }
  0x7f   : > { %17285 = vmatprep.subr.bf16.mxu0 %v18735_v17  ;;  %18574 = vmatprep.subr.bf16.mxu1 %v18735_v17  ;;  %v1663_v21 = vrot.slane %v19873_v9, 1  ;;  %v18789_v53 = vld [vmem:[#allocation2 + $0x38] sm:$0xff]   ;;  %v18799_v9 = vld [vmem:[#allocation9 + $0x118] sm:$0xff]   ;;  %v336_v48 = vld [vmem:[%s19855_s6 + $0x80] sm:$0xf] }
  0x80   : > { %v1097_v20 = vrot.slane %v1095_v12, 1  ;;  %v18793_v58 = vld [vmem:[#allocation9 + $0x120] sm:$0xff]   ;;  %v1139_v12 = vshrl.u32 %v18790_v54, 16  ;;  %396 = vst [vmem:[#allocation2 + $0x80] sm:$0xf] %v336_v48 }
  0x82   : > { %17286 = vmatpush3.bf16.msra.mxu0 %v18735_v17  ;;  %18582 = vmatpush3.bf16.msra.mxu1 %v18735_v17  ;;  %v18774_v17 = vld [vmem:[#allocation9 + $0xf8] sm:$0xff]  }
  0x83   : > { %17319 = vmatprep.subr.bf16.mxu1 %v18740_v18  ;;  %17367 = vmatprep.subr.bf16.mxu0 %v18741_v23 }
  0x85   : > { %17288 = vmatmul.mubr.bf16.vlgmr.msra.gmra.mxu0 %v18738_v24  ;;  %17304 = vmatmul.mubr.bf16.vlgmr.msra.gmra.mxu1 %v18739_v25  ;;  %v1103_v24 = vshll.u32 %v18778_v13, 16  ;;  %v18782_v25 = vld [vmem:[#allocation2 + $0x28] sm:$0xff]   ;;  %v1143_v13 = vshll.u32 %v18794_v1, 16 }
  0x86   : > { %17320 = vmatpush3.bf16.msra.mxu1 %v18740_v18  ;;  %17368 = vmatpush3.bf16.msra.mxu0 %v18741_v23  ;;  %v1085_v18 = vor.u32 %v1083_v7, %v1081_v0  ;;  %v1093_v23 = vor.u32 %v1091_v11, %v1089_v16  ;;  %v1111_v32 = vshll.u32 %v18782_v25, 16 }
  0x87   : > { %17321 = vmatprep.subr.bf16.mxu1 %v18742_v26  ;;  %17369 = vmatprep.subr.bf16.mxu0 %v18743_v27 }
  0x88   : > { %17291 = vmatprep.mubr.bf16.mxu0 %v18744_v28  ;;  %17307 = vmatprep.mubr.bf16.mxu1 %v18745_v29  ;;  %v1099_v28 = vshrl.u32 %v18776_v8, 16  ;;  %v18780_v29 = vld [vmem:[#allocation9 + $0xf0] sm:$0xff]   ;;  %v1098_v33 = vsel %vm1070_vm0, %v1093_v23, %v1097_v20 }
  0x89   : > { %v19895_v8 = vld [vmem:[#allocation2 + $0x48] sm:$0xff]  }
  0x8a   : > { %17322 = vmatpush3.bf16.msra.mxu1 %v18742_v26  ;;  %17370 = vmatpush3.bf16.msra.mxu0 %v18743_v27  ;;  %v1090_v26 = vsel %vm1070_vm0, %v1085_v18, %v1089_v16  ;;  %v1662_v27 = vsel %vm1657_vm1, %v1659_v2, %v1661_v10  ;;  %v1135_v2 = vshll.u32 %v18790_v54, 16  ;;  %v1673_v16 = vrot.slane %v18791_v3, 1 }
  0x8b   : > { %17323 = vmatprep.subr.bf16.mxu1 %v18748_v34  ;;  %17371 = vmatprep.subr.bf16.mxu0 %v18749_v35  ;;  %v1675_v18 = vrot.slane %v19895_v8, 1 }
  0x8d   : > { %17292 = vmatmul.mubr.bf16.gmra.mxu0 %v18746_v36  ;;  %17308 = vmatmul.mubr.bf16.gmra.mxu1 %v18747_v37  ;;  %v1665_v36 = vrot.slane %v18779_v22, 1  ;;  %v18781_v37 = vld [vmem:[#allocation9 + $0x130] sm:$0xff]   ;;  %v18797_v22 = vld [vmem:[#allocation2 + $0x50] sm:$0xff]  }
  0x8e   : > { %17324 = vmatpush3.bf16.msra.mxu1 %v18748_v34  ;;  %17372 = vmatpush3.bf16.msra.mxu0 %v18749_v35  ;;  %v1664_v34 = vsel %vm1657_vm1, %v1661_v10, %v1663_v21  ;;  %v1105_v35 = vrot.slane %v1103_v24, 1  ;;  %v18804_v24 = vld [vmem:[#allocation9 + $0xd0] sm:$0xff]  }
  0x8f   : > { %17325 = vmatprep.subr.bf16.mxu1 %v18750_v38  ;;  %17373 = vmatprep.subr.bf16.mxu0 %v18751_v39  ;;  %v1666_v50 = vsel %vm1657_vm1, %v1663_v21, %v1665_v36  ;;  %v1145_v21 = vrot.slane %v1143_v13, 1 }
  0x90   : > { %17295 = vmatprep.mubr.bf16.mxu0 %v18752_v40  ;;  %17311 = vmatprep.mubr.bf16.mxu1 %v18753_v41  ;;  %v1101_v40 = vor.u32 %v1099_v28, %v1097_v20  ;;  %v1667_v41 = vrot.slane %v19880_v30, 1  ;;  %v19902_v30 = vld [vmem:[#allocation2 + $0x58] sm:$0xff]  }
  0x92   : > { %17326 = vmatpush3.bf16.msra.mxu1 %v18750_v38  ;;  %17374 = vmatpush3.bf16.msra.mxu0 %v18751_v39  ;;  %v18784_v38 = vld [vmem:[#allocation2 + $0x30] sm:$0xff]   ;;  %v18786_v39 = vld [vmem:[#allocation9 + $0xe8] sm:$0xff]   ;;  %v1668_v56 = vsel %vm1657_vm1, %v1665_v36, %v1667_v41  ;;  %v1670_v6 = vsel %vm1657_vm1, %v1667_v41, %v1669_v61  ;;  %v1677_v36 = vrot.slane %v18797_v22, 1  ;;  %v18806_v41 = vld [vmem:[#allocation2 + $0x68] sm:$0xff]  }
  0x93   : > { %17327 = vmatprep.subr.bf16.mxu1 %v18756_v42  ;;  %17375 = vmatprep.subr.bf16.mxu0 %v18757_v43  ;;  %v1179_v8 = vshrl.u32 %v18806_v41, 16 }
  0x95   : > { %17296 = vmatmul.mubr.bf16.gmra.mxu0 %v18754_v44  ;;  %17312 = vmatmul.mubr.bf16.gmra.mxu1 %v18755_v45  ;;  %v1113_v44 = vrot.slane %v1111_v32, 1  ;;  %v18787_v45 = vld [vmem:[#allocation9 + $0x128] sm:$0xff]   ;;  %v1676_v32 = vsel %vm1657_vm1, %v1673_v16, %v1675_v18 }
  0x96   : > { %17328 = vmatpush3.bf16.msra.mxu1 %v18756_v42  ;;  %17376 = vmatpush3.bf16.msra.mxu0 %v18757_v43  ;;  %v19885_v42 = vld [vmem:[#allocation2 + $0x38] sm:$0xff]   ;;  %v1109_v43 = vor.u32 %v1107_v31, %v1105_v35 }
  0x97   : > { %17329 = vmatprep.subr.bf16.mxu1 %v18758_v46  ;;  %17377 = vmatprep.subr.bf16.mxu0 %v18759_v47  ;;  %v1127_v52 = vshll.u32 %v19885_v42, 16  ;;  %v1131_v7 = vshrl.u32 %v19885_v42, 16  ;;  %v18811_v42 = vld [vmem:[#allocation9 + $0x108] sm:$0xff]  }
  0x98   : > { %17299 = vmatprep.mubr.bf16.mxu0 %v18760_v49  ;;  %17315 = vmatprep.mubr.bf16.mxu1 %v18761_v51  ;;  %v1106_v49 = vsel %vm1070_vm0, %v1101_v40, %v1105_v35  ;;  %v1123_v51 = vshrl.u32 %v18784_v38, 16  ;;  %v1114_v55 = vsel %vm1070_vm0, %v1109_v43, %v1113_v44  ;;  %v18802_v35 = vld [vmem:[#allocation2 + $0x60] sm:$0xff]   ;;  %v1679_v40 = vrot.slane %v19902_v30, 1  ;;  %v18819_v30 = vld [vmem:[#allocation2 + $0xc] sm:$0xff]  }
  0x99   : > { %v1129_v0 = vrot.slane %v1127_v52, 1  ;;  %v18808_v52 = vld [vmem:[#allocation2 + $0x70] sm:$0xff]  }
  0x9a   : > { %17330 = vmatpush3.bf16.msra.mxu1 %v18758_v46  ;;  %17378 = vmatpush3.bf16.msra.mxu0 %v18759_v47  ;;  %v1115_v46 = vshrl.u32 %v18782_v25, 16  ;;  %v1119_v47 = vshll.u32 %v18784_v38, 16  ;;  %v1147_v25 = vshrl.u32 %v18794_v1, 16  ;;  %v1680_v54 = vsel %vm1657_vm1, %v1677_v36, %v1679_v40 }
  0x9b   : > { %17331 = vmatprep.subr.bf16.mxu1 %v18764_v57  ;;  %17379 = vmatprep.subr.bf16.mxu0 %v18765_v60 }
  0x9c   : > { %v1121_v59 = vrot.slane %v1119_v47, 1  ;;  %v1149_v38 = vor.u32 %v1147_v25, %v1145_v21  ;;  %v19907_v47 = vld [vmem:[#allocation2 + $0x68] sm:$0xff]  }
  0x9d   : > { %17300 = vmatmul.mubr.bf16.gmra.mxu0 %v18762_v62  ;;  %17316 = vmatmul.mubr.bf16.gmra.mxu1 %v18763_v63  ;;  %v1671_v62 = vrot.slane %v18789_v53, 1 }
  0x9e   : > { %17332 = vmatpush3.bf16.msra.mxu1 %v18764_v57  ;;  %17380 = vmatpush3.bf16.msra.mxu0 %v18765_v60  ;;  %v18792_v57 = vld [vmem:[#allocation9 + $0xe0] sm:$0xff]   ;;  %v1117_v60 = vor.u32 %v1115_v46, %v1113_v44  ;;  %v1125_v63 = vor.u32 %v1123_v51, %v1121_v59  ;;  %v1167_v44 = vshll.u32 %v18802_v35, 16  ;;  %v1171_v51 = vshrl.u32 %v18802_v35, 16 }
  0x9f   : > { %17333 = vmatprep.subr.bf16.mxu1 %v18766_v4  ;;  %17381 = vmatprep.subr.bf16.mxu0 %v18767_v5  ;;  %v1672_v11 = vsel %vm1657_vm1, %v1669_v61, %v1671_v62  ;;  %v1674_v28 = vsel %vm1657_vm1, %v1671_v62, %v1673_v16  ;;  %v1683_v62 = vrot.slane %v19907_v47, 1  ;;  %v2146_v47 = vrot.slane %v18819_v30, 1 }
  0xa0   : > { %17335 = vmatprep.mubr.bf16.mxu1 %v1082_v14  ;;  %17383 = vmatprep.mubr.bf16.mxu0 %v1660_v15  ;;  %v1130_v10 = vsel %vm1070_vm0, %v1125_v63, %v1129_v0  ;;  %v18796_v14 = vld [vmem:[#allocation2 + $0x50] sm:$0xff]   ;;  %v1137_v15 = vrot.slane %v1135_v2, 1  ;;  %v1183_v2 = vshll.u32 %v18808_v52, 16 }
  0xa1   : > { %v1151_v23 = vshll.u32 %v18796_v14, 16  ;;  %v18809_v63 = vld [vmem:[#allocation2 + $0x70] sm:$0xff]  }
  0xa2   : > { %17334 = vmatpush3.bf16.msra.mxu1 %v18766_v4  ;;  %17382 = vmatpush3.bf16.msra.mxu0 %v18767_v5  ;;  %v18798_v4 = vld [vmem:[#allocation9 + $0xd8] sm:$0xff]   ;;  %v1122_v5 = vsel %vm1070_vm0, %v1117_v60, %v1121_v59  ;;  %v1141_v20 = vor.u32 %v1139_v12, %v1137_v15  ;;  %v18812_v60 = vld [vmem:[#allocation2 + $0x78] sm:$0xff]   ;;  %v1185_v13 = vrot.slane %v1183_v2, 1 }
  0xa3   : > { %17415 = vmatprep.subr.bf16.mxu1 %v18774_v17  ;;  %17463 = vmatprep.subr.bf16.mxu0 %v18775_v19  ;;  %v1191_v3 = vshll.u32 %v18812_v60, 16  ;;  %v1195_v16 = vshrl.u32 %v18812_v60, 16 }
  0xa4   : > { %v1146_v31 = vsel %vm1070_vm0, %v1141_v20, %v1145_v21  ;;  %v19922_v20 = vld [vmem:[#allocation9 + $0x178] sm:$0xff]  }
  0xa5   : > { %17336 = vmatmul.mubr.bf16.vlgmr.msra.gmra.mxu1 %v1090_v26  ;;  %17384 = vmatmul.mubr.bf16.vlgmr.msra.gmra.mxu0 %v1662_v27  ;;  %v18805_v26 = vld [vmem:[#allocation9 + $0x110] sm:$0xff]  }
  0xa6   : > { %17416 = vmatpush3.bf16.msra.mxu1 %v18774_v17  ;;  %17464 = vmatpush3.bf16.msra.mxu0 %v18775_v19  ;;  %v1133_v17 = vor.u32 %v1131_v7, %v1129_v0  ;;  %v18800_v19 = vld [vmem:[#allocation2 + $0x58] sm:$0xff]  }
  0xa7   : > { %17339 = vmatprep.mubr.bf16.mxu1 %v1098_v33  ;;  %17387 = vmatprep.mubr.bf16.mxu0 %v1664_v34  ;;  %v1155_v33 = vshrl.u32 %v18796_v14, 16  ;;  %v1153_v34 = vrot.slane %v1151_v23, 1  ;;  %v1163_v46 = vshrl.u32 %v18800_v19, 16  ;;  %v1187_v14 = vshrl.u32 %v18808_v52, 16 }
  0xa8   : > { %17417 = vmatprep.subr.bf16.mxu1 %v18780_v29  ;;  %17465 = vmatprep.subr.bf16.mxu0 %v18781_v37  ;;  %v1138_v27 = vsel %vm1070_vm0, %v1133_v17, %v1137_v15  ;;  %v18814_v15 = vld [vmem:[#allocation2 + $0x80] ss:$0 sps:$4 sm:$0x11]   ;;  %v1193_v17 = vrot.slane %v1191_v3, 1 }
  0xa9   : > { %v1157_v43 = vor.u32 %v1155_v33, %v1153_v34 }
  0xaa   : > { %17418 = vmatpush3.bf16.msra.mxu1 %v18780_v29  ;;  %17466 = vmatpush3.bf16.msra.mxu0 %v18781_v37  ;;  %v1159_v29 = vshll.u32 %v18800_v19, 16  ;;  %v18810_v37 = vld [vmem:[#allocation9 + $0xc8] sm:$0xff]  }
  0xab   : > { %17419 = vmatprep.subr.bf16.mxu1 %v18786_v39  ;;  %17467 = vmatprep.subr.bf16.mxu0 %v18787_v45 }
  0xad   : > { %17340 = vmatmul.mubr.bf16.gmra.mxu1 %v1106_v49  ;;  %17388 = vmatmul.mubr.bf16.gmra.mxu0 %v1666_v50  ;;  %v1154_v49 = vsel %vm1070_vm0, %v1149_v38, %v1153_v34  ;;  %v1678_v50 = vsel %vm1657_vm1, %v1675_v18, %v1677_v36 }
  0xae   : > { %17343 = vmatprep.mubr.bf16.mxu1 %v1114_v55  ;;  %17391 = vmatprep.mubr.bf16.mxu0 %v1668_v56  ;;  %v1175_v55 = vshll.u32 %v18806_v41, 16  ;;  %v18816_v56 = vld [vmem:[#allocation9 + $0xc0] sm:$0xff]   ;;  %v1197_v41 = vor.u32 %v1195_v16, %v1193_v17 }
  0xaf   : > { %17420 = vmatpush3.bf16.msra.mxu1 %v18786_v39  ;;  %17468 = vmatpush3.bf16.msra.mxu0 %v18787_v45  ;;  %v1161_v39 = vrot.slane %v1159_v29, 1  ;;  %v18803_v45 = vld [vmem:[#allocation2 + $0x60] sm:$0xff]   ;;  %v1199_v29 = vshll.u32 %v18814_v15, 16 }
  0xb0   : > { %17421 = vmatprep.subr.bf16.mxu1 %v18792_v57  ;;  %17469 = vmatprep.subr.bf16.mxu0 %v18793_v58  ;;  %v1681_v59 = vrot.slane %v18803_v45, 1  ;;  %v1177_v1 = vrot.slane %v1175_v55, 1 }
  0xb1   : > { %v1162_v53 = vsel %vm1070_vm0, %v1157_v43, %v1161_v39  ;;  %v1165_v61 = vor.u32 %v1163_v46, %v1161_v39  ;;  %v1201_v43 = vrot.slane %v1199_v29, 1 }
  0xb2   : > { %v1682_v7 = vsel %vm1657_vm1, %v1679_v40, %v1681_v59  ;;  %v1684_v12 = vsel %vm1657_vm1, %v1681_v59, %v1683_v62  ;;  %v1181_v21 = vor.u32 %v1179_v8, %v1177_v1  ;;  %v18827_v40 = vld [vmem:[#allocation2 + $0x1c] sm:$0xff]  }
  0xb3   : > { %17422 = vmatpush3.bf16.msra.mxu1 %v18792_v57  ;;  %17470 = vmatpush3.bf16.msra.mxu0 %v18793_v58  ;;  %v1169_v57 = vrot.slane %v1167_v44, 1  ;;  %v18817_v58 = vld [vmem:[#allocation9 + $0x100] sm:$0xff]   ;;  %v2663_v52 = vshll.u32 %v18827_v40, 16  ;;  %v1202_v55 = vsel %vm1070_vm0, %v1197_v41, %v1201_v43 }
  0xb4   : > { %17423 = vmatprep.subr.bf16.mxu1 %v18798_v4  ;;  %17471 = vmatprep.subr.bf16.mxu0 %v18799_v9 }
  0xb5   : > { %17344 = vmatmul.mubr.bf16.gmra.mxu1 %v1122_v5  ;;  %17392 = vmatmul.mubr.bf16.gmra.mxu0 %v1670_v6  ;;  %v1173_v0 = vor.u32 %v1171_v51, %v1169_v57  ;;  %v18821_v5 = vld [vmem:[#allocation2 + $0xc] sm:$0xff]   ;;  %v1170_v6 = vsel %vm1070_vm0, %v1165_v61, %v1169_v57  ;;  %v2660_v51 = vshrl.u32 %v18827_v40, 16  ;;  %v18826_v61 = vld [vmem:[#allocation2 + $0x1c] sm:$0xff]  }
  0xb6   : > { %17347 = vmatprep.mubr.bf16.mxu1 %v1130_v10  ;;  %17395 = vmatprep.mubr.bf16.mxu0 %v1672_v11  ;;  %v18820_v10 = vld [vmem:[#allocation2 + $0x4] sm:$0xfe]   ;;  %v2642_v19 = vshrl.u32 %v18821_v5, 16  ;;  %v2645_v25 = vshll.u32 %v18821_v5, 16  ;;  %v18845_v40 = vld [vmem:[#allocation2 + $0x4c] sm:$0xff]  }
  0xb7   : > { %17424 = vmatpush3.bf16.msra.mxu1 %v18798_v4  ;;  %17472 = vmatpush3.bf16.msra.mxu0 %v18799_v9  ;;  %v19915_v4 = vld [vmem:[#allocation2 + $0x78] sm:$0xff]   ;;  %v1685_v9 = vrot.slane %v18809_v63, 1  ;;  %v1178_v11 = vsel %vm1070_vm0, %v1173_v0, %v1177_v1  ;;  %v2634_v22 = vshrl.u32 %v18820_v10, 16  ;;  %v2637_v23 = vshll.u32 %v18820_v10, 16  ;;  %v18828_v5 = vld [vmem:[#allocation2 + $0x24] sm:$0xff]  }
  0xb8   : > { %17425 = vmatprep.subr.bf16.mxu1 %v18804_v24  ;;  %17473 = vmatprep.subr.bf16.mxu0 %v18805_v26  ;;  %v1687_v18 = vrot.slane %v19915_v4, 1  ;;  %v2644_v35 = vrot.slane %v2642_v19, 1  ;;  %v2647_v39 = vrot.slane %v2645_v25, 2  ;;  %v2665_v63 = vrot.slane %v2663_v52, 2  ;;  %v18834_v25 = vld [vmem:[#allocation2 + $0x34] sm:$0xff]  }
  0xb9   : > { %v1686_v33 = vsel %vm1657_vm1, %v1683_v62, %v1685_v9  ;;  %v2636_v34 = vrot.slane %v2634_v22, 1  ;;  %v2639_v38 = vrot.slane %v2637_v23, 2  ;;  %v2662_v62 = vrot.slane %v2660_v51, 1  ;;  %v18830_v22 = vld [vmem:[#allocation9 + $0x170] sm:$0xff]  }
  0xba   : > { %v18831_v23 = vld [vmem:[#allocation9 + $0x1b0] sm:$0xff]   ;;  %v2714_v52 = vshrl.u32 %v18845_v40, 16 }
  0xbb   : > { %17426 = vmatpush3.bf16.msra.mxu1 %v18804_v24  ;;  %17474 = vmatpush3.bf16.msra.mxu0 %v18805_v26  ;;  %v1189_v24 = vor.u32 %v1187_v14, %v1185_v13  ;;  %v19925_v26 = vld [vmem:[#allocation9 + $0x1b8] sm:$0xff]   ;;  %v2640_v48 = vor.u32 %v2639_v38, %v2636_v34  ;;  %v2666_v8 = vor.u32 %v2665_v63, %v2662_v62 }
  0xbc   : > { %17427 = vmatprep.subr.bf16.mxu1 %v18810_v37  ;;  %17475 = vmatprep.subr.bf16.mxu0 %v18811_v42 }
  0xbd   : > { %17348 = vmatmul.mubr.bf16.gmra.mxu1 %v1138_v27  ;;  %17396 = vmatmul.mubr.bf16.gmra.mxu0 %v1674_v28  ;;  %v18815_v27 = vld [vmem:[#allocation2 + $0x80] ss:$0 sps:$4 sm:$0x11]   ;;  %v18818_v28 = vld [vmem:[#allocation2 + $0x4] sm:$0xfe]   ;;  %v1194_v36 = vsel %vm1070_vm0, %v1189_v24, %v1193_v17 }
  0xbe   : > { %17351 = vmatprep.mubr.bf16.mxu1 %v1146_v31  ;;  %17399 = vmatprep.mubr.bf16.mxu0 %v1676_v32  ;;  %v18823_v31 = vld [vmem:[#allocation2 + $0x14] sm:$0xff]   ;;  %v1186_v32 = vsel %vm1070_vm0, %v1181_v21, %v1185_v13  ;;  %v1689_v44 = vrot.slane %v18815_v27, 1  ;;  %v2145_v45 = vrot.slane %v18818_v28, 1  ;;  %v18839_v17 = vld [vmem:[#allocation2 + $0x3c] sm:$0xff]   ;;  %v2152_v21 = vrot.slane %v18828_v5, 1 }
  0xbf   : > { %17428 = vmatpush3.bf16.msra.mxu1 %v18810_v37  ;;  %17476 = vmatpush3.bf16.msra.mxu0 %v18811_v42  ;;  %v1688_v37 = vsel %vm1657_vm1, %v1685_v9, %v1687_v18  ;;  %v2651_v42 = vshrl.u32 %v18823_v31, 16  ;;  %v2654_v46 = vshll.u32 %v18823_v31, 16  ;;  %v19936_v9 = vld [vmem:[#allocation2 + $0x2c] sm:$0xff]   ;;  %v18836_v28 = vld [vmem:[#allocation9 + $0x168] sm:$0xff]   ;;  %v2699_v34 = vshll.u32 %v18839_v17, 16  ;;  %v18854_v5 = vld [vmem:[#allocation9 + $0x150] sm:$0xff]  }
  0xc0   : > { %17429 = vmatprep.subr.bf16.mxu1 %v18816_v56  ;;  %17477 = vmatprep.subr.bf16.mxu0 %v18817_v58  ;;  %v2147_v59 = vsel %vm1657_vm1, %v2145_v45, %v2146_v47  ;;  %v2154_v24 = vrot.slane %v19936_v9, 1  ;;  %v18837_v31 = vld [vmem:[#allocation9 + $0x1a8] sm:$0xff]   ;;  %v18842_v45 = vld [vmem:[#allocation9 + $0x160] sm:$0xff]  }
  0xc1   : > { %v2656_v57 = vrot.slane %v2654_v46, 2 }
  0xc3   : > { %17430 = vmatpush3.bf16.msra.mxu1 %v18816_v56  ;;  %17478 = vmatpush3.bf16.msra.mxu0 %v18817_v58  ;;  %v1690_v56 = vsel %vm1657_vm1, %v1687_v18, %v1689_v44  ;;  %v18833_v58 = vld [vmem:[#allocation2 + $0x2c] sm:$0xff]   ;;  %v2701_v44 = vrot.slane %v2699_v34, 2 }
  0xc4   : > { %17511 = vmatprep.subr.bf16.mxu1 %v19922_v20  ;;  %17559 = vmatprep.subr.bf16.mxu0 %v19925_v26  ;;  %v2678_v4 = vshrl.u32 %v18833_v58, 16 }
  0xc5   : > { %17352 = vmatmul.mubr.bf16.gmra.mxu1 %v1154_v49  ;;  %17400 = vmatmul.mubr.bf16.gmra.mxu0 %v1678_v50  ;;  %v2648_v49 = vor.u32 %v2647_v39, %v2644_v35  ;;  %v18822_v50 = vld [vmem:[#allocation2 + $0x14] sm:$0xff]   ;;  %v19945_v35 = vld [vmem:[#allocation2 + $0x3c] sm:$0xff]  }
  0xc6   : > { %17355 = vmatprep.mubr.bf16.mxu1 %v1162_v53  ;;  %17403 = vmatprep.mubr.bf16.mxu0 %v1680_v54  ;;  %v2653_v53 = vrot.slane %v2651_v42, 1  ;;  %v18829_v54 = vld [vmem:[#allocation2 + $0x24] sm:$0xff]   ;;  %v2148_v0 = vrot.slane %v18822_v50, 1  ;;  %v2680_v15 = vrot.slane %v2678_v4, 1  ;;  %v2156_v42 = vrot.slane %v18834_v25, 1  ;;  %v18857_v25 = vld [vmem:[#allocation2 + $0x6c] sm:$0xff]  }
  0xc7   : > { %v2649_v60 = vsel %vm2632_vm2, %v2640_v48, %v2648_v49  ;;  %v2669_v1 = vshrl.u32 %v18829_v54, 16  ;;  %v2672_v3 = vshll.u32 %v18829_v54, 16  ;;  %v2158_v46 = vrot.slane %v19945_v35, 1  ;;  %v18840_v48 = vld [vmem:[#allocation2 + $0x44] sm:$0xff]   ;;  %v19952_v54 = vld [vmem:[#allocation2 + $0x4c] sm:$0xff]  }
  0xc8   : > { %v2657_v2 = vor.u32 %v2656_v57, %v2653_v53  ;;  %v2149_v10 = vsel %vm1657_vm1, %v2146_v47, %v2148_v0  ;;  %v18843_v47 = vld [vmem:[#allocation9 + $0x1a0] sm:$0xff]   ;;  %v18849_v57 = vld [vmem:[#allocation9 + $0x198] sm:$0xff]  }
  0xc9   : > { %v2671_v13 = vrot.slane %v2669_v1, 1  ;;  %v2674_v14 = vrot.slane %v2672_v3, 2  ;;  %v18851_v1 = vld [vmem:[#allocation2 + $0x5c] sm:$0xff]   ;;  %v18866_v35 = vld [vmem:[#allocation9 + $0x140] sm:$0xff]  }
  0xca   : > { %v2667_v19 = vsel %vm2632_vm2, %v2657_v2, %v2666_v8 }
  0xcb   : > { %v2675_v29 = vor.u32 %v2674_v14, %v2671_v13  ;;  %v2732_v14 = vshrl.u32 %v18851_v1, 16 }
  0xcd   : > { %17356 = vmatmul.mubr.bf16.gmra.mxu1 %v1170_v6  ;;  %17404 = vmatmul.mubr.bf16.gmra.mxu0 %v1682_v7  ;;  %v2681_v6 = vshll.u32 %v18833_v58, 16  ;;  %v2150_v7 = vrot.slane %v18826_v61, 1  ;;  %v2157_v58 = vsel %vm1657_vm1, %v2154_v24, %v2156_v42 }
  0xce   : > { %17359 = vmatprep.mubr.bf16.mxu1 %v1178_v11  ;;  %17407 = vmatprep.mubr.bf16.mxu0 %v1684_v12  ;;  %v18835_v11 = vld [vmem:[#allocation2 + $0x34] sm:$0xff]   ;;  %v2658_v12 = vsel %vm2632_vm2, %v2648_v49, %v2657_v2  ;;  %v2159_v2 = vsel %vm1657_vm1, %v2156_v42, %v2158_v46  ;;  %v18856_v42 = vld [vmem:[#allocation2 + $0x6c] sm:$0xff]  }
  0xcf   : > { %v2683_v16 = vrot.slane %v2681_v6, 2  ;;  %v2151_v18 = vsel %vm1657_vm1, %v2148_v0, %v2150_v7  ;;  %v2687_v27 = vshrl.u32 %v18835_v11, 16  ;;  %v2690_v30 = vshll.u32 %v18835_v11, 16 }
  0xd0   : > { %v2153_v38 = vsel %vm1657_vm1, %v2150_v7, %v2152_v21  ;;  %v2716_v0 = vrot.slane %v2714_v52, 1  ;;  %v2162_v6 = vrot.slane %v19952_v54, 1  ;;  %v18855_v7 = vld [vmem:[#allocation9 + $0x190] sm:$0xff]  }
  0xd1   : > { %v2692_v39 = vrot.slane %v2690_v30, 2 }
  0xd5   : > { %17360 = vmatmul.mubr.bf16.gmra.mxu1 %v1186_v32  ;;  %17408 = vmatmul.mubr.bf16.gmra.mxu0 %v1686_v33  ;;  %v2684_v32 = vor.u32 %v2683_v16, %v2680_v15  ;;  %v2696_v33 = vshrl.u32 %v18839_v17, 16  ;;  %v2735_v15 = vshll.u32 %v18851_v1, 16  ;;  %v18853_v16 = vld [vmem:[#allocation2 + $0x64] sm:$0xff]   ;;  %v18860_v17 = vld [vmem:[#allocation9 + $0x148] sm:$0xff]  }
  0xd6   : > { %17363 = vmatprep.mubr.bf16.mxu1 %v1194_v36  ;;  %17411 = vmatprep.mubr.bf16.mxu0 %v1688_v37  ;;  %v2689_v36 = vrot.slane %v2687_v27, 1  ;;  %v18841_v37 = vld [vmem:[#allocation2 + $0x44] sm:$0xff]   ;;  %v2744_v34 = vshll.u32 %v18853_v16, 16 }
  0xd7   : > { %v2685_v41 = vsel %vm2632_vm2, %v2675_v29, %v2684_v32  ;;  %v2698_v43 = vrot.slane %v2696_v33, 1  ;;  %v2705_v49 = vshrl.u32 %v18841_v37, 16  ;;  %v2708_v51 = vshll.u32 %v18841_v37, 16  ;;  %v337_v33 = vld [vmem:[%s19855_s6 + $0x84] sm:$0xf]  ;;  %v19973_v1 = vld [vmem:[#allocation9 + $0x238] sm:$0xff]  }
  0xd8   : > { %v2693_v50 = vor.u32 %v2692_v39, %v2689_v36  ;;  %v2737_v30 = vrot.slane %v2735_v15, 2  ;;  %397 = vst [vmem:[#allocation2 + $0x84] sm:$0xf] %v337_v33  ;;  %v2750_v37 = vshrl.u32 %v18857_v25, 16  ;;  %v18872_v33 = vld [vmem:[#allocation2 + $0x14] sm:$0xff]  }
  0xd9   : > { %v2702_v53 = vor.u32 %v2701_v44, %v2698_v43  ;;  %v2707_v62 = vrot.slane %v2705_v49, 1  ;;  %v2710_v63 = vrot.slane %v2708_v51, 2  ;;  %v18863_v51 = vld [vmem:[#allocation2 + $0x7c] sm:$0xff]  }
  0xda   : > { %v2694_v61 = vsel %vm2632_vm2, %v2684_v32, %v2693_v50  ;;  %v2741_v32 = vshrl.u32 %v18853_v16, 16  ;;  %v2752_v49 = vrot.slane %v2750_v37, 1  ;;  %v18868_v16 = vld [vmem:[#allocation2 + $0x4] sm:$0xfc]  }
  0xdb   : > { %v2703_v3 = vsel %vm2632_vm2, %v2693_v50, %v2702_v53 }
  0xdd   : > { %17364 = vmatmul.mubr.bf16.gmra.mxu1 %v1202_v55  ;;  %17412 = vmatmul.mubr.bf16.gmra.mxu0 %v1690_v56  ;;  %v2717_v55 = vshll.u32 %v18845_v40, 16  ;;  %v18848_v56 = vld [vmem:[#allocation9 + $0x158] sm:$0xff]  }
  0xde   : > { %17431 = vmatprep.mubr.bf16.mxu1 %v2147_v59  ;;  %17479 = vmatprep.mubr.bf16.mxu0 %v2649_v60  ;;  %v2160_v59 = vrot.slane %v18840_v48, 1  ;;  %v18847_v60 = vld [vmem:[#allocation2 + $0x54] sm:$0xff]   ;;  %v18852_v40 = vld [vmem:[#allocation2 + $0x64] sm:$0xff]  }
  0xdf   : > { %v2719_v4 = vrot.slane %v2717_v55, 2  ;;  %v2723_v9 = vshrl.u32 %v18847_v60, 16  ;;  %v2726_v11 = vshll.u32 %v18847_v60, 16  ;;  %v2170_v55 = vrot.slane %v18856_v42, 1 }
  0xe0   : > { %v2163_v27 = vsel %vm1657_vm1, %v2160_v59, %v2162_v6  ;;  %v2771_v60 = vshll.u32 %v18863_v51, 16  ;;  %v18864_v15 = vld [vmem:[#allocation2 + $0x84] ss:$0 sps:$4 sm:$0x11]  }
  0xe1   : > { %v2720_v13 = vor.u32 %v2719_v4, %v2716_v0  ;;  %v18865_v0 = vld [vmem:[#allocation2 + $0x84] ss:$0 sps:$4 sm:$0x33]  }
  0xe5   : > { %17432 = vmatmul.mubr.bf16.vlgmr.msra.gmra.mxu1 %v2149_v10  ;;  %17480 = vmatmul.mubr.bf16.vlgmr.msra.gmra.mxu0 %v2658_v12  ;;  %v2711_v10 = vor.u32 %v2710_v63, %v2707_v62  ;;  %v19959_v12 = vld [vmem:[#allocation2 + $0x5c] sm:$0xff]   ;;  %v19971_v62 = vld [vmem:[#allocation9 + $0x1f8] sm:$0xff]  }
  0xe6   : > { %17512 = vmatpush3.bf16.msra.mxu1 %v19922_v20  ;;  %17560 = vmatpush3.bf16.msra.mxu0 %v19925_v26  ;;  %v2676_v20 = vsel %vm2632_vm2, %v2666_v8, %v2675_v29  ;;  %v2155_v26 = vsel %vm1657_vm1, %v2152_v21, %v2154_v24  ;;  %v18846_v8 = vld [vmem:[#allocation2 + $0x54] sm:$0xff]   ;;  %v2725_v21 = vrot.slane %v2723_v9, 1  ;;  %v2728_v24 = vrot.slane %v2726_v11, 2  ;;  %v18862_v63 = vld [vmem:[#allocation2 + $0x7c] sm:$0xff]  }
  0xe7   : > { %17435 = vmatprep.mubr.bf16.mxu1 %v2151_v18  ;;  %17483 = vmatprep.mubr.bf16.mxu0 %v2667_v19  ;;  %v18861_v18 = vld [vmem:[#allocation9 + $0x188] sm:$0xff]   ;;  %v2164_v19 = vrot.slane %v18846_v8, 1  ;;  %v2734_v29 = vrot.slane %v2732_v14, 1  ;;  %v2780_v11 = vshll.u32 %v18865_v0, 16  ;;  %v18869_v14 = vld [vmem:[#allocation2 + $0xc] sm:$0xff]  }
  0xe8   : > { %17513 = vmatprep.subr.bf16.mxu1 %v18830_v22  ;;  %17561 = vmatprep.subr.bf16.mxu0 %v18831_v23  ;;  %v2729_v36 = vor.u32 %v2728_v24, %v2725_v21 }
  0xe9   : > { %v2738_v39 = vor.u32 %v2737_v30, %v2734_v29  ;;  %v2165_v43 = vsel %vm1657_vm1, %v2162_v6, %v2164_v19  ;;  %v3240_v30 = vrot.slane %v18868_v16, 2 }
  0xea   : > { %17514 = vmatpush3.bf16.msra.mxu1 %v18830_v22  ;;  %17562 = vmatpush3.bf16.msra.mxu0 %v18831_v23  ;;  %v2161_v22 = vsel %vm1657_vm1, %v2158_v46, %v2160_v59  ;;  %v2712_v23 = vsel %vm2632_vm2, %v2702_v53, %v2711_v10  ;;  %v2730_v44 = vsel %vm2632_vm2, %v2720_v13, %v2729_v36  ;;  %v2168_v53 = vrot.slane %v18852_v40, 1 }
  0xeb   : > { %17515 = vmatprep.subr.bf16.mxu1 %v18836_v28  ;;  %17563 = vmatprep.subr.bf16.mxu0 %v18837_v31  ;;  %v2739_v48 = vsel %vm2632_vm2, %v2729_v36, %v2738_v39  ;;  %v2768_v59 = vshrl.u32 %v18863_v51, 16  ;;  %v18873_v36 = vld [vmem:[#allocation2 + $0x18] sm:$0xff]  }
  0xec   : > { %v2171_v4 = vsel %vm1657_vm1, %v2168_v53, %v2170_v55  ;;  %v3730_v40 = vrot.slane %v18873_v36, 2 }
  0xed   : > { %17436 = vmatmul.mubr.bf16.gmra.mxu1 %v2153_v38  ;;  %17484 = vmatmul.mubr.bf16.gmra.mxu0 %v2676_v20  ;;  %v2753_v38 = vshll.u32 %v18857_v25, 16  ;;  %v18859_v20 = vld [vmem:[#allocation2 + $0x74] sm:$0xff]   ;;  %v2770_v6 = vrot.slane %v2768_v59, 1  ;;  %v18870_v25 = vld [vmem:[#allocation2 + $0x8] sm:$0xfc]  }
  0xee   : > { %17439 = vmatprep.mubr.bf16.mxu1 %v2155_v26  ;;  %17487 = vmatprep.mubr.bf16.mxu0 %v2685_v41  ;;  %v18867_v26 = vld [vmem:[#allocation9 + $0x180] sm:$0xff]   ;;  %v2743_v41 = vrot.slane %v2741_v32, 1  ;;  %v2759_v46 = vshrl.u32 %v18859_v20, 16  ;;  %v2762_v52 = vshll.u32 %v18859_v20, 16  ;;  %v18876_v20 = vld [vmem:[#allocation2 + $0x1c] sm:$0xff]  }
  0xef   : > { %17516 = vmatpush3.bf16.msra.mxu1 %v18836_v28  ;;  %17564 = vmatpush3.bf16.msra.mxu0 %v18837_v31  ;;  %v2721_v28 = vsel %vm2632_vm2, %v2711_v10, %v2720_v13  ;;  %v2166_v31 = vrot.slane %v19959_v12, 1  ;;  %v2755_v50 = vrot.slane %v2753_v38, 2  ;;  %v2777_v10 = vshrl.u32 %v18865_v0, 16  ;;  %v18884_v59 = vld [vmem:[#allocation2 + $0x34] sm:$0xff]  }
  0xf0   : > { %17517 = vmatprep.subr.bf16.mxu1 %v18842_v45  ;;  %17565 = vmatprep.subr.bf16.mxu0 %v18843_v47  ;;  %v2174_v12 = vrot.slane %v18862_v63, 1 }
  0xf1   : > { %v2779_v21 = vrot.slane %v2777_v10, 1  ;;  %v18891_v10 = vld [vmem:[#allocation2 + $0x48] sm:$0xff]  }
  0xf3   : > { %17518 = vmatpush3.bf16.msra.mxu1 %v18842_v45  ;;  %17566 = vmatpush3.bf16.msra.mxu0 %v18843_v47  ;;  %v2746_v45 = vrot.slane %v2744_v34, 2  ;;  %v2167_v47 = vsel %vm1657_vm1, %v2164_v19, %v2166_v31 }
  0xf4   : > { %17519 = vmatprep.subr.bf16.mxu1 %v18848_v56  ;;  %17567 = vmatprep.subr.bf16.mxu0 %v18849_v57 }
  0xf5   : > { %17440 = vmatmul.mubr.bf16.gmra.mxu1 %v2157_v58  ;;  %17488 = vmatmul.mubr.bf16.gmra.mxu0 %v2694_v61  ;;  %v2747_v54 = vor.u32 %v2746_v45, %v2743_v41  ;;  %v18858_v58 = vld [vmem:[#allocation2 + $0x74] sm:$0xff]   ;;  %v2764_v61 = vrot.slane %v2762_v52, 2  ;;  %v3245_v41 = vrot.slane %v18876_v20, 2  ;;  %v18881_v52 = vld [vmem:[#allocation9 + $0x230] sm:$0xff]  }
  0xf6   : > { %17443 = vmatprep.mubr.bf16.mxu1 %v2159_v2  ;;  %17491 = vmatprep.mubr.bf16.mxu0 %v2703_v3  ;;  %v2169_v2 = vsel %vm1657_vm1, %v2166_v31, %v2168_v53  ;;  %v2172_v8 = vrot.slane %v18858_v58, 1  ;;  %v3727_v31 = vrot.slane %v18870_v25, 2  ;;  %v18887_v58 = vld [vmem:[#allocation9 + $0x228] sm:$0xff]   ;;  %v18917_v20 = vld [vmem:[#allocation9 + $0x200] sm:$0xff]  }
  0xf7   : > { %17520 = vmatpush3.bf16.msra.mxu1 %v18848_v56  ;;  %17568 = vmatpush3.bf16.msra.mxu0 %v18849_v57  ;;  %v2761_v56 = vrot.slane %v2759_v46, 1  ;;  %v2756_v57 = vor.u32 %v2755_v50, %v2752_v49  ;;  %v2748_v3 = vsel %vm2632_vm2, %v2738_v39, %v2747_v54  ;;  %v3243_v39 = vrot.slane %v18872_v33, 2  ;;  %v18883_v49 = vld [vmem:[#allocation2 + $0x30] sm:$0xff]  }
  0xf8   : > { %17521 = vmatprep.subr.bf16.mxu1 %v18854_v5  ;;  %17569 = vmatprep.subr.bf16.mxu0 %v18855_v7 }
  0xf9   : > { %v2765_v9 = vor.u32 %v2764_v61, %v2761_v56  ;;  %v3246_v50 = vsel %vm3239_vm3, %v3243_v39, %v3245_v41  ;;  %v18886_v56 = vld [vmem:[#allocation9 + $0x1e8] sm:$0xff]  }
  0xfa   : > { %v18888_v61 = vld [vmem:[#allocation2 + $0x3c] sm:$0xff]  }
  0xfb   : > { %17522 = vmatpush3.bf16.msra.mxu1 %v18854_v5  ;;  %17570 = vmatpush3.bf16.msra.mxu0 %v18855_v7  ;;  %v2757_v5 = vsel %vm2632_vm2, %v2747_v54, %v2756_v57  ;;  %v2773_v7 = vrot.slane %v2771_v60, 2  ;;  %v2766_v19 = vsel %vm2632_vm2, %v2756_v57, %v2765_v9  ;;  %v3736_v57 = vrot.slane %v18883_v49, 2  ;;  %v18885_v60 = vld [vmem:[#allocation2 + $0x38] sm:$0xff]  }
  0xfc   : > { %17523 = vmatprep.subr.bf16.mxu1 %v18860_v17  ;;  %17571 = vmatprep.subr.bf16.mxu0 %v18861_v18 }
  0xfd   : > { %17444 = vmatmul.mubr.bf16.gmra.mxu1 %v2161_v22  ;;  %17492 = vmatmul.mubr.bf16.gmra.mxu0 %v2712_v23  ;;  %v2774_v13 = vor.u32 %v2773_v7, %v2770_v6  ;;  %v2782_v22 = vrot.slane %v2780_v11, 2  ;;  %v2175_v23 = vsel %vm1657_vm1, %v2172_v8, %v2174_v12  ;;  %v3738_v6 = vrot.slane %v18885_v60, 2  ;;  %v18898_v11 = vld [vmem:[#allocation9 + $0x1d8] sm:$0xff]   ;;  %v18908_v60 = vld [vmem:[#allocation2 + $0x74] sm:$0xff]  }
  0xfe   : > { %17447 = vmatprep.mubr.bf16.mxu1 %v2163_v27  ;;  %17495 = vmatprep.mubr.bf16.mxu0 %v2721_v28  ;;  %v3241_v27 = vrot.slane %v18869_v14, 2  ;;  %v2176_v28 = vrot.slane %v18864_v15, 1  ;;  %v3253_v7 = vrot.slane %v18888_v61, 2  ;;  %v18894_v14 = vld [vmem:[#allocation2 + $0x4c] sm:$0xff]   ;;  %v18909_v61 = vld [vmem:[#allocation2 + $0x78] sm:$0xff]  }
  0xff   : > { %17524 = vmatpush3.bf16.msra.mxu1 %v18860_v17  ;;  %17572 = vmatpush3.bf16.msra.mxu0 %v18861_v18  ;;  %v18871_v17 = vld [vmem:[#allocation2 + $0x10] sm:$0xff]   ;;  %v2173_v18 = vsel %vm1657_vm1, %v2170_v55, %v2172_v8  ;;  %v2775_v24 = vsel %vm2632_vm2, %v2765_v9, %v2774_v13  ;;  %v2783_v29 = vor.u32 %v2782_v22, %v2779_v21  ;;  %v18890_v9 = vld [vmem:[#allocation2 + $0x44] sm:$0xff]   ;;  %v3257_v25 = vrot.slane %v18894_v14, 2 }
 0x100   : > { %17525 = vmatprep.subr.bf16.mxu1 %v18866_v35  ;;  %17573 = vmatprep.subr.bf16.mxu0 %v18867_v26  ;;  %v3728_v32 = vrot.slane %v18871_v17, 2  ;;  %v2177_v34 = vsel %vm1657_vm1, %v2174_v12, %v2176_v28  ;;  %v3242_v37 = vsel %vm3239_vm3, %v3240_v30, %v3241_v27  ;;  %v3244_v45 = vsel %vm3239_vm3, %v3241_v27, %v3243_v39  ;;  %v18899_v12 = vld [vmem:[#allocation9 + $0x218] sm:$0xff]   ;;  %v18904_v21 = vld [vmem:[#allocation9 + $0x1d0] sm:$0xff]   ;;  %v18910_v28 = vld [vmem:[#allocation9 + $0x1c8] sm:$0xff]  }
 0x101   : > { %v3739_v16 = vsel %vm3239_vm3, %v3736_v57, %v3738_v6  ;;  %v18895_v17 = vld [vmem:[#allocation2 + $0x50] sm:$0xff]   ;;  %v18905_v22 = vld [vmem:[#allocation9 + $0x210] sm:$0xff]  }
 0x102   : > { %v3729_v38 = vsel %vm3239_vm3, %v3727_v31, %v3728_v32  ;;  %v3731_v46 = vsel %vm3239_vm3, %v3728_v32, %v3730_v40  ;;  %v3744_v27 = vrot.slane %v18895_v17, 2  ;;  %v18896_v30 = vld [vmem:[#allocation2 + $0x54] sm:$0xff]  }
 0x103   : > { %17526 = vmatpush3.bf16.msra.mxu1 %v18866_v35  ;;  %17574 = vmatpush3.bf16.msra.mxu0 %v18867_v26  ;;  %v2784_v35 = vsel %vm2632_vm2, %v2774_v13, %v2783_v29  ;;  %v18877_v26 = vld [vmem:[#allocation2 + $0x20] sm:$0xff]   ;;  %v338_v13 = vld [vmem:[%s19855_s6 + $0x88] sm:$0xf]  ;;  %v18897_v31 = vld [vmem:[#allocation2 + $0x58] sm:$0xff]  }
 0x104   : > { %17607 = vmatprep.subr.bf16.mxu1 %v19971_v62  ;;  %17655 = vmatprep.subr.bf16.mxu0 %v19973_v1  ;;  %v3732_v42 = vrot.slane %v18877_v26, 2  ;;  %398 = vst [vmem:[#allocation2 + $0x88] sm:$0xf] %v338_v13  ;;  %v18911_v29 = vld [vmem:[#allocation9 + $0x208] sm:$0xff]   ;;  %v3259_v26 = vrot.slane %v18896_v30, 2  ;;  %v3746_v39 = vrot.slane %v18897_v31, 2 }
 0x105   : > { %17448 = vmatmul.mubr.bf16.gmra.mxu1 %v2165_v43  ;;  %17496 = vmatmul.mubr.bf16.gmra.mxu0 %v2730_v44  ;;  %v18878_v43 = vld [vmem:[#allocation2 + $0x24] sm:$0xff]  }
 0x106   : > { %17451 = vmatprep.mubr.bf16.mxu1 %v2167_v47  ;;  %17499 = vmatprep.mubr.bf16.mxu0 %v2739_v48  ;;  %v18879_v44 = vld [vmem:[#allocation2 + $0x28] sm:$0xff]   ;;  %v3733_v51 = vsel %vm3239_vm3, %v3730_v40, %v3732_v42  ;;  %v3247_v53 = vrot.slane %v18878_v43, 2 }
 0x107   : > { %v18880_v47 = vld [vmem:[#allocation9 + $0x1f0] sm:$0xff]   ;;  %v18882_v48 = vld [vmem:[#allocation2 + $0x2c] sm:$0xff]   ;;  %v3734_v54 = vrot.slane %v18879_v44, 2 }
 0x108   : > { %v3249_v55 = vrot.slane %v18882_v48, 2  ;;  %v3248_v63 = vsel %vm3239_vm3, %v3245_v41, %v3247_v53  ;;  %v20010_v43 = vld [vmem:[#allocation9 + $0x2b8] sm:$0xff]  }
 0x109   : > { %v3735_v0 = vsel %vm3239_vm3, %v3732_v42, %v3734_v54  ;;  %v20008_v42 = vld [vmem:[#allocation9 + $0x278] sm:$0xff]  }
 0x10a   : > { %v18902_v44 = vld [vmem:[#allocation2 + $0x64] sm:$0xff]  }
 0x10d   : > { %17452 = vmatmul.mubr.bf16.gmra.mxu1 %v2169_v2  ;;  %17500 = vmatmul.mubr.bf16.gmra.mxu0 %v2748_v3  ;;  %v3737_v2 = vsel %vm3239_vm3, %v3734_v54, %v3736_v57  ;;  %v18892_v3 = vld [vmem:[#allocation9 + $0x1e0] sm:$0xff]   ;;  %v3263_v54 = vrot.slane %v18902_v44, 2 }
 0x10e   : > { %17455 = vmatprep.mubr.bf16.mxu1 %v2171_v4  ;;  %17503 = vmatprep.mubr.bf16.mxu0 %v2757_v5  ;;  %v18893_v4 = vld [vmem:[#allocation9 + $0x220] sm:$0xff]   ;;  %v3251_v5 = vrot.slane %v18884_v59, 2 }
 0x110   : > { %v3252_v15 = vsel %vm3239_vm3, %v3249_v55, %v3251_v5 }
 0x115   : > { %17456 = vmatmul.mubr.bf16.gmra.mxu1 %v2173_v18  ;;  %17504 = vmatmul.mubr.bf16.gmra.mxu0 %v2766_v19  ;;  %v3254_v18 = vsel %vm3239_vm3, %v3251_v5, %v3253_v7 }
 0x116   : > { %17459 = vmatprep.mubr.bf16.mxu1 %v2175_v23  ;;  %17507 = vmatprep.mubr.bf16.mxu0 %v2775_v24  ;;  %v3255_v23 = vrot.slane %v18890_v9, 2  ;;  %v3742_v24 = vrot.slane %v18891_v10, 2  ;;  %v18919_v9 = vld [vmem:[#allocation2 + $0x10] sm:$0xff]   ;;  %v3267_v10 = vrot.slane %v18908_v60, 2 }
 0x118   : > { %v3256_v32 = vsel %vm3239_vm3, %v3253_v7, %v3255_v23  ;;  %v3258_v36 = vsel %vm3239_vm3, %v3255_v23, %v3257_v25  ;;  %v4227_v23 = vshll.u32 %v18919_v9, 16 }
 0x11d   : > { %17460 = vmatmul.mubr.bf16.gmra.mxu1 %v2177_v34  ;;  %17508 = vmatmul.mubr.bf16.gmra.mxu0 %v2784_v35  ;;  %v18900_v34 = vld [vmem:[#allocation2 + $0x5c] sm:$0xff]  }
 0x11e   : > { %17527 = vmatprep.mubr.bf16.mxu1 %v3242_v37  ;;  %17575 = vmatprep.mubr.bf16.mxu0 %v3729_v38  ;;  %v18901_v35 = vld [vmem:[#allocation2 + $0x60] sm:$0xff]   ;;  %v3745_v37 = vsel %vm3239_vm3, %v3742_v24, %v3744_v27  ;;  %v18916_v38 = vld [vmem:[#allocation9 + $0x1c0] sm:$0xff]   ;;  %v3261_v40 = vrot.slane %v18900_v34, 2 }
 0x11f   : > { %v3748_v41 = vrot.slane %v18901_v35, 2  ;;  %v18922_v34 = vld [vmem:[#allocation2 + $0x18] sm:$0xff]  }
 0x120   : > { %v3262_v48 = vsel %vm3239_vm3, %v3259_v26, %v3261_v40 }
 0x121   : > { %v3749_v49 = vsel %vm3239_vm3, %v3746_v39, %v3748_v41 }
 0x125   : > { %17528 = vmatmul.mubr.bf16.vlgmr.msra.gmra.mxu1 %v3244_v45  ;;  %17576 = vmatmul.mubr.bf16.vlgmr.msra.gmra.mxu0 %v3731_v46  ;;  %v18903_v45 = vld [vmem:[#allocation2 + $0x68] sm:$0xff]   ;;  %v3260_v46 = vsel %vm3239_vm3, %v3257_v25, %v3259_v26  ;;  %v4229_v26 = vrot.slane %v4227_v23, 3 }
 0x126   : > { %17608 = vmatpush3.bf16.msra.mxu1 %v19971_v62  ;;  %17656 = vmatpush3.bf16.msra.mxu0 %v19973_v1  ;;  %v18889_v62 = vld [vmem:[#allocation2 + $0x40] sm:$0xff]   ;;  %v3250_v1 = vsel %vm3239_vm3, %v3247_v53, %v3249_v55  ;;  %v3750_v55 = vrot.slane %v18903_v45, 2 }
 0x127   : > { %17531 = vmatprep.mubr.bf16.mxu1 %v3246_v50  ;;  %17579 = vmatprep.mubr.bf16.mxu0 %v3733_v51  ;;  %v3740_v8 = vrot.slane %v18889_v62, 2  ;;  %v18906_v50 = vld [vmem:[#allocation2 + $0x6c] sm:$0xff]   ;;  %v20030_v62 = vld [vmem:[#allocation2 + $0x7c] sm:$0xff]  }
 0x128   : > { %17609 = vmatprep.subr.bf16.mxu1 %v18880_v47  ;;  %17657 = vmatprep.subr.bf16.mxu0 %v18881_v52  ;;  %v18907_v51 = vld [vmem:[#allocation2 + $0x70] sm:$0xff]   ;;  %v3269_v14 = vrot.slane %v20030_v62, 2  ;;  %v18928_v62 = vld [vmem:[#allocation2 + $0x28] sm:$0xff]  }
 0x129   : > { %v3741_v19 = vsel %vm3239_vm3, %v3738_v6, %v3740_v8  ;;  %v3743_v33 = vsel %vm3239_vm3, %v3740_v8, %v3742_v24  ;;  %v3752_v59 = vrot.slane %v18907_v51, 2 }
 0x12a   : > { %17610 = vmatpush3.bf16.msra.mxu1 %v18880_v47  ;;  %17658 = vmatpush3.bf16.msra.mxu0 %v18881_v52  ;;  %v3747_v47 = vsel %vm3239_vm3, %v3744_v27, %v3746_v39  ;;  %v18915_v27 = vld [vmem:[#allocation2 + $0x88] ss:$0 sps:$4 sm:$0x33]   ;;  %v18926_v39 = vld [vmem:[#allocation2 + $0x20] sm:$0xff]  }
 0x12b   : > { %17611 = vmatprep.subr.bf16.mxu1 %v18886_v56  ;;  %17659 = vmatprep.subr.bf16.mxu0 %v18887_v58  ;;  %v3753_v8 = vsel %vm3239_vm3, %v3750_v55, %v3752_v59  ;;  %v3758_v45 = vrot.slane %v18915_v27, 2  ;;  %v4254_v27 = vshll.u32 %v18928_v62, 16 }
 0x12d   : > { %17532 = vmatmul.mubr.bf16.gmra.mxu1 %v3248_v63  ;;  %17580 = vmatmul.mubr.bf16.gmra.mxu0 %v3735_v0 }
 0x12e   : > { %17535 = vmatprep.mubr.bf16.mxu1 %v3250_v1  ;;  %17583 = vmatprep.mubr.bf16.mxu0 %v3737_v2  ;;  %v3264_v1 = vsel %vm3239_vm3, %v3261_v40, %v3263_v54  ;;  %v3751_v2 = vsel %vm3239_vm3, %v3748_v41, %v3750_v55 }
 0x12f   : > { %17612 = vmatpush3.bf16.msra.mxu1 %v18886_v56  ;;  %17660 = vmatpush3.bf16.msra.mxu0 %v18887_v58  ;;  %v3265_v58 = vrot.slane %v18906_v50, 2 }
 0x130   : > { %17613 = vmatprep.subr.bf16.mxu1 %v18892_v3  ;;  %17661 = vmatprep.subr.bf16.mxu0 %v18893_v4 }
 0x131   : > { %v3266_v7 = vsel %vm3239_vm3, %v3263_v54, %v3265_v58  ;;  %v3268_v30 = vsel %vm3239_vm3, %v3265_v58, %v3267_v10  ;;  %v4242_v58 = vshrl.u32 %v18926_v39, 16 }
 0x133   : > { %17614 = vmatpush3.bf16.msra.mxu1 %v18892_v3  ;;  %17662 = vmatpush3.bf16.msra.mxu0 %v18893_v4  ;;  %v20034_v3 = vld [vmem:[#allocation2 + $0x80] sm:$0xff]   ;;  %v18918_v4 = vld [vmem:[#allocation2 + $0x8] sm:$0xfc]  }
 0x134   : > { %17615 = vmatprep.subr.bf16.mxu1 %v18898_v11  ;;  %17663 = vmatprep.subr.bf16.mxu0 %v18899_v12  ;;  %v4219_v17 = vshll.u32 %v18918_v4, 16 }
 0x135   : > { %17536 = vmatmul.mubr.bf16.gmra.mxu1 %v3252_v15  ;;  %17584 = vmatmul.mubr.bf16.gmra.mxu0 %v3739_v16  ;;  %v3756_v15 = vrot.slane %v20034_v3, 2  ;;  %v4216_v16 = vshrl.u32 %v18918_v4, 16 }
 0x136   : > { %17539 = vmatprep.mubr.bf16.mxu1 %v3254_v18  ;;  %17587 = vmatprep.mubr.bf16.mxu0 %v3741_v19 }
 0x137   : > { %17616 = vmatpush3.bf16.msra.mxu1 %v18898_v11  ;;  %17664 = vmatpush3.bf16.msra.mxu0 %v18899_v12  ;;  %v3754_v11 = vrot.slane %v18909_v61, 2 }
 0x138   : > { %17617 = vmatprep.subr.bf16.mxu1 %v18904_v21  ;;  %17665 = vmatprep.subr.bf16.mxu0 %v18905_v22 }
 0x139   : > { %v3755_v31 = vsel %vm3239_vm3, %v3752_v59, %v3754_v11  ;;  %v4245_v59 = vshll.u32 %v18926_v39, 16 }
 0x13b   : > { %17618 = vmatpush3.bf16.msra.mxu1 %v18904_v21  ;;  %17666 = vmatpush3.bf16.msra.mxu0 %v18905_v22  ;;  %v18914_v21 = vld [vmem:[#allocation2 + $0x84] ss:$0 sps:$4 sm:$0x33]   ;;  %v4224_v22 = vshrl.u32 %v18919_v9, 16 }
 0x13c   : > { %17619 = vmatprep.subr.bf16.mxu1 %v18910_v28  ;;  %17667 = vmatprep.subr.bf16.mxu0 %v18911_v29  ;;  %v3271_v44 = vrot.slane %v18914_v21, 2  ;;  %v4247_v21 = vrot.slane %v4245_v59, 3 }
 0x13d   : > { %17540 = vmatmul.mubr.bf16.gmra.mxu1 %v3256_v32  ;;  %17588 = vmatmul.mubr.bf16.gmra.mxu0 %v3743_v33  ;;  %v3270_v32 = vsel %vm3239_vm3, %v3267_v10, %v3269_v14  ;;  %v4218_v33 = vrot.slane %v4216_v16, 2 }
 0x13e   : > { %17543 = vmatprep.mubr.bf16.mxu1 %v3258_v36  ;;  %17591 = vmatprep.mubr.bf16.mxu0 %v3745_v37  ;;  %v3757_v37 = vsel %vm3239_vm3, %v3754_v11, %v3756_v15 }
 0x13f   : > { %17620 = vmatpush3.bf16.msra.mxu1 %v18910_v28  ;;  %17668 = vmatpush3.bf16.msra.mxu0 %v18911_v29  ;;  %v18920_v28 = vld [vmem:[#allocation2 + $0x8] sm:$0xf8]   ;;  %v20056_v29 = vld [vmem:[#allocation2 + $0x10] sm:$0xff]  }
 0x140   : > { %17621 = vmatprep.subr.bf16.mxu1 %v18916_v38  ;;  %17669 = vmatprep.subr.bf16.mxu0 %v18917_v20  ;;  %v4822_v54 = vrot.slane %v18920_v28, 3  ;;  %v4823_v55 = vrot.slane %v20056_v29, 3 }
 0x142   : > { %v4824_v16 = vsel %vm4821_vm4, %v4822_v54, %v4823_v55  ;;  %v18930_v54 = vld [vmem:[#allocation9 + $0x270] sm:$0xff]  }
 0x143   : > { %17622 = vmatpush3.bf16.msra.mxu1 %v18916_v38  ;;  %17670 = vmatpush3.bf16.msra.mxu0 %v18917_v20  ;;  %v4221_v38 = vrot.slane %v4219_v17, 3  ;;  %v4226_v20 = vrot.slane %v4224_v22, 2  ;;  %v4244_v17 = vrot.slane %v4242_v58, 2  ;;  %v20087_v22 = vld [vmem:[#allocation2 + $0x20] sm:$0xff]  }
 0x144   : > { %17703 = vmatprep.subr.bf16.mxu1 %v20008_v42  ;;  %17751 = vmatprep.subr.bf16.mxu0 %v20010_v43 }
 0x145   : > { %v20018_v52 = vpop.f32.mrf.mxu0  ;;  %v20020_v53 = vpop.f32.mrf.mxu1  ;;  %17544 = vmatmul.mubr.bf16.gmra.mxu1 %v3260_v46  ;;  %17592 = vmatmul.mubr.bf16.gmra.mxu0 %v3747_v47  ;;  %v4233_v46 = vshrl.u32 %v18922_v34, 16  ;;  %v4236_v47 = vshll.u32 %v18922_v34, 16  ;;  %v4222_v50 = vor.u32 %v4221_v38, %v4218_v33  ;;  %v4230_v51 = vor.u32 %v4229_v26, %v4226_v20  ;;  %v18934_v38 = vld [vmem:[#allocation2 + $0x38] sm:$0xff]  }
 0x146   : > { %17547 = vmatprep.mubr.bf16.mxu1 %v3262_v48  ;;  %17595 = vmatprep.mubr.bf16.mxu0 %v3749_v49  ;;  %v4248_v34 = vor.u32 %v4247_v21, %v4244_v17 }
 0x147   : > { %v20022_v56 = vpop.f32.mrf.mxu0  ;;  %v20024_v57 = vpop.f32.mrf.mxu1  ;;  %v4235_v3 = vrot.slane %v4233_v46, 2  ;;  %v4238_v4 = vrot.slane %v4236_v47, 3  ;;  %v4231_v11 = vsel %vm4214_vm5, %v4222_v50, %v4230_v51  ;;  %v20102_v46 = vld [vmem:[#allocation2 + $0x30] sm:$0xff]  }
 0x149   : > { %v20026_v63 = vpop.f32.mrf.mxu0  ;;  %v20028_v0 = vpop.f32.mrf.mxu1  ;;  %v4239_v28 = vor.u32 %v4238_v4, %v4235_v3  ;;  %v18938_v3 = vld [vmem:[#allocation2 + $0x40] sm:$0xff]  }
 0x14b   : > { %v20036_v5 = vpop.f32.mrf.mxu0  ;;  %v20038_v6 = vpop.f32.mrf.mxu1  ;;  %v4240_v47 = vsel %vm4214_vm5, %v4230_v51, %v4239_v28  ;;  %v4249_v4 = vsel %vm4214_vm5, %v4239_v28, %v4248_v34 }
 0x14d   : > { %v20042_v12 = vpop.f32.mrf.mxu0  ;;  %v20044_v13 = vpop.f32.mrf.mxu1  ;;  %17548 = vmatmul.mubr.bf16.gmra.mxu1 %v3264_v1  ;;  %17596 = vmatmul.mubr.bf16.gmra.mxu0 %v3751_v2  ;;  %v3272_v1 = vsel %vm3239_vm3, %v3269_v14, %v3271_v44  ;;  %v3759_v2 = vsel %vm3239_vm3, %v3756_v15, %v3758_v45  ;;  %v4251_v15 = vshrl.u32 %v18928_v62, 16  ;;  %v4256_v44 = vrot.slane %v4254_v27, 3  ;;  %v18929_v45 = vld [vmem:[#allocation2 + $0x28] sm:$0xff]   ;;  %v18937_v27 = vld [vmem:[#allocation9 + $0x2a8] sm:$0xff]  }
 0x14e   : > { %17551 = vmatprep.mubr.bf16.mxu1 %v3266_v7  ;;  %17599 = vmatprep.mubr.bf16.mxu0 %v3753_v8  ;;  %v18923_v7 = vld [vmem:[#allocation2 + $0x18] sm:$0xff]   ;;  %v18932_v8 = vld [vmem:[#allocation2 + $0x30] sm:$0xff]   ;;  %v18931_v62 = vld [vmem:[#allocation9 + $0x2b0] sm:$0xff]   ;;  %v4829_v51 = vrot.slane %v18929_v45, 3  ;;  %v4281_v45 = vshll.u32 %v18938_v3, 16 }
 0x14f   : > { %v20048_v18 = vpop.f32.mrf.mxu0  ;;  %v20050_v19 = vpop.f32.mrf.mxu1  ;;  %v4825_v29 = vrot.slane %v18923_v7, 3  ;;  %v4263_v33 = vshll.u32 %v18932_v8, 16  ;;  %v4253_v39 = vrot.slane %v4251_v15, 2  ;;  %v18936_v15 = vld [vmem:[#allocation9 + $0x268] sm:$0xff]  }
 0x151   : > { %v20052_v24 = vpop.f32.mrf.mxu0  ;;  %v20054_v25 = vpop.f32.mrf.mxu1  ;;  %v4826_v50 = vsel %vm4821_vm4, %v4823_v55, %v4825_v29  ;;  %v4257_v21 = vor.u32 %v4256_v44, %v4253_v39  ;;  %v20123_v44 = vld [vmem:[#allocation2 + $0x40] sm:$0xff]  }
 0x153   : > { %v20061_v35 = vpop.f32.mrf.mxu0  ;;  %v20063_v36 = vpop.f32.mrf.mxu1 }
 0x155   : > { %v20066_v40 = vpop.f32.mrf.mxu0  ;;  %v20068_v41 = vpop.f32.mrf.mxu1  ;;  %17552 = vmatmul.mubr.bf16.gmra.mxu1 %v3268_v30  ;;  %17600 = vmatmul.mubr.bf16.gmra.mxu0 %v3755_v31 }
 0x156   : > { %17555 = vmatprep.mubr.bf16.mxu1 %v3270_v32  ;;  %17603 = vmatprep.mubr.bf16.mxu0 %v3757_v37  ;;  %v4260_v32 = vshrl.u32 %v18932_v8, 16  ;;  %v4827_v37 = vrot.slane %v20087_v22, 3  ;;  %v4269_v8 = vshrl.u32 %v18934_v38, 16  ;;  %v23185_v22 = vrot.slane %v20102_v46, 3 }
 0x157   : > { %v20070_v48 = vpop.f32.mrf.mxu0  ;;  %v20072_v49 = vpop.f32.mrf.mxu1 }
 0x158   : > { %v4828_v7 = vsel %vm4821_vm4, %v4825_v29, %v4827_v37 }
 0x159   : > { %v20075_v60 = vpop.f32.mrf.mxu0  ;;  %v20077_v61 = vpop.f32.mrf.mxu1 }
 0x15b   : > { %v20081_v9 = vpop.f32.mrf.mxu0  ;;  %v20083_v10 = vpop.f32.mrf.mxu1 }
 0x15d   : > { %v20089_v23 = vpop.f32.mrf.mxu0  ;;  %v20091_v14 = vpop.f32.mrf.mxu1  ;;  %17556 = vmatmul.mubr.bf16.gmra.mxu1 %v3272_v1  ;;  %17604 = vmatmul.mubr.bf16.gmra.mxu0 %v3759_v2  ;;  %v4262_v1 = vrot.slane %v4260_v32, 2  ;;  %v4265_v2 = vrot.slane %v4263_v33, 3  ;;  %v20118_v33 = vld [vmem:[#allocation2 + $0x38] sm:$0xff]  }
 0x15e   : > { %17623 = vmatprep.mubr.bf16.mxu1 %v4231_v11  ;;  %17671 = vmatprep.mubr.bf16.mxu0 %v4824_v16  ;;  %v4272_v11 = vshll.u32 %v18934_v38, 16  ;;  %v4278_v38 = vshrl.u32 %v18938_v3, 16  ;;  %v4258_v3 = vsel %vm4214_vm5, %v4248_v34, %v4257_v21 }
 0x15f   : > { %v20093_v30 = vpop.f32.mrf.mxu0  ;;  %v20095_v31 = vpop.f32.mrf.mxu1  ;;  %v20116_v32 = vor.u32 %v4265_v2, %v4262_v1  ;;  %v4830_v1 = vsel %vm4821_vm4, %v4827_v37, %v4829_v51 }
 0x160   : > { %v4274_v39 = vrot.slane %v4272_v11, 3  ;;  %v4832_v11 = vsel %vm4821_vm4, %v4829_v51, %v23185_v22  ;;  %v4280_v37 = vrot.slane %v4278_v38, 2  ;;  %v4835_v51 = vrot.slane %v20123_v44, 3 }
 0x161   : > { %v20098_v20 = vpop.f32.mrf.mxu0  ;;  %v20100_v26 = vpop.f32.mrf.mxu1 }
 0x163   : > { %v20106_v58 = vpop.f32.mrf.mxu0  ;;  %v20108_v59 = vpop.f32.mrf.mxu1 }
 0x165   : > { %v17337_v16 = vpop.f32.mrf.mxu1  ;;  %v17385_v17 = vpop.f32.mrf.mxu0  ;;  %17624 = vmatmul.mubr.bf16.vlgmr.msra.gmra.mxu1 %v4240_v47  ;;  %17672 = vmatmul.mubr.bf16.vlgmr.msra.gmra.mxu0 %v4826_v50  ;;  %v18940_v47 = vld [vmem:[#allocation2 + $0x48] sm:$0xff]  }
 0x166   : > { %v1430_v55 = vadd.f32 %v17337_v16, %v20018_v52  ;;  %17704 = vmatpush3.bf16.msra.mxu1 %v20008_v42  ;;  %17752 = vmatpush3.bf16.msra.mxu0 %v20010_v43  ;;  %v4271_v43 = vrot.slane %v4269_v8, 2  ;;  %v4267_v8 = vsel %vm4214_vm5, %v4257_v21, %v20116_v32 }
 0x167   : > { %v1301_v28 = vpop.f32.mrf.mxu1  ;;  %v1789_v29 = vpop.f32.mrf.mxu0  ;;  %17627 = vmatprep.mubr.bf16.mxu1 %v4249_v4  ;;  %17675 = vmatprep.mubr.bf16.mxu0 %v4828_v7 }
 0x168   : > { %v20120_v52 = vadd.f32 %v17385_v17, %v1430_v55  ;;  %v1428_v42 = vadd.f32 %v1301_v28, %v20022_v56  ;;  %17705 = vmatprep.subr.bf16.mxu1 %v18930_v54  ;;  %17753 = vmatprep.subr.bf16.mxu0 %v18931_v62  ;;  %v18944_v56 = vld [vmem:[#allocation2 + $0x50] sm:$0xff]   ;;  %v4283_v55 = vrot.slane %v4281_v45, 3  ;;  %v4275_v21 = vor.u32 %v4274_v39, %v4271_v43  ;;  %v20149_v39 = vld [vmem:[#allocation2 + $0x58] sm:$0xff]  }
 0x169   : > { %v17338_v50 = vpop.f32.mrf.mxu1  ;;  %v17386_v4 = vpop.f32.mrf.mxu0  ;;  %v18942_v28 = vld [vmem:[#allocation9 + $0x260] sm:$0xff]   ;;  %v4290_v45 = vshll.u32 %v18940_v47, 16  ;;  %v4299_v43 = vshll.u32 %v18944_v56, 16 }
 0x16a   : > { %v20126_v2 = vadd.f32 %v1789_v29, %v1428_v42  ;;  %v1431_v7 = vadd.f32 %v17338_v50, %v20026_v63  ;;  %17706 = vmatpush3.bf16.msra.mxu1 %v18930_v54  ;;  %17754 = vmatpush3.bf16.msra.mxu0 %v18931_v62  ;;  %v4287_v54 = vshrl.u32 %v18940_v47, 16  ;;  %v18943_v62 = vld [vmem:[#allocation9 + $0x2a0] sm:$0xff]   ;;  %v4833_v50 = vrot.slane %v20118_v33, 3  ;;  %v18948_v47 = vld [vmem:[#allocation9 + $0x258] sm:$0xff]  }
 0x16b   : > { %v1304_v16 = vpop.f32.mrf.mxu1  ;;  %v1792_v17 = vpop.f32.mrf.mxu0  ;;  %17707 = vmatprep.subr.bf16.mxu1 %v18936_v15  ;;  %17755 = vmatprep.subr.bf16.mxu0 %v18937_v27  ;;  %v20147_v33 = vld [vmem:[#allocation2 + $0x50] sm:$0xff]  }
 0x16c   : > { %v20135_v63 = vadd.f32 %v17386_v4, %v1431_v7  ;;  %v1429_v34 = vadd.f32 %v1304_v16, %v20036_v5  ;;  %v4296_v4 = vshrl.u32 %v18944_v56, 16  ;;  %v20143_v16 = vor.u32 %v4283_v55, %v4280_v37 }
 0x16d   : > { %v17341_v29 = vpop.f32.mrf.mxu1  ;;  %v17389_v42 = vpop.f32.mrf.mxu0  ;;  %17628 = vmatmul.mubr.bf16.gmra.mxu1 %v4258_v3  ;;  %17676 = vmatmul.mubr.bf16.gmra.mxu0 %v4830_v1  ;;  %v20145_v1 = vld [vmem:[#allocation2 + $0x48] sm:$0xff]   ;;  %v23240_v56 = vrot.slane %v20102_v46, 3  ;;  %v4301_v46 = vrot.slane %v4299_v43, 3  ;;  %v4308_v43 = vshll.u32 %v20149_v39, 16  ;;  %v23242_v44 = vrot.slane %v20147_v33, 3 }
 0x16e   : > { %v20140_v22 = vadd.f32 %v1792_v17, %v1429_v34  ;;  %v1434_v38 = vadd.f32 %v17341_v29, %v20042_v12  ;;  %17631 = vmatprep.mubr.bf16.mxu1 %v4267_v8  ;;  %17679 = vmatprep.mubr.bf16.mxu0 %v4832_v11  ;;  %v4289_v17 = vrot.slane %v4287_v54, 2  ;;  %v18949_v8 = vld [vmem:[#allocation9 + $0x298] sm:$0xff]   ;;  %v4276_v11 = vsel %vm4214_vm5, %v20116_v32, %v4275_v21  ;;  %v18950_v54 = vld [vmem:[#allocation2 + $0x60] sm:$0xff]  }
 0x16f   : > { %v1317_v5 = vpop.f32.mrf.mxu1  ;;  %v1805_v7 = vpop.f32.mrf.mxu0  ;;  %17708 = vmatpush3.bf16.msra.mxu1 %v18936_v15  ;;  %17756 = vmatpush3.bf16.msra.mxu0 %v18937_v27  ;;  %v4834_v37 = vsel %vm4821_vm4, %v23240_v56, %v4833_v50  ;;  %v4292_v29 = vrot.slane %v4290_v45, 3  ;;  %v4836_v32 = vsel %vm4821_vm4, %v4833_v50, %v4835_v51  ;;  %v18954_v56 = vld [vmem:[#allocation9 + $0x250] sm:$0xff]  }
 0x170   : > { %v20151_v3 = vadd.f32 %v17389_v42, %v1434_v38  ;;  %v1432_v12 = vadd.f32 %v1317_v5, %v20048_v18  ;;  %17709 = vmatprep.subr.bf16.mxu1 %v18942_v28  ;;  %17757 = vmatprep.subr.bf16.mxu0 %v18943_v62  ;;  %v4298_v18 = vrot.slane %v4296_v4, 2  ;;  %v4285_v5 = vsel %vm4214_vm5, %v4275_v21, %v20143_v16  ;;  %v18955_v45 = vld [vmem:[#allocation9 + $0x290] sm:$0xff]  }
 0x171   : > { %v17342_v15 = vpop.f32.mrf.mxu1  ;;  %v17390_v27 = vpop.f32.mrf.mxu0  ;;  %v4837_v21 = vrot.slane %v20145_v1, 3  ;;  %v4314_v1 = vshrl.u32 %v18950_v54, 16 }
 0x172   : > { %v20159_v55 = vadd.f32 %v1805_v7, %v1432_v12  ;;  %v1435_v34 = vadd.f32 %v17342_v15, %v20052_v24  ;;  %v20181_v15 = vld [vmem:[#allocation2 + $0x60] sm:$0xff]  }
 0x173   : > { %v1320_v42 = vpop.f32.mrf.mxu1  ;;  %v1808_v38 = vpop.f32.mrf.mxu0  ;;  %17710 = vmatpush3.bf16.msra.mxu1 %v18942_v28  ;;  %17758 = vmatpush3.bf16.msra.mxu0 %v18943_v62  ;;  %v4305_v28 = vshrl.u32 %v20149_v39, 16  ;;  %v18961_v39 = vld [vmem:[#allocation9 + $0x288] sm:$0xff]  }
 0x174   : > { %v20167_v7 = vadd.f32 %v17390_v27, %v1435_v34  ;;  %v1433_v24 = vadd.f32 %v1320_v42, %v20061_v35  ;;  %17711 = vmatprep.subr.bf16.mxu1 %v18948_v47  ;;  %17759 = vmatprep.subr.bf16.mxu0 %v18949_v8  ;;  %v4293_v35 = vor.u32 %v4292_v29, %v4289_v17  ;;  %v20177_v27 = vld [vmem:[#allocation2 + $0x58] sm:$0xff]   ;;  %v4317_v42 = vshll.u32 %v18950_v54, 16 }
 0x175   : > { %v17345_v4 = vpop.f32.mrf.mxu1  ;;  %v17393_v12 = vpop.f32.mrf.mxu0  ;;  %17632 = vmatmul.mubr.bf16.gmra.mxu1 %v4276_v11  ;;  %17680 = vmatmul.mubr.bf16.gmra.mxu0 %v4834_v37  ;;  %v20179_v37 = vor.u32 %v4301_v46, %v4298_v18  ;;  %v4838_v18 = vsel %vm4821_vm4, %v4835_v51, %v4837_v21  ;;  %v4310_v46 = vrot.slane %v4308_v43, 3  ;;  %v4840_v51 = vsel %vm4821_vm4, %v4837_v21, %v23242_v44 }
 0x176   : > { %v20173_v62 = vadd.f32 %v1808_v38, %v1433_v24  ;;  %v1438_v50 = vadd.f32 %v17345_v4, %v20066_v40  ;;  %17635 = vmatprep.mubr.bf16.mxu1 %v4285_v5  ;;  %17683 = vmatprep.mubr.bf16.mxu0 %v4836_v32  ;;  %v18960_v38 = vld [vmem:[#allocation9 + $0x248] sm:$0xff]   ;;  %v4294_v32 = vsel %vm4214_vm5, %v20143_v16, %v4293_v35  ;;  %v4841_v16 = vrot.slane %v20177_v27, 3  ;;  %v20207_v27 = vld [vmem:[#allocation2 + $0x68] sm:$0xff]  }
 0x177   : > { %v1333_v34 = vpop.f32.mrf.mxu1  ;;  %v1821_v11 = vpop.f32.mrf.mxu0  ;;  %17712 = vmatpush3.bf16.msra.mxu1 %v18948_v47  ;;  %17760 = vmatpush3.bf16.msra.mxu0 %v18949_v8  ;;  %v4307_v47 = vrot.slane %v4305_v28, 2  ;;  %v18952_v8 = vld [vmem:[#allocation2 + $0x68] sm:$0xff]   ;;  %v4316_v28 = vrot.slane %v4314_v1, 2  ;;  %v4843_v43 = vrot.slane %v20181_v15, 3 }
 0x178   : > { %v20183_v24 = vadd.f32 %v17393_v12, %v1438_v50  ;;  %v1436_v40 = vadd.f32 %v1333_v34, %v20070_v48  ;;  %17713 = vmatprep.subr.bf16.mxu1 %v18954_v56  ;;  %17761 = vmatprep.subr.bf16.mxu0 %v18955_v45  ;;  %v18956_v48 = vld [vmem:[#allocation2 + $0x70] sm:$0xff]   ;;  %v4303_v50 = vsel %vm4214_vm5, %v4293_v35, %v20179_v37  ;;  %v4319_v34 = vrot.slane %v4317_v42, 3 }
 0x179   : > { %v17346_v17 = vpop.f32.mrf.mxu1  ;;  %v17394_v29 = vpop.f32.mrf.mxu0  ;;  %v18967_v35 = vld [vmem:[#allocation9 + $0x280] sm:$0xff]   ;;  %v4323_v21 = vshrl.u32 %v18952_v8, 16  ;;  %v4326_v1 = vshll.u32 %v18952_v8, 16  ;;  %v4332_v42 = vshrl.u32 %v18956_v48, 16  ;;  %v4335_v44 = vshll.u32 %v18956_v48, 16 }
 0x17a   : > { %v20189_v5 = vadd.f32 %v1821_v11, %v1436_v40  ;;  %v1439_v54 = vadd.f32 %v17346_v17, %v20075_v60  ;;  %v18966_v40 = vld [vmem:[#allocation9 + $0x240] sm:$0xff]  }
 0x17b   : > { %v1336_v4 = vpop.f32.mrf.mxu1  ;;  %v1824_v12 = vpop.f32.mrf.mxu0  ;;  %17714 = vmatpush3.bf16.msra.mxu1 %v18954_v56  ;;  %17762 = vmatpush3.bf16.msra.mxu0 %v18955_v45  ;;  %v4328_v48 = vrot.slane %v4326_v1, 3  ;;  %v4337_v1 = vrot.slane %v4335_v44, 3 }
 0x17c   : > { %23241 = vst [vmem:[#allocation23_spill] sm:$0xff] %v20189_v5  ;;  %v20199_v11 = vadd.f32 %v17394_v29, %v1439_v54  ;;  %v1437_v60 = vadd.f32 %v1336_v4, %v20081_v9  ;;  %17715 = vmatprep.subr.bf16.mxu1 %v18960_v38  ;;  %17763 = vmatprep.subr.bf16.mxu0 %v18961_v39 }
 0x17d   : > { %v17349_v17 = vpop.f32.mrf.mxu1  ;;  %v17397_v5 = vpop.f32.mrf.mxu0  ;;  %17636 = vmatmul.mubr.bf16.gmra.mxu1 %v4294_v32  ;;  %17684 = vmatmul.mubr.bf16.gmra.mxu0 %v4838_v18  ;;  %v4311_v9 = vor.u32 %v4310_v46, %v4307_v47  ;;  %v20209_v4 = vor.u32 %v4319_v34, %v4316_v28  ;;  %v20211_v18 = vld [vmem:[#allocation9 + $0x2f8] sm:$0xff]   ;;  %v4334_v28 = vrot.slane %v4332_v42, 2  ;;  %v4845_v42 = vrot.slane %v20207_v27, 3  ;;  %v20243_v27 = vld [vmem:[#allocation2 + $0x78] sm:$0xff]  }
 0x17e   : > { %v20204_v56 = vadd.f32 %v1824_v12, %v1437_v60  ;;  %v1442_v45 = vadd.f32 %v17349_v17, %v20089_v23  ;;  %17639 = vmatprep.mubr.bf16.mxu1 %v4303_v50  ;;  %17687 = vmatprep.mubr.bf16.mxu0 %v4840_v51  ;;  %v20216_v23 = vld [vmem:[#allocation9 + $0x338] sm:$0xff]   ;;  %v23243_v12 = vrot.slane %v20147_v33, 3  ;;  %v4325_v51 = vrot.slane %v4323_v21, 2 }
 0x17f   : > { %v1349_v29 = vpop.f32.mrf.mxu1  ;;  %v1837_v54 = vpop.f32.mrf.mxu0  ;;  %17716 = vmatpush3.bf16.msra.mxu1 %v18960_v38  ;;  %17764 = vmatpush3.bf16.msra.mxu0 %v18961_v39  ;;  %v18958_v38 = vld [vmem:[#allocation2 + $0x78] sm:$0xff]   ;;  %v20226_v34 = vld [vmem:[#allocation2 + $0x70] sm:$0xff]   ;;  %v4321_v33 = vsel %vm4214_vm5, %v4311_v9, %v20209_v4  ;;  %v4844_v21 = vsel %vm4821_vm4, %v4841_v16, %v4843_v43  ;;  %v4849_v15 = vrot.slane %v20243_v27, 3 }
 0x180   : > { %v20213_v8 = vadd.f32 %v17397_v5, %v1442_v45  ;;  %v1440_v32 = vadd.f32 %v1349_v29, %v20093_v30  ;;  %17717 = vmatprep.subr.bf16.mxu1 %v18966_v40  ;;  %17765 = vmatprep.subr.bf16.mxu0 %v18967_v35  ;;  %v4842_v50 = vsel %vm4821_vm4, %v23243_v12, %v4841_v16  ;;  %v18962_v45 = vld [vmem:[#allocation2 + $0x80] sm:$0xff]   ;;  %v4344_v16 = vshll.u32 %v18958_v38, 16 }
 0x181   : > { %v17350_v47 = vpop.f32.mrf.mxu1  ;;  %v17398_v46 = vpop.f32.mrf.mxu0  ;;  %v4312_v30 = vsel %vm4214_vm5, %v20179_v37, %v4311_v9  ;;  %v4338_v12 = vor.u32 %v4337_v1, %v4334_v28 }
 0x182   : > { %v20221_v39 = vadd.f32 %v1837_v54, %v1440_v32  ;;  %v1443_v5 = vadd.f32 %v17350_v47, %v20098_v20  ;;  %v4341_v54 = vshrl.u32 %v18958_v38, 16  ;;  %v18964_v32 = vld [vmem:[#allocation2 + $0x88] ss:$0 sps:$4 sm:$0x77]  }
 0x183   : > { %v1352_v60 = vpop.f32.mrf.mxu1  ;;  %v1840_v17 = vpop.f32.mrf.mxu0  ;;  %17718 = vmatpush3.bf16.msra.mxu1 %v18966_v40  ;;  %17766 = vmatpush3.bf16.msra.mxu0 %v18967_v35  ;;  %v4329_v35 = vor.u32 %v4328_v48, %v4325_v51  ;;  %v4346_v48 = vrot.slane %v4344_v16, 3 }
 0x184   : > { %v20233_v20 = vadd.f32 %v17398_v46, %v1443_v5  ;;  %v1441_v37 = vadd.f32 %v1352_v60, %v20106_v58  ;;  %17799 = vmatprep.subr.bf16.mxu1 %v20211_v18  ;;  %17847 = vmatprep.subr.bf16.mxu0 %v20216_v23  ;;  %v4847_v58 = vrot.slane %v20226_v34, 3  ;;  %v4350_v5 = vshrl.u32 %v18962_v45, 16  ;;  %v18971_v34 = vld [vmem:[#allocation2 + $0x38] sm:$0xff]  }
 0x185   : > { %v17353_v29 = vpop.f32.mrf.mxu1  ;;  %v17401_v9 = vpop.f32.mrf.mxu0  ;;  %17640 = vmatmul.mubr.bf16.gmra.mxu1 %v4312_v30  ;;  %17688 = vmatmul.mubr.bf16.gmra.mxu0 %v4842_v50  ;;  %v4353_v30 = vshll.u32 %v18962_v45, 16  ;;  %v4343_v51 = vrot.slane %v4341_v54, 2  ;;  %v4330_v28 = vsel %vm4214_vm5, %v20209_v4, %v4329_v35  ;;  %v18970_v45 = vld [vmem:[#allocation2 + $0x30] sm:$0xfc]   ;;  %v20259_v54 = vld [vmem:[#allocation2 + $0x80] sm:$0xff]  }
 0x186   : > { %v20239_v44 = vadd.f32 %v1840_v17, %v1441_v37  ;;  %v1446_v40 = vadd.f32 %v17353_v29, %v20020_v53  ;;  %17643 = vmatprep.mubr.bf16.mxu1 %v4321_v33  ;;  %17691 = vmatprep.mubr.bf16.mxu0 %v4844_v21  ;;  %v4846_v53 = vsel %vm4821_vm4, %v4843_v43, %v4845_v42  ;;  %v4352_v43 = vrot.slane %v4350_v5, 2 }
 0x187   : > { %v1365_v47 = vpop.f32.mrf.mxu1  ;;  %v1853_v46 = vpop.f32.mrf.mxu0  ;;  %v4848_v1 = vsel %vm4821_vm4, %v4845_v42, %v4847_v58  ;;  %v4339_v29 = vsel %vm4214_vm5, %v4329_v35, %v4338_v12  ;;  %v5805_v42 = vshrl.u32 %v18971_v34, 16  ;;  %v4347_v27 = vor.u32 %v4346_v48, %v4343_v51 }
 0x188   : > { %v20245_v50 = vadd.f32 %v17401_v9, %v1446_v40  ;;  %v1444_v38 = vadd.f32 %v1365_v47, %v20024_v57  ;;  %v4355_v9 = vrot.slane %v4353_v30, 3  ;;  %v4359_v40 = vshrl.u32 %v18964_v32, 16 }
 0x189   : > { %v17354_v60 = vpop.f32.mrf.mxu1  ;;  %v17402_v17 = vpop.f32.mrf.mxu0  ;;  %v4362_v47 = vshll.u32 %v18964_v32, 16  ;;  %v5797_v5 = vshrl.u32 %v18970_v45, 16  ;;  %v18965_v32 = vld [vmem:[#allocation2 + $0x88] ss:$0 sps:$4 sm:$0x77]   ;;  %v4850_v51 = vsel %vm4821_vm4, %v4847_v58, %v4849_v15 }
 0x18a   : > { %v20251_v33 = vadd.f32 %v1853_v46, %v1444_v38  ;;  %v1447_v21 = vadd.f32 %v17354_v60, %v20028_v0  ;;  %v5808_v38 = vshll.u32 %v18971_v34, 16  ;;  %v20273_v34 = vrot.slane %v4359_v40, 2 }
 0x18b   : > { %v1368_v57 = vpop.f32.mrf.mxu1  ;;  %v1856_v37 = vpop.f32.mrf.mxu0  ;;  %v4364_v48 = vrot.slane %v4362_v47, 3  ;;  %v5799_v40 = vrot.slane %v5797_v5, 2 }
 0x18c   : > { %v20261_v16 = vadd.f32 %v17402_v17, %v1447_v21  ;;  %v1445_v0 = vadd.f32 %v1368_v57, %v20038_v6  ;;  %v20267_v21 = vor.u32 %v4355_v9, %v4352_v43  ;;  %v4851_v6 = vrot.slane %v20259_v54, 3 }
 0x18d   : > { %v17357_v4 = vpop.f32.mrf.mxu1  ;;  %v17405_v46 = vpop.f32.mrf.mxu0  ;;  %17644 = vmatmul.mubr.bf16.gmra.mxu1 %v4330_v28  ;;  %17692 = vmatmul.mubr.bf16.gmra.mxu0 %v4846_v53  ;;  %v5800_v57 = vshll.u32 %v18970_v45, 16  ;;  %v5807_v43 = vrot.slane %v5805_v42, 2  ;;  %v5810_v9 = vrot.slane %v5808_v38, 3  ;;  %v18973_v45 = vld [vmem:[#allocation2 + $0x40] sm:$0xff]   ;;  %v341_v42 = vld [vmem:[%s19855_s6 + $0x94] sm:$0xff]  }
 0x18e   : > { %v20264_v60 = vadd.f32 %v1856_v37, %v1445_v0  ;;  %v1450_v35 = vadd.f32 %v17357_v4, %v20044_v13  ;;  %17647 = vmatprep.mubr.bf16.mxu1 %v4339_v29  ;;  %17695 = vmatprep.mubr.bf16.mxu0 %v4848_v1  ;;  %v20276_v1 = vld [vmem:[#allocation2 + $0x30] sm:$0xfc]   ;;  %v20278_v29 = vld [vmem:[#allocation2 + $0x38] sm:$0xff]   ;;  %v4357_v58 = vsel %vm4214_vm5, %v4347_v27, %v20267_v21 }
 0x18f   : > { %v1381_v30 = vpop.f32.mrf.mxu1  ;;  %v1869_v17 = vpop.f32.mrf.mxu0  ;;  %v339_v4 = vld [vmem:[%s19855_s6 + $0x8c] sm:$0xff]   ;;  %v4852_v47 = vsel %vm4821_vm4, %v4849_v15, %v4851_v6  ;;  %401 = vst [vmem:[#allocation2 + $0x94] sm:$0xff] %v341_v42  }
 0x190   : > { %v20270_v28 = vadd.f32 %v17405_v46, %v1450_v35  ;;  %v1448_v53 = vadd.f32 %v1381_v30, %v20050_v19  ;;  %v4348_v19 = vsel %vm4214_vm5, %v4338_v12, %v4347_v27  ;;  %v5802_v30 = vrot.slane %v5800_v57, 3  ;;  %399 = vst [vmem:[#allocation2 + $0x8c] sm:$0xff] %v339_v4  }
 0x191   : > { %v17358_v13 = vpop.f32.mrf.mxu1  ;;  %v17406_v37 = vpop.f32.mrf.mxu0  ;;  %v4365_v57 = vor.u32 %v4364_v48, %v20273_v34 }
 0x192   : > { %v20280_v54 = vadd.f32 %v1869_v17, %v1448_v53  ;;  %v1451_v0 = vadd.f32 %v17358_v13, %v20054_v25  ;;  %v18977_v25 = vld [vmem:[#allocation2 + $0x48] sm:$0xff]   ;;  %v4853_v53 = vrot.slane %v18965_v32, 3  ;;  %v5814_v13 = vshrl.u32 %v18973_v45, 16 }
 0x193   : > { %v1384_v46 = vpop.f32.mrf.mxu1  ;;  %v1872_v35 = vpop.f32.mrf.mxu0  ;;  %v5310_v32 = vrot.slane %v20278_v29, 2  ;;  %v5823_v34 = vshrl.u32 %v18977_v25, 16  ;;  %v5826_v48 = vshll.u32 %v18977_v25, 16 }
 0x194   : > { %23244 = vst [vmem:[#allocation24_spill] sm:$0xff] %v20280_v54  ;;  %v20289_v38 = vadd.f32 %v17406_v37, %v1451_v0  ;;  %v1449_v17 = vadd.f32 %v1384_v46, %v20063_v36  ;;  %v343_v54 = vld [vmem:[%s19855_s6 + $0x9c] sm:$0xff]   ;;  %v5817_v36 = vshll.u32 %v18973_v45, 16  ;;  %v345_v37 = vld [vmem:[%s19855_s6 + $0xa4] sm:$0xff]   ;;  %v5811_v46 = vor.u32 %v5810_v9, %v5807_v43  ;;  %v347_v45 = vld [vmem:[%s19855_s6 + $0xac] sm:$0xff]  }
 0x195   : > { %v17361_v12 = vpop.f32.mrf.mxu1  ;;  %v17409_v5 = vpop.f32.mrf.mxu0  ;;  %17648 = vmatmul.mubr.bf16.gmra.mxu1 %v4348_v19  ;;  %17696 = vmatmul.mubr.bf16.gmra.mxu0 %v4850_v51  ;;  %403 = vst [vmem:[#allocation2 + $0x9c] sm:$0xff] %v343_v54   ;;  %v5309_v19 = vrot.slane %v20276_v1, 2  ;;  %v5803_v51 = vor.u32 %v5802_v30, %v5799_v40  ;;  %405 = vst [vmem:[#allocation2 + $0xa4] sm:$0xff] %v345_v37   ;;  %v4854_v42 = vsel %vm4821_vm4, %v4851_v6, %v4853_v53  ;;  %v18979_v1 = vld [vmem:[#allocation2 + $0x50] sm:$0xff]   ;;  %v18983_v40 = vld [vmem:[#allocation2 + $0x58] sm:$0xff]  }
 0x196   : > { %v20293_v27 = vadd.f32 %v1872_v35, %v1449_v17  ;;  %v1454_v15 = vadd.f32 %v17361_v12, %v20068_v41  ;;  %17651 = vmatprep.mubr.bf16.mxu1 %v4357_v58  ;;  %17699 = vmatprep.mubr.bf16.mxu0 %v4852_v47  ;;  %v20303_v58 = vld [vmem:[#allocation2 + $0x40] sm:$0xff]   ;;  %v5816_v17 = vrot.slane %v5814_v13, 2  ;;  %407 = vst [vmem:[#allocation2 + $0xac] sm:$0xff] %v347_v45   ;;  %v5825_v13 = vrot.slane %v5823_v34, 2 }
 0x197   : > { %v1397_v0 = vpop.f32.mrf.mxu1  ;;  %v1885_v4 = vpop.f32.mrf.mxu0  ;;  %v4366_v9 = vsel %vm4214_vm5, %v20267_v21, %v4365_v57  ;;  %v5311_v25 = vsel %vm3239_vm3, %v5309_v19, %v5310_v32  ;;  %v5828_v37 = vrot.slane %v5826_v48, 3  ;;  %v5312_v21 = vrot.slane %v20303_v58, 2 }
 0x198   : > { %v20300_v35 = vadd.f32 %v17409_v5, %v1454_v15  ;;  %v1452_v41 = vadd.f32 %v1397_v0, %v20072_v49  ;;  %v5819_v49 = vrot.slane %v5817_v36, 3  ;;  %v5812_v5 = vsel %vm4214_vm5, %v5803_v51, %v5811_v46  ;;  %v20314_v15 = vld [vmem:[#allocation2 + $0x48] sm:$0xff]  }
 0x199   : > { %v17362_v54 = vpop.f32.mrf.mxu1  ;;  %v17410_v47 = vpop.f32.mrf.mxu0  ;;  %v5832_v57 = vshrl.u32 %v18979_v1, 16  ;;  %v5835_v36 = vshll.u32 %v18979_v1, 16  ;;  %v5844_v34 = vshll.u32 %v18983_v40, 16  ;;  %v5829_v58 = vor.u32 %v5828_v37, %v5825_v13  ;;  %v18989_v13 = vld [vmem:[#allocation2 + $0x68] sm:$0xff]  }
 0x19a   : > { %v20307_v29 = vadd.f32 %v1885_v4, %v1452_v41  ;;  %v1455_v43 = vadd.f32 %v17362_v54, %v20077_v61  ;;  %v5820_v51 = vor.u32 %v5819_v49, %v5816_v17  ;;  %v5841_v41 = vshrl.u32 %v18983_v40, 16  ;;  %v20330_v17 = vld [vmem:[#allocation2 + $0x58] sm:$0xff]  }
 0x19b   : > { %v1400_v30 = vpop.f32.mrf.mxu1  ;;  %v1888_v12 = vpop.f32.mrf.mxu0 }
 0x19c   : > { %v20316_v6 = vadd.f32 %v17410_v47, %v1455_v43  ;;  %v1453_v53 = vadd.f32 %v1400_v30, %v20083_v10  ;;  %v5314_v47 = vrot.slane %v20314_v15, 2  ;;  %v5313_v43 = vsel %vm3239_vm3, %v5310_v32, %v5312_v21 }
 0x19d   : > { %v17365_v61 = vpop.f32.mrf.mxu1  ;;  %v17413_v0 = vpop.f32.mrf.mxu0  ;;  %17652 = vmatmul.mubr.bf16.gmra.mxu1 %v4366_v9  ;;  %17700 = vmatmul.mubr.bf16.gmra.mxu0 %v4854_v42  ;;  %v20328_v9 = vld [vmem:[#allocation2 + $0x50] sm:$0xff]   ;;  %v5837_v30 = vrot.slane %v5835_v36, 3  ;;  %v18981_v36 = vld [vmem:[#allocation9 + $0x330] sm:$0xff]  }
 0x19e   : > { %v20320_v4 = vadd.f32 %v1888_v12, %v1453_v53  ;;  %v1458_v19 = vadd.f32 %v17365_v61, %v20091_v14  ;;  %17719 = vmatprep.mubr.bf16.mxu1 %v5311_v25  ;;  %17767 = vmatprep.mubr.bf16.mxu0 %v5812_v5  ;;  %v5834_v14 = vrot.slane %v5832_v57, 2  ;;  %v5821_v12 = vsel %vm4214_vm5, %v5811_v46, %v5820_v51  ;;  %v18985_v25 = vld [vmem:[#allocation2 + $0x60] sm:$0xff]  }
 0x19f   : > { %v1413_v45 = vpop.f32.mrf.mxu1  ;;  %v1901_v10 = vpop.f32.mrf.mxu0  ;;  %v5846_v53 = vrot.slane %v5844_v34, 3  ;;  %v5315_v61 = vsel %vm3239_vm3, %v5312_v21, %v5314_v47  ;;  %v18980_v57 = vld [vmem:[#allocation9 + $0x2f0] sm:$0xff]   ;;  %v5316_v46 = vrot.slane %v20328_v9, 2  ;;  %v5853_v21 = vshll.u32 %v18985_v25, 16  ;;  %v18987_v9 = vld [vmem:[#allocation9 + $0x328] sm:$0xff]  }
 0x1a0   : > { %v20323_v48 = vadd.f32 %v17413_v0, %v1458_v19  ;;  %v1456_v54 = vadd.f32 %v1413_v45, %v20095_v31  ;;  %v5843_v31 = vrot.slane %v5841_v41, 2  ;;  %v5830_v0 = vsel %vm4214_vm5, %v5820_v51, %v5829_v58 }
 0x1a1   : > { %v17366_v42 = vpop.f32.mrf.mxu1  ;;  %v17414_v1 = vpop.f32.mrf.mxu0  ;;  %v5838_v41 = vor.u32 %v5837_v30, %v5834_v14  ;;  %v5859_v14 = vshrl.u32 %v18989_v13, 16 }
 0x1a2   : > { %v20332_v49 = vadd.f32 %v1901_v10, %v1456_v54  ;;  %v1459_v40 = vadd.f32 %v17366_v42, %v20100_v26  ;;  %v5318_v54 = vrot.slane %v20330_v17, 2  ;;  %v20348_v42 = vor.u32 %v5846_v53, %v5843_v31 }
 0x1a3   : > { %v1416_v5 = vpop.f32.mrf.mxu1  ;;  %v1904_v15 = vpop.f32.mrf.mxu0  ;;  %v5839_v31 = vsel %vm4214_vm5, %v5829_v58, %v5838_v41 }
 0x1a4   : > { %v20336_v37 = vadd.f32 %v17414_v1, %v1459_v40  ;;  %v1457_v32 = vadd.f32 %v1416_v5, %v20108_v59  ;;  %v5850_v59 = vshrl.u32 %v18985_v25, 16  ;;  %v20350_v1 = vld [vmem:[#allocation2 + $0x60] sm:$0xff]   ;;  %v5317_v25 = vsel %vm3239_vm3, %v5314_v47, %v5316_v46  ;;  %v18991_v5 = vld [vmem:[#allocation2 + $0x70] sm:$0xff]  }
 0x1a5   : > { %v17433_v19 = vpop.f32.mrf.mxu1  ;;  %v17481_v26 = vpop.f32.mrf.mxu0  ;;  %17720 = vmatmul.mubr.bf16.vlgmr.msra.gmra.mxu1 %v5313_v43  ;;  %17768 = vmatmul.mubr.bf16.vlgmr.msra.gmra.mxu0 %v5821_v12  ;;  %v18986_v43 = vld [vmem:[#allocation9 + $0x2e8] sm:$0xff]   ;;  %v5319_v47 = vsel %vm3239_vm3, %v5316_v46, %v5318_v54  ;;  %v5848_v58 = vsel %vm4214_vm5, %v5838_v41, %v20348_v42 }
 0x1a6   : > { %v20342_v45 = vadd.f32 %v1904_v15, %v1457_v32  ;;  %v2405_v10 = vadd.f32 %v17433_v19, %v20120_v52  ;;  %17800 = vmatpush3.bf16.msra.mxu1 %v20211_v18  ;;  %17848 = vmatpush3.bf16.msra.mxu0 %v20216_v23  ;;  %v5862_v52 = vshll.u32 %v18989_v13, 16  ;;  %v20355_v23 = vld [vmem:[#allocation2 + $0x68] sm:$0xff]   ;;  %v20359_v15 = vld [vmem:[#allocation2 + $0x78] sm:$0xff]   ;;  %v5855_v32 = vrot.slane %v5853_v21, 3 }
 0x1a7   : > { %v2276_v51 = vpop.f32.mrf.mxu1  ;;  %v2883_v34 = vpop.f32.mrf.mxu0  ;;  %17723 = vmatprep.mubr.bf16.mxu1 %v5315_v61  ;;  %17771 = vmatprep.mubr.bf16.mxu0 %v5830_v0  ;;  %v18992_v61 = vld [vmem:[#allocation9 + $0x2e0] sm:$0xff]   ;;  %v5322_v46 = vrot.slane %v20355_v23, 2  ;;  %v5877_v41 = vshrl.u32 %v20359_v15, 16 }
 0x1a8   : > { %v20352_v30 = vadd.f32 %v17481_v26, %v2405_v10  ;;  %v2403_v18 = vadd.f32 %v2276_v51, %v20126_v2  ;;  %17801 = vmatprep.subr.bf16.mxu1 %v18980_v57  ;;  %17849 = vmatprep.subr.bf16.mxu0 %v18981_v36  ;;  %v5852_v2 = vrot.slane %v5850_v59, 2  ;;  %v5861_v26 = vrot.slane %v5859_v14, 2 }
 0x1a9   : > { %v17434_v40 = vpop.f32.mrf.mxu1  ;;  %v17482_v12 = vpop.f32.mrf.mxu0  ;;  %v5864_v10 = vrot.slane %v5862_v52, 3  ;;  %v20378_v52 = vld [vmem:[#allocation2 + $0x80] sm:$0xff]  }
 0x1aa   : > { %v20361_v53 = vadd.f32 %v2883_v34, %v2403_v18  ;;  %v2406_v13 = vadd.f32 %v17434_v40, %v20135_v63  ;;  %17802 = vmatpush3.bf16.msra.mxu1 %v18980_v57  ;;  %17850 = vmatpush3.bf16.msra.mxu0 %v18981_v36  ;;  %v5320_v57 = vrot.slane %v20350_v1, 2  ;;  %v18993_v36 = vld [vmem:[#allocation9 + $0x320] sm:$0xff]   ;;  %v5868_v34 = vshrl.u32 %v18991_v5, 16 }
 0x1ab   : > { %v2279_v0 = vpop.f32.mrf.mxu1  ;;  %v2886_v19 = vpop.f32.mrf.mxu0  ;;  %17803 = vmatprep.subr.bf16.mxu1 %v18986_v43  ;;  %17851 = vmatprep.subr.bf16.mxu0 %v18987_v9  ;;  %v5871_v18 = vshll.u32 %v18991_v5, 16  ;;  %v5880_v5 = vshll.u32 %v20359_v15, 16 }
 0x1ac   : > { %v20369_v51 = vadd.f32 %v17482_v12, %v2406_v13  ;;  %v2404_v63 = vadd.f32 %v2279_v0, %v20140_v22  ;;  %v5856_v22 = vor.u32 %v5855_v32, %v5852_v2  ;;  %v18998_v13 = vld [vmem:[#allocation9 + $0x2d8] sm:$0xff]   ;;  %v20388_v2 = vld [vmem:[#allocation2 + $0x78] sm:$0xff]  }
 0x1ad   : > { %v17437_v59 = vpop.f32.mrf.mxu1  ;;  %v17485_v21 = vpop.f32.mrf.mxu0  ;;  %17724 = vmatmul.mubr.bf16.gmra.mxu1 %v5317_v25  ;;  %17772 = vmatmul.mubr.bf16.gmra.mxu0 %v5839_v31  ;;  %v20380_v25 = vor.u32 %v5864_v10, %v5861_v26  ;;  %v20382_v31 = vld [vmem:[#allocation2 + $0x70] sm:$0xff]   ;;  %v5879_v10 = vrot.slane %v5877_v41, 2  ;;  %v19005_v41 = vld [vmem:[#allocation9 + $0x310] sm:$0xff]  }
 0x1ae   : > { %v20375_v40 = vadd.f32 %v2886_v19, %v2404_v63  ;;  %v2409_v14 = vadd.f32 %v17437_v59, %v20151_v3  ;;  %17727 = vmatprep.mubr.bf16.mxu1 %v5319_v47  ;;  %17775 = vmatprep.mubr.bf16.mxu0 %v5848_v58  ;;  %v18999_v32 = vld [vmem:[#allocation9 + $0x318] sm:$0xff]   ;;  %v5873_v58 = vrot.slane %v5871_v18, 3  ;;  %v19004_v63 = vld [vmem:[#allocation9 + $0x2d0] sm:$0xff]  }
 0x1af   : > { %v2292_v1 = vpop.f32.mrf.mxu1  ;;  %v2899_v12 = vpop.f32.mrf.mxu0  ;;  %17804 = vmatpush3.bf16.msra.mxu1 %v18986_v43  ;;  %17852 = vmatpush3.bf16.msra.mxu0 %v18987_v9  ;;  %v5321_v43 = vsel %vm3239_vm3, %v5318_v54, %v5320_v57  ;;  %v5870_v9 = vrot.slane %v5868_v34, 2  ;;  %v5866_v17 = vsel %vm4214_vm5, %v5856_v22, %v20380_v25  ;;  %v5882_v54 = vrot.slane %v5880_v5, 3  ;;  %v19001_v34 = vld [vmem:[#allocation2 + $0x88] sm:$0xff]  }
 0x1b0   : > { %v20385_v0 = vadd.f32 %v17485_v21, %v2409_v14  ;;  %v2407_v3 = vadd.f32 %v2292_v1, %v20159_v55  ;;  %17805 = vmatprep.subr.bf16.mxu1 %v18992_v61  ;;  %17853 = vmatprep.subr.bf16.mxu0 %v18993_v36  ;;  %v5857_v55 = vsel %vm4214_vm5, %v20348_v42, %v5856_v22  ;;  %v5886_v42 = vshrl.u32 %v20378_v52, 16 }
 0x1b1   : > { %v17438_v19 = vpop.f32.mrf.mxu1  ;;  %v17486_v47 = vpop.f32.mrf.mxu0  ;;  %v5323_v14 = vsel %vm3239_vm3, %v5320_v57, %v5322_v46  ;;  %v5324_v57 = vrot.slane %v20382_v31, 2  ;;  %v5898_v31 = vshll.u32 %v19001_v34, 16 }
 0x1b2   : > { %v20393_v26 = vadd.f32 %v2899_v12, %v2407_v3  ;;  %v2410_v15 = vadd.f32 %v17438_v19, %v20167_v7  ;;  %v20413_v3 = vld [vmem:[#allocation2 + $0x80] sm:$0xff]  }
 0x1b3   : > { %v2295_v59 = vpop.f32.mrf.mxu1  ;;  %v2902_v21 = vpop.f32.mrf.mxu0  ;;  %17806 = vmatpush3.bf16.msra.mxu1 %v18992_v61  ;;  %17854 = vmatpush3.bf16.msra.mxu0 %v18993_v36  ;;  %v5889_v61 = vshll.u32 %v20378_v52, 16  ;;  %v19010_v19 = vld [vmem:[#allocation9 + $0x2c8] sm:$0xff]   ;;  %v5895_v52 = vshrl.u32 %v19001_v34, 16  ;;  %v19016_v34 = vld [vmem:[#allocation9 + $0x2c0] sm:$0xff]  }
 0x1b4   : > { %v20403_v18 = vadd.f32 %v17486_v47, %v2410_v15  ;;  %v2408_v7 = vadd.f32 %v2295_v59, %v20173_v62  ;;  %17807 = vmatprep.subr.bf16.mxu1 %v18998_v13  ;;  %17855 = vmatprep.subr.bf16.mxu0 %v18999_v32  ;;  %v5874_v62 = vor.u32 %v5873_v58, %v5870_v9  ;;  %v19011_v47 = vld [vmem:[#allocation9 + $0x308] sm:$0xff]   ;;  %v20420_v9 = vld [vmem:[#allocation2 + $0x88] sm:$0xff]  }
 0x1b5   : > { %v17441_v1 = vpop.f32.mrf.mxu1  ;;  %v17489_v12 = vpop.f32.mrf.mxu0  ;;  %17728 = vmatmul.mubr.bf16.gmra.mxu1 %v5321_v43  ;;  %17776 = vmatmul.mubr.bf16.gmra.mxu0 %v5857_v55  ;;  %v20415_v55 = vor.u32 %v5882_v54, %v5879_v10  ;;  %v19007_v54 = vld [vmem:[#allocation2 + $0x98] sm:$0xff]  }
 0x1b6   : > { %v20409_v36 = vadd.f32 %v2902_v21, %v2408_v7  ;;  %v2413_v22 = vadd.f32 %v17441_v1, %v20183_v24  ;;  %17731 = vmatprep.mubr.bf16.mxu1 %v5323_v14  ;;  %17779 = vmatprep.mubr.bf16.mxu0 %v5866_v17  ;;  %v23245_v24 = vld [vmem:[#allocation23_spill] sm:$0xff]  ;;  %v5888_v14 = vrot.slane %v5886_v42, 2  ;;  %v5891_v7 = vrot.slane %v5889_v61, 3  ;;  %v19003_v1 = vld [vmem:[#allocation2 + $0x90] sm:$0xff]  }
 0x1b7   : > { %v2308_v15 = vpop.f32.mrf.mxu1  ;;  %v2915_v43 = vpop.f32.mrf.mxu0  ;;  %17808 = vmatpush3.bf16.msra.mxu1 %v18998_v13  ;;  %17856 = vmatpush3.bf16.msra.mxu0 %v18999_v32  ;;  %v5325_v32 = vsel %vm3239_vm3, %v5322_v46, %v5324_v57  ;;  %v5875_v10 = vsel %vm4214_vm5, %v20380_v25, %v5874_v62  ;;  %v5328_v25 = vrot.slane %v20413_v3, 2  ;;  %v5913_v3 = vshrl.u32 %v19007_v54, 16 }
 0x1b8   : > { %v20417_v59 = vadd.f32 %v17489_v12, %v2413_v22  ;;  %v2411_v21 = vadd.f32 %v2308_v15, %v23245_v24  ;;  %17809 = vmatprep.subr.bf16.mxu1 %v19004_v63  ;;  %17857 = vmatprep.subr.bf16.mxu0 %v19005_v41  ;;  %v23246_v22 = vrot.slane %v20388_v2, 2  ;;  %v5884_v15 = vsel %vm4214_vm5, %v5874_v62, %v20415_v55  ;;  %v19017_v24 = vld [vmem:[#allocation9 + $0x300] sm:$0xff]  }
 0x1b9   : > { %v17442_v58 = vpop.f32.mrf.mxu1  ;;  %v17490_v17 = vpop.f32.mrf.mxu0  ;;  %v5330_v62 = vrot.slane %v20420_v9, 2 }
 0x1ba   : > { %v20422_v5 = vadd.f32 %v2915_v43, %v2411_v21  ;;  %v2414_v13 = vadd.f32 %v17442_v58, %v20199_v11  ;;  %v5327_v61 = vsel %vm3239_vm3, %v5324_v57, %v23246_v22  ;;  %v5897_v43 = vrot.slane %v5895_v52, 2 }
 0x1bb   : > { %v2311_v42 = vpop.f32.mrf.mxu1  ;;  %v2918_v12 = vpop.f32.mrf.mxu0  ;;  %v5900_v11 = vrot.slane %v5898_v31, 3  ;;  %17810 = vmatpush3.bf16.msra.mxu1 %v19004_v63  ;;  %17858 = vmatpush3.bf16.msra.mxu0 %v19005_v41  ;;  %v5892_v57 = vor.u32 %v5891_v7, %v5888_v14  ;;  %v5904_v52 = vshrl.u32 %v19003_v1, 16  ;;  %v5907_v41 = vshll.u32 %v19003_v1, 16  ;;  %v20447_v14 = vld [vmem:[#allocation9 + $0x378] sm:$0xff]  }
 0x1bc   : > { %v20435_v23 = vadd.f32 %v17490_v17, %v2414_v13  ;;  %v2412_v46 = vadd.f32 %v2311_v42, %v20204_v56  ;;  %17811 = vmatprep.subr.bf16.mxu1 %v19010_v19  ;;  %17859 = vmatprep.subr.bf16.mxu0 %v19011_v47  ;;  %v20443_v56 = vld [vmem:[#allocation2 + $0x90] sm:$0xff]  }
 0x1bd   : > { %v17445_v21 = vpop.f32.mrf.mxu1  ;;  %v17493_v58 = vpop.f32.mrf.mxu0  ;;  %17732 = vmatmul.mubr.bf16.gmra.mxu1 %v5325_v32  ;;  %17780 = vmatmul.mubr.bf16.gmra.mxu0 %v5875_v10  ;;  %v20445_v42 = vor.u32 %v5900_v11, %v5897_v43  ;;  %v5916_v32 = vshll.u32 %v19007_v54, 16  ;;  %v5909_v11 = vrot.slane %v5907_v41, 3 }
 0x1be   : > { %v20440_v31 = vadd.f32 %v2918_v12, %v2412_v46  ;;  %v2417_v63 = vadd.f32 %v17445_v21, %v20213_v8  ;;  %17735 = vmatprep.mubr.bf16.mxu1 %v5327_v61  ;;  %17783 = vmatprep.mubr.bf16.mxu0 %v5884_v15  ;;  %v20452_v8 = vld [vmem:[#allocation2 + $0x98] sm:$0xff]   ;;  %v20454_v12 = vld [vmem:[#allocation9 + $0x3b8] sm:$0xff]   ;;  %v23247_v61 = vrot.slane %v20388_v2, 2  ;;  %v19009_v15 = vld [vmem:[#allocation2 + $0xa0] sm:$0xff]   ;;  %v5915_v46 = vrot.slane %v5913_v3, 2 }
 0x1bf   : > { %v2324_v17 = vpop.f32.mrf.mxu1  ;;  %v2931_v13 = vpop.f32.mrf.mxu0  ;;  %17812 = vmatpush3.bf16.msra.mxu1 %v19010_v19  ;;  %17860 = vmatpush3.bf16.msra.mxu0 %v19011_v47  ;;  %v5893_v19 = vsel %vm4214_vm5, %v20415_v55, %v5892_v57  ;;  %v5906_v47 = vrot.slane %v5904_v52, 2  ;;  %v5902_v2 = vsel %vm4214_vm5, %v5892_v57, %v20445_v42  ;;  %v5925_v57 = vshll.u32 %v19009_v15, 16 }
 0x1c0   : > { %v20449_v7 = vadd.f32 %v17493_v58, %v2417_v63  ;;  %v2415_v10 = vadd.f32 %v2324_v17, %v20221_v39  ;;  %17813 = vmatprep.subr.bf16.mxu1 %v19016_v34  ;;  %17861 = vmatprep.subr.bf16.mxu0 %v19017_v24  ;;  %v5329_v54 = vsel %vm3239_vm3, %v23247_v61, %v5328_v25  ;;  %v5918_v17 = vrot.slane %v5916_v32, 3  ;;  %v19013_v61 = vld [vmem:[#allocation2 + $0xa8] sm:$0xff]  }
 0x1c1   : > { %v17446_v1 = vpop.f32.mrf.mxu1  ;;  %v17494_v22 = vpop.f32.mrf.mxu0  ;;  %v5331_v63 = vsel %vm3239_vm3, %v5328_v25, %v5330_v62  ;;  %v5922_v25 = vshrl.u32 %v19009_v15, 16  ;;  %v19015_v15 = vld [vmem:[#allocation2 + $0xb0] ss:$0 sps:$4 sm:$0x77]  }
 0x1c2   : > { %v20461_v43 = vadd.f32 %v2931_v13, %v2415_v10  ;;  %v2418_v39 = vadd.f32 %v17446_v1, %v20233_v20  ;;  %v5332_v20 = vrot.slane %v20443_v56, 2  ;;  %v5919_v10 = vor.u32 %v5918_v17, %v5915_v46  ;;  %v20490_v46 = vld [vmem:[#allocation2 + $0xa8] sm:$0xff]  }
 0x1c3   : > { %v2327_v21 = vpop.f32.mrf.mxu1  ;;  %v2934_v58 = vpop.f32.mrf.mxu0  ;;  %17814 = vmatpush3.bf16.msra.mxu1 %v19016_v34  ;;  %17862 = vmatpush3.bf16.msra.mxu0 %v19017_v24  ;;  %v5910_v24 = vor.u32 %v5909_v11, %v5906_v47  ;;  %v5931_v1 = vshrl.u32 %v19013_v61, 16 }
 0x1c4   : > { %v20469_v55 = vadd.f32 %v17494_v22, %v2418_v39  ;;  %v2416_v52 = vadd.f32 %v2327_v21, %v20239_v44  ;;  %17895 = vmatprep.subr.bf16.mxu1 %v20447_v14  ;;  %17943 = vmatprep.subr.bf16.mxu0 %v20454_v12  ;;  %v5334_v44 = vrot.slane %v20452_v8, 2  ;;  %v5934_v22 = vshll.u32 %v19013_v61, 16 }
 0x1c5   : > { %v17449_v41 = vpop.f32.mrf.mxu1  ;;  %v17497_v3 = vpop.f32.mrf.mxu0  ;;  %17736 = vmatmul.mubr.bf16.gmra.mxu1 %v5329_v54  ;;  %17784 = vmatmul.mubr.bf16.gmra.mxu0 %v5893_v19  ;;  %v19008_v19 = vld [vmem:[#allocation2 + $0xa0] sm:$0xff]   ;;  %v5333_v8 = vsel %vm3239_vm3, %v5330_v62, %v5332_v20  ;;  %v5911_v11 = vsel %vm4214_vm5, %v20445_v42, %v5910_v24  ;;  %v5920_v61 = vsel %vm4214_vm5, %v5910_v24, %v5919_v10  ;;  %v5943_v24 = vshll.u32 %v19015_v15, 16 }
 0x1c6   : > { %v20475_v13 = vadd.f32 %v2934_v58, %v2416_v52  ;;  %v2421_v34 = vadd.f32 %v17449_v41, %v20245_v50  ;;  %17739 = vmatprep.mubr.bf16.mxu1 %v5331_v63  ;;  %17787 = vmatprep.mubr.bf16.mxu0 %v5902_v2  ;;  %v5924_v52 = vrot.slane %v5922_v25, 2  ;;  %v5927_v50 = vrot.slane %v5925_v57, 3 }
 0x1c7   : > { %v2340_v56 = vpop.f32.mrf.mxu1  ;;  %v2947_v32 = vpop.f32.mrf.mxu0  ;;  %v5335_v17 = vsel %vm3239_vm3, %v5332_v20, %v5334_v44  ;;  %v5933_v41 = vrot.slane %v5931_v1, 2  ;;  %v5336_v62 = vrot.slane %v19008_v19, 2  ;;  %v5940_v20 = vshrl.u32 %v19015_v15, 16  ;;  %v20508_v15 = vld [vmem:[#allocation2 + $0x3c] sm:$0xff]  }
 0x1c8   : > { %v20479_v39 = vadd.f32 %v17497_v3, %v2421_v34  ;;  %v2419_v54 = vadd.f32 %v2340_v56, %v20251_v33  ;;  %v5936_v3 = vrot.slane %v5934_v22, 3  ;;  %v5928_v42 = vor.u32 %v5927_v50, %v5924_v52 }
 0x1c9   : > { %v17450_v21 = vpop.f32.mrf.mxu1  ;;  %v17498_v58 = vpop.f32.mrf.mxu0  ;;  %v5338_v22 = vrot.slane %v20490_v46, 2  ;;  %v5337_v50 = vsel %vm3239_vm3, %v5334_v44, %v5336_v62  ;;  %v19020_v44 = vld [vmem:[#allocation2 + $0x34] sm:$0xf8]  }
 0x1ca   : > { %v20482_v63 = vadd.f32 %v2947_v32, %v2419_v54  ;;  %v2422_v47 = vadd.f32 %v17450_v21, %v20261_v16  ;;  %v5937_v54 = vor.u32 %v5936_v3, %v5933_v41  ;;  %v23248_v21 = vld [vmem:[#allocation24_spill] sm:$0xff] }
 0x1cb   : > { %v2343_v33 = vpop.f32.mrf.mxu1  ;;  %v2950_v2 = vpop.f32.mrf.mxu0  ;;  %v5339_v3 = vsel %vm3239_vm3, %v5336_v62, %v5338_v22 }
 0x1cc   : > { %v20494_v25 = vadd.f32 %v17498_v58, %v2422_v47  ;;  %v2420_v16 = vadd.f32 %v2343_v33, %v20264_v60  ;;  %v19014_v47 = vld [vmem:[#allocation2 + $0xb0] ss:$0 sps:$4 sm:$0x33]  }
 0x1cd   : > { %v17453_v9 = vpop.f32.mrf.mxu1  ;;  %v17501_v57 = vpop.f32.mrf.mxu0  ;;  %17740 = vmatmul.mubr.bf16.gmra.mxu1 %v5333_v8  ;;  %17788 = vmatmul.mubr.bf16.gmra.mxu0 %v5911_v11  ;;  %v19018_v8 = vld [vmem:[#allocation2 + $0x30] sm:$0xf8]   ;;  %v20506_v11 = vld [vmem:[#allocation2 + $0x38] sm:$0xff]  }
 0x1ce   : > { %v20497_v34 = vadd.f32 %v2950_v2, %v2420_v16  ;;  %v2425_v56 = vadd.f32 %v17453_v9, %v20270_v28  ;;  %17743 = vmatprep.mubr.bf16.mxu1 %v5335_v17  ;;  %17791 = vmatprep.mubr.bf16.mxu0 %v5920_v61  ;;  %v5929_v28 = vsel %vm4214_vm5, %v5919_v10, %v5928_v42  ;;  %v5942_v2 = vrot.slane %v5940_v20, 2 }
 0x1cf   : > { %v2356_v32 = vpop.f32.mrf.mxu1  ;;  %v2963_v1 = vpop.f32.mrf.mxu0  ;;  %v5945_v17 = vrot.slane %v5943_v24, 3  ;;  %v5938_v16 = vsel %vm4214_vm5, %v5928_v42, %v5937_v54  ;;  %v5340_v20 = vrot.slane %v19014_v47, 2 }
 0x1d0   : > { %v20501_v60 = vadd.f32 %v17501_v57, %v2425_v56  ;;  %v2423_v58 = vadd.f32 %v2356_v32, %v23248_v21  ;;  %v6403_v21 = vrot.slane %v20506_v11, 3 }
 0x1d1   : > { %v17454_v19 = vpop.f32.mrf.mxu1  ;;  %v17502_v52 = vpop.f32.mrf.mxu0  ;;  %v5946_v62 = vor.u32 %v5945_v17, %v5942_v2  ;;  %v19023_v2 = vld [vmem:[#allocation2 + $0x44] sm:$0xff]  }
 0x1d2   : > { %v20510_v33 = vadd.f32 %v2963_v1, %v2423_v58  ;;  %v2426_v46 = vadd.f32 %v17454_v19, %v20289_v38  ;;  %v6402_v1 = vrot.slane %v19018_v8, 3  ;;  %v6889_v58 = vrot.slane %v19020_v44, 3  ;;  %v20537_v44 = vld [vmem:[#allocation2 + $0x48] sm:$0xff]  }
 0x1d3   : > { %v2359_v61 = vpop.f32.mrf.mxu1  ;;  %v2966_v41 = vpop.f32.mrf.mxu0  ;;  %v5341_v8 = vsel %vm3239_vm3, %v5338_v22, %v5340_v20  ;;  %v5947_v11 = vsel %vm4214_vm5, %v5937_v54, %v5946_v62 }
 0x1d4   : > { %v20515_v9 = vadd.f32 %v17502_v52, %v2426_v46  ;;  %v2424_v10 = vadd.f32 %v2359_v61, %v20293_v27  ;;  %v6890_v27 = vrot.slane %v20508_v15, 3 }
 0x1d5   : > { %v17457_v57 = vpop.f32.mrf.mxu1  ;;  %v17505_v56 = vpop.f32.mrf.mxu0  ;;  %17744 = vmatmul.mubr.bf16.gmra.mxu1 %v5337_v50  ;;  %17792 = vmatmul.mubr.bf16.gmra.mxu0 %v5929_v28  ;;  %v349_v50 = vld [vmem:[%s19855_s6 + $0xb4] sm:$0xf] }
 0x1d6   : > { %v20518_v32 = vadd.f32 %v2966_v41, %v2424_v10  ;;  %v2429_v38 = vadd.f32 %v17457_v57, %v20300_v35  ;;  %17747 = vmatprep.mubr.bf16.mxu1 %v5339_v3  ;;  %17795 = vmatprep.mubr.bf16.mxu0 %v5938_v16  ;;  %v19022_v35 = vld [vmem:[#allocation2 + $0x40] sm:$0xff]   ;;  %409 = vst [vmem:[#allocation2 + $0xb4] sm:$0xf] %v349_v50  ;;  %v20539_v10 = vld [vmem:[#allocation2 + $0x4c] sm:$0xff]  }
 0x1d7   : > { %v2372_v24 = vpop.f32.mrf.mxu1  ;;  %v2979_v42 = vpop.f32.mrf.mxu0  ;;  %v6404_v41 = vsel %vm4821_vm4, %v6402_v1, %v6403_v21  ;;  %v6894_v1 = vrot.slane %v20539_v10, 3  ;;  %v19028_v50 = vld [vmem:[#allocation2 + $0x50] sm:$0xff]  }
 0x1d8   : > { %v20523_v19 = vadd.f32 %v17505_v56, %v2429_v38  ;;  %v2427_v52 = vadd.f32 %v2372_v24, %v20307_v29  ;;  %v6891_v29 = vsel %vm4821_vm4, %v6889_v58, %v6890_v27  ;;  %v6405_v56 = vrot.slane %v19022_v35, 3 }
 0x1d9   : > { %v17458_v28 = vpop.f32.mrf.mxu1  ;;  %v17506_v46 = vpop.f32.mrf.mxu0  ;;  %v6892_v38 = vrot.slane %v19023_v2, 3 }
 0x1da   : > { %v20527_v61 = vadd.f32 %v2979_v42, %v2427_v52  ;;  %v2430_v47 = vadd.f32 %v17458_v28, %v20316_v6  ;;  %v6407_v42 = vrot.slane %v20537_v44, 3  ;;  %v19029_v28 = vld [vmem:[#allocation2 + $0x54] sm:$0xff]   ;;  %v6406_v35 = vsel %vm4821_vm4, %v6403_v21, %v6405_v56 }
 0x1db   : > { %v2375_v17 = vpop.f32.mrf.mxu1  ;;  %v2982_v15 = vpop.f32.mrf.mxu0  ;;  %v6896_v10 = vrot.slane %v19029_v28, 3  ;;  %v20576_v28 = vld [vmem:[#allocation2 + $0x68] sm:$0xff]  }
 0x1dc   : > { %v20534_v3 = vadd.f32 %v17506_v46, %v2430_v47  ;;  %v2428_v16 = vadd.f32 %v2375_v17, %v20320_v4  ;;  %v6893_v47 = vsel %vm4821_vm4, %v6890_v27, %v6892_v38  ;;  %v20556_v17 = vld [vmem:[#allocation2 + $0x5c] sm:$0xff]   ;;  %v6409_v27 = vrot.slane %v19028_v50, 3 }
 0x1dd   : > { %v17461_v6 = vpop.f32.mrf.mxu1  ;;  %v17509_v57 = vpop.f32.mrf.mxu0  ;;  %17748 = vmatmul.mubr.bf16.gmra.mxu1 %v5341_v8  ;;  %17796 = vmatmul.mubr.bf16.gmra.mxu0 %v5947_v11  ;;  %v19030_v8 = vld [vmem:[#allocation9 + $0x370] sm:$0xff]   ;;  %v20554_v11 = vld [vmem:[#allocation2 + $0x58] sm:$0xff]  }
 0x1de   : > { %v20541_v22 = vadd.f32 %v2982_v15, %v2428_v16  ;;  %v2433_v54 = vadd.f32 %v17461_v6, %v20323_v48  ;;  %17815 = vmatprep.mubr.bf16.mxu1 %v6404_v41  ;;  %17863 = vmatprep.mubr.bf16.mxu0 %v6891_v29  ;;  %v6408_v29 = vsel %vm4821_vm4, %v6405_v56, %v6407_v42 }
 0x1df   : > { %v2388_v20 = vpop.f32.mrf.mxu1  ;;  %v2995_v62 = vpop.f32.mrf.mxu0  ;;  %v6895_v16 = vsel %vm4821_vm4, %v6892_v38, %v6894_v1  ;;  %v6410_v50 = vsel %vm4821_vm4, %v6407_v42, %v6409_v27 }
 0x1e0   : > { %v20544_v24 = vadd.f32 %v17509_v57, %v2433_v54  ;;  %v2431_v4 = vadd.f32 %v2388_v20, %v20332_v49  ;;  %v19036_v54 = vld [vmem:[#allocation9 + $0x368] sm:$0xff]   ;;  %v6898_v20 = vrot.slane %v20556_v17, 3 }
 0x1e1   : > { %v17462_v58 = vpop.f32.mrf.mxu1  ;;  %v17510_v52 = vpop.f32.mrf.mxu0 }
 0x1e2   : > { %v20549_v46 = vadd.f32 %v2995_v62, %v2431_v4  ;;  %v2434_v48 = vadd.f32 %v17462_v58, %v20336_v37  ;;  %v19031_v37 = vld [vmem:[#allocation9 + $0x3b0] sm:$0xff]   ;;  %v19037_v4 = vld [vmem:[#allocation9 + $0x3a8] sm:$0xff]   ;;  %v6899_v42 = vsel %vm4821_vm4, %v6896_v10, %v6898_v20 }
 0x1e3   : > { %v2391_v49 = vpop.f32.mrf.mxu1  ;;  %v2998_v2 = vpop.f32.mrf.mxu0  ;;  %v20570_v62 = vld [vmem:[#allocation2 + $0x60] sm:$0xff]  }
 0x1e4   : > { %v20558_v15 = vadd.f32 %v17510_v52, %v2434_v48  ;;  %v2432_v41 = vadd.f32 %v2391_v49, %v20342_v45  ;;  %v6411_v45 = vrot.slane %v20554_v11, 3  ;;  %v20582_v49 = vld [vmem:[#allocation2 + $0x6c] sm:$0xff]  }
 0x1e5   : > { %v17529_v44 = vpop.f32.mrf.mxu1  ;;  %v17577_v21 = vpop.f32.mrf.mxu0  ;;  %17816 = vmatmul.mubr.bf16.vlgmr.msra.gmra.mxu1 %v6406_v35  ;;  %17864 = vmatmul.mubr.bf16.vlgmr.msra.gmra.mxu0 %v6893_v47  ;;  %v6897_v47 = vsel %vm4821_vm4, %v6894_v1, %v6896_v10  ;;  %v19043_v1 = vld [vmem:[#allocation9 + $0x3a0] sm:$0xff]  }
 0x1e6   : > { %v20563_v6 = vadd.f32 %v2998_v2, %v2432_v41  ;;  %v3500_v57 = vadd.f32 %v17529_v44, %v20352_v30  ;;  %17896 = vmatpush3.bf16.msra.mxu1 %v20447_v14  ;;  %17944 = vmatpush3.bf16.msra.mxu0 %v20454_v12  ;;  %v19035_v14 = vld [vmem:[#allocation2 + $0x64] sm:$0xff]   ;;  %v6412_v17 = vsel %vm4821_vm4, %v6409_v27, %v6411_v45  ;;  %v19042_v41 = vld [vmem:[#allocation9 + $0x360] sm:$0xff]  }
 0x1e7   : > { %v3371_v56 = vpop.f32.mrf.mxu1  ;;  %v3858_v38 = vpop.f32.mrf.mxu0  ;;  %17819 = vmatprep.mubr.bf16.mxu1 %v6408_v29  ;;  %17867 = vmatprep.mubr.bf16.mxu0 %v6895_v16  ;;  %v6900_v44 = vrot.slane %v19035_v14, 3  ;;  %v19040_v14 = vld [vmem:[#allocation2 + $0x70] sm:$0xff]  }
 0x1e8   : > { %v20572_v58 = vadd.f32 %v17577_v21, %v3500_v57  ;;  %v3498_v30 = vadd.f32 %v3371_v56, %v20361_v53  ;;  %17897 = vmatprep.subr.bf16.mxu1 %v19030_v8  ;;  %17945 = vmatprep.subr.bf16.mxu0 %v19031_v37  ;;  %v6902_v56 = vrot.slane %v20582_v49, 3 }
 0x1e9   : > { %v17530_v12 = vpop.f32.mrf.mxu1  ;;  %v17578_v52 = vpop.f32.mrf.mxu0 }
 0x1ea   : > { %v20578_v48 = vadd.f32 %v3858_v38, %v3498_v30  ;;  %v3501_v35 = vadd.f32 %v17530_v12, %v20369_v51  ;;  %17898 = vmatpush3.bf16.msra.mxu1 %v19030_v8  ;;  %17946 = vmatpush3.bf16.msra.mxu0 %v19031_v37  ;;  %v6413_v37 = vrot.slane %v20570_v62, 3  ;;  %v19048_v38 = vld [vmem:[#allocation9 + $0x358] sm:$0xff]   ;;  %v19041_v12 = vld [vmem:[#allocation2 + $0x74] sm:$0xff]  }
 0x1eb   : > { %v3374_v53 = vpop.f32.mrf.mxu1  ;;  %v3861_v2 = vpop.f32.mrf.mxu0  ;;  %17899 = vmatprep.subr.bf16.mxu1 %v19036_v54  ;;  %17947 = vmatprep.subr.bf16.mxu0 %v19037_v4 }
 0x1ec   : > { %v20588_v29 = vadd.f32 %v17578_v52, %v3501_v35  ;;  %v3499_v51 = vadd.f32 %v3374_v53, %v20375_v40  ;;  %v6415_v40 = vrot.slane %v20576_v28, 3  ;;  %v20600_v35 = vld [vmem:[#allocation2 + $0x78] sm:$0xff]   ;;  %v6414_v28 = vsel %vm4821_vm4, %v6411_v45, %v6413_v37 }
 0x1ed   : > { %v17533_v8 = vpop.f32.mrf.mxu1  ;;  %v17581_v16 = vpop.f32.mrf.mxu0  ;;  %17820 = vmatmul.mubr.bf16.gmra.mxu1 %v6410_v50  ;;  %17868 = vmatmul.mubr.bf16.gmra.mxu0 %v6897_v47  ;;  %v6901_v47 = vsel %vm4821_vm4, %v6898_v20, %v6900_v44 }
 0x1ee   : > { %v20592_v21 = vadd.f32 %v3861_v2, %v3499_v51  ;;  %v3504_v27 = vadd.f32 %v17533_v8, %v20385_v0  ;;  %17823 = vmatprep.mubr.bf16.mxu1 %v6412_v17  ;;  %17871 = vmatprep.mubr.bf16.mxu0 %v6899_v42  ;;  %v19049_v0 = vld [vmem:[#allocation9 + $0x398] sm:$0xff]   ;;  %v6416_v2 = vsel %vm4821_vm4, %v6413_v37, %v6415_v40  ;;  %v19054_v42 = vld [vmem:[#allocation9 + $0x350] sm:$0xff]  }
 0x1ef   : > { %v3387_v10 = vpop.f32.mrf.mxu1  ;;  %v3874_v57 = vpop.f32.mrf.mxu0  ;;  %17900 = vmatpush3.bf16.msra.mxu1 %v19036_v54  ;;  %17948 = vmatpush3.bf16.msra.mxu0 %v19037_v4  ;;  %v6903_v17 = vsel %vm4821_vm4, %v6900_v44, %v6902_v56  ;;  %v19055_v51 = vld [vmem:[#allocation9 + $0x390] sm:$0xff]  }
 0x1f0   : > { %v20597_v30 = vadd.f32 %v17581_v16, %v3504_v27  ;;  %v3502_v62 = vadd.f32 %v3387_v10, %v20393_v26  ;;  %17901 = vmatprep.subr.bf16.mxu1 %v19042_v41  ;;  %17949 = vmatprep.subr.bf16.mxu0 %v19043_v1  ;;  %v20609_v26 = vld [vmem:[#allocation2 + $0x7c] sm:$0xff]   ;;  %v6419_v27 = vrot.slane %v20600_v35, 3 }
 0x1f1   : > { %v17534_v52 = vpop.f32.mrf.mxu1  ;;  %v17582_v50 = vpop.f32.mrf.mxu0  ;;  %v20621_v10 = vld [vmem:[#allocation2 + $0x80] sm:$0xff]  }
 0x1f2   : > { %v20602_v54 = vadd.f32 %v3874_v57, %v3502_v62  ;;  %v3505_v4 = vadd.f32 %v17534_v52, %v20403_v18  ;;  %v19060_v57 = vld [vmem:[#allocation9 + $0x348] sm:$0xff]  }
 0x1f3   : > { %v3390_v49 = vpop.f32.mrf.mxu1  ;;  %v3877_v53 = vpop.f32.mrf.mxu0  ;;  %17902 = vmatpush3.bf16.msra.mxu1 %v19042_v41  ;;  %17950 = vmatpush3.bf16.msra.mxu0 %v19043_v1  ;;  %v6417_v41 = vrot.slane %v19040_v14, 3  ;;  %v6904_v1 = vrot.slane %v19041_v12, 3  ;;  %v19061_v62 = vld [vmem:[#allocation9 + $0x388] sm:$0xff]  }
 0x1f4   : > { %v20613_v8 = vadd.f32 %v17582_v50, %v3505_v4  ;;  %v3503_v18 = vadd.f32 %v3390_v49, %v20409_v36  ;;  %17903 = vmatprep.subr.bf16.mxu1 %v19048_v38  ;;  %17951 = vmatprep.subr.bf16.mxu0 %v19049_v0  ;;  %v6906_v36 = vrot.slane %v20609_v26, 3  ;;  %v19047_v50 = vld [vmem:[#allocation2 + $0x84] sm:$0xff]  }
 0x1f5   : > { %v17537_v11 = vpop.f32.mrf.mxu1  ;;  %v17585_v45 = vpop.f32.mrf.mxu0  ;;  %17824 = vmatmul.mubr.bf16.gmra.mxu1 %v6414_v28  ;;  %17872 = vmatmul.mubr.bf16.gmra.mxu0 %v6901_v47  ;;  %v20626_v4 = vld [vmem:[#allocation2 + $0x88] sm:$0xff]   ;;  %v6420_v49 = vsel %vm4821_vm4, %v6417_v41, %v6419_v27 }
 0x1f6   : > { %v20616_v20 = vadd.f32 %v3877_v53, %v3503_v18  ;;  %v3508_v16 = vadd.f32 %v17537_v11, %v20417_v59  ;;  %17827 = vmatprep.mubr.bf16.mxu1 %v6416_v2  ;;  %17875 = vmatprep.mubr.bf16.mxu0 %v6903_v17  ;;  %v20635_v53 = vld [vmem:[#allocation2 + $0x8c] sm:$0xff]   ;;  %v6421_v11 = vrot.slane %v20621_v10, 3 }
 0x1f7   : > { %v3403_v37 = vpop.f32.mrf.mxu1  ;;  %v3890_v44 = vpop.f32.mrf.mxu0  ;;  %17904 = vmatpush3.bf16.msra.mxu1 %v19048_v38  ;;  %17952 = vmatpush3.bf16.msra.mxu0 %v19049_v0  ;;  %v6418_v38 = vsel %vm4821_vm4, %v6415_v40, %v6417_v41  ;;  %v6905_v0 = vsel %vm4821_vm4, %v6902_v56, %v6904_v1  ;;  %v19066_v2 = vld [vmem:[#allocation9 + $0x340] sm:$0xff]  }
 0x1f8   : > { %v20623_v52 = vadd.f32 %v17585_v45, %v3508_v16  ;;  %v3506_v59 = vadd.f32 %v3403_v37, %v20422_v5  ;;  %17905 = vmatprep.subr.bf16.mxu1 %v19054_v42  ;;  %17953 = vmatprep.subr.bf16.mxu0 %v19055_v51  ;;  %v6907_v5 = vsel %vm4821_vm4, %v6904_v1, %v6906_v36  ;;  %v6910_v1 = vrot.slane %v20635_v53, 3  ;;  %v19052_v37 = vld [vmem:[#allocation2 + $0x90] sm:$0xff]  }
 0x1f9   : > { %v17538_v14 = vpop.f32.mrf.mxu1  ;;  %v17586_v12 = vpop.f32.mrf.mxu0 }
 0x1fa   : > { %v20628_v35 = vadd.f32 %v3890_v44, %v3506_v59  ;;  %v3509_v28 = vadd.f32 %v17538_v14, %v20435_v23  ;;  %v19067_v23 = vld [vmem:[#allocation9 + $0x380] sm:$0xff]   ;;  %v20646_v59 = vld [vmem:[#allocation9 + $0x3f8] sm:$0xff]  }
 0x1fb   : > { %v3406_v47 = vpop.f32.mrf.mxu1  ;;  %v3893_v26 = vpop.f32.mrf.mxu0  ;;  %17906 = vmatpush3.bf16.msra.mxu1 %v19054_v42  ;;  %17954 = vmatpush3.bf16.msra.mxu0 %v19055_v51  ;;  %v6908_v42 = vrot.slane %v19047_v50, 3  ;;  %v6423_v51 = vrot.slane %v20626_v4, 3  ;;  %v19053_v44 = vld [vmem:[#allocation2 + $0x94] sm:$0xff]  }
 0x1fc   : > { %v20637_v17 = vadd.f32 %v17586_v12, %v3509_v28  ;;  %v3507_v18 = vadd.f32 %v3406_v47, %v20440_v31  ;;  %17907 = vmatprep.subr.bf16.mxu1 %v19060_v57  ;;  %17955 = vmatprep.subr.bf16.mxu0 %v19061_v62  ;;  %v20653_v4 = vld [vmem:[#allocation2 + $0x98] sm:$0xff]  }
 0x1fd   : > { %v17541_v40 = vpop.f32.mrf.mxu1  ;;  %v17589_v56 = vpop.f32.mrf.mxu0  ;;  %17828 = vmatmul.mubr.bf16.gmra.mxu1 %v6418_v38  ;;  %17876 = vmatmul.mubr.bf16.gmra.mxu0 %v6905_v0  ;;  %v20660_v0 = vld [vmem:[#allocation2 + $0x9c] sm:$0xff]  }
 0x1fe   : > { %v20641_v45 = vadd.f32 %v3893_v26, %v3507_v18  ;;  %v3512_v16 = vadd.f32 %v17541_v40, %v20449_v7  ;;  %17831 = vmatprep.mubr.bf16.mxu1 %v6420_v49  ;;  %17879 = vmatprep.mubr.bf16.mxu0 %v6907_v5  ;;  %v20651_v7 = vld [vmem:[#allocation9 + $0x438] sm:$0xff]   ;;  %v6424_v26 = vsel %vm4821_vm4, %v6421_v11, %v6423_v51  ;;  %v6912_v18 = vrot.slane %v19053_v44, 3 }
 0x1ff   : > { %v3419_v41 = vpop.f32.mrf.mxu1  ;;  %v3906_v31 = vpop.f32.mrf.mxu0  ;;  %17908 = vmatpush3.bf16.msra.mxu1 %v19060_v57  ;;  %17956 = vmatpush3.bf16.msra.mxu0 %v19061_v62  ;;  %v6422_v57 = vsel %vm4821_vm4, %v6419_v27, %v6421_v11  ;;  %v6909_v62 = vsel %vm4821_vm4, %v6906_v36, %v6908_v42  ;;  %v6911_v49 = vsel %vm4821_vm4, %v6908_v42, %v6910_v1  ;;  %v6425_v36 = vrot.slane %v19052_v37, 3  ;;  %v19059_v42 = vld [vmem:[#allocation2 + $0xa4] sm:$0xff]   ;;  %v20679_v44 = vld [vmem:[#allocation2 + $0xac] sm:$0xff]  }
 0x200   : > { %v20648_v10 = vadd.f32 %v17589_v56, %v3512_v16  ;;  %v3510_v14 = vadd.f32 %v3419_v41, %v20461_v43  ;;  %17909 = vmatprep.subr.bf16.mxu1 %v19066_v2  ;;  %17957 = vmatprep.subr.bf16.mxu0 %v19067_v23  ;;  %v20677_v37 = vld [vmem:[#allocation2 + $0xa8] sm:$0xff]  }
 0x201   : > { %v17542_v12 = vpop.f32.mrf.mxu1  ;;  %v17590_v50 = vpop.f32.mrf.mxu0 }
 0x202   : > { %v20655_v28 = vadd.f32 %v3906_v31, %v3510_v14  ;;  %v3513_v38 = vadd.f32 %v17542_v12, %v20469_v55  ;;  %v19068_v12 = vld [vmem:[#allocation2 + $0x34] sm:$0xf8]  }
 0x203   : > { %v3422_v47 = vpop.f32.mrf.mxu1  ;;  %v3909_v43 = vpop.f32.mrf.mxu0  ;;  %17910 = vmatpush3.bf16.msra.mxu1 %v19066_v2  ;;  %17958 = vmatpush3.bf16.msra.mxu0 %v19067_v23  ;;  %v6427_v2 = vrot.slane %v20653_v4, 3  ;;  %v19058_v23 = vld [vmem:[#allocation2 + $0xa0] sm:$0xff]  }
 0x204   : > { %v20664_v5 = vadd.f32 %v17590_v50, %v3513_v38  ;;  %v3511_v53 = vadd.f32 %v3422_v47, %v20475_v13  ;;  %17991 = vmatprep.subr.bf16.mxu1 %v20646_v59  ;;  %18039 = vmatprep.subr.bf16.mxu0 %v20651_v7  ;;  %v6914_v13 = vrot.slane %v20660_v0, 3  ;;  %v6426_v38 = vsel %vm4821_vm4, %v6423_v51, %v6425_v36 }
 0x205   : > { %v17545_v55 = vpop.f32.mrf.mxu1  ;;  %v17593_v27 = vpop.f32.mrf.mxu0  ;;  %17832 = vmatmul.mubr.bf16.gmra.mxu1 %v6422_v57  ;;  %17880 = vmatmul.mubr.bf16.gmra.mxu0 %v6909_v62  ;;  %v6913_v57 = vsel %vm4821_vm4, %v6910_v1, %v6912_v18  ;;  %v19069_v62 = vld [vmem:[#allocation2 + $0x3c] sm:$0xff]   ;;  %v23186_v51 = vrot.slane %v20677_v37, 3 }
 0x206   : > { %v20669_v40 = vadd.f32 %v3909_v43, %v3511_v53  ;;  %v3516_v56 = vadd.f32 %v17545_v55, %v20479_v39  ;;  %17835 = vmatprep.mubr.bf16.mxu1 %v6424_v26  ;;  %17883 = vmatprep.mubr.bf16.mxu0 %v6911_v49  ;;  %v6915_v43 = vsel %vm4821_vm4, %v6912_v18, %v6914_v13  ;;  %v6429_v26 = vrot.slane %v19058_v23, 3 }
 0x207   : > { %v3435_v11 = vpop.f32.mrf.mxu1  ;;  %v3922_v16 = vpop.f32.mrf.mxu0  ;;  %v7381_v18 = vshll.u32 %v19068_v12, 16  ;;  %v7386_v23 = vshrl.u32 %v19069_v62, 16 }
 0x208   : > { %v20674_v41 = vadd.f32 %v17593_v27, %v3516_v56  ;;  %v3514_v31 = vadd.f32 %v3435_v11, %v20482_v63  ;;  %v6428_v63 = vsel %vm4821_vm4, %v6425_v36, %v6427_v2  ;;  %v7378_v56 = vshrl.u32 %v19068_v12, 16 }
 0x209   : > { %v17546_v14 = vpop.f32.mrf.mxu1  ;;  %v17594_v39 = vpop.f32.mrf.mxu0 }
 0x20a   : > { %v20681_v50 = vadd.f32 %v3922_v16, %v3514_v31  ;;  %v3517_v4 = vadd.f32 %v17546_v14, %v20494_v25  ;;  %v6916_v25 = vrot.slane %v19059_v42, 3  ;;  %v19064_v31 = vld [vmem:[#allocation2 + $0xb0] ss:$0 sps:$4 sm:$0x77]  }
 0x20b   : > { %v3438_v0 = vpop.f32.mrf.mxu1  ;;  %v3925_v47 = vpop.f32.mrf.mxu0  ;;  %v19065_v14 = vld [vmem:[#allocation2 + $0xb4] ss:$0 sps:$4 sm:$0x77]  }
 0x20c   : > { %v20688_v49 = vadd.f32 %v17594_v39, %v3517_v4  ;;  %v3515_v53 = vadd.f32 %v3438_v0, %v20497_v34  ;;  %v7389_v39 = vshll.u32 %v19069_v62, 16  ;;  %v6430_v0 = vsel %vm4821_vm4, %v6427_v2, %v6429_v26 }
 0x20d   : > { %v17549_v55 = vpop.f32.mrf.mxu1  ;;  %v17597_v27 = vpop.f32.mrf.mxu0  ;;  %17836 = vmatmul.mubr.bf16.gmra.mxu1 %v6426_v38  ;;  %17884 = vmatmul.mubr.bf16.gmra.mxu0 %v6913_v57 }
 0x20e   : > { %v20693_v11 = vadd.f32 %v3925_v47, %v3515_v53  ;;  %v3520_v36 = vadd.f32 %v17549_v55, %v20501_v60  ;;  %17839 = vmatprep.mubr.bf16.mxu1 %v6428_v63  ;;  %17887 = vmatprep.mubr.bf16.mxu0 %v6915_v43  ;;  %v6917_v47 = vsel %vm4821_vm4, %v6914_v13, %v6916_v25  ;;  %v7380_v60 = vrot.slane %v7378_v56, 3  ;;  %v19071_v63 = vld [vmem:[#allocation2 + $0x44] sm:$0xff]   ;;  %v19075_v13 = vld [vmem:[#allocation2 + $0x4c] sm:$0xff]  }
 0x20f   : > { %v3451_v16 = vpop.f32.mrf.mxu1  ;;  %v3938_v34 = vpop.f32.mrf.mxu0  ;;  %v7383_v53 = vrot.slane %v7381_v18, 4  ;;  %v7388_v55 = vrot.slane %v7386_v23, 3  ;;  %v6433_v23 = vrot.slane %v19064_v31, 3  ;;  %v19070_v31 = vld [vmem:[#allocation2 + $0x38] sm:$0xff]  }
 0x210   : > { %v20696_v4 = vadd.f32 %v17597_v27, %v3520_v36  ;;  %v3518_v42 = vadd.f32 %v3451_v16, %v20510_v33  ;;  %v6432_v33 = vsel %vm4821_vm4, %v6429_v26, %v23186_v51  ;;  %v23249_v27 = vrot.slane %v20679_v44, 3 }
 0x211   : > { %v17550_v38 = vpop.f32.mrf.mxu1  ;;  %v17598_v57 = vpop.f32.mrf.mxu0  ;;  %v7391_v36 = vrot.slane %v7389_v39, 4 }
 0x212   : > { %v20701_v43 = vadd.f32 %v3938_v34, %v3518_v42  ;;  %v3521_v12 = vadd.f32 %v17550_v38, %v20515_v9  ;;  %v6919_v2 = vsel %vm4821_vm4, %v6916_v25, %v23249_v27  ;;  %v6920_v34 = vrot.slane %v19065_v14, 3  ;;  %v19077_v14 = vld [vmem:[#allocation2 + $0x54] sm:$0xff]  }
 0x213   : > { %v3454_v1 = vpop.f32.mrf.mxu1  ;;  %v3941_v62 = vpop.f32.mrf.mxu0  ;;  %v7395_v42 = vshrl.u32 %v19071_v63, 16  ;;  %v7398_v38 = vshll.u32 %v19071_v63, 16 }
 0x214   : > { %v20710_v56 = vadd.f32 %v17598_v57, %v3521_v12  ;;  %v3519_v16 = vadd.f32 %v3454_v1, %v20518_v32  ;;  %v7384_v57 = vor.u32 %v7383_v53, %v7380_v60  ;;  %v7392_v12 = vor.u32 %v7391_v36, %v7388_v55  ;;  %v19081_v55 = vld [vmem:[#allocation2 + $0x5c] sm:$0xff]  }
 0x215   : > { %v17553_v9 = vpop.f32.mrf.mxu1  ;;  %v17601_v18 = vpop.f32.mrf.mxu0  ;;  %17840 = vmatmul.mubr.bf16.gmra.mxu1 %v6430_v0  ;;  %17888 = vmatmul.mubr.bf16.gmra.mxu0 %v6917_v47  ;;  %v7404_v32 = vshrl.u32 %v19075_v13, 16  ;;  %v7407_v1 = vshll.u32 %v19075_v13, 16  ;;  %v23252_v53 = vrot.slane %v20679_v44, 3 }
 0x216   : > { %v20713_v26 = vadd.f32 %v3941_v62, %v3519_v16  ;;  %v3524_v51 = vadd.f32 %v17553_v9, %v20523_v19  ;;  %17843 = vmatprep.mubr.bf16.mxu1 %v6432_v33  ;;  %17891 = vmatprep.mubr.bf16.mxu0 %v6919_v2  ;;  %v7397_v62 = vrot.slane %v7395_v42, 3  ;;  %v7400_v16 = vrot.slane %v7398_v38, 4 }
 0x217   : > { %v3467_v25 = vpop.f32.mrf.mxu1  ;;  %v3954_v39 = vpop.f32.mrf.mxu0  ;;  %v23251_v33 = vrot.slane %v20677_v37, 3  ;;  %v7393_v36 = vsel %vm7376_vm6, %v7384_v57, %v7392_v12  ;;  %v7406_v13 = vrot.slane %v7404_v32, 3  ;;  %v7409_v9 = vrot.slane %v7407_v1, 4 }
 0x218   : > { %23250 = vst [vmem:[#allocation23_spill] sm:$0xff] %v20713_v26  ;;  %v20716_v27 = vadd.f32 %v17601_v18, %v3524_v51  ;;  %v3522_v0 = vadd.f32 %v3467_v25, %v20527_v61  ;;  %v6921_v51 = vsel %vm4821_vm4, %v23252_v53, %v6920_v34  ;;  %v7416_v38 = vshll.u32 %v19077_v14, 16 }
 0x219   : > { %v17554_v47 = vpop.f32.mrf.mxu1  ;;  %v17602_v63 = vpop.f32.mrf.mxu0  ;;  %v6434_v60 = vsel %vm4821_vm4, %v23251_v33, %v6433_v23  ;;  %v7401_v44 = vor.u32 %v7400_v16, %v7397_v62  ;;  %v7425_v57 = vshll.u32 %v19081_v55, 16  ;;  %v19072_v33 = vld [vmem:[#allocation2 + $0x40] sm:$0xff]   ;;  %v19076_v62 = vld [vmem:[#allocation2 + $0x48] sm:$0xff]  }
 0x21a   : > { %v20719_v26 = vadd.f32 %v3954_v39, %v3522_v0  ;;  %v3525_v19 = vadd.f32 %v17554_v47, %v20534_v3  ;;  %v7413_v3 = vshrl.u32 %v19077_v14, 16  ;;  %v7422_v39 = vshrl.u32 %v19081_v55, 16  ;;  %v19083_v47 = vld [vmem:[#allocation2 + $0x64] sm:$0xff]   ;;  %v19087_v55 = vld [vmem:[#allocation2 + $0x6c] sm:$0xff]  }
 0x21b   : > { %v3470_v61 = vpop.f32.mrf.mxu1  ;;  %v3957_v2 = vpop.f32.mrf.mxu0  ;;  %v7410_v14 = vor.u32 %v7409_v9, %v7406_v13  ;;  %v7418_v53 = vrot.slane %v7416_v38, 4 }
 0x21c   : > { %v20729_v18 = vadd.f32 %v17602_v63, %v3525_v19  ;;  %v3523_v42 = vadd.f32 %v3470_v61, %v20541_v22  ;;  %v7415_v16 = vrot.slane %v7413_v3, 3  ;;  %v19080_v3 = vld [vmem:[#allocation9 + $0x430] sm:$0xff]  }
 0x21d   : > { %v17557_v37 = vpop.f32.mrf.mxu1  ;;  %v17605_v25 = vpop.f32.mrf.mxu0  ;;  %17844 = vmatmul.mubr.bf16.gmra.mxu1 %v6434_v60  ;;  %17892 = vmatmul.mubr.bf16.gmra.mxu0 %v6921_v51  ;;  %v19079_v51 = vld [vmem:[#allocation9 + $0x3f0] sm:$0xff]  }
 0x21e   : > { %v20732_v23 = vadd.f32 %v3957_v2, %v3523_v42  ;;  %v3528_v34 = vadd.f32 %v17557_v37, %v20544_v24  ;;  %17911 = vmatprep.mubr.bf16.mxu1 %v7393_v36  ;;  %17959 = vmatprep.mubr.bf16.mxu0 %v19070_v31  ;;  %v7402_v31 = vsel %vm7376_vm6, %v7392_v12, %v7401_v44  ;;  %v7424_v36 = vrot.slane %v7422_v39, 3 }
 0x21f   : > { %v3483_v32 = vpop.f32.mrf.mxu1  ;;  %v3970_v1 = vpop.f32.mrf.mxu0  ;;  %v7411_v42 = vsel %vm7376_vm6, %v7401_v44, %v7410_v14  ;;  %v7431_v37 = vshrl.u32 %v19083_v47, 16  ;;  %v7419_v39 = vor.u32 %v7418_v53, %v7415_v16 }
 0x220   : > { %v20735_v0 = vadd.f32 %v17605_v25, %v3528_v34  ;;  %v3526_v22 = vadd.f32 %v3483_v32, %v20549_v46  ;;  %v7427_v46 = vrot.slane %v7425_v57, 4  ;;  %v19085_v57 = vld [vmem:[#allocation9 + $0x3e8] sm:$0xff]  }
 0x221   : > { %v17558_v63 = vpop.f32.mrf.mxu1  ;;  %v17606_v19 = vpop.f32.mrf.mxu0 }
 0x222   : > { %v20738_v60 = vadd.f32 %v3970_v1, %v3526_v22  ;;  %v3529_v24 = vadd.f32 %v17558_v63, %v20558_v15  ;;  %v7434_v15 = vshll.u32 %v19083_v47, 16  ;;  %v19078_v1 = vld [vmem:[#allocation2 + $0x50] sm:$0xff]   ;;  %v20751_v22 = vor.u32 %v7427_v46, %v7424_v36  ;;  %v19086_v63 = vld [vmem:[#allocation9 + $0x428] sm:$0xff]  }
 0x223   : > { %v3486_v61 = vpop.f32.mrf.mxu1  ;;  %v3973_v2 = vpop.f32.mrf.mxu0  ;;  %v7443_v47 = vshll.u32 %v19087_v55, 16 }
 0x224   : > { %v20742_v13 = vadd.f32 %v17606_v19, %v3529_v24  ;;  %v3527_v9 = vadd.f32 %v3486_v61, %v20563_v6  ;;  %v7440_v6 = vshrl.u32 %v19087_v55, 16  ;;  %v7436_v24 = vrot.slane %v7434_v15, 4 }
 0x225   : > { %v17625_v25 = vpop.f32.mrf.mxu1  ;;  %v17673_v34 = vpop.f32.mrf.mxu0  ;;  %17912 = vmatmul.mubr.bf16.vlgmr.msra.gmra.mxu1 %v7402_v31  ;;  %17960 = vmatmul.mubr.bf16.vlgmr.msra.gmra.mxu0 %v19072_v33  ;;  %v19089_v31 = vld [vmem:[#allocation2 + $0x74] sm:$0xff]   ;;  %v7420_v61 = vsel %vm7376_vm6, %v7410_v14, %v7419_v39  ;;  %v7429_v46 = vsel %vm7376_vm6, %v7419_v39, %v20751_v22 }
 0x226   : > { %v20746_v12 = vadd.f32 %v3973_v2, %v3527_v9  ;;  %v4594_v38 = vadd.f32 %v17625_v25, %v20572_v58  ;;  %17992 = vmatpush3.bf16.msra.mxu1 %v20646_v59  ;;  %18040 = vmatpush3.bf16.msra.mxu0 %v20651_v7  ;;  %v19082_v59 = vld [vmem:[#allocation2 + $0x58] sm:$0xff]   ;;  %v7433_v7 = vrot.slane %v7431_v37, 3  ;;  %v7442_v55 = vrot.slane %v7440_v6, 3 }
 0x227   : > { %v4465_v32 = vpop.f32.mrf.mxu1  ;;  %v4953_v44 = vpop.f32.mrf.mxu0  ;;  %17915 = vmatprep.mubr.bf16.mxu1 %v7411_v42  ;;  %17963 = vmatprep.mubr.bf16.mxu0 %v19076_v62  ;;  %v19091_v2 = vld [vmem:[#allocation9 + $0x3e0] sm:$0xff]   ;;  %v7445_v9 = vrot.slane %v7443_v47, 4  ;;  %v19093_v42 = vld [vmem:[#allocation2 + $0x7c] sm:$0xff]  }
 0x228   : > { %v20753_v19 = vadd.f32 %v17673_v34, %v4594_v38  ;;  %v4592_v58 = vadd.f32 %v4465_v32, %v20578_v48  ;;  %17993 = vmatprep.subr.bf16.mxu1 %v19079_v51  ;;  %18041 = vmatprep.subr.bf16.mxu0 %v19080_v3  ;;  %v7437_v39 = vor.u32 %v7436_v24, %v7433_v7  ;;  %v7458_v47 = vshrl.u32 %v19093_v42, 16 }
 0x229   : > { %v17626_v33 = vpop.f32.mrf.mxu1  ;;  %v17674_v16 = vpop.f32.mrf.mxu0 }
 0x22a   : > { %v20756_v53 = vadd.f32 %v4953_v44, %v4592_v58  ;;  %v4595_v62 = vadd.f32 %v17626_v33, %v20588_v29  ;;  %17994 = vmatpush3.bf16.msra.mxu1 %v19079_v51  ;;  %18042 = vmatpush3.bf16.msra.mxu0 %v19080_v3  ;;  %v19092_v29 = vld [vmem:[#allocation9 + $0x420] sm:$0xff]   ;;  %v7449_v51 = vshrl.u32 %v19089_v31, 16  ;;  %v7452_v3 = vshll.u32 %v19089_v31, 16  ;;  %v19084_v44 = vld [vmem:[#allocation2 + $0x60] sm:$0xff]   ;;  %v19097_v33 = vld [vmem:[#allocation9 + $0x3d8] sm:$0xff]  }
 0x22b   : > { %v4468_v36 = vpop.f32.mrf.mxu1  ;;  %v4956_v48 = vpop.f32.mrf.mxu0  ;;  %17995 = vmatprep.subr.bf16.mxu1 %v19085_v57  ;;  %18043 = vmatprep.subr.bf16.mxu0 %v19086_v63  ;;  %v7461_v58 = vshll.u32 %v19093_v42, 16 }
 0x22c   : > { %v20762_v37 = vadd.f32 %v17674_v16, %v4595_v62  ;;  %v4593_v25 = vadd.f32 %v4468_v36, %v20592_v21  ;;  %v20768_v21 = vor.u32 %v7445_v9, %v7442_v55  ;;  %v19088_v62 = vld [vmem:[#allocation2 + $0x68] sm:$0xff]   ;;  %v7451_v7 = vrot.slane %v7449_v51, 3 }
 0x22d   : > { %v17629_v34 = vpop.f32.mrf.mxu1  ;;  %v17677_v14 = vpop.f32.mrf.mxu0  ;;  %17916 = vmatmul.mubr.bf16.gmra.mxu1 %v7420_v61  ;;  %17964 = vmatmul.mubr.bf16.gmra.mxu0 %v19078_v1  ;;  %v19098_v1 = vld [vmem:[#allocation9 + $0x418] sm:$0xff]   ;;  %v7454_v24 = vrot.slane %v7452_v3, 4  ;;  %v7438_v36 = vsel %vm7376_vm6, %v20751_v22, %v7437_v39  ;;  %v7460_v9 = vrot.slane %v7458_v47, 3  ;;  %v7463_v42 = vrot.slane %v7461_v58, 4 }
 0x22e   : > { %v20765_v15 = vadd.f32 %v4956_v48, %v4593_v25  ;;  %v4598_v38 = vadd.f32 %v17629_v34, %v20597_v30  ;;  %17919 = vmatprep.mubr.bf16.mxu1 %v7429_v46  ;;  %17967 = vmatprep.mubr.bf16.mxu0 %v19082_v59  ;;  %v19095_v61 = vld [vmem:[#allocation2 + $0x84] sm:$0xff]   ;;  %v19090_v47 = vld [vmem:[#allocation2 + $0x70] sm:$0xff]  }
 0x22f   : > { %v4481_v6 = vpop.f32.mrf.mxu1  ;;  %v4969_v32 = vpop.f32.mrf.mxu0  ;;  %17996 = vmatpush3.bf16.msra.mxu1 %v19085_v57  ;;  %18044 = vmatpush3.bf16.msra.mxu0 %v19086_v63  ;;  %v19099_v57 = vld [vmem:[#allocation2 + $0x8c] sm:$0xff]   ;;  %v19103_v25 = vld [vmem:[#allocation9 + $0x3d0] sm:$0xff]   ;;  %v7467_v22 = vshrl.u32 %v19095_v61, 16  ;;  %v20786_v58 = vor.u32 %v7463_v42, %v7460_v9 }
 0x230   : > { %v20770_v16 = vadd.f32 %v17677_v14, %v4598_v38  ;;  %v4596_v31 = vadd.f32 %v4481_v6, %v20602_v54  ;;  %17997 = vmatprep.subr.bf16.mxu1 %v19091_v2  ;;  %18045 = vmatprep.subr.bf16.mxu0 %v19092_v29  ;;  %v7447_v54 = vsel %vm7376_vm6, %v7437_v39, %v20768_v21  ;;  %v19104_v34 = vld [vmem:[#allocation9 + $0x410] sm:$0xff]   ;;  %v7470_v38 = vshll.u32 %v19095_v61, 16 }
 0x231   : > { %v17630_v30 = vpop.f32.mrf.mxu1  ;;  %v17678_v59 = vpop.f32.mrf.mxu0 }
 0x232   : > { %v20773_v63 = vadd.f32 %v4969_v32, %v4596_v31  ;;  %v4599_v55 = vadd.f32 %v17630_v30, %v20613_v8  ;;  %v7479_v31 = vshll.u32 %v19099_v57, 16  ;;  %v19109_v30 = vld [vmem:[#allocation9 + $0x3c8] sm:$0xff]  }
 0x233   : > { %v4484_v48 = vpop.f32.mrf.mxu1  ;;  %v4972_v46 = vpop.f32.mrf.mxu0  ;;  %17998 = vmatpush3.bf16.msra.mxu1 %v19091_v2  ;;  %18046 = vmatpush3.bf16.msra.mxu0 %v19092_v29  ;;  %v7455_v29 = vor.u32 %v7454_v24, %v7451_v7  ;;  %v7469_v7 = vrot.slane %v7467_v22, 3  ;;  %v7472_v24 = vrot.slane %v7470_v38, 4 }
 0x234   : > { %v20780_v14 = vadd.f32 %v17678_v59, %v4599_v55  ;;  %v4597_v51 = vadd.f32 %v4484_v48, %v20616_v20  ;;  %17999 = vmatprep.subr.bf16.mxu1 %v19097_v33  ;;  %18047 = vmatprep.subr.bf16.mxu0 %v19098_v1  ;;  %v7476_v20 = vshrl.u32 %v19099_v57, 16  ;;  %v19094_v55 = vld [vmem:[#allocation2 + $0x78] sm:$0xff]   ;;  %v7481_v42 = vrot.slane %v7479_v31, 4 }
 0x235   : > { %v17633_v8 = vpop.f32.mrf.mxu1  ;;  %v17681_v3 = vpop.f32.mrf.mxu0  ;;  %17920 = vmatmul.mubr.bf16.gmra.mxu1 %v7438_v36  ;;  %17968 = vmatmul.mubr.bf16.gmra.mxu0 %v19084_v44  ;;  %v19110_v44 = vld [vmem:[#allocation9 + $0x408] sm:$0xff]  }
 0x236   : > { %v20783_v6 = vadd.f32 %v4972_v46, %v4597_v51  ;;  %v4602_v2 = vadd.f32 %v17633_v8, %v20623_v52  ;;  %17923 = vmatprep.mubr.bf16.mxu1 %v7447_v54  ;;  %17971 = vmatprep.mubr.bf16.mxu0 %v19088_v62  ;;  %v19101_v36 = vld [vmem:[#allocation2 + $0x94] sm:$0xff]   ;;  %v19105_v48 = vld [vmem:[#allocation2 + $0x9c] sm:$0xff]   ;;  %v7478_v9 = vrot.slane %v7476_v20, 3  ;;  %v20804_v20 = vld [vmem:[#allocation9 + $0x478] sm:$0xff]  }
 0x237   : > { %v4497_v39 = vpop.f32.mrf.mxu1  ;;  %v4985_v32 = vpop.f32.mrf.mxu0  ;;  %18000 = vmatpush3.bf16.msra.mxu1 %v19097_v33  ;;  %18048 = vmatpush3.bf16.msra.mxu0 %v19098_v1  ;;  %v7456_v1 = vsel %vm7376_vm6, %v20768_v21, %v7455_v29  ;;  %v19115_v51 = vld [vmem:[#allocation9 + $0x3c0] sm:$0xff]   ;;  %v7485_v38 = vshrl.u32 %v19101_v36, 16 }
 0x238   : > { %v20788_v59 = vadd.f32 %v17681_v3, %v4602_v2  ;;  %v4600_v61 = vadd.f32 %v4497_v39, %v20628_v35  ;;  %18001 = vmatprep.subr.bf16.mxu1 %v19103_v25  ;;  %18049 = vmatprep.subr.bf16.mxu0 %v19104_v34  ;;  %v7465_v35 = vsel %vm7376_vm6, %v7455_v29, %v20786_v58  ;;  %v19116_v8 = vld [vmem:[#allocation9 + $0x400] sm:$0xff]   ;;  %v7488_v2 = vshll.u32 %v19101_v36, 16 }
 0x239   : > { %v17634_v52 = vpop.f32.mrf.mxu1  ;;  %v17682_v62 = vpop.f32.mrf.mxu0  ;;  %v7494_v39 = vshrl.u32 %v19105_v48, 16 }
 0x23a   : > { %v20791_v46 = vadd.f32 %v4985_v32, %v4600_v61  ;;  %v4603_v33 = vadd.f32 %v17634_v52, %v20637_v17  ;;  %v19107_v32 = vld [vmem:[#allocation2 + $0xa4] sm:$0xff]  }
 0x23b   : > { %v4500_v57 = vpop.f32.mrf.mxu1  ;;  %v4988_v54 = vpop.f32.mrf.mxu0  ;;  %18002 = vmatpush3.bf16.msra.mxu1 %v19103_v25  ;;  %18050 = vmatpush3.bf16.msra.mxu0 %v19104_v34  ;;  %v7473_v34 = vor.u32 %v7472_v24, %v7469_v7  ;;  %v19096_v52 = vld [vmem:[#allocation2 + $0x80] sm:$0xff]   ;;  %v19100_v24 = vld [vmem:[#allocation2 + $0x88] sm:$0xff]  }
 0x23c   : > { %v20798_v3 = vadd.f32 %v17682_v62, %v4603_v33  ;;  %v4601_v22 = vadd.f32 %v4500_v57, %v20641_v45  ;;  %18003 = vmatprep.subr.bf16.mxu1 %v19109_v30  ;;  %18051 = vmatprep.subr.bf16.mxu0 %v19110_v44  ;;  %v350_v45 = vld [vmem:[%s19855_s6 + $0xb8] sm:$0xff]   ;;  %v7482_v62 = vor.u32 %v7481_v42, %v7478_v9  ;;  %v7497_v33 = vshll.u32 %v19105_v48, 16  ;;  %v19111_v48 = vld [vmem:[#allocation2 + $0xac] sm:$0xff]  }
 0x23d   : > { %v17637_v17 = vpop.f32.mrf.mxu1  ;;  %v17685_v21 = vpop.f32.mrf.mxu0  ;;  %17924 = vmatmul.mubr.bf16.gmra.mxu1 %v7456_v1  ;;  %17972 = vmatmul.mubr.bf16.gmra.mxu0 %v19090_v47  ;;  %v20807_v47 = vld [vmem:[#allocation9 + $0x4b8] sm:$0xff]   ;;  %410 = vst [vmem:[#allocation2 + $0xb8] sm:$0xff] %v350_v45   ;;  %v7487_v1 = vrot.slane %v7485_v38, 3  ;;  %v7503_v38 = vshrl.u32 %v19107_v32, 16 }
 0x23e   : > { %v20801_v29 = vadd.f32 %v4988_v54, %v4601_v22  ;;  %v4606_v25 = vadd.f32 %v17637_v17, %v20648_v10  ;;  %17927 = vmatprep.mubr.bf16.mxu1 %v7465_v35  ;;  %17975 = vmatprep.mubr.bf16.mxu0 %v19094_v55  ;;  %v7483_v42 = vsel %vm7376_vm6, %v7473_v34, %v7482_v62  ;;  %v7499_v22 = vrot.slane %v7497_v33, 4  ;;  %v19102_v33 = vld [vmem:[#allocation2 + $0x90] sm:$0xff]  }
 0x23f   : > { %v4513_v31 = vpop.f32.mrf.mxu1  ;;  %v5001_v61 = vpop.f32.mrf.mxu0  ;;  %18004 = vmatpush3.bf16.msra.mxu1 %v19109_v30  ;;  %18052 = vmatpush3.bf16.msra.mxu0 %v19110_v44  ;;  %v7474_v30 = vsel %vm7376_vm6, %v20786_v58, %v7473_v34  ;;  %v7490_v44 = vrot.slane %v7488_v2, 4 }
 0x240   : > { %v20809_v36 = vadd.f32 %v17685_v21, %v4606_v25  ;;  %v4604_v10 = vadd.f32 %v4513_v31, %v20655_v28  ;;  %18005 = vmatprep.subr.bf16.mxu1 %v19115_v51  ;;  %18053 = vmatprep.subr.bf16.mxu0 %v19116_v8  ;;  %v7496_v28 = vrot.slane %v7494_v39, 3  ;;  %v7506_v25 = vshll.u32 %v19107_v32, 16 }
 0x241   : > { %v17638_v55 = vpop.f32.mrf.mxu1  ;;  %v17686_v7 = vpop.f32.mrf.mxu0  ;;  %v7515_v32 = vshll.u32 %v19111_v48, 16 }
 0x242   : > { %v20812_v57 = vadd.f32 %v5001_v61, %v4604_v10  ;;  %v4607_v54 = vadd.f32 %v17638_v55, %v20664_v5  ;;  %v7500_v45 = vor.u32 %v7499_v22, %v7496_v28  ;;  %v7505_v10 = vrot.slane %v7503_v38, 3 }
 0x243   : > { %v4516_v35 = vpop.f32.mrf.mxu1  ;;  %v5004_v9 = vpop.f32.mrf.mxu0  ;;  %18006 = vmatpush3.bf16.msra.mxu1 %v19115_v51  ;;  %18054 = vmatpush3.bf16.msra.mxu0 %v19116_v8  ;;  %v7491_v51 = vor.u32 %v7490_v44, %v7487_v1  ;;  %v7512_v8 = vshrl.u32 %v19111_v48, 16  ;;  %v7508_v55 = vrot.slane %v7506_v25, 4  ;;  %v19106_v1 = vld [vmem:[#allocation2 + $0x98] sm:$0xff]  }
 0x244   : > { %v20818_v17 = vadd.f32 %v17686_v7, %v4607_v54  ;;  %v4605_v21 = vadd.f32 %v4516_v35, %v20669_v40  ;;  %18087 = vmatprep.subr.bf16.mxu1 %v20804_v20  ;;  %18135 = vmatprep.subr.bf16.mxu0 %v20807_v47  ;;  %v19113_v54 = vld [vmem:[#allocation2 + $0xb4] ss:$0 sps:$4 sm:$0xff]  }
 0x245   : > { %v17641_v5 = vpop.f32.mrf.mxu1  ;;  %v17689_v58 = vpop.f32.mrf.mxu0  ;;  %17928 = vmatmul.mubr.bf16.gmra.mxu1 %v7474_v30  ;;  %17976 = vmatmul.mubr.bf16.gmra.mxu0 %v19096_v52  ;;  %v7514_v44 = vrot.slane %v7512_v8, 3  ;;  %v7509_v25 = vor.u32 %v7508_v55, %v7505_v10 }
 0x246   : > { %v20823_v2 = vadd.f32 %v5004_v9, %v4605_v21  ;;  %v4610_v34 = vadd.f32 %v17641_v5, %v20674_v41  ;;  %17931 = vmatprep.mubr.bf16.mxu1 %v7483_v42  ;;  %17979 = vmatprep.mubr.bf16.mxu0 %v19100_v24  ;;  %v7492_v24 = vsel %vm7376_vm6, %v7482_v62, %v7491_v51  ;;  %v7517_v42 = vrot.slane %v7515_v32, 4 }
 0x247   : > { %v4529_v39 = vpop.f32.mrf.mxu1  ;;  %v5017_v40 = vpop.f32.mrf.mxu0  ;;  %v7501_v9 = vsel %vm7376_vm6, %v7491_v51, %v7500_v45  ;;  %v7510_v55 = vsel %vm7376_vm6, %v7500_v45, %v7509_v25 }
 0x248   : > { %v20826_v31 = vadd.f32 %v17689_v58, %v4610_v34  ;;  %v4608_v61 = vadd.f32 %v4529_v39, %v20681_v50  ;;  %v19118_v50 = vld [vmem:[#allocation2 + $0x3c] sm:$0xff]   ;;  %v7524_v58 = vshll.u32 %v19113_v54, 16  ;;  %v7518_v8 = vor.u32 %v7517_v42, %v7514_v44  ;;  %v20840_v39 = vld [vmem:[#allocation2 + $0x44] sm:$0xff]  }
 0x249   : > { %v17642_v52 = vpop.f32.mrf.mxu1  ;;  %v17690_v7 = vpop.f32.mrf.mxu0  ;;  %v23253_v42 = vld [vmem:[#allocation23_spill] sm:$0xff] }
 0x24a   : > { %v20829_v30 = vadd.f32 %v5017_v40, %v4608_v61  ;;  %v4611_v41 = vadd.f32 %v17642_v52, %v20688_v49  ;;  %v7521_v49 = vshrl.u32 %v19113_v54, 16  ;;  %v8886_v40 = vshll.u32 %v19118_v50, 16  ;;  %v19108_v61 = vld [vmem:[#allocation2 + $0xa0] sm:$0xff]   ;;  %v19112_v52 = vld [vmem:[#allocation2 + $0xa8] sm:$0xff]  }
 0x24b   : > { %v4532_v35 = vpop.f32.mrf.mxu1  ;;  %v5020_v48 = vpop.f32.mrf.mxu0 }
 0x24c   : > { %v20834_v28 = vadd.f32 %v17690_v7, %v4611_v41  ;;  %v4609_v22 = vadd.f32 %v4532_v35, %v20693_v11  ;;  %v7526_v41 = vrot.slane %v7524_v58, 4  ;;  %v7519_v35 = vsel %vm7376_vm6, %v7509_v25, %v7518_v8 }
 0x24d   : > { %v17645_v21 = vpop.f32.mrf.mxu1  ;;  %v17693_v38 = vpop.f32.mrf.mxu0  ;;  %17932 = vmatmul.mubr.bf16.gmra.mxu1 %v7492_v24  ;;  %17980 = vmatmul.mubr.bf16.gmra.mxu0 %v19102_v33  ;;  %v8884_v24 = vshrl.u32 %v19118_v50, 16 }
 0x24e   : > { %v20837_v5 = vadd.f32 %v5020_v48, %v4609_v22  ;;  %v4614_v62 = vadd.f32 %v17645_v21, %v20696_v4  ;;  %17935 = vmatprep.mubr.bf16.mxu1 %v7501_v9  ;;  %17983 = vmatprep.mubr.bf16.mxu0 %v19106_v1  ;;  %v7523_v4 = vrot.slane %v7521_v49, 3  ;;  %v8888_v48 = vrot.slane %v8886_v40, 1  ;;  %v19121_v49 = vld [vmem:[#allocation2 + $0x4c] sm:$0xff]  }
 0x24f   : > { %v4545_v34 = vpop.f32.mrf.mxu1  ;;  %v5033_v51 = vpop.f32.mrf.mxu0 }
 0x250   : > { %v20842_v11 = vadd.f32 %v17693_v38, %v4614_v62  ;;  %v4612_v32 = vadd.f32 %v4545_v34, %v20701_v43  ;;  %v8891_v43 = vshll.u32 %v20840_v39, 16  ;;  %v7527_v50 = vor.u32 %v7526_v41, %v7523_v4 }
 0x251   : > { %v17646_v33 = vpop.f32.mrf.mxu1  ;;  %v17694_v10 = vpop.f32.mrf.mxu0  ;;  %v8889_v58 = vor.u32 %v8888_v48, %v8884_v24  ;;  %v8899_v41 = vshll.u32 %v19121_v49, 16  ;;  %v8903_v48 = vshrl.u32 %v19121_v49, 16 }
 0x252   : > { %v20846_v7 = vadd.f32 %v5033_v51, %v4612_v32  ;;  %v4615_v54 = vadd.f32 %v17646_v33, %v20710_v56  ;;  %v8893_v34 = vrot.slane %v8891_v43, 1  ;;  %v20860_v32 = vld [vmem:[#allocation2 + $0x54] sm:$0xff]   ;;  %v7528_v4 = vsel %vm7376_vm6, %v7518_v8, %v7527_v50 }
 0x253   : > { %v4548_v1 = vpop.f32.mrf.mxu1  ;;  %v5036_v44 = vpop.f32.mrf.mxu0  ;;  %v8907_v43 = vshll.u32 %v20860_v32, 16 }
 0x254   : > { %v20851_v9 = vadd.f32 %v17694_v10, %v4615_v54  ;;  %v4613_v22 = vadd.f32 %v4548_v1, %v23253_v42  ;;  %v19114_v10 = vld [vmem:[#allocation2 + $0xb0] sm:$0xff]   ;;  %v19117_v54 = vld [vmem:[#allocation2 + $0x3c] sm:$0xff]  }
 0x255   : > { %v17649_v45 = vpop.f32.mrf.mxu1  ;;  %v17697_v21 = vpop.f32.mrf.mxu0  ;;  %17936 = vmatmul.mubr.bf16.gmra.mxu1 %v7510_v55  ;;  %17984 = vmatmul.mubr.bf16.gmra.mxu0 %v19108_v61  ;;  %v8895_v55 = vshrl.u32 %v20840_v39, 16 }
 0x256   : > { %v20854_v38 = vadd.f32 %v5036_v44, %v4613_v22  ;;  %v4618_v56 = vadd.f32 %v17649_v45, %v20716_v27  ;;  %17939 = vmatprep.mubr.bf16.mxu1 %v7519_v35  ;;  %17987 = vmatprep.mubr.bf16.mxu0 %v19112_v52  ;;  %v8894_v44 = vsel %vm1070_vm0, %v8889_v58, %v8893_v34 }
 0x257   : > { %v4561_v25 = vpop.f32.mrf.mxu1  ;;  %v5049_v62 = vpop.f32.mrf.mxu0  ;;  %v8897_v45 = vor.u32 %v8895_v55, %v8893_v34 }
 0x258   : > { %v20857_v51 = vadd.f32 %v17697_v21, %v4618_v56  ;;  %v4616_v40 = vadd.f32 %v4561_v25, %v20719_v26  ;;  %v8901_v21 = vrot.slane %v8899_v41, 1  ;;  %v20875_v25 = vld [vmem:[#allocation2 + $0x64] sm:$0xff]  }
 0x259   : > { %v17650_v33 = vpop.f32.mrf.mxu1  ;;  %v17698_v61 = vpop.f32.mrf.mxu0  ;;  %v19129_v41 = vld [vmem:[#allocation9 + $0x4b0] sm:$0xff]  }
 0x25a   : > { %v20863_v27 = vadd.f32 %v5049_v62, %v4616_v40  ;;  %v4619_v52 = vadd.f32 %v17650_v33, %v20729_v18  ;;  %v19127_v18 = vld [vmem:[#allocation2 + $0x5c] sm:$0xff]   ;;  %v19120_v62 = vld [vmem:[#allocation2 + $0x44] sm:$0xff]   ;;  %v8905_v58 = vor.u32 %v8903_v48, %v8901_v21  ;;  %v8909_v40 = vrot.slane %v8907_v43, 1 }
 0x25b   : > { %v4564_v24 = vpop.f32.mrf.mxu1  ;;  %v5052_v1 = vpop.f32.mrf.mxu0  ;;  %v8902_v55 = vsel %vm1070_vm0, %v8897_v45, %v8901_v21  ;;  %v19135_v45 = vld [vmem:[#allocation9 + $0x4a8] sm:$0xff]  }
 0x25c   : > { %v20868_v26 = vadd.f32 %v17698_v61, %v4619_v52  ;;  %v4617_v35 = vadd.f32 %v4564_v24, %v20732_v23  ;;  %v8915_v52 = vshll.u32 %v19127_v18, 16  ;;  %v8910_v43 = vsel %vm1070_vm0, %v8905_v58, %v8909_v40  ;;  %v352_v21 = vld [vmem:[%s19855_s6 + $0xc0] sm:$0xff]  }
 0x25d   : > { %v17653_v39 = vpop.f32.mrf.mxu1  ;;  %v17701_v42 = vpop.f32.mrf.mxu0  ;;  %17940 = vmatmul.mubr.bf16.gmra.mxu1 %v7528_v4  ;;  %17988 = vmatmul.mubr.bf16.gmra.mxu0 %v19114_v10  ;;  %v19124_v10 = vld [vmem:[#allocation2 + $0x4c] sm:$0xff]   ;;  %v8911_v4 = vshrl.u32 %v20860_v32, 16  ;;  %412 = vst [vmem:[#allocation2 + $0xc0] sm:$0xff] %v352_v21   ;;  %v19139_v21 = vld [vmem:[#allocation2 + $0x7c] sm:$0xff]  }
 0x25e   : > { %v20872_v22 = vadd.f32 %v5052_v1, %v4617_v35  ;;  %v4622_v8 = vadd.f32 %v17653_v39, %v20735_v0  ;;  %18007 = vmatprep.mubr.bf16.mxu1 %v19117_v54  ;;  %18055 = vmatprep.mubr.bf16.mxu0 %v8894_v44  ;;  %v19128_v54 = vld [vmem:[#allocation9 + $0x470] sm:$0xff]   ;;  %v8919_v1 = vshrl.u32 %v19127_v18, 16  ;;  %v8923_v44 = vshll.u32 %v20875_v25, 16  ;;  %v20890_v39 = vld [vmem:[#allocation2 + $0x6c] sm:$0xff]  }
 0x25f   : > { %v4577_v56 = vpop.f32.mrf.mxu1  ;;  %v5065_v50 = vpop.f32.mrf.mxu0  ;;  %v8917_v32 = vrot.slane %v8915_v52, 1 }
 0x260   : > { %v20877_v23 = vadd.f32 %v17701_v42, %v4622_v8  ;;  %v4620_v49 = vadd.f32 %v4577_v56, %v20738_v60  ;;  %v19134_v8 = vld [vmem:[#allocation9 + $0x468] sm:$0xff]   ;;  %v8925_v58 = vrot.slane %v8923_v44, 1 }
 0x261   : > { %v17654_v33 = vpop.f32.mrf.mxu1  ;;  %v17702_v61 = vpop.f32.mrf.mxu0 }
 0x262   : > { %v20880_v0 = vadd.f32 %v5065_v50, %v4620_v49  ;;  %v4623_v34 = vadd.f32 %v17654_v33, %v20742_v13  ;;  %v20898_v33 = vld [vmem:[#allocation2 + $0x74] sm:$0xff]  }
 0x263   : > { %v4580_v24 = vpop.f32.mrf.mxu1  ;;  %v5068_v60 = vpop.f32.mrf.mxu0 }
 0x264   : > { %v20886_v35 = vadd.f32 %v17702_v61, %v4623_v34  ;;  %v4621_v48 = vadd.f32 %v4580_v24, %v20746_v12  ;;  %v8913_v12 = vor.u32 %v8911_v4, %v8909_v40  ;;  %v8927_v40 = vshrl.u32 %v20875_v25, 16 }
 0x265   : > { %v17721_v13 = vpop.f32.mrf.mxu1  ;;  %v17769_v42 = vpop.f32.mrf.mxu0  ;;  %18008 = vmatmul.mubr.bf16.vlgmr.msra.gmra.mxu1 %v19120_v62  ;;  %18056 = vmatmul.mubr.bf16.vlgmr.msra.gmra.mxu0 %v8902_v55  ;;  %v8921_v62 = vor.u32 %v8919_v1, %v8917_v32  ;;  %v8931_v34 = vshll.u32 %v20890_v39, 16  ;;  %v356_v1 = vld [vmem:[%s19855_s6 + $0xd0] sm:$0xff]  }
 0x266   : > { %v20893_v56 = vadd.f32 %v5068_v60, %v4621_v48  ;;  %v5569_v18 = vadd.f32 %v17721_v13, %v20753_v19  ;;  %18088 = vmatpush3.bf16.msra.mxu1 %v20804_v20  ;;  %18136 = vmatpush3.bf16.msra.mxu0 %v20807_v47  ;;  %v19126_v47 = vld [vmem:[#allocation2 + $0x54] sm:$0xff]   ;;  %v8918_v24 = vsel %vm1070_vm0, %v8913_v12, %v8917_v32  ;;  %v8935_v60 = vshrl.u32 %v20890_v39, 16 }
 0x267   : > { %v5440_v50 = vpop.f32.mrf.mxu1  ;;  %v6046_v49 = vpop.f32.mrf.mxu0  ;;  %18011 = vmatprep.mubr.bf16.mxu1 %v19124_v10  ;;  %18059 = vmatprep.mubr.bf16.mxu0 %v8910_v43  ;;  %v354_v10 = vld [vmem:[%s19855_s6 + $0xc8] sm:$0xff]   ;;  %v8926_v25 = vsel %vm1070_vm0, %v8921_v62, %v8925_v58  ;;  %v8939_v43 = vshll.u32 %v20898_v33, 16  ;;  %v19140_v13 = vld [vmem:[#allocation9 + $0x460] sm:$0xff]   ;;  %416 = vst [vmem:[#allocation2 + $0xd0] sm:$0xff] %v356_v1   ;;  %v8933_v39 = vrot.slane %v8931_v34, 1 }
 0x268   : > { %v20900_v61 = vadd.f32 %v17769_v42, %v5569_v18  ;;  %v5567_v52 = vadd.f32 %v5440_v50, %v20756_v53  ;;  %18089 = vmatprep.subr.bf16.mxu1 %v19128_v54  ;;  %18137 = vmatprep.subr.bf16.mxu0 %v19129_v41  ;;  %v19130_v53 = vld [vmem:[#allocation2 + $0x5c] sm:$0xff]   ;;  %414 = vst [vmem:[#allocation2 + $0xc8] sm:$0xff] %v354_v10  }
 0x269   : > { %v17722_v19 = vpop.f32.mrf.mxu1  ;;  %v17770_v20 = vpop.f32.mrf.mxu0  ;;  %v8929_v50 = vor.u32 %v8927_v40, %v8925_v58  ;;  %v358_v34 = vld [vmem:[%s19855_s6 + $0xd8] sm:$0xff]   ;;  %v19147_v58 = vld [vmem:[#allocation9 + $0x498] sm:$0xff]   ;;  %v360_v40 = vld [vmem:[%s19855_s6 + $0xe0] sm:$0xf] }
 0x26a   : > { %v20906_v55 = vadd.f32 %v6046_v49, %v5567_v52  ;;  %v5570_v4 = vadd.f32 %v17722_v19, %v20762_v37  ;;  %18090 = vmatpush3.bf16.msra.mxu1 %v19128_v54  ;;  %18138 = vmatpush3.bf16.msra.mxu0 %v19129_v41  ;;  %v19141_v41 = vld [vmem:[#allocation9 + $0x4a0] sm:$0xff]   ;;  %v20920_v49 = vld [vmem:[#allocation2 + $0x84] sm:$0xff]   ;;  %v8937_v19 = vor.u32 %v8935_v60, %v8933_v39 }
 0x26b   : > { %v5443_v44 = vpop.f32.mrf.mxu1  ;;  %v6049_v48 = vpop.f32.mrf.mxu0  ;;  %18091 = vmatprep.subr.bf16.mxu1 %v19134_v8  ;;  %18139 = vmatprep.subr.bf16.mxu0 %v19135_v45  ;;  %418 = vst [vmem:[#allocation2 + $0xd8] sm:$0xff] %v358_v34   ;;  %420 = vst [vmem:[#allocation2 + $0xe0] sm:$0xf] %v360_v40 }
 0x26c   : > { %v20914_v37 = vadd.f32 %v17770_v20, %v5570_v4  ;;  %v5568_v54 = vadd.f32 %v5443_v44, %v20765_v15  ;;  %v19132_v15 = vld [vmem:[#allocation2 + $0x64] sm:$0xff]   ;;  %v8941_v20 = vrot.slane %v8939_v43, 1 }
 0x26d   : > { %v17725_v42 = vpop.f32.mrf.mxu1  ;;  %v17773_v32 = vpop.f32.mrf.mxu0  ;;  %18012 = vmatmul.mubr.bf16.gmra.mxu1 %v19126_v47  ;;  %18060 = vmatmul.mubr.bf16.gmra.mxu0 %v8918_v24  ;;  %v19146_v47 = vld [vmem:[#allocation9 + $0x458] sm:$0xff]   ;;  %v8943_v24 = vshrl.u32 %v20898_v33, 16 }
 0x26e   : > { %v20917_v18 = vadd.f32 %v6049_v48, %v5568_v54  ;;  %v5573_v12 = vadd.f32 %v17725_v42, %v20770_v16  ;;  %18015 = vmatprep.mubr.bf16.mxu1 %v19130_v53  ;;  %18063 = vmatprep.mubr.bf16.mxu0 %v8926_v25  ;;  %v19136_v16 = vld [vmem:[#allocation2 + $0x6c] sm:$0xff]   ;;  %v8934_v48 = vsel %vm1070_vm0, %v8929_v50, %v8933_v39  ;;  %v19152_v25 = vld [vmem:[#allocation9 + $0x450] sm:$0xff]  }
 0x26f   : > { %v5456_v62 = vpop.f32.mrf.mxu1  ;;  %v6062_v52 = vpop.f32.mrf.mxu0  ;;  %18092 = vmatpush3.bf16.msra.mxu1 %v19134_v8  ;;  %18140 = vmatpush3.bf16.msra.mxu0 %v19135_v45  ;;  %v8947_v8 = vshll.u32 %v19139_v21, 16  ;;  %v8951_v45 = vshrl.u32 %v19139_v21, 16  ;;  %v8942_v54 = vsel %vm1070_vm0, %v8937_v19, %v8941_v20  ;;  %v19153_v21 = vld [vmem:[#allocation9 + $0x490] sm:$0xff]   ;;  %v8945_v39 = vor.u32 %v8943_v24, %v8941_v20  ;;  %v19158_v20 = vld [vmem:[#allocation9 + $0x448] sm:$0xff]  }
 0x270   : > { %v20923_v10 = vadd.f32 %v17773_v32, %v5573_v12  ;;  %v5571_v4 = vadd.f32 %v5456_v62, %v20773_v63  ;;  %18093 = vmatprep.subr.bf16.mxu1 %v19140_v13  ;;  %18141 = vmatprep.subr.bf16.mxu0 %v19141_v41  ;;  %v8955_v63 = vshll.u32 %v20920_v49, 16  ;;  %v19145_v62 = vld [vmem:[#allocation2 + $0x8c] sm:$0xff]   ;;  %v19159_v24 = vld [vmem:[#allocation9 + $0x488] sm:$0xff]  }
 0x271   : > { %v17726_v53 = vpop.f32.mrf.mxu1  ;;  %v17774_v1 = vpop.f32.mrf.mxu0  ;;  %v8949_v50 = vrot.slane %v8947_v8, 1  ;;  %v8963_v8 = vshll.u32 %v19145_v62, 16 }
 0x272   : > { %v20928_v60 = vadd.f32 %v6062_v52, %v5571_v4  ;;  %v5574_v44 = vadd.f32 %v17726_v53, %v20780_v14  ;;  %v20940_v4 = vld [vmem:[#allocation2 + $0x94] sm:$0xff]  }
 0x273   : > { %v5459_v33 = vpop.f32.mrf.mxu1  ;;  %v6065_v43 = vpop.f32.mrf.mxu0  ;;  %18094 = vmatpush3.bf16.msra.mxu1 %v19140_v13  ;;  %18142 = vmatpush3.bf16.msra.mxu0 %v19141_v41  ;;  %v8953_v34 = vor.u32 %v8951_v45, %v8949_v50 }
 0x274   : > { %v20934_v42 = vadd.f32 %v17774_v1, %v5574_v44  ;;  %v5572_v32 = vadd.f32 %v5459_v33, %v20783_v6  ;;  %18095 = vmatprep.subr.bf16.mxu1 %v19146_v47  ;;  %18143 = vmatprep.subr.bf16.mxu0 %v19147_v58  ;;  %v8957_v6 = vrot.slane %v8955_v63, 1  ;;  %v8950_v1 = vsel %vm1070_vm0, %v8945_v39, %v8949_v50  ;;  %v19151_v50 = vld [vmem:[#allocation2 + $0x9c] sm:$0xff]  }
 0x275   : > { %v17729_v12 = vpop.f32.mrf.mxu1  ;;  %v17777_v14 = vpop.f32.mrf.mxu0  ;;  %18016 = vmatmul.mubr.bf16.gmra.mxu1 %v19132_v15  ;;  %18064 = vmatmul.mubr.bf16.gmra.mxu0 %v8934_v48  ;;  %v8959_v44 = vshrl.u32 %v20920_v49, 16  ;;  %v8967_v48 = vshrl.u32 %v19145_v62, 16  ;;  %v8965_v49 = vrot.slane %v8963_v8, 1  ;;  %v8979_v8 = vshll.u32 %v19151_v50, 16 }
 0x276   : > { %v20937_v52 = vadd.f32 %v6065_v43, %v5572_v32  ;;  %v5577_v19 = vadd.f32 %v17729_v12, %v20788_v59  ;;  %18019 = vmatprep.mubr.bf16.mxu1 %v19136_v16  ;;  %18067 = vmatprep.mubr.bf16.mxu0 %v8942_v54  ;;  %v19138_v16 = vld [vmem:[#allocation2 + $0x74] sm:$0xff]   ;;  %v8958_v33 = vsel %vm1070_vm0, %v8953_v34, %v8957_v6  ;;  %v8971_v43 = vshll.u32 %v20940_v4, 16 }
 0x277   : > { %v5472_v13 = vpop.f32.mrf.mxu1  ;;  %v6078_v41 = vpop.f32.mrf.mxu0  ;;  %18096 = vmatpush3.bf16.msra.mxu1 %v19146_v47  ;;  %18144 = vmatpush3.bf16.msra.mxu0 %v19147_v58  ;;  %v19142_v58 = vld [vmem:[#allocation2 + $0x7c] sm:$0xff]   ;;  %v19164_v54 = vld [vmem:[#allocation9 + $0x440] sm:$0xff]  }
 0x278   : > { %v20942_v40 = vadd.f32 %v17777_v14, %v5577_v19  ;;  %v5575_v15 = vadd.f32 %v5472_v13, %v20791_v46  ;;  %18097 = vmatprep.subr.bf16.mxu1 %v19152_v25  ;;  %18145 = vmatprep.subr.bf16.mxu0 %v19153_v21  ;;  %v8973_v34 = vrot.slane %v8971_v43, 1 }
 0x279   : > { %v17730_v53 = vpop.f32.mrf.mxu1  ;;  %v17778_v59 = vpop.f32.mrf.mxu0 }
 0x27a   : > { %v20946_v45 = vadd.f32 %v6078_v41, %v5575_v15  ;;  %v5578_v47 = vadd.f32 %v17730_v53, %v20798_v3  ;;  %v19165_v3 = vld [vmem:[#allocation9 + $0x480] sm:$0xff]   ;;  %v8969_v41 = vor.u32 %v8967_v48, %v8965_v49  ;;  %v20960_v15 = vld [vmem:[#allocation9 + $0x4f8] sm:$0xff]  }
 0x27b   : > { %v5475_v63 = vpop.f32.mrf.mxu1  ;;  %v6081_v46 = vpop.f32.mrf.mxu0  ;;  %18098 = vmatpush3.bf16.msra.mxu1 %v19152_v25  ;;  %18146 = vmatpush3.bf16.msra.mxu0 %v19153_v21  ;;  %v8961_v25 = vor.u32 %v8959_v44, %v8957_v6  ;;  %v20958_v21 = vld [vmem:[#allocation2 + $0xa4] sm:$0xff]   ;;  %v8975_v44 = vshrl.u32 %v20940_v4, 16  ;;  %v8981_v4 = vrot.slane %v8979_v8, 1 }
 0x27c   : > { %v20952_v32 = vadd.f32 %v17778_v59, %v5578_v47  ;;  %v5576_v12 = vadd.f32 %v5475_v63, %v20801_v29  ;;  %18099 = vmatprep.subr.bf16.mxu1 %v19158_v20  ;;  %18147 = vmatprep.subr.bf16.mxu0 %v19159_v24 }
 0x27d   : > { %v17733_v14 = vpop.f32.mrf.mxu1  ;;  %v17781_v39 = vpop.f32.mrf.mxu0  ;;  %18020 = vmatmul.mubr.bf16.gmra.mxu1 %v19138_v16  ;;  %18068 = vmatmul.mubr.bf16.gmra.mxu0 %v8950_v1  ;;  %v19144_v1 = vld [vmem:[#allocation2 + $0x84] sm:$0xff]  }
 0x27e   : > { %v20955_v62 = vadd.f32 %v6081_v46, %v5576_v12  ;;  %v5581_v19 = vadd.f32 %v17733_v14, %v20809_v36  ;;  %18023 = vmatprep.mubr.bf16.mxu1 %v19142_v58  ;;  %18071 = vmatprep.mubr.bf16.mxu0 %v8958_v33  ;;  %v20965_v36 = vld [vmem:[#allocation9 + $0x538] sm:$0xff]   ;;  %v8983_v46 = vshrl.u32 %v19151_v50, 16  ;;  %v8987_v33 = vshll.u32 %v20958_v21, 16 }
 0x27f   : > { %v5488_v13 = vpop.f32.mrf.mxu1  ;;  %v6094_v29 = vpop.f32.mrf.mxu0  ;;  %18100 = vmatpush3.bf16.msra.mxu1 %v19158_v20  ;;  %18148 = vmatpush3.bf16.msra.mxu0 %v19159_v24  ;;  %v8966_v20 = vsel %vm1070_vm0, %v8961_v25, %v8965_v49  ;;  %v19148_v24 = vld [vmem:[#allocation2 + $0x8c] sm:$0xff]  }
 0x280   : > { %v20962_v53 = vadd.f32 %v17781_v39, %v5581_v19  ;;  %v5579_v59 = vadd.f32 %v5488_v13, %v20812_v57  ;;  %18101 = vmatprep.subr.bf16.mxu1 %v19164_v54  ;;  %18149 = vmatprep.subr.bf16.mxu0 %v19165_v3  ;;  %v8974_v57 = vsel %vm1070_vm0, %v8969_v41, %v8973_v34  ;;  %v19157_v39 = vld [vmem:[#allocation2 + $0xac] sm:$0xff]   ;;  %v8989_v25 = vrot.slane %v8987_v33, 1  ;;  %v19161_v13 = vld [vmem:[#allocation2 + $0xb4] sm:$0xff]   ;;  %v19163_v33 = vld [vmem:[#allocation2 + $0xbc] ss:$0 sps:$4 sm:$0x11]  }
 0x281   : > { %v17734_v16 = vpop.f32.mrf.mxu1  ;;  %v17782_v6 = vpop.f32.mrf.mxu0  ;;  %v8995_v8 = vshll.u32 %v19157_v39, 16 }
 0x282   : > { %v20967_v47 = vadd.f32 %v6094_v29, %v5579_v59  ;;  %v5582_v58 = vadd.f32 %v17734_v16, %v20818_v17 }
 0x283   : > { %v5491_v48 = vpop.f32.mrf.mxu1  ;;  %v6097_v63 = vpop.f32.mrf.mxu0  ;;  %18102 = vmatpush3.bf16.msra.mxu1 %v19164_v54  ;;  %18150 = vmatpush3.bf16.msra.mxu0 %v19165_v3  ;;  %v8977_v54 = vor.u32 %v8975_v44, %v8973_v34 }
 0x284   : > { %v20974_v43 = vadd.f32 %v17782_v6, %v5582_v58  ;;  %v5580_v12 = vadd.f32 %v5491_v48, %v20823_v2  ;;  %18183 = vmatprep.subr.bf16.mxu1 %v20960_v15  ;;  %18231 = vmatprep.subr.bf16.mxu0 %v20965_v36  ;;  %v8985_v2 = vor.u32 %v8983_v46, %v8981_v4  ;;  %v19150_v6 = vld [vmem:[#allocation2 + $0x94] sm:$0xff]  }
 0x285   : > { %v17737_v17 = vpop.f32.mrf.mxu1  ;;  %v17785_v14 = vpop.f32.mrf.mxu0  ;;  %18024 = vmatmul.mubr.bf16.gmra.mxu1 %v19144_v1  ;;  %18072 = vmatmul.mubr.bf16.gmra.mxu0 %v8966_v20  ;;  %v8991_v1 = vshrl.u32 %v20958_v21, 16  ;;  %v8982_v34 = vsel %vm1070_vm0, %v8977_v54, %v8981_v4  ;;  %v19154_v20 = vld [vmem:[#allocation2 + $0x9c] sm:$0xff]   ;;  %v19156_v54 = vld [vmem:[#allocation2 + $0xa4] sm:$0xff]  }
 0x286   : > { %v20979_v49 = vadd.f32 %v6097_v63, %v5580_v12  ;;  %v5585_v50 = vadd.f32 %v17737_v17, %v20826_v31  ;;  %18027 = vmatprep.mubr.bf16.mxu1 %v19148_v24  ;;  %18075 = vmatprep.mubr.bf16.mxu0 %v8974_v57  ;;  %v8990_v48 = vsel %vm1070_vm0, %v8985_v2, %v8989_v25  ;;  %v8999_v63 = vshrl.u32 %v19157_v39, 16 }
 0x287   : > { %v5504_v3 = vpop.f32.mrf.mxu1  ;;  %v6110_v19 = vpop.f32.mrf.mxu0  ;;  %v9003_v57 = vshll.u32 %v19161_v13, 16  ;;  %v8993_v17 = vor.u32 %v8991_v1, %v8989_v25 }
 0x288   : > { %v20982_v29 = vadd.f32 %v17785_v14, %v5585_v50  ;;  %v5583_v41 = vadd.f32 %v5504_v3, %v20829_v30 }
 0x289   : > { %v17738_v59 = vpop.f32.mrf.mxu1  ;;  %v17786_v16 = vpop.f32.mrf.mxu0 }
 0x28a   : > { %v20986_v58 = vadd.f32 %v6110_v19, %v5583_v41  ;;  %v5586_v31 = vadd.f32 %v17738_v59, %v20834_v28  ;;  %v8997_v28 = vrot.slane %v8995_v8, 1  ;;  %v9005_v19 = vrot.slane %v9003_v57, 1  ;;  %v19160_v41 = vld [vmem:[#allocation2 + $0xac] sm:$0xff]  }
 0x28b   : > { %v5507_v24 = vpop.f32.mrf.mxu1  ;;  %v6113_v44 = vpop.f32.mrf.mxu0  ;;  %v9007_v8 = vshrl.u32 %v19161_v13, 16 }
 0x28c   : > { %v20991_v30 = vadd.f32 %v17786_v16, %v5586_v31  ;;  %v5584_v46 = vadd.f32 %v5507_v24, %v20837_v5  ;;  %v9001_v3 = vor.u32 %v8999_v63, %v8997_v28  ;;  %v8998_v25 = vsel %vm1070_vm0, %v8993_v17, %v8997_v28 }
 0x28d   : > { %v17741_v21 = vpop.f32.mrf.mxu1  ;;  %v17789_v12 = vpop.f32.mrf.mxu0  ;;  %18028 = vmatmul.mubr.bf16.gmra.mxu1 %v19150_v6  ;;  %18076 = vmatmul.mubr.bf16.gmra.mxu0 %v8982_v34  ;;  %v19166_v6 = vld [vmem:[#allocation2 + $0x3c] sm:$0xfe]   ;;  %v9011_v31 = vshll.u32 %v19163_v33, 16 }
 0x28e   : > { %v20994_v14 = vadd.f32 %v6113_v44, %v5584_v46  ;;  %v5589_v4 = vadd.f32 %v17741_v21, %v20842_v11  ;;  %18031 = vmatprep.mubr.bf16.mxu1 %v19154_v20  ;;  %18079 = vmatprep.mubr.bf16.mxu0 %v8990_v48  ;;  %v9006_v24 = vsel %vm1070_vm0, %v9001_v3, %v9005_v19  ;;  %v19167_v44 = vld [vmem:[#allocation2 + $0x44] sm:$0xff]   ;;  %v9469_v17 = vrot.slane %v19166_v6, 1  ;;  %v19162_v3 = vld [vmem:[#allocation2 + $0xb4] sm:$0xff]  }
 0x28f   : > { %v5520_v50 = vpop.f32.mrf.mxu1  ;;  %v6126_v39 = vpop.f32.mrf.mxu0  ;;  %v9013_v13 = vrot.slane %v9011_v31, 1  ;;  %v9470_v28 = vrot.slane %v19167_v44, 1  ;;  %v21019_v6 = vld [vmem:[#allocation2 + $0x54] sm:$0xff]  }
 0x290   : > { %v20997_v2 = vadd.f32 %v17789_v12, %v5589_v4  ;;  %v5587_v5 = vadd.f32 %v5520_v50, %v20846_v7  ;;  %v19168_v50 = vld [vmem:[#allocation2 + $0x64] sm:$0xff]  }
 0x291   : > { %v17742_v59 = vpop.f32.mrf.mxu1  ;;  %v17790_v16 = vpop.f32.mrf.mxu0 }
 0x292   : > { %v21001_v1 = vadd.f32 %v6126_v39, %v5587_v5  ;;  %v5590_v11 = vadd.f32 %v17742_v59, %v20851_v9  ;;  %v9009_v9 = vor.u32 %v9007_v8, %v9005_v19  ;;  %v19169_v19 = vld [vmem:[#allocation2 + $0x4c] sm:$0xff]  }
 0x293   : > { %v5523_v34 = vpop.f32.mrf.mxu1  ;;  %v6129_v20 = vpop.f32.mrf.mxu0 }
 0x294   : > { %v21005_v48 = vadd.f32 %v17790_v16, %v5590_v11  ;;  %v5588_v7 = vadd.f32 %v5523_v34, %v20854_v38 }
 0x295   : > { %v17745_v63 = vpop.f32.mrf.mxu1  ;;  %v17793_v57 = vpop.f32.mrf.mxu0  ;;  %18032 = vmatmul.mubr.bf16.gmra.mxu1 %v19156_v54  ;;  %18080 = vmatmul.mubr.bf16.gmra.mxu0 %v8998_v25  ;;  %v9471_v25 = vsel %vm1657_vm1, %v9469_v17, %v9470_v28 }
 0x296   : > { %v21008_v46 = vadd.f32 %v6129_v20, %v5588_v7  ;;  %v5593_v21 = vadd.f32 %v17745_v63, %v20857_v51  ;;  %18035 = vmatprep.mubr.bf16.mxu1 %v19160_v41  ;;  %18083 = vmatprep.mubr.bf16.mxu0 %v9006_v24  ;;  %v9014_v41 = vsel %vm1070_vm0, %v9009_v9, %v9013_v13  ;;  %v9472_v20 = vrot.slane %v19169_v19, 1  ;;  %v19170_v7 = vld [vmem:[#allocation2 + $0x6c] sm:$0xff]   ;;  %v19174_v13 = vld [vmem:[#allocation2 + $0x74] sm:$0xff]  }
 0x297   : > { %v5536_v33 = vpop.f32.mrf.mxu1  ;;  %v6142_v12 = vpop.f32.mrf.mxu0  ;;  %v9474_v63 = vrot.slane %v21019_v6, 1  ;;  %v361_v6 = vld [vmem:[%s19855_s6 + $0xe4] sm:$0xf] }
 0x298   : > { %v21011_v4 = vadd.f32 %v17793_v57, %v5593_v21  ;;  %v5591_v38 = vadd.f32 %v5536_v33, %v20863_v27  ;;  %v19175_v33 = vld [vmem:[#allocation2 + $0x5c] sm:$0xff]   ;;  %v9473_v17 = vsel %vm1657_vm1, %v9470_v28, %v9472_v20  ;;  %421 = vst [vmem:[#allocation2 + $0xe4] sm:$0xf] %v361_v6 }
 0x299   : > { %v17746_v39 = vpop.f32.mrf.mxu1  ;;  %v17794_v54 = vpop.f32.mrf.mxu0 }
 0x29a   : > { %v21014_v5 = vadd.f32 %v6142_v12, %v5591_v38  ;;  %v5594_v51 = vadd.f32 %v17746_v39, %v20868_v26  ;;  %v19177_v38 = vld [vmem:[#allocation9 + $0x4f0] sm:$0xff]  }
 0x29b   : > { %v5539_v59 = vpop.f32.mrf.mxu1  ;;  %v6145_v16 = vpop.f32.mrf.mxu0 }
 0x29c   : > { %v21021_v11 = vadd.f32 %v17794_v54, %v5594_v51  ;;  %v5592_v27 = vadd.f32 %v5539_v59, %v20872_v22  ;;  %v19178_v54 = vld [vmem:[#allocation9 + $0x530] sm:$0xff]  }
 0x29d   : > { %v17749_v8 = vpop.f32.mrf.mxu1  ;;  %v17797_v31 = vpop.f32.mrf.mxu0  ;;  %18036 = vmatmul.mubr.bf16.gmra.mxu1 %v19162_v3  ;;  %18084 = vmatmul.mubr.bf16.gmra.mxu0 %v9014_v41  ;;  %v21035_v3 = vld [vmem:[#allocation2 + $0x64] sm:$0xff]   ;;  %v9475_v41 = vsel %vm1657_vm1, %v9472_v20, %v9474_v63 }
 0x29e   : > { %v21024_v34 = vadd.f32 %v6145_v16, %v5592_v27  ;;  %v5597_v26 = vadd.f32 %v17749_v8, %v20877_v23  ;;  %18103 = vmatprep.mubr.bf16.mxu1 %v9471_v25  ;;  %18151 = vmatprep.mubr.bf16.mxu0 %v19168_v50  ;;  %v9476_v16 = vrot.slane %v19175_v33, 1  ;;  %v19183_v25 = vld [vmem:[#allocation9 + $0x4e8] sm:$0xff]  }
 0x29f   : > { %v5552_v24 = vpop.f32.mrf.mxu1  ;;  %v6158_v44 = vpop.f32.mrf.mxu0 }
 0x2a0   : > { %v21028_v57 = vadd.f32 %v17797_v31, %v5597_v26  ;;  %v5595_v22 = vadd.f32 %v5552_v24, %v20880_v0  ;;  %v9478_v31 = vrot.slane %v21035_v3, 1  ;;  %v19184_v26 = vld [vmem:[#allocation9 + $0x528] sm:$0xff]  }
 0x2a1   : > { %v17750_v21 = vpop.f32.mrf.mxu1  ;;  %v17798_v9 = vpop.f32.mrf.mxu0 }
 0x2a2   : > { %v21031_v12 = vadd.f32 %v6158_v44, %v5595_v22  ;;  %v5598_v23 = vadd.f32 %v17750_v21, %v20886_v35  ;;  %v19181_v44 = vld [vmem:[#allocation2 + $0x6c] sm:$0xff]   ;;  %v9477_v21 = vsel %vm1657_vm1, %v9474_v63, %v9476_v16 }
 0x2a3   : > { %v5555_v50 = vpop.f32.mrf.mxu1  ;;  %v6161_v39 = vpop.f32.mrf.mxu0 }
 0x2a4   : > { %v21037_v51 = vadd.f32 %v17798_v9, %v5598_v23  ;;  %v5596_v0 = vadd.f32 %v5555_v50, %v20893_v56  ;;  %v19176_v56 = vld [vmem:[#allocation2 + $0x7c] sm:$0xff]   ;;  %v21055_v9 = vld [vmem:[#allocation2 + $0x74] sm:$0xff]  }
 0x2a5   : > { %v17817_v19 = vpop.f32.mrf.mxu1  ;;  %v17865_v59 = vpop.f32.mrf.mxu0  ;;  %18104 = vmatmul.mubr.bf16.vlgmr.msra.gmra.mxu1 %v9473_v17  ;;  %18152 = vmatmul.mubr.bf16.vlgmr.msra.gmra.mxu0 %v19170_v7  ;;  %v19189_v23 = vld [vmem:[#allocation9 + $0x4e0] sm:$0xff]  }
 0x2a6   : > { %v21041_v35 = vadd.f32 %v6161_v39, %v5596_v0  ;;  %v6662_v28 = vadd.f32 %v17817_v19, %v20900_v61  ;;  %18184 = vmatpush3.bf16.msra.mxu1 %v20960_v15  ;;  %18232 = vmatpush3.bf16.msra.mxu0 %v20965_v36  ;;  %v19180_v15 = vld [vmem:[#allocation2 + $0x84] sm:$0xff]   ;;  %v19190_v39 = vld [vmem:[#allocation9 + $0x520] sm:$0xff]   ;;  %v9482_v19 = vrot.slane %v21055_v9, 1 }
 0x2a7   : > { %v6533_v27 = vpop.f32.mrf.mxu1  ;;  %v7020_v8 = vpop.f32.mrf.mxu0  ;;  %18107 = vmatprep.mubr.bf16.mxu1 %v9475_v41  ;;  %18155 = vmatprep.mubr.bf16.mxu0 %v19174_v13  ;;  %v19202_v9 = vld [vmem:[#allocation9 + $0x510] sm:$0xff]  }
 0x2a8   : > { %v21048_v20 = vadd.f32 %v17865_v59, %v6662_v28  ;;  %v6660_v61 = vadd.f32 %v6533_v27, %v20906_v55  ;;  %18185 = vmatprep.subr.bf16.mxu1 %v19177_v38  ;;  %18233 = vmatprep.subr.bf16.mxu0 %v19178_v54  ;;  %v9479_v55 = vsel %vm1657_vm1, %v9476_v16, %v9478_v31  ;;  %v19195_v59 = vld [vmem:[#allocation9 + $0x4d8] sm:$0xff]  }
 0x2a9   : > { %v17818_v36 = vpop.f32.mrf.mxu1  ;;  %v17866_v24 = vpop.f32.mrf.mxu0  ;;  %v19196_v16 = vld [vmem:[#allocation9 + $0x518] sm:$0xff]  }
 0x2aa   : > { %v21051_v7 = vadd.f32 %v7020_v8, %v6660_v61  ;;  %v6663_v22 = vadd.f32 %v17818_v36, %v20914_v37  ;;  %18186 = vmatpush3.bf16.msra.mxu1 %v19177_v38  ;;  %18234 = vmatpush3.bf16.msra.mxu0 %v19178_v54  ;;  %v9480_v54 = vrot.slane %v19181_v44, 1  ;;  %v19186_v8 = vld [vmem:[#allocation2 + $0x94] sm:$0xff]   ;;  %v19201_v44 = vld [vmem:[#allocation9 + $0x4d0] sm:$0xff]  }
 0x2ab   : > { %v6536_v13 = vpop.f32.mrf.mxu1  ;;  %v7023_v33 = vpop.f32.mrf.mxu0  ;;  %18187 = vmatprep.subr.bf16.mxu1 %v19183_v25  ;;  %18235 = vmatprep.subr.bf16.mxu0 %v19184_v26 }
 0x2ac   : > { %v21058_v17 = vadd.f32 %v17866_v24, %v6663_v22  ;;  %v6661_v50 = vadd.f32 %v6536_v13, %v20917_v18 }
 0x2ad   : > { %v17821_v3 = vpop.f32.mrf.mxu1  ;;  %v17869_v37 = vpop.f32.mrf.mxu0  ;;  %18108 = vmatmul.mubr.bf16.gmra.mxu1 %v9477_v21  ;;  %18156 = vmatmul.mubr.bf16.gmra.mxu0 %v19176_v56 }
 0x2ae   : > { %v21061_v63 = vadd.f32 %v7023_v33, %v6661_v50  ;;  %v6666_v38 = vadd.f32 %v17821_v3, %v20923_v10  ;;  %18111 = vmatprep.mubr.bf16.mxu1 %v9479_v55  ;;  %18159 = vmatprep.mubr.bf16.mxu0 %v19180_v15  ;;  %v19182_v10 = vld [vmem:[#allocation2 + $0x8c] sm:$0xff]   ;;  %v21072_v15 = vld [vmem:[#allocation2 + $0x84] sm:$0xff]  }
 0x2af   : > { %v6549_v0 = vpop.f32.mrf.mxu1  ;;  %v7036_v41 = vpop.f32.mrf.mxu0  ;;  %18188 = vmatpush3.bf16.msra.mxu1 %v19183_v25  ;;  %18236 = vmatpush3.bf16.msra.mxu0 %v19184_v26  ;;  %v9481_v25 = vsel %vm1657_vm1, %v9478_v31, %v9480_v54  ;;  %v19187_v26 = vld [vmem:[#allocation2 + $0x7c] sm:$0xff]   ;;  %v9486_v3 = vrot.slane %v21072_v15, 1  ;;  %v19214_v15 = vld [vmem:[#allocation9 + $0x500] sm:$0xff]  }
 0x2b0   : > { %v21065_v18 = vadd.f32 %v17869_v37, %v6666_v38  ;;  %v6664_v28 = vadd.f32 %v6549_v0, %v20928_v60  ;;  %18189 = vmatprep.subr.bf16.mxu1 %v19189_v23  ;;  %18237 = vmatprep.subr.bf16.mxu0 %v19190_v39  ;;  %v9483_v60 = vsel %vm1657_vm1, %v9480_v54, %v9482_v19  ;;  %v9484_v55 = vrot.slane %v19187_v26, 1  ;;  %v19208_v54 = vld [vmem:[#allocation9 + $0x508] sm:$0xff]  }
 0x2b1   : > { %v17822_v6 = vpop.f32.mrf.mxu1  ;;  %v17870_v27 = vpop.f32.mrf.mxu0 }
 0x2b2   : > { %v21068_v56 = vadd.f32 %v7036_v41, %v6664_v28  ;;  %v6667_v61 = vadd.f32 %v17822_v6, %v20934_v42  ;;  %v19192_v41 = vld [vmem:[#allocation2 + $0xa4] sm:$0xff]  }
 0x2b3   : > { %v6552_v36 = vpop.f32.mrf.mxu1  ;;  %v7039_v24 = vpop.f32.mrf.mxu0  ;;  %18190 = vmatpush3.bf16.msra.mxu1 %v19189_v23  ;;  %18238 = vmatpush3.bf16.msra.mxu0 %v19190_v39  ;;  %v19188_v39 = vld [vmem:[#allocation2 + $0x9c] sm:$0xff]  }
 0x2b4   : > { %v21075_v22 = vadd.f32 %v17870_v27, %v6667_v61  ;;  %v6665_v21 = vadd.f32 %v6552_v36, %v20937_v52  ;;  %18191 = vmatprep.subr.bf16.mxu1 %v19195_v59  ;;  %18239 = vmatprep.subr.bf16.mxu0 %v19196_v16  ;;  %v19207_v52 = vld [vmem:[#allocation9 + $0x4c8] sm:$0xff]   ;;  %v9485_v27 = vsel %vm1657_vm1, %v9482_v19, %v9484_v55 }
 0x2b5   : > { %v17825_v42 = vpop.f32.mrf.mxu1  ;;  %v17873_v13 = vpop.f32.mrf.mxu0  ;;  %18112 = vmatmul.mubr.bf16.gmra.mxu1 %v9481_v25  ;;  %18160 = vmatmul.mubr.bf16.gmra.mxu0 %v19182_v10  ;;  %v19193_v10 = vld [vmem:[#allocation2 + $0x8c] sm:$0xff]   ;;  %v9487_v61 = vsel %vm1657_vm1, %v9484_v55, %v9486_v3 }
 0x2b6   : > { %v21078_v31 = vadd.f32 %v7039_v24, %v6665_v21  ;;  %v6670_v33 = vadd.f32 %v17825_v42, %v20942_v40  ;;  %18115 = vmatprep.mubr.bf16.mxu1 %v9483_v60  ;;  %18163 = vmatprep.mubr.bf16.mxu0 %v19186_v8  ;;  %v9488_v60 = vrot.slane %v19193_v10, 1 }
 0x2b7   : > { %v6565_v23 = vpop.f32.mrf.mxu1  ;;  %v7052_v50 = vpop.f32.mrf.mxu0  ;;  %18192 = vmatpush3.bf16.msra.mxu1 %v19195_v59  ;;  %18240 = vmatpush3.bf16.msra.mxu0 %v19196_v16  ;;  %v21089_v59 = vld [vmem:[#allocation2 + $0x94] sm:$0xff]  }
 0x2b8   : > { %v21082_v37 = vadd.f32 %v17873_v13, %v6670_v33  ;;  %v6668_v38 = vadd.f32 %v6565_v23, %v20946_v45  ;;  %18193 = vmatprep.subr.bf16.mxu1 %v19201_v44  ;;  %18241 = vmatprep.subr.bf16.mxu0 %v19202_v9  ;;  %v19213_v45 = vld [vmem:[#allocation9 + $0x4c0] sm:$0xff]   ;;  %v21104_v33 = vld [vmem:[#allocation9 + $0x5b8] sm:$0xff]  }
 0x2b9   : > { %v17826_v0 = vpop.f32.mrf.mxu1  ;;  %v17874_v40 = vpop.f32.mrf.mxu0  ;;  %v19194_v23 = vld [vmem:[#allocation2 + $0xac] sm:$0xff]  }
 0x2ba   : > { %v21085_v28 = vadd.f32 %v7052_v50, %v6668_v38  ;;  %v6671_v6 = vadd.f32 %v17826_v0, %v20952_v32  ;;  %v19198_v50 = vld [vmem:[#allocation2 + $0xb4] sm:$0xff]  }
 0x2bb   : > { %v6568_v16 = vpop.f32.mrf.mxu1  ;;  %v7055_v8 = vpop.f32.mrf.mxu0  ;;  %18194 = vmatpush3.bf16.msra.mxu1 %v19201_v44  ;;  %18242 = vmatpush3.bf16.msra.mxu0 %v19202_v9  ;;  %v9490_v9 = vrot.slane %v21089_v59, 1 }
 0x2bc   : > { %v21092_v25 = vadd.f32 %v17874_v40, %v6671_v6  ;;  %v6669_v26 = vadd.f32 %v6568_v16, %v20955_v62  ;;  %18195 = vmatprep.subr.bf16.mxu1 %v19207_v52  ;;  %18243 = vmatprep.subr.bf16.mxu0 %v19208_v54  ;;  %v21099_v62 = vld [vmem:[#allocation9 + $0x578] sm:$0xff]  }
 0x2bd   : > { %v17829_v32 = vpop.f32.mrf.mxu1  ;;  %v17877_v36 = vpop.f32.mrf.mxu0  ;;  %18116 = vmatmul.mubr.bf16.gmra.mxu1 %v9485_v27  ;;  %18164 = vmatmul.mubr.bf16.gmra.mxu0 %v19188_v39 }
 0x2be   : > { %v21095_v19 = vadd.f32 %v7055_v8, %v6669_v26  ;;  %v6674_v24 = vadd.f32 %v17829_v32, %v20962_v53  ;;  %18119 = vmatprep.mubr.bf16.mxu1 %v9487_v61  ;;  %18167 = vmatprep.mubr.bf16.mxu0 %v19192_v41  ;;  %v9491_v41 = vsel %vm1657_vm1, %v9488_v60, %v9490_v9  ;;  %v19205_v26 = vld [vmem:[#allocation2 + $0xac] sm:$0xff]   ;;  %v19200_v32 = vld [vmem:[#allocation2 + $0xbc] sm:$0xff]  }
 0x2bf   : > { %v6581_v44 = vpop.f32.mrf.mxu1  ;;  %v7068_v21 = vpop.f32.mrf.mxu0  ;;  %18196 = vmatpush3.bf16.msra.mxu1 %v19207_v52  ;;  %18244 = vmatpush3.bf16.msra.mxu0 %v19208_v54  ;;  %v9489_v52 = vsel %vm1657_vm1, %v9486_v3, %v9488_v60  ;;  %v19199_v54 = vld [vmem:[#allocation2 + $0x9c] sm:$0xff]   ;;  %v19204_v60 = vld [vmem:[#allocation2 + $0xc4] sm:$0xff]  }
 0x2c0   : > { %v21101_v42 = vadd.f32 %v17877_v36, %v6674_v24  ;;  %v6672_v13 = vadd.f32 %v6581_v44, %v20967_v47  ;;  %18197 = vmatprep.subr.bf16.mxu1 %v19213_v45  ;;  %18245 = vmatprep.subr.bf16.mxu0 %v19214_v15  ;;  %v19203_v47 = vld [vmem:[#allocation2 + $0xa4] sm:$0xff]   ;;  %v9492_v16 = vrot.slane %v19199_v54, 1 }
 0x2c1   : > { %v17830_v53 = vpop.f32.mrf.mxu1  ;;  %v17878_v55 = vpop.f32.mrf.mxu0 }
 0x2c2   : > { %v21106_v39 = vadd.f32 %v7068_v21, %v6672_v13  ;;  %v6675_v38 = vadd.f32 %v17830_v53, %v20974_v43  ;;  %v19215_v13 = vld [vmem:[#allocation2 + $0x64] sm:$0xff]  }
 0x2c3   : > { %v6584_v0 = vpop.f32.mrf.mxu1  ;;  %v7071_v40 = vpop.f32.mrf.mxu0  ;;  %18198 = vmatpush3.bf16.msra.mxu1 %v19213_v45  ;;  %18246 = vmatpush3.bf16.msra.mxu0 %v19214_v15  ;;  %v9494_v45 = vrot.slane %v19203_v47, 1 }
 0x2c4   : > { %v21111_v6 = vadd.f32 %v17878_v55, %v6675_v38  ;;  %v6673_v27 = vadd.f32 %v6584_v0, %v20979_v49  ;;  %18279 = vmatprep.subr.bf16.mxu1 %v21099_v62  ;;  %18327 = vmatprep.subr.bf16.mxu0 %v21104_v33  ;;  %v9496_v0 = vrot.slane %v19205_v26, 1  ;;  %v19206_v26 = vld [vmem:[#allocation2 + $0xcc] sm:$0xff]  }
 0x2c5   : > { %v17833_v10 = vpop.f32.mrf.mxu1  ;;  %v17881_v43 = vpop.f32.mrf.mxu0  ;;  %18120 = vmatmul.mubr.bf16.gmra.mxu1 %v9489_v52  ;;  %18168 = vmatmul.mubr.bf16.gmra.mxu0 %v19194_v23  ;;  %v9495_v23 = vsel %vm1657_vm1, %v9492_v16, %v9494_v45 }
 0x2c6   : > { %v21116_v3 = vadd.f32 %v7071_v40, %v6673_v27  ;;  %v6678_v59 = vadd.f32 %v17833_v10, %v20982_v29  ;;  %18123 = vmatprep.mubr.bf16.mxu1 %v9491_v41  ;;  %18171 = vmatprep.mubr.bf16.mxu0 %v19198_v50  ;;  %v9493_v29 = vsel %vm1657_vm1, %v9490_v9, %v9492_v16  ;;  %v21127_v50 = vld [vmem:[#allocation2 + $0xb4] sm:$0xff]   ;;  %v21135_v9 = vld [vmem:[#allocation2 + $0x6c] sm:$0xff]   ;;  %v10409_v41 = vshll.u32 %v19215_v13, 16 }
 0x2c7   : > { %v6597_v8 = vpop.f32.mrf.mxu1  ;;  %v7084_v61 = vpop.f32.mrf.mxu0  ;;  %v9498_v10 = vrot.slane %v21127_v50, 1 }
 0x2c8   : > { %v21119_v49 = vadd.f32 %v17881_v43, %v6678_v59  ;;  %v6676_v15 = vadd.f32 %v6597_v8, %v20986_v58  ;;  %v19211_v43 = vld [vmem:[#allocation2 + $0xbc] ss:$0 sps:$4 sm:$0x11]  }
 0x2c9   : > { %v17834_v36 = vpop.f32.mrf.mxu1  ;;  %v17882_v24 = vpop.f32.mrf.mxu0 }
 0x2ca   : > { %v21122_v44 = vadd.f32 %v7084_v61, %v6676_v15  ;;  %v6679_v21 = vadd.f32 %v17834_v36, %v20991_v30  ;;  %v9497_v61 = vsel %vm1657_vm1, %v9494_v45, %v9496_v0  ;;  %v19210_v36 = vld [vmem:[#allocation2 + $0xd4] sm:$0xff]  }
 0x2cb   : > { %v6600_v53 = vpop.f32.mrf.mxu1  ;;  %v7087_v55 = vpop.f32.mrf.mxu0 }
 0x2cc   : > { %v21129_v38 = vadd.f32 %v17882_v24, %v6679_v21  ;;  %v6677_v58 = vadd.f32 %v6600_v53, %v20994_v14  ;;  %v10411_v24 = vrot.slane %v10409_v41, 1  ;;  %v21146_v21 = vld [vmem:[#allocation2 + $0x6c] sm:$0xff]  }
 0x2cd   : > { %v17837_v52 = vpop.f32.mrf.mxu1  ;;  %v17885_v54 = vpop.f32.mrf.mxu0  ;;  %18124 = vmatmul.mubr.bf16.gmra.mxu1 %v9493_v29  ;;  %18172 = vmatmul.mubr.bf16.gmra.mxu0 %v19200_v32 }
 0x2ce   : > { %v21132_v40 = vadd.f32 %v7087_v55, %v6677_v58  ;;  %v6682_v30 = vadd.f32 %v17837_v52, %v20997_v2  ;;  %18127 = vmatprep.mubr.bf16.mxu1 %v9495_v23  ;;  %18175 = vmatprep.mubr.bf16.mxu0 %v19204_v60  ;;  %v10407_v2 = vshrl.u32 %v19215_v13, 16  ;;  %v10414_v60 = vshll.u32 %v21135_v9, 16  ;;  %v19217_v55 = vld [vmem:[#allocation2 + $0x64] sm:$0xfe]   ;;  %v19219_v58 = vld [vmem:[#allocation2 + $0x74] sm:$0xff]  }
 0x2cf   : > { %v6613_v47 = vpop.f32.mrf.mxu1  ;;  %v7100_v27 = vpop.f32.mrf.mxu0 }
 0x2d0   : > { %v21138_v14 = vadd.f32 %v17885_v54, %v6682_v30  ;;  %v6680_v59 = vadd.f32 %v6613_v47, %v21001_v1  ;;  %v9499_v1 = vsel %vm1657_vm1, %v9496_v0, %v9498_v10  ;;  %v10416_v30 = vrot.slane %v10414_v60, 1 }
 0x2d1   : > { %v17838_v16 = vpop.f32.mrf.mxu1  ;;  %v17886_v8 = vpop.f32.mrf.mxu0  ;;  %v10993_v0 = vrot.slane %v21146_v21, 1 }
 0x2d2   : > { %v21142_v15 = vadd.f32 %v7100_v27, %v6680_v59  ;;  %v6683_v32 = vadd.f32 %v17838_v16, %v21005_v48  ;;  %v9500_v48 = vrot.slane %v19211_v43, 1  ;;  %v10412_v27 = vor.u32 %v10411_v24, %v10407_v2  ;;  %v19220_v2 = vld [vmem:[#allocation2 + $0x74] sm:$0xff]  }
 0x2d3   : > { %v6616_v29 = vpop.f32.mrf.mxu1  ;;  %v7103_v53 = vpop.f32.mrf.mxu0  ;;  %v10992_v59 = vrot.slane %v19217_v55, 1 }
 0x2d4   : > { %v21149_v23 = vadd.f32 %v17886_v8, %v6683_v32  ;;  %v6681_v45 = vadd.f32 %v6616_v29, %v21008_v46  ;;  %v21156_v46 = vld [vmem:[#allocation2 + $0x7c] sm:$0xff]   ;;  %v10422_v32 = vshll.u32 %v19219_v58, 16  ;;  %v9501_v21 = vsel %vm1657_vm1, %v9498_v10, %v9500_v48 }
 0x2d5   : > { %v17841_v13 = vpop.f32.mrf.mxu1  ;;  %v17889_v50 = vpop.f32.mrf.mxu0  ;;  %18128 = vmatmul.mubr.bf16.gmra.mxu1 %v9497_v61  ;;  %18176 = vmatmul.mubr.bf16.gmra.mxu0 %v19206_v26  ;;  %v19212_v8 = vld [vmem:[#allocation2 + $0xdc] sm:$0xff]   ;;  %v10430_v55 = vshll.u32 %v21156_v46, 16 }
 0x2d6   : > { %v21152_v52 = vadd.f32 %v7103_v53, %v6681_v45  ;;  %v6686_v54 = vadd.f32 %v17841_v13, %v21011_v4  ;;  %18131 = vmatprep.mubr.bf16.mxu1 %v9499_v1  ;;  %18179 = vmatprep.mubr.bf16.mxu0 %v19210_v36  ;;  %v10418_v4 = vshrl.u32 %v21135_v9, 16  ;;  %v10417_v53 = vsel %vm1070_vm0, %v10412_v27, %v10416_v30  ;;  %v21169_v45 = vld [vmem:[#allocation2 + $0x7c] sm:$0xff]  }
 0x2d7   : > { %v6629_v41 = vpop.f32.mrf.mxu1  ;;  %v7116_v47 = vpop.f32.mrf.mxu0  ;;  %v10994_v1 = vsel %vm1657_vm1, %v10992_v59, %v10993_v0  ;;  %v10995_v27 = vrot.slane %v19220_v2, 1  ;;  %v21181_v59 = vld [vmem:[#allocation2 + $0x8c] sm:$0xff]  }
 0x2d8   : > { %v21158_v16 = vadd.f32 %v17889_v50, %v6686_v54  ;;  %v6684_v43 = vadd.f32 %v6629_v41, %v21014_v5  ;;  %v10426_v5 = vshrl.u32 %v19219_v58, 16  ;;  %v21174_v50 = vld [vmem:[#allocation2 + $0x84] sm:$0xff]   ;;  %v10420_v48 = vor.u32 %v10418_v4, %v10416_v30 }
 0x2d9   : > { %v17842_v61 = vpop.f32.mrf.mxu1  ;;  %v17890_v26 = vpop.f32.mrf.mxu0  ;;  %v10424_v54 = vrot.slane %v10422_v32, 1  ;;  %v21176_v41 = vld [vmem:[#allocation2 + $0x84] sm:$0xff]   ;;  %v10434_v30 = vshrl.u32 %v21156_v46, 16 }
 0x2da   : > { %v21162_v36 = vadd.f32 %v7116_v47, %v6684_v43  ;;  %v6687_v60 = vadd.f32 %v17842_v61, %v21021_v11 }
 0x2db   : > { %v6632_v24 = vpop.f32.mrf.mxu1  ;;  %v7119_v29 = vpop.f32.mrf.mxu0  ;;  %v10428_v61 = vor.u32 %v10426_v5, %v10424_v54 }
 0x2dc   : > { %v21171_v9 = vadd.f32 %v17890_v26, %v6687_v60  ;;  %v6685_v13 = vadd.f32 %v6632_v24, %v21024_v34  ;;  %v10432_v26 = vrot.slane %v10430_v55, 1  ;;  %v10438_v60 = vshll.u32 %v21174_v50, 16  ;;  %v19227_v55 = vld [vmem:[#allocation9 + $0x570] sm:$0xff]  }
 0x2dd   : > { %v17845_v11 = vpop.f32.mrf.mxu1  ;;  %v17893_v10 = vpop.f32.mrf.mxu0  ;;  %18132 = vmatmul.mubr.bf16.gmra.mxu1 %v9501_v21  ;;  %18180 = vmatmul.mubr.bf16.gmra.mxu0 %v19212_v8  ;;  %v10997_v8 = vrot.slane %v21169_v45, 1  ;;  %v362_v21 = vld [vmem:[%s19855_s6 + $0xe8] sm:$0xf] }
 0x2de   : > { %v21178_v47 = vadd.f32 %v7119_v29, %v6685_v13  ;;  %v6690_v58 = vadd.f32 %v17845_v11, %v21028_v57  ;;  %18199 = vmatprep.mubr.bf16.mxu1 %v10417_v53  ;;  %18247 = vmatprep.mubr.bf16.mxu0 %v10994_v1  ;;  %v21189_v57 = vld [vmem:[#allocation2 + $0x94] sm:$0xff]   ;;  %v10425_v29 = vsel %vm1070_vm0, %v10420_v48, %v10424_v54  ;;  %v10999_v53 = vrot.slane %v21176_v41, 1  ;;  %v19228_v45 = vld [vmem:[#allocation9 + $0x5b0] sm:$0xff]   ;;  %v21200_v11 = vld [vmem:[#allocation2 + $0x8c] sm:$0xff]  }
 0x2df   : > { %v6645_v34 = vpop.f32.mrf.mxu1  ;;  %v7132_v43 = vpop.f32.mrf.mxu0  ;;  %v10442_v1 = vshrl.u32 %v21174_v50, 16  ;;  %422 = vst [vmem:[#allocation2 + $0xe8] sm:$0xf] %v362_v21  ;;  %v10446_v13 = vshll.u32 %v21181_v59, 16  ;;  %v10433_v48 = vsel %vm1070_vm0, %v10428_v61, %v10432_v26  ;;  %v10998_v54 = vsel %vm1657_vm1, %v10995_v27, %v10997_v8 }
 0x2e0   : > { %v21185_v4 = vadd.f32 %v17893_v10, %v6690_v58  ;;  %v6688_v32 = vadd.f32 %v6645_v34, %v21031_v12  ;;  %v10996_v12 = vsel %vm1657_vm1, %v10993_v0, %v10995_v27  ;;  %v10440_v34 = vrot.slane %v10438_v60, 1  ;;  %v21208_v0 = vld [vmem:[#allocation2 + $0x94] sm:$0xff]  }
 0x2e1   : > { %v17846_v2 = vpop.f32.mrf.mxu1  ;;  %v17894_v24 = vpop.f32.mrf.mxu0  ;;  %v23187_v27 = vrot.slane %v21200_v11, 1  ;;  %v19233_v60 = vld [vmem:[#allocation9 + $0x568] sm:$0xff]  }
 0x2e2   : > { %v21195_v5 = vadd.f32 %v7132_v43, %v6688_v32  ;;  %v6691_v46 = vadd.f32 %v17846_v2, %v21037_v51  ;;  %v10454_v51 = vshll.u32 %v21189_v57, 16  ;;  %v21210_v43 = vld [vmem:[#allocation2 + $0x9c] sm:$0xff]  }
 0x2e3   : > { %v6648_v10 = vpop.f32.mrf.mxu1  ;;  %v7135_v58 = vpop.f32.mrf.mxu0 }
 0x2e4   : > { %v21204_v50 = vadd.f32 %v17894_v24, %v6691_v46  ;;  %v6689_v41 = vadd.f32 %v6648_v10, %v21041_v35  ;;  %v10436_v35 = vor.u32 %v10434_v30, %v10432_v26  ;;  %v19234_v24 = vld [vmem:[#allocation9 + $0x5a8] sm:$0xff]  }
 0x2e5   : > { %v17913_v32 = vpop.f32.mrf.mxu1  ;;  %v17961_v21 = vpop.f32.mrf.mxu0  ;;  %18200 = vmatmul.mubr.bf16.vlgmr.msra.gmra.mxu1 %v10425_v29  ;;  %18248 = vmatmul.mubr.bf16.vlgmr.msra.gmra.mxu0 %v10996_v12  ;;  %v10448_v29 = vrot.slane %v10446_v13, 1  ;;  %v21218_v12 = vld [vmem:[#allocation2 + $0xa4] sm:$0xff]   ;;  %v10462_v13 = vshll.u32 %v21210_v43, 16 }
 0x2e6   : > { %23254 = vst [vmem:[#allocation24_spill] sm:$0xff] %v21204_v50  ;;  %v21212_v2 = vadd.f32 %v7135_v58, %v6689_v41  ;;  %v7756_v61 = vadd.f32 %v17913_v32, %v21048_v20  ;;  %18280 = vmatpush3.bf16.msra.mxu1 %v21099_v62  ;;  %18328 = vmatpush3.bf16.msra.mxu0 %v21104_v33  ;;  %v21224_v33 = vld [vmem:[#allocation2 + $0x9c] sm:$0xff]   ;;  %v10450_v41 = vshrl.u32 %v21181_v59, 16 }
 0x2e7   : > { %v7627_v46 = vpop.f32.mrf.mxu1  ;;  %v8077_v10 = vpop.f32.mrf.mxu0  ;;  %18203 = vmatprep.mubr.bf16.mxu1 %v10433_v48  ;;  %18251 = vmatprep.mubr.bf16.mxu0 %v10998_v54  ;;  %v10444_v50 = vor.u32 %v10442_v1, %v10440_v34  ;;  %v11000_v62 = vsel %vm1657_vm1, %v10997_v8, %v10999_v53  ;;  %v10456_v48 = vrot.slane %v10454_v51, 1  ;;  %v11003_v1 = vrot.slane %v21208_v0, 1  ;;  %v19239_v0 = vld [vmem:[#allocation9 + $0x560] sm:$0xff]  }
 0x2e8   : > { %v21220_v58 = vadd.f32 %v17961_v21, %v7756_v61  ;;  %v7754_v20 = vadd.f32 %v7627_v46, %v21051_v7  ;;  %18281 = vmatprep.subr.bf16.mxu1 %v19227_v55  ;;  %18329 = vmatprep.subr.bf16.mxu0 %v19228_v45  ;;  %v10441_v7 = vsel %vm1070_vm0, %v10436_v35, %v10440_v34  ;;  %v10458_v8 = vshrl.u32 %v21189_v57, 16  ;;  %v21234_v21 = vld [vmem:[#allocation2 + $0xa4] sm:$0xff]  }
 0x2e9   : > { %v17914_v26 = vpop.f32.mrf.mxu1  ;;  %v17962_v30 = vpop.f32.mrf.mxu0  ;;  %v10449_v59 = vsel %vm1070_vm0, %v10444_v50, %v10448_v29  ;;  %v11002_v51 = vsel %vm1657_vm1, %v10999_v53, %v23187_v27  ;;  %v10464_v50 = vrot.slane %v10462_v13, 1  ;;  %v21246_v53 = vld [vmem:[#allocation2 + $0xac] sm:$0xff]  }
 0x2ea   : > { %v21229_v54 = vadd.f32 %v8077_v10, %v7754_v20  ;;  %v7757_v32 = vadd.f32 %v17914_v26, %v21058_v17  ;;  %18282 = vmatpush3.bf16.msra.mxu1 %v19227_v55  ;;  %18330 = vmatpush3.bf16.msra.mxu0 %v19228_v45  ;;  %v10470_v17 = vshll.u32 %v21218_v12, 16  ;;  %v19240_v45 = vld [vmem:[#allocation9 + $0x5a0] sm:$0xff]   ;;  %v10466_v20 = vshrl.u32 %v21210_v43, 16 }
 0x2eb   : > { %v7630_v61 = vpop.f32.mrf.mxu1  ;;  %v8080_v46 = vpop.f32.mrf.mxu0  ;;  %18283 = vmatprep.subr.bf16.mxu1 %v19233_v60  ;;  %18331 = vmatprep.subr.bf16.mxu0 %v19234_v24  ;;  %v21248_v26 = vld [vmem:[#allocation2 + $0xb4] sm:$0xff]  }
 0x2ec   : > { %v21241_v34 = vadd.f32 %v17962_v30, %v7757_v32  ;;  %v7755_v55 = vadd.f32 %v7630_v61, %v21061_v63  ;;  %v10452_v63 = vor.u32 %v10450_v41, %v10448_v29  ;;  %v21253_v32 = vld [vmem:[#allocation2 + $0xac] sm:$0xff]   ;;  %v21255_v13 = vrot.slane %v10470_v17, 1 }
 0x2ed   : > { %v17917_v35 = vpop.f32.mrf.mxu1  ;;  %v17965_v10 = vpop.f32.mrf.mxu0  ;;  %18204 = vmatmul.mubr.bf16.gmra.mxu1 %v10441_v7  ;;  %18252 = vmatmul.mubr.bf16.gmra.mxu0 %v11000_v62  ;;  %v10460_v62 = vor.u32 %v10458_v8, %v10456_v48  ;;  %v19245_v7 = vld [vmem:[#allocation9 + $0x558] sm:$0xff]   ;;  %v21265_v8 = vld [vmem:[#allocation2 + $0xb4] sm:$0xff]  }
 0x2ee   : > { %23255 = vst [vmem:[#allocation23_spill] sm:$0xff] %v21241_v34  ;;  %v21250_v27 = vadd.f32 %v8080_v46, %v7755_v55  ;;  %v7760_v30 = vadd.f32 %v17917_v35, %v21065_v18  ;;  %18207 = vmatprep.mubr.bf16.mxu1 %v10449_v59  ;;  %18255 = vmatprep.mubr.bf16.mxu0 %v11002_v51  ;;  %v19246_v34 = vld [vmem:[#allocation9 + $0x598] sm:$0xff]   ;;  %v23256_v59 = vrot.slane %v21200_v11, 1  ;;  %v21272_v35 = vld [vmem:[#allocation2 + $0xbc] sm:$0xff]  }
 0x2ef   : > { %v7643_v61 = vpop.f32.mrf.mxu1  ;;  %v8093_v57 = vpop.f32.mrf.mxu0  ;;  %18284 = vmatpush3.bf16.msra.mxu1 %v19233_v60  ;;  %18332 = vmatpush3.bf16.msra.mxu0 %v19234_v24  ;;  %v10478_v24 = vshll.u32 %v21246_v53, 16  ;;  %v10457_v55 = vsel %vm1070_vm0, %v10452_v63, %v10456_v48  ;;  %v10465_v11 = vsel %vm1070_vm0, %v10460_v62, %v10464_v50  ;;  %v19252_v63 = vld [vmem:[#allocation9 + $0x590] sm:$0xff]  }
 0x2f0   : > { %v21258_v46 = vadd.f32 %v17965_v10, %v7760_v30  ;;  %v7758_v18 = vadd.f32 %v7643_v61, %v21068_v56  ;;  %18285 = vmatprep.subr.bf16.mxu1 %v19239_v0  ;;  %18333 = vmatprep.subr.bf16.mxu0 %v19240_v45  ;;  %v11004_v60 = vsel %vm1657_vm1, %v23256_v59, %v11003_v1  ;;  %v10474_v56 = vshrl.u32 %v21218_v12, 16 }
 0x2f1   : > { %v17918_v29 = vpop.f32.mrf.mxu1  ;;  %v17966_v41 = vpop.f32.mrf.mxu0  ;;  %v23257_v61 = vrot.slane %v21224_v33, 1  ;;  %v10480_v43 = vrot.slane %v10478_v24, 1 }
 0x2f2   : > { %v21267_v51 = vadd.f32 %v8093_v57, %v7758_v18  ;;  %v7761_v17 = vadd.f32 %v17918_v29, %v21075_v22  ;;  %v10486_v57 = vshll.u32 %v21248_v26, 16  ;;  %v19251_v18 = vld [vmem:[#allocation9 + $0x550] sm:$0xff]   ;;  %v10476_v12 = vor.u32 %v10474_v56, %v21255_v13 }
 0x2f3   : > { %v7646_v10 = vpop.f32.mrf.mxu1  ;;  %v8096_v30 = vpop.f32.mrf.mxu0  ;;  %v11006_v59 = vsel %vm1657_vm1, %v11003_v1, %v23257_v61  ;;  %18286 = vmatpush3.bf16.msra.mxu1 %v19239_v0  ;;  %18334 = vmatpush3.bf16.msra.mxu0 %v19240_v45  ;;  %v10482_v1 = vshrl.u32 %v21246_v53, 16  ;;  %v21293_v53 = vld [vmem:[#allocation2 + $0xbc] sm:$0xff]  }
 0x2f4   : > { %v21279_v22 = vadd.f32 %v17966_v41, %v7761_v17  ;;  %v7759_v48 = vadd.f32 %v7646_v10, %v21078_v31  ;;  %18287 = vmatprep.subr.bf16.mxu1 %v19245_v7  ;;  %18335 = vmatprep.subr.bf16.mxu0 %v19246_v34  ;;  %v10468_v41 = vor.u32 %v10466_v20, %v10464_v50  ;;  %v21288_v17 = vld [vmem:[#allocation2 + $0xc4] sm:$0xff]   ;;  %v10494_v50 = vshll.u32 %v21272_v35, 16 }
 0x2f5   : > { %v17921_v29 = vpop.f32.mrf.mxu1  ;;  %v17969_v62 = vpop.f32.mrf.mxu0  ;;  %18208 = vmatmul.mubr.bf16.gmra.mxu1 %v10457_v55  ;;  %18256 = vmatmul.mubr.bf16.gmra.mxu0 %v11004_v60  ;;  %v21291_v55 = vrot.slane %v10486_v57, 1  ;;  %v19257_v60 = vld [vmem:[#allocation9 + $0x548] sm:$0xff]   ;;  %v21299_v20 = vld [vmem:[#allocation2 + $0xc4] sm:$0xff]   ;;  %v10490_v57 = vshrl.u32 %v21248_v26, 16  ;;  %v23262_v26 = vrot.slane %v21234_v21, 1 }
 0x2f6   : > { %v21284_v0 = vadd.f32 %v8096_v30, %v7759_v48  ;;  %v7764_v45 = vadd.f32 %v17921_v29, %v21082_v37  ;;  %18211 = vmatprep.mubr.bf16.mxu1 %v10465_v11  ;;  %18259 = vmatprep.mubr.bf16.mxu0 %v11006_v59  ;;  %v19258_v30 = vld [vmem:[#allocation9 + $0x588] sm:$0xff]   ;;  %v23259_v59 = vrot.slane %v21234_v21, 1  ;;  %v21307_v48 = vld [vmem:[#allocation2 + $0xcc] sm:$0xff]  }
 0x2f7   : > { %v7659_v10 = vpop.f32.mrf.mxu1  ;;  %v8109_v61 = vpop.f32.mrf.mxu0  ;;  %18288 = vmatpush3.bf16.msra.mxu1 %v19245_v7  ;;  %18336 = vmatpush3.bf16.msra.mxu0 %v19246_v34  ;;  %v23260_v34 = vrot.slane %v21224_v33, 1  ;;  %v10481_v33 = vsel %vm1070_vm0, %v10476_v12, %v10480_v43 }
 0x2f8   : > { %v21295_v24 = vadd.f32 %v17969_v62, %v7764_v45  ;;  %v7762_v37 = vadd.f32 %v7659_v10, %v21085_v28  ;;  %18289 = vmatprep.subr.bf16.mxu1 %v19251_v18  ;;  %18337 = vmatprep.subr.bf16.mxu0 %v19252_v63  ;;  %v10473_v62 = vsel %vm1070_vm0, %v10468_v41, %v21255_v13  ;;  %v21315_v10 = vld [vmem:[#allocation2 + $0xcc] sm:$0xff]  }
 0x2f9   : > { %v17922_v11 = vpop.f32.mrf.mxu1  ;;  %v17970_v56 = vpop.f32.mrf.mxu0  ;;  %v11008_v7 = vsel %vm1657_vm1, %v23260_v34, %v23259_v59  ;;  %v23261_v59 = vrot.slane %v21253_v32, 1  ;;  %v19264_v34 = vld [vmem:[#allocation9 + $0x580] sm:$0xff]  }
 0x2fa   : > { %23258 = vst [vmem:[#allocation25_spill] sm:$0xff] %v21295_v24  ;;  %v21309_v28 = vadd.f32 %v8109_v61, %v7762_v37  ;;  %v7765_v29 = vadd.f32 %v17922_v11, %v21092_v25  ;;  %v10502_v37 = vshll.u32 %v21288_v17, 16  ;;  %v19263_v25 = vld [vmem:[#allocation9 + $0x540] sm:$0xff]   ;;  %v10496_v11 = vrot.slane %v10494_v50, 1 }
 0x2fb   : > { %v7662_v31 = vpop.f32.mrf.mxu1  ;;  %v8112_v24 = vpop.f32.mrf.mxu0  ;;  %v11010_v61 = vsel %vm1657_vm1, %v23262_v26, %v23261_v59  ;;  %18290 = vmatpush3.bf16.msra.mxu1 %v19251_v18  ;;  %18338 = vmatpush3.bf16.msra.mxu0 %v19252_v63  ;;  %v10510_v59 = vshll.u32 %v21307_v48, 16  ;;  %v10484_v63 = vor.u32 %v10482_v1, %v10480_v43  ;;  %v21343_v1 = vld [vmem:[#allocation9 + $0x5f8] sm:$0xff]  }
 0x2fc   : > { %v21324_v13 = vadd.f32 %v17970_v56, %v7765_v29  ;;  %v7763_v41 = vadd.f32 %v7662_v31, %v21095_v19  ;;  %18291 = vmatprep.subr.bf16.mxu1 %v19257_v60  ;;  %18339 = vmatprep.subr.bf16.mxu0 %v19258_v30  ;;  %v21333_v31 = vld [vmem:[#allocation2 + $0xd4] sm:$0xff]   ;;  %v10492_v29 = vor.u32 %v10490_v57, %v21291_v55  ;;  %v21363_v19 = vld [vmem:[#allocation2 + $0xdc] sm:$0xff]  }
 0x2fd   : > { %v17925_v12 = vpop.f32.mrf.mxu1  ;;  %v17973_v45 = vpop.f32.mrf.mxu0  ;;  %18212 = vmatmul.mubr.bf16.gmra.mxu1 %v10473_v62  ;;  %18260 = vmatmul.mubr.bf16.gmra.mxu0 %v11008_v7  ;;  %v10504_v7 = vrot.slane %v10502_v37, 1  ;;  %v21336_v62 = vld [vmem:[#allocation2 + $0xdc] sm:$0xff]   ;;  %v10518_v43 = vshll.u32 %v21333_v31, 16 }
 0x2fe   : > { %v21329_v26 = vadd.f32 %v8112_v24, %v7763_v41  ;;  %v7768_v18 = vadd.f32 %v17925_v12, %v21101_v42  ;;  %18215 = vmatprep.mubr.bf16.mxu1 %v10481_v33  ;;  %18263 = vmatprep.mubr.bf16.mxu0 %v11010_v61  ;;  %v10506_v33 = vshrl.u32 %v21288_v17, 16  ;;  %v21345_v61 = vld [vmem:[#allocation9 + $0x638] sm:$0xff]   ;;  %v21352_v41 = vrot.slane %v10510_v59, 1  ;;  %v21355_v17 = vld [vmem:[#allocation2 + $0xd4] sm:$0xff]  }
 0x2ff   : > { %v7675_v50 = vpop.f32.mrf.mxu1  ;;  %v8125_v56 = vpop.f32.mrf.mxu0  ;;  %18292 = vmatpush3.bf16.msra.mxu1 %v19257_v60  ;;  %18340 = vmatpush3.bf16.msra.mxu0 %v19258_v30  ;;  %v23263_v60 = vrot.slane %v21265_v8, 1  ;;  %v23264_v30 = vrot.slane %v21253_v32, 1  ;;  %v10497_v59 = vsel %vm1070_vm0, %v10492_v29, %v10496_v11 }
 0x300   : > { %v21338_v24 = vadd.f32 %v17973_v45, %v7768_v18  ;;  %v7766_v42 = vadd.f32 %v7675_v50, %v21106_v39  ;;  %18293 = vmatprep.subr.bf16.mxu1 %v19263_v25  ;;  %18341 = vmatprep.subr.bf16.mxu0 %v19264_v34  ;;  %v10489_v50 = vsel %vm1070_vm0, %v10484_v63, %v21291_v55  ;;  %v10520_v39 = vrot.slane %v10518_v43, 1 }
 0x301   : > { %v17926_v57 = vpop.f32.mrf.mxu1  ;;  %v17974_v37 = vpop.f32.mrf.mxu0  ;;  %v11012_v45 = vsel %vm1657_vm1, %v23264_v30, %v23263_v60  ;;  %v23266_v60 = vrot.slane %v21293_v53, 1  ;;  %v23267_v30 = vrot.slane %v21265_v8, 1  ;;  %v23271_v43 = vrot.slane %v21299_v20, 1 }
 0x302   : > { %v21357_v12 = vadd.f32 %v8125_v56, %v7766_v42  ;;  %v7769_v18 = vadd.f32 %v17926_v57, %v21111_v6  ;;  %v10526_v42 = vshll.u32 %v21336_v62, 16  ;;  %v21372_v6 = vld [vmem:[#allocation2 + $0x70] sm:$0xff]   ;;  %v21377_v57 = vld [vmem:[#allocation2 + $0xe4] ss:$0 sps:$4 sm:$0x11]  }
 0x303   : > { %v7678_v32 = vpop.f32.mrf.mxu1  ;;  %v8128_v21 = vpop.f32.mrf.mxu0  ;;  %v11014_v56 = vsel %vm1657_vm1, %v23267_v30, %v23266_v60  ;;  %18294 = vmatpush3.bf16.msra.mxu1 %v19263_v25  ;;  %18342 = vmatpush3.bf16.msra.mxu0 %v19264_v34  ;;  %v23269_v60 = vshrl.u32 %v21272_v35, 16  ;;  %v19267_v34 = vld [vmem:[#allocation2 + $0x68] sm:$0xfe]  }
 0x304   : > { %23265 = vst [vmem:[#allocation26_spill] sm:$0xff] %v21357_v12  ;;  %v21374_v55 = vadd.f32 %v17974_v37, %v7769_v18  ;;  %v7767_v63 = vadd.f32 %v7678_v32, %v21116_v3  ;;  %18375 = vmatprep.subr.bf16.mxu1 %v21343_v1  ;;  %18423 = vmatprep.subr.bf16.mxu0 %v21345_v61  ;;  %v10522_v12 = vshrl.u32 %v21333_v31, 16 }
 0x305   : > { %v17929_v29 = vpop.f32.mrf.mxu1  ;;  %v17977_v8 = vpop.f32.mrf.mxu0  ;;  %18216 = vmatmul.mubr.bf16.gmra.mxu1 %v10489_v50  ;;  %18264 = vmatmul.mubr.bf16.gmra.mxu0 %v11012_v45  ;;  %v10500_v25 = vor.u32 %v23269_v60, %v10496_v11  ;;  %v10508_v3 = vor.u32 %v10506_v33, %v10504_v7  ;;  %v21392_v11 = vrot.slane %v10526_v42, 1 }
 0x306   : > { %23268 = vst [vmem:[#allocation27_spill] sm:$0xff] %v21374_v55  ;;  %v21383_v30 = vadd.f32 %v8128_v21, %v7767_v63  ;;  %v7772_v37 = vadd.f32 %v17929_v29, %v21119_v49  ;;  %18219 = vmatprep.mubr.bf16.mxu1 %v10497_v59  ;;  %18267 = vmatprep.mubr.bf16.mxu0 %v11014_v56  ;;  %v23272_v56 = vrot.slane %v21293_v53, 1  ;;  %v21401_v63 = vld [vmem:[#allocation2 + $0xe4] ss:$0 sps:$4 sm:$0x11]   ;;  %v11970_v49 = vshll.u32 %v19267_v34, 16 }
 0x307   : > { %v7691_v18 = vpop.f32.mrf.mxu1  ;;  %v8141_v32 = vpop.f32.mrf.mxu0  ;;  %v10505_v33 = vsel %vm1070_vm0, %v10500_v25, %v10504_v7  ;;  %v21403_v29 = vld [vmem:[#allocation2 + $0x68] sm:$0xfe]   ;;  %v10534_v7 = vshll.u32 %v21377_v57, 16  ;;  %v11967_v25 = vshrl.u32 %v19267_v34, 16  ;;  %v10513_v53 = vsel %vm1070_vm0, %v10508_v3, %v21352_v41  ;;  %v19270_v57 = vld [vmem:[#allocation2 + $0x78] sm:$0xff]  }
 0x308   : > { %v21389_v50 = vadd.f32 %v17977_v8, %v7772_v37  ;;  %v7770_v35 = vadd.f32 %v7691_v18, %v21122_v44  ;;  %v11016_v31 = vsel %vm1657_vm1, %v23272_v56, %v23271_v43  ;;  %v21405_v8 = vld [vmem:[#allocation2 + $0x70] sm:$0xff]   ;;  %v11975_v44 = vshrl.u32 %v21372_v6, 16 }
 0x309   : > { %v17930_v21 = vpop.f32.mrf.mxu1  ;;  %v17978_v59 = vpop.f32.mrf.mxu0  ;;  %v23274_v43 = vrot.slane %v21315_v10, 1  ;;  %v23275_v56 = vrot.slane %v21299_v20, 1  ;;  %v23276_v3 = vshrl.u32 %v21307_v48, 16 }
 0x30a   : > { %23270 = vst [vmem:[#allocation28_spill] sm:$0xff] %v21389_v50  ;;  %v21408_v42 = vadd.f32 %v8141_v32, %v7770_v35  ;;  %v7773_v60 = vadd.f32 %v17930_v21, %v21129_v38  ;;  %v11978_v32 = vshll.u32 %v21372_v6, 16  ;;  %v10524_v6 = vor.u32 %v10522_v12, %v10520_v39 }
 0x30b   : > { %v7694_v37 = vpop.f32.mrf.mxu1  ;;  %v8144_v18 = vpop.f32.mrf.mxu0  ;;  %v11018_v45 = vsel %vm1657_vm1, %v23275_v56, %v23274_v43 }
 0x30c   : > { %23273 = vst [vmem:[#allocation29_spill] sm:$0xff] %v21408_v42  ;;  %v21420_v35 = vadd.f32 %v17978_v59, %v7773_v60  ;;  %v7771_v38 = vadd.f32 %v7694_v37, %v21132_v40  ;;  %v10516_v42 = vor.u32 %v23276_v3, %v21352_v41  ;;  %v11023_v40 = vrot.slane %v21401_v63, 1 }
 0x30d   : > { %v17933_v21 = vpop.f32.mrf.mxu1  ;;  %v17981_v55 = vpop.f32.mrf.mxu0  ;;  %18220 = vmatmul.mubr.bf16.gmra.mxu1 %v10505_v33  ;;  %18268 = vmatmul.mubr.bf16.gmra.mxu0 %v11016_v31  ;;  %v11479_v60 = vrot.slane %v21403_v29, 1  ;;  %v11480_v33 = vrot.slane %v21405_v8, 1  ;;  %v11969_v31 = vrot.slane %v11967_v25, 1  ;;  %v10536_v41 = vrot.slane %v10534_v7, 1  ;;  %v19278_v8 = vld [vmem:[#allocation9 + $0x630] sm:$0xff]  }
 0x30e   : > { %v21426_v50 = vadd.f32 %v8144_v18, %v7771_v38  ;;  %v7776_v20 = vadd.f32 %v17933_v21, %v21138_v14  ;;  %18223 = vmatprep.mubr.bf16.mxu1 %v10513_v53  ;;  %18271 = vmatprep.mubr.bf16.mxu0 %v11018_v45  ;;  %v11977_v18 = vrot.slane %v11975_v44, 1  ;;  %v10521_v12 = vsel %vm1070_vm0, %v10516_v42, %v10520_v39  ;;  %v19274_v44 = vld [vmem:[#allocation2 + $0x80] sm:$0xff]  }
 0x30f   : > { %v7707_v34 = vpop.f32.mrf.mxu1  ;;  %v8157_v59 = vpop.f32.mrf.mxu0  ;;  %v23277_v45 = vrot.slane %v21355_v17, 1  ;;  %v23278_v63 = vrot.slane %v21315_v10, 1  ;;  %v11972_v53 = vrot.slane %v11970_v49, 2  ;;  %v11980_v56 = vrot.slane %v11978_v32, 2 }
 0x310   : > { %v21432_v37 = vadd.f32 %v17981_v55, %v7776_v20  ;;  %v7774_v48 = vadd.f32 %v7707_v34, %v21142_v15  ;;  %v11984_v15 = vshrl.u32 %v19270_v57, 16  ;;  %v11987_v7 = vshll.u32 %v19270_v57, 16  ;;  %v363_v20 = vld [vmem:[%s19855_s6 + $0xec] sm:$0xf]  ;;  %s19479_s6 = scalar_lea.vmem %s23053_s0, 2048 }
 0x311   : > { %v17934_v43 = vpop.f32.mrf.mxu1  ;;  %v17982_v14 = vpop.f32.mrf.mxu0  ;;  %v11020_v29 = vsel %vm1657_vm1, %v23278_v63, %v23277_v45  ;;  %v10529_v39 = vsel %vm1070_vm0, %v10524_v6, %v21392_v11  ;;  %v23279_v42 = vrot.slane %v21363_v19, 1  ;;  %v23280_v10 = vmov %v23277_v45  ;;  %423 = vst [vmem:[#allocation2 + $0xec] sm:$0xf] %v363_v20  ;;  %p19480_p6 = scmp.ne.s32.totalorder %s23053_s0, %s19479_s6  ;;  %p19487_p12 = scmp.lt.s32.totalorder %s19485_s17, %s19479_s6 }
 0x312   : > { %v21441_v25 = vadd.f32 %v8157_v59, %v7774_v48  ;;  %v7777_v55 = vadd.f32 %v17934_v43, %v21149_v23  ;;  %v23281_v17 = vshrl.u32 %v21336_v62, 16  ;;  %v11993_v45 = vshrl.u32 %v19274_v44, 16 }
 0x313   : > { %v7710_v38 = vpop.f32.mrf.mxu1  ;;  %v8160_v21 = vpop.f32.mrf.mxu0  ;;  %v11022_v3 = vsel %vm1657_vm1, %v23280_v10, %v23279_v42  ;;  %v11996_v63 = vshll.u32 %v19274_v44, 16  ;;  %p19481_p4 = pnand %p19480_p6, %p23461_p1  ;;  %p19488_p2 = por %p19487_p12, %p19486_p10 }
 0x314   : > { %v21451_v49 = vadd.f32 %v17982_v14, %v7777_v55  ;;  %v7775_v32 = vadd.f32 %v7710_v38, %v21152_v52  ;;  %v10532_v59 = vor.u32 %v23281_v17, %v21392_v11  ;;  %v11973_v14 = vor.u32 %v11972_v53, %v11969_v31  ;;  %v19276_v53 = vld [vmem:[#allocation2 + $0x88] sm:$0xff]  }
 0x315   : > { %v17937_v23 = vpop.f32.mrf.mxu1  ;;  %v17985_v34 = vpop.f32.mrf.mxu0  ;;  %18224 = vmatmul.mubr.bf16.gmra.mxu1 %v10521_v12  ;;  %18272 = vmatmul.mubr.bf16.gmra.mxu0 %v11020_v29  ;;  %v11981_v52 = vor.u32 %v11980_v56, %v11977_v18  ;;  %v19269_v29 = vld [vmem:[#allocation2 + $0x78] sm:$0xff]   ;;  %v23282_v31 = vrot.slane %v21363_v19, 1  ;;  %v11995_v10 = vrot.slane %v11993_v45, 1  ;;  %v12005_v17 = vshll.u32 %v19276_v53, 16  ;;  %p19482_p3 = pneg %p19481_p4 }
 0x316   : > { %v21455_v57 = vadd.f32 %v8160_v21, %v7775_v32  ;;  %v7780_v6 = vadd.f32 %v17937_v23, %v21158_v16  ;;  %18227 = vmatprep.mubr.bf16.mxu1 %v10529_v39  ;;  %18275 = vmatprep.mubr.bf16.mxu0 %v11022_v3  ;;  %v11986_v16 = vrot.slane %v11984_v15, 1  ;;  %v11989_v39 = vrot.slane %v11987_v7, 2  ;;  %v21475_v7 = vld [vmem:[#allocation2 + $0x80] sm:$0xff]  }
 0x317   : > { %v7723_v48 = vpop.f32.mrf.mxu1  ;;  %v8173_v43 = vpop.f32.mrf.mxu0  ;;  %v10537_v11 = vsel %vm1070_vm0, %v10532_v59, %v10536_v41  ;;  %v11024_v18 = vsel %vm1657_vm1, %v23282_v31, %v11023_v40  ;;  %v11982_v15 = vsel %vm2632_vm2, %v11973_v14, %v11981_v52  ;;  %v11998_v3 = vrot.slane %v11996_v63, 2  ;;  %v23283_v31 = vld [vmem:[#allocation24_spill] sm:$0xff]  ;;  %p19489_p9 = pnand %p19488_p2, %p19482_p3 }
 0x318   : > { %v21461_v55 = vadd.f32 %v17985_v34, %v7780_v6  ;;  %v7778_v12 = vadd.f32 %v7723_v48, %v21162_v36  ;;  %v11481_v36 = vsel %vm1657_vm1, %v11479_v60, %v11480_v33  ;;  %v11482_v20 = vrot.slane %v19269_v29, 1  ;;  %v21489_v29 = vld [vmem:[#allocation2 + $0x88] sm:$0xff]  }
 0x319   : > { %v17938_v38 = vpop.f32.mrf.mxu1  ;;  %v17986_v21 = vpop.f32.mrf.mxu0  ;;  %v11990_v23 = vor.u32 %v11989_v39, %v11986_v16  ;;  %v12002_v6 = vshrl.u32 %v19276_v53, 16  ;;  %v21484_v14 = vor.u32 %v11998_v3, %v11995_v10  ;;  %v21501_v10 = vld [vmem:[#allocation2 + $0x90] sm:$0xff]  }
 0x31a   : > { %v21464_v42 = vadd.f32 %v8173_v43, %v7778_v12  ;;  %v7781_v62 = vadd.f32 %v17938_v38, %v21171_v9  ;;  %v19280_v9 = vld [vmem:[#allocation2 + $0x90] sm:$0xff]   ;;  %v11484_v43 = vrot.slane %v21475_v7, 1  ;;  %v19282_v38 = vld [vmem:[#allocation2 + $0x98] sm:$0xff]   ;;  %v11483_v16 = vsel %vm1657_vm1, %v11480_v33, %v11482_v20 }
 0x31b   : > { %v7726_v56 = vpop.f32.mrf.mxu1  ;;  %v8176_v44 = vpop.f32.mrf.mxu0  ;;  %v12014_v45 = vshll.u32 %v19280_v9, 16  ;;  %v11991_v39 = vsel %vm2632_vm2, %v11981_v52, %v11990_v23  ;;  %v12004_v53 = vrot.slane %v12002_v6, 1  ;;  %v12000_v7 = vsel %vm2632_vm2, %v11990_v23, %v21484_v14 }
 0x31c   : > { %v21477_v32 = vadd.f32 %v17986_v21, %v7781_v62  ;;  %v7779_v19 = vadd.f32 %v7726_v56, %v21178_v47  ;;  %v12011_v47 = vshrl.u32 %v19280_v9, 16  ;;  %v19286_v62 = vld [vmem:[#allocation2 + $0xa0] sm:$0xff]   ;;  %v12007_v56 = vrot.slane %v12005_v17, 2 }
 0x31d   : > { %v17941_v41 = vpop.f32.mrf.mxu1  ;;  %v17989_v40 = vpop.f32.mrf.mxu0  ;;  %18228 = vmatmul.mubr.bf16.gmra.mxu1 %v10537_v11  ;;  %18276 = vmatmul.mubr.bf16.gmra.mxu0 %v11024_v18  ;;  %v12016_v52 = vrot.slane %v12014_v45, 2  ;;  %v12029_v6 = vshrl.u32 %v19286_v62, 16 }
 0x31e   : > { %v21480_v34 = vadd.f32 %v8176_v44, %v7779_v19  ;;  %v7784_v60 = vadd.f32 %v17941_v41, %v21185_v4  ;;  %18295 = vmatprep.mubr.bf16.mxu1 %v11481_v36  ;;  %18343 = vmatprep.mubr.bf16.mxu0 %v11982_v15  ;;  %v19277_v44 = vld [vmem:[#allocation9 + $0x5f0] sm:$0xff]   ;;  %v11485_v15 = vsel %vm1657_vm1, %v11482_v20, %v11484_v43  ;;  %v12013_v33 = vrot.slane %v12011_v47, 1 }
 0x31f   : > { %v7739_v59 = vpop.f32.mrf.mxu1  ;;  %v8189_v48 = vpop.f32.mrf.mxu0  ;;  %v12020_v19 = vshrl.u32 %v19282_v38, 16  ;;  %v12023_v41 = vshll.u32 %v19282_v38, 16  ;;  %v11486_v20 = vrot.slane %v21489_v29, 1  ;;  %v19283_v38 = vld [vmem:[#allocation9 + $0x5e8] sm:$0xff]  }
 0x320   : > { %v21486_v63 = vadd.f32 %v17989_v40, %v7784_v60  ;;  %v7782_v12 = vadd.f32 %v7739_v59, %v21195_v5  ;;  %v12008_v59 = vor.u32 %v12007_v56, %v12004_v53  ;;  %v21515_v29 = vor.u32 %v12016_v52, %v12013_v33  ;;  %v19288_v53 = vld [vmem:[#allocation2 + $0xa8] sm:$0xff]  }
 0x321   : > { %v17942_v4 = vpop.f32.mrf.mxu1  ;;  %v17990_v21 = vpop.f32.mrf.mxu0 }
 0x322   : > { %v21495_v11 = vadd.f32 %v8189_v48, %v7782_v12  ;;  %v7785_v18 = vadd.f32 %v17942_v4, %v23283_v31  ;;  %v21512_v48 = vld [vmem:[#allocation2 + $0x98] sm:$0xff]   ;;  %v11488_v12 = vrot.slane %v21501_v10, 1  ;;  %v11487_v31 = vsel %vm1657_vm1, %v11484_v43, %v11486_v20  ;;  %v21572_v10 = vld [vmem:[#allocation2 + $0xc0] sm:$0xff]  }
 0x323   : > { %v7742_v5 = vpop.f32.mrf.mxu1  ;;  %v8192_v36 = vpop.f32.mrf.mxu0  ;;  %v19284_v4 = vld [vmem:[#allocation9 + $0x628] sm:$0xff]  }
 0x324   : > { %v21503_v3 = vadd.f32 %v17990_v21, %v7785_v18  ;;  %v7783_v9 = vadd.f32 %v7742_v5, %v21212_v2  ;;  %v12032_v2 = vshll.u32 %v19286_v62, 16  ;;  %v12031_v18 = vrot.slane %v12029_v6, 1  ;;  %v23284_v5 = vld [vmem:[#allocation23_spill] sm:$0xff]  ;;  %v14474_v6 = vld [vmem:[#allocation2 + $0x34] sm:$0x8] }
 0x325   : > { %v18009_v40 = vpop.f32.mrf.mxu1  ;;  %v18057_v60 = vpop.f32.mrf.mxu0  ;;  %18296 = vmatmul.mubr.bf16.vlgmr.msra.gmra.mxu1 %v11483_v16  ;;  %18344 = vmatmul.mubr.bf16.vlgmr.msra.gmra.mxu0 %v11991_v39  ;;  %v21520_v16 = vld [vmem:[#allocation2 + $0xa0] sm:$0xff]   ;;  %v11489_v43 = vsel %vm1657_vm1, %v11486_v20, %v11488_v12 }
 0x326   : > { %v21507_v17 = vadd.f32 %v8192_v36, %v7783_v9  ;;  %v8656_v23 = vadd.f32 %v18009_v40, %v21220_v58  ;;  %18376 = vmatpush3.bf16.msra.mxu1 %v21343_v1  ;;  %18424 = vmatpush3.bf16.msra.mxu0 %v21345_v61  ;;  %v12022_v1 = vrot.slane %v12020_v19, 1  ;;  %v12025_v61 = vrot.slane %v12023_v41, 2  ;;  %v19289_v41 = vld [vmem:[#allocation9 + $0x5e0] sm:$0xff]  }
 0x327   : > { %v8527_v47 = vpop.f32.mrf.mxu1  ;;  %v9113_v45 = vpop.f32.mrf.mxu0  ;;  %18299 = vmatprep.mubr.bf16.mxu1 %v11485_v15  ;;  %18347 = vmatprep.mubr.bf16.mxu0 %v12000_v7  ;;  %v12009_v15 = vsel %vm2632_vm2, %v21484_v14, %v12008_v59  ;;  %v21528_v7 = vld [vmem:[#allocation2 + $0xb0] sm:$0xff]   ;;  %v12018_v9 = vsel %vm2632_vm2, %v12008_v59, %v21515_v29  ;;  %v11490_v19 = vrot.slane %v21512_v48, 1  ;;  %v11492_v40 = vrot.slane %v21520_v16, 1 }
 0x328   : > { %v21517_v21 = vadd.f32 %v18057_v60, %v8656_v23  ;;  %v8654_v58 = vadd.f32 %v8527_v47, %v21229_v54  ;;  %18377 = vmatprep.subr.bf16.mxu1 %v19277_v44  ;;  %18425 = vmatprep.subr.bf16.mxu0 %v19278_v8  ;;  %v12034_v54 = vrot.slane %v12032_v2, 2  ;;  %v19290_v60 = vld [vmem:[#allocation9 + $0x620] sm:$0xff]   ;;  %v12038_v59 = vshrl.u32 %v19288_v53, 16 }
 0x329   : > { %v18010_v39 = vpop.f32.mrf.mxu1  ;;  %v18058_v62 = vpop.f32.mrf.mxu0  ;;  %v21540_v23 = vld [vmem:[#allocation2 + $0x38] sm:$0xff]   ;;  %v12041_v48 = vshll.u32 %v19288_v53, 16  ;;  %v21551_v53 = vld [vmem:[#allocation2 + $0xa8] sm:$0xff]  }
 0x32a   : > { %v21523_v56 = vadd.f32 %v9113_v45, %v8654_v58  ;;  %v8657_v36 = vadd.f32 %v18010_v39, %v23284_v5  ;;  %18378 = vmatpush3.bf16.msra.mxu1 %v19277_v44  ;;  %18426 = vmatpush3.bf16.msra.mxu0 %v19278_v8  ;;  %v12026_v8 = vor.u32 %v12025_v61, %v12022_v1  ;;  %v16545_v47 = vunpack.c.l.bf16 %v21540_v23  ;;  %v21549_v39 = vld [vmem:[#allocation2 + $0x40] sm:$0xff]  }
 0x32b   : > { %v8530_v33 = vpop.f32.mrf.mxu1  ;;  %v9116_v52 = vpop.f32.mrf.mxu0  ;;  %18379 = vmatprep.subr.bf16.mxu1 %v19283_v38  ;;  %18427 = vmatprep.subr.bf16.mxu0 %v19284_v4  ;;  %v14507_v45 = vunpack.c.l.bf16 %v14474_v6  ;;  %v21546_v1 = vor.u32 %v12034_v54, %v12031_v18  ;;  %v12047_v61 = vshrl.u32 %v21528_v7, 16  ;;  %v12050_v5 = vshll.u32 %v21528_v7, 16  ;;  %v19295_v54 = vld [vmem:[#allocation9 + $0x5d8] sm:$0xff]  }
 0x32c   : > { %v21536_v14 = vadd.f32 %v18058_v62, %v8657_v36  ;;  %v8655_v44 = vadd.f32 %v8530_v33, %v21250_v27  ;;  %v21554_v36 = vld [vmem:[#allocation2 + $0xb8] sm:$0xff]   ;;  %v12040_v7 = vrot.slane %v12038_v59, 1  ;;  %v19644_v6 = vmov 127  }
 0x32d   : > { %v18013_v20 = vpop.f32.mrf.mxu1  ;;  %v18061_v2 = vpop.f32.mrf.mxu0  ;;  %18300 = vmatmul.mubr.bf16.gmra.mxu1 %v11487_v31  ;;  %18348 = vmatmul.mubr.bf16.gmra.mxu0 %v12009_v15  ;;  %v18722_v15 = vpack.i.bf16 %v16545_v47, %v14507_v45  ;;  %v12049_v47 = vrot.slane %v12047_v61, 1  ;;  %v21570_v45 = vld [vmem:[#allocation2 + $0xb8] sm:$0xff]  }
 0x32e   : > { %v21543_v58 = vadd.f32 %v9116_v52, %v8655_v44  ;;  %v8660_v27 = vadd.f32 %v18013_v20, %v21258_v46  ;;  %18303 = vmatprep.mubr.bf16.mxu1 %v11489_v43  ;;  %18351 = vmatprep.mubr.bf16.mxu0 %v12018_v9  ;;  %v16549_v46 = vunpack.c.l.bf16 %v21549_v39  ;;  %v19296_v52 = vld [vmem:[#allocation9 + $0x618] sm:$0xff]   ;;  %v12043_v9 = vrot.slane %v12041_v48, 2 }
 0x32f   : > { %v8543_v62 = vpop.f32.mrf.mxu1  ;;  %v9129_v31 = vpop.f32.mrf.mxu0  ;;  %18380 = vmatpush3.bf16.msra.mxu1 %v19283_v38  ;;  %18428 = vmatpush3.bf16.msra.mxu0 %v19284_v4  ;;  %v11491_v4 = vsel %vm1657_vm1, %v11488_v12, %v11490_v19  ;;  %v21563_v44 = vld [vmem:[#allocation2 + $0xb0] sm:$0xff]   ;;  %v11493_v48 = vsel %vm1657_vm1, %v11490_v19, %v11492_v40  ;;  %v11494_v19 = vrot.slane %v21551_v53, 1 }
 0x330   : > { %v21557_v33 = vadd.f32 %v18061_v2, %v8660_v27  ;;  %v8658_v18 = vadd.f32 %v8543_v62, %v21267_v51  ;;  %18381 = vmatprep.subr.bf16.mxu1 %v19289_v41  ;;  %18429 = vmatprep.subr.bf16.mxu0 %v19290_v60  ;;  %v12027_v2 = vsel %vm2632_vm2, %v21515_v29, %v12026_v8  ;;  %v19301_v29 = vld [vmem:[#allocation9 + $0x5d0] sm:$0xff]  }
 0x331   : > { %v18014_v43 = vpop.f32.mrf.mxu1  ;;  %v18062_v38 = vpop.f32.mrf.mxu0  ;;  %18727 = vset.pattern.permute.xlu1 %v19644_v6  ;;  %18721 = vset.pattern.permute.xlu0 %v19644_v6  ;;  %v12036_v27 = vsel %vm2632_vm2, %v12026_v8, %v21546_v1  ;;  %v16550_v8 = vunpack.c.h.bf16 %v21549_v39  ;;  %v12065_v6 = vshrl.u32 %v21572_v10, 16  ;;  %v12068_v39 = vshll.u32 %v21572_v10, 16  ;;  %v21604_v10 = vld [vmem:[#allocation2 + $0xc0] sm:$0xff]  }
 0x332   : > { %v21565_v20 = vadd.f32 %v9129_v31, %v8658_v18  ;;  %v8661_v51 = vadd.f32 %v18014_v43, %v21279_v22  ;;  %14589 = vperm.xlu1 %18727, %v16549_v46   ;;  %18723 = vperm.xlu0 %18721, %v18722_v15   ;;  %v12052_v22 = vrot.slane %v12050_v5, 2  ;;  %v12056_v31 = vshrl.u32 %v21554_v36, 16  ;;  %v19302_v46 = vld [vmem:[#allocation9 + $0x610] sm:$0xff]  }
 0x333   : > { %v8546_v12 = vpop.f32.mrf.mxu1  ;;  %v9132_v59 = vpop.f32.mrf.mxu0  ;;  %18382 = vmatpush3.bf16.msra.mxu1 %v19289_v41  ;;  %18430 = vmatpush3.bf16.msra.mxu0 %v19290_v60  ;;  %v12059_v41 = vshll.u32 %v21554_v36, 16  ;;  %v16546_v60 = vunpack.c.h.bf16 %v21540_v23  ;;  %v21595_v23 = vld [vmem:[#allocation2 + $0xc8] sm:$0xff]  }
 0x334   : > { %v21579_v61 = vadd.f32 %v18062_v38, %v8661_v51  ;;  %v8659_v62 = vadd.f32 %v8546_v12, %v21284_v0  ;;  %18383 = vmatprep.subr.bf16.mxu1 %v19295_v54  ;;  %18431 = vmatprep.subr.bf16.mxu0 %v19296_v52  ;;  %v23285_v0 = vld [vmem:[#allocation25_spill] sm:$0xff]  ;;  %v12044_v38 = vor.u32 %v12043_v9, %v12040_v7  ;;  %v11498_v7 = vrot.slane %v21570_v45, 1 }
 0x335   : > { %v18017_v15 = vpop.f32.mrf.mxu1  ;;  %v18065_v18 = vpop.f32.mrf.mxu0  ;;  %18304 = vmatmul.mubr.bf16.gmra.mxu1 %v11491_v4  ;;  %18352 = vmatmul.mubr.bf16.gmra.mxu0 %v12027_v2  ;;  %v11496_v2 = vrot.slane %v21563_v44, 1  ;;  %v21592_v53 = vor.u32 %v12052_v22, %v12049_v47  ;;  %v12058_v9 = vrot.slane %v12056_v31, 1  ;;  %v21606_v22 = vld [vmem:[#allocation2 + $0xd0] sm:$0xff]   ;;  %v16611_v45 = vld [vmem:[#allocation2 + $0x58] sm:$0xff]  }
 0x336   : > { %v21587_v5 = vadd.f32 %v9132_v59, %v8659_v62  ;;  %v8664_v43 = vadd.f32 %v18017_v15, %v23285_v0  ;;  %18307 = vmatprep.mubr.bf16.mxu1 %v11493_v48  ;;  %18355 = vmatprep.mubr.bf16.mxu0 %v12036_v27  ;;  %v19307_v59 = vld [vmem:[#allocation9 + $0x5c8] sm:$0xff]   ;;  %v12045_v31 = vsel %vm2632_vm2, %v21546_v1, %v12044_v38  ;;  %v12067_v15 = vrot.slane %v12065_v6, 1  ;;  %v19314_v6 = vld [vmem:[#allocation9 + $0x600] sm:$0xff]  }
 0x337   : > { %v8559_v51 = vpop.f32.mrf.mxu1  ;;  %v9145_v4 = vpop.f32.mrf.mxu0  ;;  %18384 = vmatpush3.bf16.msra.mxu1 %v19295_v54  ;;  %18432 = vmatpush3.bf16.msra.mxu0 %v19296_v52  ;;  %v19308_v48 = vld [vmem:[#allocation9 + $0x608] sm:$0xff]   ;;  %v11495_v54 = vsel %vm1657_vm1, %v11492_v40, %v11494_v19  ;;  %v12061_v52 = vrot.slane %v12059_v41, 2  ;;  %v11497_v40 = vsel %vm1657_vm1, %v11494_v19, %v11496_v2  ;;  %v12054_v41 = vsel %vm2632_vm2, %v12044_v38, %v21592_v53 }
 0x338   : > { %v21597_v36 = vadd.f32 %v18065_v18, %v8664_v43  ;;  %v8662_v12 = vadd.f32 %v8559_v51, %v21309_v28  ;;  %18385 = vmatprep.subr.bf16.mxu1 %v19301_v29  ;;  %18433 = vmatprep.subr.bf16.mxu0 %v19302_v46  ;;  %v16609_v18 = vld [vmem:[#allocation2 + $0x48] sm:$0xff]   ;;  %v12074_v1 = vshrl.u32 %v21595_v23, 16  ;;  %v12077_v38 = vshll.u32 %v21595_v23, 16  ;;  %v21633_v23 = vld [vmem:[#allocation2 + $0xd0] sm:$0xff]  }
 0x339   : > { %v18018_v27 = vpop.f32.mrf.mxu1  ;;  %v18066_v47 = vpop.f32.mrf.mxu0  ;;  %14594 = vperm.xlu1 %18727, %v16550_v8   ;;  %14584 = vperm.xlu0 %18721, %v16546_v60   ;;  %v12070_v8 = vrot.slane %v12068_v39, 2  ;;  %v19313_v60 = vld [vmem:[#allocation9 + $0x5c0] sm:$0xff]   ;;  %v12062_v19 = vor.u32 %v12061_v52, %v12058_v9  ;;  %v16554_v39 = vunpack.c.h.bf16 %v16609_v18 }
 0x33a   : > { %v21608_v28 = vadd.f32 %v9145_v4, %v8662_v12  ;;  %v8665_v62 = vadd.f32 %v18018_v27, %v21324_v13  ;;  %v12083_v27 = vshrl.u32 %v21606_v22, 16 }
 0x33b   : > { %v8562_v0 = vpop.f32.mrf.mxu1  ;;  %v9148_v16 = vpop.f32.mrf.mxu0  ;;  %18386 = vmatpush3.bf16.msra.mxu1 %v19301_v29  ;;  %18434 = vmatpush3.bf16.msra.mxu0 %v19302_v46  ;;  %v16553_v29 = vunpack.c.l.bf16 %v16609_v18  ;;  %v21631_v52 = vor.u32 %v12070_v8, %v12067_v15  ;;  %v23287_v18 = vld [vmem:[#allocation26_spill] sm:$0xff]  ;;  %v12079_v15 = vrot.slane %v12077_v38, 2 }
 0x33c   : > { %v21618_v43 = vadd.f32 %v18066_v47, %v8665_v62  ;;  %v8663_v13 = vadd.f32 %v8562_v0, %v21329_v26  ;;  %18387 = vmatprep.subr.bf16.mxu1 %v19307_v59  ;;  %18435 = vmatprep.subr.bf16.mxu0 %v19308_v48  ;;  %v21626_v26 = vld [vmem:[#allocation2 + $0xc8] sm:$0xff]   ;;  %v12086_v47 = vshll.u32 %v21606_v22, 16  ;;  %v19306_v8 = vld [vmem:[#allocation2 + $0xd8] sm:$0xff]  }
 0x33d   : > { %v18021_v51 = vpop.f32.mrf.mxu1  ;;  %v18069_v4 = vpop.f32.mrf.mxu0  ;;  %18308 = vmatmul.mubr.bf16.gmra.mxu1 %v11495_v54  ;;  %18356 = vmatmul.mubr.bf16.gmra.mxu0 %v12045_v31  ;;  %v21635_v31 = vld [vmem:[#allocation9 + $0x678] sm:$0xff]  }
 0x33e   : > { %v21623_v46 = vadd.f32 %v9148_v16, %v8663_v13  ;;  %v8668_v12 = vadd.f32 %v18021_v51, %v21338_v24  ;;  %18311 = vmatprep.mubr.bf16.mxu1 %v11497_v40  ;;  %18359 = vmatprep.mubr.bf16.mxu0 %v12054_v41  ;;  %v12076_v16 = vrot.slane %v12074_v1, 1  ;;  %v21640_v22 = vld [vmem:[#allocation9 + $0x6b8] sm:$0xff]   ;;  %v23288_v51 = vld [vmem:[#allocation27_spill] sm:$0xff] }
 0x33f   : > { %v8575_v62 = vpop.f32.mrf.mxu1  ;;  %v9161_v54 = vpop.f32.mrf.mxu0  ;;  %18388 = vmatpush3.bf16.msra.mxu1 %v19307_v59  ;;  %18436 = vmatpush3.bf16.msra.mxu0 %v19308_v48  ;;  %v16610_v40 = vld [vmem:[#allocation2 + $0x50] sm:$0xff]   ;;  %v11499_v59 = vsel %vm1657_vm1, %v11496_v2, %v11498_v7  ;;  %v12063_v48 = vsel %vm2632_vm2, %v21592_v53, %v12062_v19  ;;  %v12072_v2 = vsel %vm2632_vm2, %v12062_v19, %v21631_v52  ;;  %v19310_v53 = vld [vmem:[#allocation2 + $0xe0] sm:$0xff]  }
 0x340   : > { %v21637_v24 = vadd.f32 %v18069_v4, %v8668_v12  ;;  %v8666_v0 = vadd.f32 %v8575_v62, %v23287_v18  ;;  %18389 = vmatprep.subr.bf16.mxu1 %v19313_v60  ;;  %18437 = vmatprep.subr.bf16.mxu0 %v19314_v6  ;;  %v12085_v12 = vrot.slane %v12083_v27, 1  ;;  %v12088_v62 = vrot.slane %v12086_v47, 2 }
 0x341   : > { %v18022_v41 = vpop.f32.mrf.mxu1  ;;  %v18070_v13 = vpop.f32.mrf.mxu0  ;;  %14604 = vperm.xlu1 %18727, %v16554_v39   ;;  %14599 = vperm.xlu0 %18721, %v16553_v29   ;;  %v16558_v38 = vunpack.c.h.bf16 %v16610_v40  ;;  %v16557_v39 = vunpack.c.l.bf16 %v16610_v40  ;;  %v11502_v47 = vrot.slane %v21626_v26, 1  ;;  %v12080_v19 = vor.u32 %v12079_v15, %v12076_v16  ;;  %v23290_v40 = vld [vmem:[#allocation28_spill] sm:$0xff]  ;;  %v23291_v15 = vld [vmem:[#allocation29_spill] sm:$0xff] }
 0x342   : > { %23286 = vst [vmem:[#allocation24_spill] sm:$0xff] %v21637_v24  ;;  %v21649_v1 = vadd.f32 %v9161_v54, %v8666_v0  ;;  %v8669_v4 = vadd.f32 %v18022_v41, %v23288_v51  ;;  %v23289_v24 = vrot.slane %v21604_v10, 1  ;;  %v21669_v26 = vor.u32 %v12088_v62, %v12085_v12 }
 0x343   : > { %v8578_v18 = vpop.f32.mrf.mxu1  ;;  %v9164_v9 = vpop.f32.mrf.mxu0  ;;  %18390 = vmatpush3.bf16.msra.mxu1 %v19313_v60  ;;  %18438 = vmatpush3.bf16.msra.mxu0 %v19314_v6  ;;  %v23188_v60 = vrot.slane %v21633_v23, 1  ;;  %v12092_v6 = vshrl.u32 %v19306_v8, 16  ;;  %v12101_v51 = vshrl.u32 %v19310_v53, 16  ;;  %v16561_v16 = vunpack.c.l.bf16 %v16611_v45 }
 0x344   : > { %v11501_v44 = vsel %vm1657_vm1, %v11498_v7, %v23289_v24  ;;  %v21659_v29 = vadd.f32 %v18070_v13, %v8669_v4  ;;  %v8667_v27 = vadd.f32 %v8578_v18, %v21383_v30  ;;  %18471 = vmatprep.subr.bf16.mxu1 %v21635_v31  ;;  %18519 = vmatprep.subr.bf16.mxu0 %v21640_v22  ;;  %v12095_v24 = vshll.u32 %v19306_v8, 16 }
 0x345   : > { %v18025_v7 = vpop.f32.mrf.mxu1  ;;  %v18073_v54 = vpop.f32.mrf.mxu0  ;;  %18312 = vmatmul.mubr.bf16.gmra.mxu1 %v11499_v59  ;;  %18360 = vmatmul.mubr.bf16.gmra.mxu0 %v12063_v48  ;;  %v12104_v4 = vshll.u32 %v19310_v53, 16  ;;  %v16562_v59 = vunpack.c.h.bf16 %v16611_v45  ;;  %v11505_v62 = vsel %vm1657_vm1, %v11502_v47, %v23188_v60  ;;  %v12094_v53 = vrot.slane %v12092_v6, 1 }
 0x346   : > { %v21666_v0 = vadd.f32 %v9164_v9, %v8667_v27  ;;  %v8672_v30 = vadd.f32 %v18025_v7, %v23290_v40  ;;  %18315 = vmatprep.mubr.bf16.mxu1 %v11501_v44  ;;  %18363 = vmatprep.mubr.bf16.mxu0 %v12072_v2  ;;  %v16612_v9 = vld [vmem:[#allocation2 + $0x60] sm:$0xff]   ;;  %v23292_v44 = vrot.slane %v21604_v10, 1  ;;  %v19305_v2 = vld [vmem:[#allocation2 + $0xd8] sm:$0xff]   ;;  %v12081_v7 = vsel %vm2632_vm2, %v21631_v52, %v12080_v19  ;;  %v19312_v10 = vld [vmem:[#allocation2 + $0xe8] ss:$0 sps:$4 sm:$0x33]  }
 0x347   : > { %v8591_v41 = vpop.f32.mrf.mxu1  ;;  %v9177_v13 = vpop.f32.mrf.mxu0  ;;  %14614 = vperm.xlu1 %18727, %v16558_v38   ;;  %14609 = vperm.xlu0 %18721, %v16557_v39   ;;  %v12097_v38 = vrot.slane %v12095_v24, 2  ;;  %v16566_v6 = vunpack.c.h.bf16 %v16612_v9  ;;  %v16565_v24 = vunpack.c.l.bf16 %v16612_v9 }
 0x348   : > { %v21671_v48 = vadd.f32 %v18073_v54, %v8672_v30  ;;  %v8670_v8 = vadd.f32 %v8591_v41, %v23291_v15  ;;  %v11503_v12 = vsel %vm1657_vm1, %v23292_v44, %v11502_v47  ;;  %v12090_v54 = vsel %vm2632_vm2, %v12080_v19, %v21669_v26  ;;  %v21687_v41 = vld [vmem:[#allocation2 + $0xe0] sm:$0xff]  }
 0x349   : > { %v18026_v18 = vpop.f32.mrf.mxu1  ;;  %v18074_v27 = vpop.f32.mrf.mxu0  ;;  %v12103_v15 = vrot.slane %v12101_v51, 1  ;;  %v12106_v47 = vrot.slane %v12104_v4, 2  ;;  %v11506_v19 = vrot.slane %v19305_v2, 1  ;;  %v12098_v44 = vor.u32 %v12097_v38, %v12094_v53  ;;  %v16614_v53 = vld [vmem:[#allocation2 + $0x70] sm:$0xff]  }
 0x34a   : > { %v21680_v39 = vadd.f32 %v9177_v13, %v8670_v8  ;;  %v8673_v45 = vadd.f32 %v18026_v18, %v21420_v35  ;;  %v16613_v8 = vld [vmem:[#allocation2 + $0x68] sm:$0xff]   ;;  %v12110_v4 = vshrl.u32 %v19312_v10, 16 }
 0x34b   : > { %v8594_v40 = vpop.f32.mrf.mxu1  ;;  %v9180_v30 = vpop.f32.mrf.mxu0  ;;  %14624 = vperm.xlu1 %18727, %v16562_v59   ;;  %14619 = vperm.xlu0 %18721, %v16561_v16   ;;  %v12113_v59 = vshll.u32 %v19312_v10, 16  ;;  %v12099_v10 = vsel %vm2632_vm2, %v21669_v26, %v12098_v44  ;;  %v16574_v26 = vunpack.c.h.bf16 %v16614_v53 }
 0x34c   : > { %v21689_v13 = vadd.f32 %v18074_v27, %v8673_v45  ;;  %v8671_v35 = vadd.f32 %v8594_v40, %v21426_v50  ;;  %v11508_v27 = vrot.slane %v21687_v41, 1  ;;  %v12107_v50 = vor.u32 %v12106_v47, %v12103_v15  ;;  %v19315_v40 = vld [vmem:[#allocation2 + $0x68] sm:$0xfc]   ;;  %v19311_v47 = vld [vmem:[#allocation2 + $0xe8] ss:$0 sps:$4 sm:$0x11]  }
 0x34d   : > { %v18029_v52 = vpop.f32.mrf.mxu1  ;;  %v18077_v18 = vpop.f32.mrf.mxu0  ;;  %18316 = vmatmul.mubr.bf16.gmra.mxu1 %v11503_v12  ;;  %18364 = vmatmul.mubr.bf16.gmra.mxu0 %v12081_v7  ;;  %v16570_v45 = vunpack.c.h.bf16 %v16613_v8  ;;  %v16569_v12 = vunpack.c.l.bf16 %v16613_v8 }
 0x34e   : > { %v21692_v60 = vadd.f32 %v9180_v30, %v8671_v35  ;;  %v8676_v51 = vadd.f32 %v18029_v52, %v21432_v37  ;;  %18319 = vmatprep.mubr.bf16.mxu1 %v11505_v62  ;;  %18367 = vmatprep.mubr.bf16.mxu0 %v12090_v54  ;;  %v23293_v62 = vrot.slane %v21633_v23, 1  ;;  %v21704_v30 = vld [vmem:[#allocation2 + $0x70] sm:$0xff]   ;;  %v11509_v8 = vsel %vm1657_vm1, %v11506_v19, %v11508_v27 }
 0x34f   : > { %v8607_v16 = vpop.f32.mrf.mxu1  ;;  %v9193_v9 = vpop.f32.mrf.mxu0  ;;  %14634 = vperm.xlu1 %18727, %v16566_v6   ;;  %14629 = vperm.xlu0 %18721, %v16565_v24   ;;  %v12112_v6 = vrot.slane %v12110_v4, 1  ;;  %v12108_v23 = vsel %vm2632_vm2, %v12098_v44, %v12107_v50  ;;  %v19317_v52 = vld [vmem:[#allocation2 + $0x6c] sm:$0xfc]  }
 0x350   : > { %v21696_v7 = vadd.f32 %v18077_v18, %v8676_v51  ;;  %v8674_v2 = vadd.f32 %v8607_v16, %v21441_v25  ;;  %v11507_v54 = vsel %vm1657_vm1, %v23293_v62, %v11506_v19  ;;  %v12115_v25 = vrot.slane %v12113_v59, 2  ;;  %v21711_v18 = vld [vmem:[#allocation2 + $0x74] sm:$0xff]  }
 0x351   : > { %v18030_v38 = vpop.f32.mrf.mxu1  ;;  %v18078_v37 = vpop.f32.mrf.mxu0  ;;  %v16573_v51 = vunpack.c.l.bf16 %v16614_v53  ;;  %v12573_v19 = vrot.slane %v21704_v30, 2  ;;  %v13059_v62 = vrot.slane %v19317_v52, 2  ;;  %v19320_v52 = vld [vmem:[#allocation2 + $0x7c] sm:$0xff]  }
 0x352   : > { %v21706_v41 = vadd.f32 %v9193_v9, %v8674_v2  ;;  %v8677_v15 = vadd.f32 %v18030_v38, %v21451_v49  ;;  %v16615_v9 = vld [vmem:[#allocation2 + $0x78] sm:$0xff]   ;;  %v12572_v2 = vrot.slane %v19315_v40, 2 }
 0x353   : > { %v8610_v24 = vpop.f32.mrf.mxu1  ;;  %v9196_v35 = vpop.f32.mrf.mxu0  ;;  %14644 = vperm.xlu1 %18727, %v16570_v45   ;;  %14639 = vperm.xlu0 %18721, %v16569_v12   ;;  %v11510_v45 = vrot.slane %v19311_v47, 1  ;;  %v12116_v12 = vor.u32 %v12115_v25, %v12112_v6 }
 0x354   : > { %v21713_v16 = vadd.f32 %v18078_v37, %v8677_v15  ;;  %v8675_v49 = vadd.f32 %v8610_v24, %v21455_v57  ;;  %v13060_v57 = vrot.slane %v21711_v18, 2  ;;  %v16616_v24 = vld [vmem:[#allocation2 + $0x80] sm:$0xff]  }
 0x355   : > { %v18033_v4 = vpop.f32.mrf.mxu1  ;;  %v18081_v59 = vpop.f32.mrf.mxu0  ;;  %18320 = vmatmul.mubr.bf16.gmra.mxu1 %v11507_v54  ;;  %18368 = vmatmul.mubr.bf16.gmra.mxu0 %v12099_v10  ;;  %v16578_v54 = vunpack.c.h.bf16 %v16615_v9  ;;  %v16577_v10 = vunpack.c.l.bf16 %v16615_v9  ;;  %v11511_v6 = vsel %vm1657_vm1, %v11508_v27, %v11510_v45  ;;  %v12117_v25 = vsel %vm2632_vm2, %v12107_v50, %v12116_v12  ;;  %v21736_v27 = vld [vmem:[#allocation2 + $0x80] sm:$0xff]  }
 0x356   : > { %v21717_v44 = vadd.f32 %v9196_v35, %v8675_v49  ;;  %v8680_v38 = vadd.f32 %v18033_v4, %v21461_v55  ;;  %18323 = vmatprep.mubr.bf16.mxu1 %v11509_v8  ;;  %18371 = vmatprep.mubr.bf16.mxu0 %v12108_v23  ;;  %v19319_v23 = vld [vmem:[#allocation2 + $0x78] sm:$0xff]   ;;  %v16582_v49 = vunpack.c.h.bf16 %v16616_v24  ;;  %v16581_v9 = vunpack.c.l.bf16 %v16616_v24  ;;  %v21738_v50 = vld [vmem:[#allocation2 + $0x84] sm:$0xff]  }
 0x357   : > { %v8623_v53 = vpop.f32.mrf.mxu1  ;;  %v9209_v37 = vpop.f32.mrf.mxu0  ;;  %14654 = vperm.xlu1 %18727, %v16574_v26   ;;  %14649 = vperm.xlu0 %18721, %v16573_v51   ;;  %v12574_v51 = vsel %vm3239_vm3, %v12572_v2, %v12573_v19 }
 0x358   : > { %v21721_v40 = vadd.f32 %v18081_v59, %v8680_v38  ;;  %v8678_v15 = vadd.f32 %v8623_v53, %v21464_v42  ;;  %v13061_v42 = vsel %vm3239_vm3, %v13059_v62, %v13060_v57  ;;  %v16617_v59 = vld [vmem:[#allocation2 + $0x88] sm:$0xff]   ;;  %v12575_v53 = vrot.slane %v19319_v23, 2 }
 0x359   : > { %v18034_v35 = vpop.f32.mrf.mxu1  ;;  %v18082_v55 = vpop.f32.mrf.mxu0 }
 0x35a   : > { %v21724_v8 = vadd.f32 %v9209_v37, %v8678_v15  ;;  %v8681_v47 = vadd.f32 %v18034_v35, %v21477_v32  ;;  %v13062_v37 = vrot.slane %v19320_v52, 2  ;;  %v12577_v35 = vrot.slane %v21736_v27, 2  ;;  %v19327_v27 = vld [vmem:[#allocation9 + $0x670] sm:$0xff]  }
 0x35b   : > { %v8626_v18 = vpop.f32.mrf.mxu1  ;;  %v9212_v26 = vpop.f32.mrf.mxu0  ;;  %14664 = vperm.xlu1 %18727, %v16578_v54   ;;  %14659 = vperm.xlu0 %18721, %v16577_v10   ;;  %v16585_v10 = vunpack.c.l.bf16 %v16617_v59  ;;  %v12576_v52 = vsel %vm3239_vm3, %v12573_v19, %v12575_v53 }
 0x35c   : > { %v21733_v4 = vadd.f32 %v18082_v55, %v8681_v47  ;;  %v8679_v32 = vadd.f32 %v8626_v18, %v21480_v34  ;;  %v16586_v34 = vunpack.c.h.bf16 %v16617_v59  ;;  %v13064_v55 = vrot.slane %v21738_v50, 2 }
 0x35d   : > { %v18037_v38 = vpop.f32.mrf.mxu1  ;;  %v18085_v45 = vpop.f32.mrf.mxu0  ;;  %18324 = vmatmul.mubr.bf16.gmra.mxu1 %v11511_v6  ;;  %18372 = vmatmul.mubr.bf16.gmra.mxu0 %v12117_v25  ;;  %v19325_v6 = vld [vmem:[#allocation2 + $0x88] sm:$0xff]   ;;  %v13063_v18 = vsel %vm3239_vm3, %v13060_v57, %v13062_v37  ;;  %v12578_v30 = vsel %vm3239_vm3, %v12575_v53, %v12577_v35 }
 0x35e   : > { %v21740_v2 = vadd.f32 %v9212_v26, %v8679_v32  ;;  %v8684_v12 = vadd.f32 %v18037_v38, %v21486_v63  ;;  %18391 = vmatprep.mubr.bf16.mxu1 %v12574_v51  ;;  %18439 = vmatprep.mubr.bf16.mxu0 %v13061_v42  ;;  %v19326_v26 = vld [vmem:[#allocation2 + $0x8c] sm:$0xff]   ;;  %v13065_v19 = vsel %vm3239_vm3, %v13062_v37, %v13064_v55  ;;  %v19328_v57 = vld [vmem:[#allocation9 + $0x6b0] sm:$0xff]   ;;  %v12579_v38 = vrot.slane %v19325_v6, 2 }
 0x35f   : > { %v8639_v62 = vpop.f32.mrf.mxu1  ;;  %v9225_v54 = vpop.f32.mrf.mxu0  ;;  %14674 = vperm.xlu1 %18727, %v16582_v49   ;;  %14669 = vperm.xlu0 %18721, %v16581_v9   ;;  %v16618_v51 = vld [vmem:[#allocation2 + $0x90] sm:$0xff]  }
 0x360   : > { %v21743_v15 = vadd.f32 %v18085_v45, %v8684_v12  ;;  %v8682_v24 = vadd.f32 %v8639_v62, %v21495_v11  ;;  %v21755_v49 = vld [vmem:[#allocation2 + $0x90] sm:$0xff]   ;;  %v16590_v45 = vunpack.c.h.bf16 %v16618_v51  ;;  %v16589_v12 = vunpack.c.l.bf16 %v16618_v51  ;;  %v19332_v51 = vld [vmem:[#allocation2 + $0x9c] sm:$0xff]  }
 0x361   : > { %v18038_v47 = vpop.f32.mrf.mxu1  ;;  %v18086_v63 = vpop.f32.mrf.mxu0  ;;  %v21757_v9 = vld [vmem:[#allocation2 + $0x94] sm:$0xff]  }
 0x362   : > { %v21748_v25 = vadd.f32 %v9225_v54, %v8682_v24  ;;  %v8685_v23 = vadd.f32 %v18038_v47, %v21503_v3  ;;  %v19333_v24 = vld [vmem:[#allocation9 + $0x668] sm:$0xff]  }
 0x363   : > { %v8642_v11 = vpop.f32.mrf.mxu1  ;;  %v9228_v42 = vpop.f32.mrf.mxu0  ;;  %14684 = vperm.xlu1 %18727, %v16586_v34   ;;  %14679 = vperm.xlu0 %18721, %v16585_v10   ;;  %v12581_v34 = vrot.slane %v21755_v49, 2  ;;  %v13068_v10 = vrot.slane %v21757_v9, 2  ;;  %v19334_v47 = vld [vmem:[#allocation9 + $0x6a8] sm:$0xff]   ;;  %v21815_v49 = vld [vmem:[#allocation2 + $0xb0] sm:$0xff]  }
 0x364   : > { %v21759_v32 = vadd.f32 %v18086_v63, %v8685_v23  ;;  %v8683_v3 = vadd.f32 %v8642_v11, %v21507_v17  ;;  %v13066_v17 = vrot.slane %v19326_v26, 2  ;;  %v19331_v26 = vld [vmem:[#allocation2 + $0x98] sm:$0xff]  }
 0x365   : > { %v18105_v50 = vpop.f32.mrf.mxu1  ;;  %v18153_v59 = vpop.f32.mrf.mxu0  ;;  %18392 = vmatmul.mubr.bf16.vlgmr.msra.gmra.mxu1 %v12576_v52  ;;  %18440 = vmatmul.mubr.bf16.vlgmr.msra.gmra.mxu0 %v13063_v18  ;;  %v16619_v11 = vld [vmem:[#allocation2 + $0x98] sm:$0xff]  }
 0x366   : > { %v21764_v62 = vadd.f32 %v9228_v42, %v8683_v3  ;;  %v9729_v54 = vadd.f32 %v18105_v50, %v21517_v21  ;;  %18472 = vmatpush3.bf16.msra.mxu1 %v21635_v31  ;;  %18520 = vmatpush3.bf16.msra.mxu0 %v21640_v22  ;;  %v12580_v22 = vsel %vm3239_vm3, %v12577_v35, %v12579_v38  ;;  %v21817_v9 = vld [vmem:[#allocation2 + $0xb4] sm:$0xff]  }
 0x367   : > { %v9600_v53 = vpop.f32.mrf.mxu1  ;;  %v10050_v37 = vpop.f32.mrf.mxu0  ;;  %18395 = vmatprep.mubr.bf16.mxu1 %v12578_v30  ;;  %18443 = vmatprep.mubr.bf16.mxu0 %v13065_v19  ;;  %v13067_v18 = vsel %vm3239_vm3, %v13064_v55, %v13066_v17  ;;  %v12582_v3 = vsel %vm3239_vm3, %v12579_v38, %v12581_v34  ;;  %v13069_v35 = vsel %vm3239_vm3, %v13066_v17, %v13068_v10  ;;  %v21787_v55 = vld [vmem:[#allocation2 + $0xa4] sm:$0xff]   ;;  %v16594_v38 = vunpack.c.h.bf16 %v16619_v11 }
 0x368   : > { %v21771_v63 = vadd.f32 %v18153_v59, %v9729_v54  ;;  %v9727_v6 = vadd.f32 %v9600_v53, %v21523_v56  ;;  %18473 = vmatprep.subr.bf16.mxu1 %v19327_v27  ;;  %18521 = vmatprep.subr.bf16.mxu0 %v19328_v57  ;;  %v12583_v17 = vrot.slane %v19331_v26, 2  ;;  %v13070_v53 = vrot.slane %v19332_v51, 2  ;;  %v19337_v51 = vld [vmem:[#allocation2 + $0xa8] sm:$0xff]  }
 0x369   : > { %v18106_v21 = vpop.f32.mrf.mxu1  ;;  %v18154_v31 = vpop.f32.mrf.mxu0  ;;  %14694 = vperm.xlu1 %18727, %v16590_v45   ;;  %14689 = vperm.xlu0 %18721, %v16589_v12   ;;  %v16593_v45 = vunpack.c.l.bf16 %v16619_v11 }
 0x36a   : > { %v21775_v23 = vadd.f32 %v10050_v37, %v9727_v6  ;;  %v9730_v52 = vadd.f32 %v18106_v21, %v21536_v14  ;;  %18474 = vmatpush3.bf16.msra.mxu1 %v19327_v27  ;;  %18522 = vmatpush3.bf16.msra.mxu0 %v19328_v57  ;;  %v21785_v14 = vld [vmem:[#allocation2 + $0xa0] sm:$0xff]   ;;  %v19339_v27 = vld [vmem:[#allocation9 + $0x660] sm:$0xff]   ;;  %v13072_v21 = vrot.slane %v21787_v55, 2 }
 0x36b   : > { %v9603_v56 = vpop.f32.mrf.mxu1  ;;  %v10053_v42 = vpop.f32.mrf.mxu0  ;;  %18475 = vmatprep.subr.bf16.mxu1 %v19333_v24  ;;  %18523 = vmatprep.subr.bf16.mxu0 %v19334_v47  ;;  %v19340_v57 = vld [vmem:[#allocation9 + $0x6a0] sm:$0xff]  }
 0x36c   : > { %v21789_v30 = vadd.f32 %v18154_v31, %v9730_v52  ;;  %v9728_v19 = vadd.f32 %v9603_v56, %v21543_v58  ;;  %v12585_v58 = vrot.slane %v21785_v14, 2  ;;  %v19345_v52 = vld [vmem:[#allocation9 + $0x658] sm:$0xff]   ;;  %v21845_v14 = vld [vmem:[#allocation2 + $0xc0] sm:$0xff]  }
 0x36d   : > { %v18109_v50 = vpop.f32.mrf.mxu1  ;;  %v18157_v59 = vpop.f32.mrf.mxu0  ;;  %18396 = vmatmul.mubr.bf16.gmra.mxu1 %v12580_v22  ;;  %18444 = vmatmul.mubr.bf16.gmra.mxu0 %v13067_v18  ;;  %v19338_v56 = vld [vmem:[#allocation2 + $0xac] sm:$0xff]  }
 0x36e   : > { %v21792_v12 = vadd.f32 %v10053_v42, %v9728_v19  ;;  %v9733_v54 = vadd.f32 %v18109_v50, %v21557_v33  ;;  %18399 = vmatprep.mubr.bf16.mxu1 %v12582_v3  ;;  %18447 = vmatprep.mubr.bf16.mxu0 %v13069_v35  ;;  %v19346_v33 = vld [vmem:[#allocation9 + $0x698] sm:$0xff]   ;;  %v16620_v42 = vld [vmem:[#allocation2 + $0xa0] sm:$0xff]   ;;  %v12586_v19 = vsel %vm3239_vm3, %v12583_v17, %v12585_v58 }
 0x36f   : > { %v9616_v37 = vpop.f32.mrf.mxu1  ;;  %v10066_v6 = vpop.f32.mrf.mxu0  ;;  %18476 = vmatpush3.bf16.msra.mxu1 %v19333_v24  ;;  %18524 = vmatpush3.bf16.msra.mxu0 %v19334_v47  ;;  %v12584_v47 = vsel %vm3239_vm3, %v12581_v34, %v12583_v17  ;;  %v19351_v50 = vld [vmem:[#allocation9 + $0x650] sm:$0xff]   ;;  %v16597_v17 = vunpack.c.l.bf16 %v16620_v42 }
 0x370   : > { %v21797_v31 = vadd.f32 %v18157_v59, %v9733_v54  ;;  %v9731_v22 = vadd.f32 %v9616_v37, %v21565_v20  ;;  %18477 = vmatprep.subr.bf16.mxu1 %v19339_v27  ;;  %18525 = vmatprep.subr.bf16.mxu0 %v19340_v57  ;;  %v13071_v20 = vsel %vm3239_vm3, %v13068_v10, %v13070_v53  ;;  %v19352_v59 = vld [vmem:[#allocation9 + $0x690] sm:$0xff]   ;;  %v16598_v54 = vunpack.c.h.bf16 %v16620_v42 }
 0x371   : > { %v18110_v18 = vpop.f32.mrf.mxu1  ;;  %v18158_v11 = vpop.f32.mrf.mxu0  ;;  %14704 = vperm.xlu1 %18727, %v16594_v38   ;;  %14699 = vperm.xlu0 %18721, %v16593_v45   ;;  %v13074_v37 = vrot.slane %v19338_v56, 2 }
 0x372   : > { %v21800_v26 = vadd.f32 %v10066_v6, %v9731_v22  ;;  %v9734_v24 = vadd.f32 %v18110_v18, %v21579_v61  ;;  %v13073_v61 = vsel %vm3239_vm3, %v13070_v53, %v13072_v21  ;;  %v12587_v53 = vrot.slane %v19337_v51, 2 }
 0x373   : > { %v9619_v3 = vpop.f32.mrf.mxu1  ;;  %v10069_v35 = vpop.f32.mrf.mxu0  ;;  %18478 = vmatpush3.bf16.msra.mxu1 %v19339_v27  ;;  %18526 = vmatpush3.bf16.msra.mxu0 %v19340_v57  ;;  %v12589_v22 = vrot.slane %v21815_v49, 2  ;;  %v13076_v18 = vrot.slane %v21817_v9, 2 }
 0x374   : > { %v21819_v34 = vadd.f32 %v18158_v11, %v9734_v24  ;;  %v9732_v10 = vadd.f32 %v9619_v3, %v21587_v5  ;;  %18479 = vmatprep.subr.bf16.mxu1 %v19345_v52  ;;  %18527 = vmatprep.subr.bf16.mxu0 %v19346_v33  ;;  %v19344_v3 = vld [vmem:[#allocation2 + $0xbc] sm:$0xff]  }
 0x375   : > { %v18113_v38 = vpop.f32.mrf.mxu1  ;;  %v18161_v45 = vpop.f32.mrf.mxu0  ;;  %18400 = vmatmul.mubr.bf16.gmra.mxu1 %v12584_v47  ;;  %18448 = vmatmul.mubr.bf16.gmra.mxu0 %v13071_v20  ;;  %v19357_v47 = vld [vmem:[#allocation9 + $0x648] sm:$0xff]  }
 0x376   : > { %v21822_v27 = vadd.f32 %v10069_v35, %v9732_v10  ;;  %v9737_v57 = vadd.f32 %v18113_v38, %v21597_v36  ;;  %18403 = vmatprep.mubr.bf16.mxu1 %v12586_v19  ;;  %18451 = vmatprep.mubr.bf16.mxu0 %v13073_v61  ;;  %v19358_v36 = vld [vmem:[#allocation9 + $0x688] sm:$0xff]   ;;  %v16621_v35 = vld [vmem:[#allocation2 + $0xa8] sm:$0xff]   ;;  %v12590_v10 = vsel %vm3239_vm3, %v12587_v53, %v12589_v22  ;;  %v19363_v38 = vld [vmem:[#allocation9 + $0x640] sm:$0xff]  }
 0x377   : > { %v9632_v6 = vpop.f32.mrf.mxu1  ;;  %v10082_v5 = vpop.f32.mrf.mxu0  ;;  %18480 = vmatpush3.bf16.msra.mxu1 %v19345_v52  ;;  %18528 = vmatpush3.bf16.msra.mxu0 %v19346_v33  ;;  %v12588_v52 = vsel %vm3239_vm3, %v12585_v58, %v12587_v53  ;;  %v19343_v33 = vld [vmem:[#allocation2 + $0xb8] sm:$0xff]   ;;  %v21847_v58 = vld [vmem:[#allocation2 + $0xc4] sm:$0xff]   ;;  %v16601_v53 = vunpack.c.l.bf16 %v16621_v35 }
 0x378   : > { %v21827_v11 = vadd.f32 %v18161_v45, %v9737_v57  ;;  %v9735_v24 = vadd.f32 %v9632_v6, %v21608_v28  ;;  %18481 = vmatprep.subr.bf16.mxu1 %v19351_v50  ;;  %18529 = vmatprep.subr.bf16.mxu0 %v19352_v59  ;;  %v13075_v28 = vsel %vm3239_vm3, %v13072_v21, %v13074_v37  ;;  %v19364_v45 = vld [vmem:[#allocation9 + $0x680] sm:$0xff]   ;;  %v16602_v57 = vunpack.c.h.bf16 %v16621_v35  ;;  %v23294_v6 = vld [vmem:[#allocation24_spill] sm:$0xff] }
 0x379   : > { %v18114_v20 = vpop.f32.mrf.mxu1  ;;  %v18162_v42 = vpop.f32.mrf.mxu0  ;;  %14714 = vperm.xlu1 %18727, %v16598_v54   ;;  %14709 = vperm.xlu0 %18721, %v16597_v17  }
 0x37a   : > { %v21830_v51 = vadd.f32 %v10082_v5, %v9735_v24  ;;  %v9738_v56 = vadd.f32 %v18114_v20, %v21618_v43  ;;  %v13077_v43 = vsel %vm3239_vm3, %v13074_v37, %v13076_v18  ;;  %v12593_v20 = vrot.slane %v21845_v14, 2 }
 0x37b   : > { %v9635_v19 = vpop.f32.mrf.mxu1  ;;  %v10085_v61 = vpop.f32.mrf.mxu0  ;;  %18482 = vmatpush3.bf16.msra.mxu1 %v19351_v50  ;;  %18530 = vmatpush3.bf16.msra.mxu0 %v19352_v59  ;;  %v12591_v50 = vrot.slane %v19343_v33, 2  ;;  %v13078_v59 = vrot.slane %v19344_v3, 2 }
 0x37c   : > { %v21849_v55 = vadd.f32 %v18162_v42, %v9738_v56  ;;  %v9736_v21 = vadd.f32 %v9635_v19, %v21623_v46  ;;  %18483 = vmatprep.subr.bf16.mxu1 %v19357_v47  ;;  %18531 = vmatprep.subr.bf16.mxu0 %v19358_v36  ;;  %v13080_v42 = vrot.slane %v21847_v58, 2 }
 0x37d   : > { %v18117_v54 = vpop.f32.mrf.mxu1  ;;  %v18165_v17 = vpop.f32.mrf.mxu0  ;;  %18404 = vmatmul.mubr.bf16.gmra.mxu1 %v12588_v52  ;;  %18452 = vmatmul.mubr.bf16.gmra.mxu0 %v13075_v28  ;;  %v16622_v28 = vld [vmem:[#allocation2 + $0xb0] sm:$0xff]   ;;  %v12594_v14 = vsel %vm3239_vm3, %v12591_v50, %v12593_v20 }
 0x37e   : > { %v21852_v37 = vadd.f32 %v10085_v61, %v9736_v21  ;;  %v9741_v5 = vadd.f32 %v18117_v54, %v23294_v6  ;;  %18407 = vmatprep.mubr.bf16.mxu1 %v12590_v10  ;;  %18455 = vmatprep.mubr.bf16.mxu0 %v13077_v43  ;;  %v19350_v61 = vld [vmem:[#allocation2 + $0xcc] sm:$0xff]   ;;  %v13081_v58 = vsel %vm3239_vm3, %v13078_v59, %v13080_v42  ;;  %v21873_v54 = vld [vmem:[#allocation2 + $0xd4] sm:$0xff]   ;;  %v16605_v49 = vunpack.c.l.bf16 %v16622_v28 }
 0x37f   : > { %v9648_v24 = vpop.f32.mrf.mxu1  ;;  %v10098_v46 = vpop.f32.mrf.mxu0  ;;  %18484 = vmatpush3.bf16.msra.mxu1 %v19357_v47  ;;  %18532 = vmatpush3.bf16.msra.mxu0 %v19358_v36  ;;  %v12592_v47 = vsel %vm3239_vm3, %v12589_v22, %v12591_v50  ;;  %v13079_v36 = vsel %vm3239_vm3, %v13076_v18, %v13078_v59  ;;  %v21871_v21 = vld [vmem:[#allocation2 + $0xd0] sm:$0xff]   ;;  %v13084_v59 = vrot.slane %v21873_v54, 2 }
 0x380   : > { %v21857_v56 = vadd.f32 %v18165_v17, %v9741_v5  ;;  %v9739_v52 = vadd.f32 %v9648_v24, %v21649_v1  ;;  %18485 = vmatprep.subr.bf16.mxu1 %v19363_v38  ;;  %18533 = vmatprep.subr.bf16.mxu0 %v19364_v45  ;;  %v19349_v1 = vld [vmem:[#allocation2 + $0xc8] sm:$0xff]   ;;  %v13082_v5 = vrot.slane %v19350_v61, 2  ;;  %v12597_v50 = vrot.slane %v21871_v21, 2 }
 0x381   : > { %v18118_v35 = vpop.f32.mrf.mxu1  ;;  %v18166_v19 = vpop.f32.mrf.mxu0  ;;  %14724 = vperm.xlu1 %18727, %v16602_v57   ;;  %14719 = vperm.xlu0 %18721, %v16601_v53   ;;  %v12595_v6 = vrot.slane %v19349_v1, 2  ;;  %v19366_v1 = vld [vmem:[#allocation2 + $0x74] sm:$0xff]  }
 0x382   : > { %v21860_v33 = vadd.f32 %v10098_v46, %v9739_v52  ;;  %v9742_v3 = vadd.f32 %v18118_v35, %v21659_v29  ;;  %v16606_v29 = vunpack.c.h.bf16 %v16622_v28  ;;  %v19355_v28 = vld [vmem:[#allocation2 + $0xd8] sm:$0xff]   ;;  %v19365_v35 = vld [vmem:[#allocation2 + $0x6c] sm:$0xfc]  }
 0x383   : > { %v9651_v10 = vpop.f32.mrf.mxu1  ;;  %v10101_v43 = vpop.f32.mrf.mxu0  ;;  %18486 = vmatpush3.bf16.msra.mxu1 %v19363_v38  ;;  %18534 = vmatpush3.bf16.msra.mxu0 %v19364_v45 }
 0x384   : > { %v21875_v22 = vadd.f32 %v18166_v19, %v9742_v3  ;;  %v9740_v9 = vadd.f32 %v9651_v10, %v21666_v0 }
 0x385   : > { %v18121_v18 = vpop.f32.mrf.mxu1  ;;  %v18169_v17 = vpop.f32.mrf.mxu0  ;;  %18408 = vmatmul.mubr.bf16.gmra.mxu1 %v12592_v47  ;;  %18456 = vmatmul.mubr.bf16.gmra.mxu0 %v13079_v36  ;;  %v12596_v47 = vsel %vm3239_vm3, %v12593_v20, %v12595_v6  ;;  %v13083_v36 = vsel %vm3239_vm3, %v13080_v42, %v13082_v5  ;;  %v12599_v20 = vrot.slane %v19355_v28, 2 }
 0x386   : > { %v21878_v57 = vadd.f32 %v10101_v43, %v9740_v9  ;;  %v9745_v53 = vadd.f32 %v18121_v18, %v21671_v48  ;;  %18411 = vmatprep.mubr.bf16.mxu1 %v12594_v14  ;;  %18459 = vmatprep.mubr.bf16.mxu0 %v13081_v58  ;;  %v19356_v48 = vld [vmem:[#allocation2 + $0xdc] sm:$0xff]   ;;  %v12598_v43 = vsel %vm3239_vm3, %v12595_v6, %v12597_v50  ;;  %v21895_v58 = vld [vmem:[#allocation2 + $0xe4] sm:$0xff]   ;;  %v13550_v9 = vshll.u32 %v19365_v35, 16 }
 0x387   : > { %v9664_v38 = vpop.f32.mrf.mxu1  ;;  %v10114_v45 = vpop.f32.mrf.mxu0  ;;  %14734 = vperm.xlu1 %18727, %v16606_v29   ;;  %14729 = vperm.xlu0 %18721, %v16605_v49   ;;  %v21893_v14 = vld [vmem:[#allocation2 + $0xe0] sm:$0xff]   ;;  %v13086_v42 = vrot.slane %v19356_v48, 2  ;;  %v13547_v49 = vshrl.u32 %v19365_v35, 16  ;;  %v13558_v6 = vshll.u32 %v19366_v1, 16  ;;  %v12600_v48 = vsel %vm3239_vm3, %v12597_v50, %v12599_v20  ;;  %v19367_v50 = vld [vmem:[#allocation2 + $0x6c] sm:$0xf8]  }
 0x388   : > { %v21883_v0 = vadd.f32 %v18169_v17, %v9745_v53  ;;  %v9743_v24 = vadd.f32 %v9664_v38, %v21680_v39  ;;  %v13085_v39 = vsel %vm3239_vm3, %v13082_v5, %v13084_v59  ;;  %v13555_v53 = vshrl.u32 %v19366_v1, 16  ;;  %v19361_v35 = vld [vmem:[#allocation2 + $0xe8] ss:$0 sps:$4 sm:$0x33]  }
 0x389   : > { %v18122_v46 = vpop.f32.mrf.mxu1  ;;  %v18170_v52 = vpop.f32.mrf.mxu0 }
 0x38a   : > { %v21886_v19 = vadd.f32 %v10114_v45, %v9743_v24  ;;  %v9746_v3 = vadd.f32 %v18122_v46, %v21689_v13  ;;  %v13088_v45 = vrot.slane %v21895_v58, 2 }
 0x38b   : > { %v9667_v61 = vpop.f32.mrf.mxu1  ;;  %v10117_v10 = vpop.f32.mrf.mxu0 }
 0x38c   : > { %v21897_v21 = vadd.f32 %v18170_v52, %v9746_v3  ;;  %v9744_v54 = vadd.f32 %v9667_v61, %v21692_v60  ;;  %v12601_v60 = vrot.slane %v21893_v14, 2  ;;  %v13549_v3 = vrot.slane %v13547_v49, 2 }
 0x38d   : > { %v18125_v13 = vpop.f32.mrf.mxu1  ;;  %v18173_v29 = vpop.f32.mrf.mxu0  ;;  %18412 = vmatmul.mubr.bf16.gmra.mxu1 %v12596_v47  ;;  %18460 = vmatmul.mubr.bf16.gmra.mxu0 %v13083_v36  ;;  %v13552_v47 = vrot.slane %v13550_v9, 3  ;;  %v19369_v36 = vld [vmem:[#allocation2 + $0x7c] sm:$0xff]  }
 0x38e   : > { %v21900_v18 = vadd.f32 %v10117_v10, %v9744_v54  ;;  %v9749_v17 = vadd.f32 %v18125_v13, %v21696_v7  ;;  %18415 = vmatprep.mubr.bf16.mxu1 %v12598_v43  ;;  %18463 = vmatprep.mubr.bf16.mxu0 %v13085_v39  ;;  %v13087_v7 = vsel %vm3239_vm3, %v13084_v59, %v13086_v42  ;;  %v19362_v10 = vld [vmem:[#allocation2 + $0xec] ss:$0 sps:$4 sm:$0x33]   ;;  %v13557_v43 = vrot.slane %v13555_v53, 2  ;;  %v21915_v13 = vld [vmem:[#allocation2 + $0x74] sm:$0xff]   ;;  %v19371_v59 = vld [vmem:[#allocation2 + $0x84] sm:$0xff]  }
 0x38f   : > { %v9680_v5 = vpop.f32.mrf.mxu1  ;;  %v10130_v38 = vpop.f32.mrf.mxu0  ;;  %v13560_v39 = vrot.slane %v13558_v6, 3  ;;  %v13089_v54 = vsel %vm3239_vm3, %v13086_v42, %v13088_v45  ;;  %v13553_v53 = vor.u32 %v13552_v47, %v13549_v3  ;;  %v13564_v6 = vshrl.u32 %v19369_v36, 16 }
 0x390   : > { %v21905_v24 = vadd.f32 %v18173_v29, %v9749_v17  ;;  %v9747_v46 = vadd.f32 %v9680_v5, %v21706_v41  ;;  %v12602_v41 = vsel %vm3239_vm3, %v12599_v20, %v12601_v60  ;;  %v13567_v5 = vshll.u32 %v19369_v36, 16 }
 0x391   : > { %v18126_v52 = vpop.f32.mrf.mxu1  ;;  %v18174_v28 = vpop.f32.mrf.mxu0  ;;  %v13090_v42 = vrot.slane %v19362_v10, 2  ;;  %v13566_v36 = vrot.slane %v13564_v6, 2  ;;  %v19375_v6 = vld [vmem:[#allocation2 + $0x94] sm:$0xff]  }
 0x392   : > { %v21910_v1 = vadd.f32 %v10130_v38, %v9747_v46  ;;  %v9750_v61 = vadd.f32 %v18126_v52, %v21713_v16  ;;  %v12603_v16 = vrot.slane %v19361_v35, 2  ;;  %v13561_v46 = vor.u32 %v13560_v39, %v13557_v43 }
 0x393   : > { %v9683_v14 = vpop.f32.mrf.mxu1  ;;  %v10133_v58 = vpop.f32.mrf.mxu0  ;;  %v13091_v39 = vsel %vm3239_vm3, %v13088_v45, %v13090_v42 }
 0x394   : > { %v21917_v29 = vadd.f32 %v18174_v28, %v9750_v61  ;;  %v9748_v49 = vadd.f32 %v9683_v14, %v21717_v44  ;;  %v14152_v61 = vrot.slane %v19367_v50, 3  ;;  %v14153_v44 = vrot.slane %v21915_v13, 3 }
 0x395   : > { %v18129_v9 = vpop.f32.mrf.mxu1  ;;  %v18177_v17 = vpop.f32.mrf.mxu0  ;;  %18416 = vmatmul.mubr.bf16.gmra.mxu1 %v12600_v48  ;;  %18464 = vmatmul.mubr.bf16.gmra.mxu0 %v13087_v7  ;;  %v13573_v14 = vshrl.u32 %v19371_v59, 16  ;;  %v13576_v48 = vshll.u32 %v19371_v59, 16  ;;  %v12604_v43 = vsel %vm3239_vm3, %v12601_v60, %v12603_v16  ;;  %v13562_v59 = vsel %vm4214_vm5, %v13553_v53, %v13561_v46 }
 0x396   : > { %v21920_v38 = vadd.f32 %v10133_v58, %v9748_v49  ;;  %v9753_v20 = vadd.f32 %v18129_v9, %v21721_v40  ;;  %18419 = vmatprep.mubr.bf16.mxu1 %v12602_v41  ;;  %18467 = vmatprep.mubr.bf16.mxu0 %v13089_v54  ;;  %v13569_v58 = vrot.slane %v13567_v5, 3  ;;  %v19370_v40 = vld [vmem:[#allocation2 + $0x7c] sm:$0xff]   ;;  %v19373_v54 = vld [vmem:[#allocation2 + $0x8c] sm:$0xff]  }
 0x397   : > { %v9696_v52 = vpop.f32.mrf.mxu1  ;;  %v10146_v28 = vpop.f32.mrf.mxu0  ;;  %v13575_v49 = vrot.slane %v13573_v14, 2  ;;  %v13578_v9 = vrot.slane %v13576_v48, 3  ;;  %v14155_v16 = vrot.slane %v19370_v40, 3 }
 0x398   : > { %v21924_v7 = vadd.f32 %v18177_v17, %v9753_v20  ;;  %v9751_v35 = vadd.f32 %v9696_v52, %v21724_v8  ;;  %v14154_v8 = vsel %vm4821_vm4, %v14152_v61, %v14153_v44  ;;  %v21934_v17 = vld [vmem:[#allocation2 + $0x84] sm:$0xff]   ;;  %v13570_v45 = vor.u32 %v13569_v58, %v13566_v36 }
 0x399   : > { %v18130_v3 = vpop.f32.mrf.mxu1  ;;  %v18178_v47 = vpop.f32.mrf.mxu0  ;;  %v13582_v52 = vshrl.u32 %v19373_v54, 16  ;;  %v13579_v48 = vor.u32 %v13578_v9, %v13575_v49 }
 0x39a   : > { %v21927_v41 = vadd.f32 %v10146_v28, %v9751_v35  ;;  %v9754_v10 = vadd.f32 %v18130_v3, %v21733_v4  ;;  %v13585_v28 = vshll.u32 %v19373_v54, 16  ;;  %v14157_v35 = vrot.slane %v21934_v17, 3 }
 0x39b   : > { %v9699_v50 = vpop.f32.mrf.mxu1  ;;  %v10149_v13 = vpop.f32.mrf.mxu0  ;;  %v13594_v3 = vshll.u32 %v19375_v6, 16  ;;  %v13580_v9 = vsel %vm4214_vm5, %v13570_v45, %v13579_v48 }
 0x39c   : > { %v21936_v5 = vadd.f32 %v18178_v47, %v9754_v10  ;;  %v9752_v4 = vadd.f32 %v9699_v50, %v21740_v2  ;;  %v13591_v2 = vshrl.u32 %v19375_v6, 16  ;;  %v13571_v10 = vsel %vm4214_vm5, %v13561_v46, %v13570_v45  ;;  %v19379_v46 = vld [vmem:[#allocation2 + $0xa4] sm:$0xff]  }
 0x39d   : > { %v18133_v20 = vpop.f32.mrf.mxu1  ;;  %v18181_v60 = vpop.f32.mrf.mxu0  ;;  %18420 = vmatmul.mubr.bf16.gmra.mxu1 %v12604_v43  ;;  %18468 = vmatmul.mubr.bf16.gmra.mxu0 %v13091_v39  ;;  %v19377_v43 = vld [vmem:[#allocation2 + $0x9c] sm:$0xff]   ;;  %v13584_v50 = vrot.slane %v13582_v52, 2  ;;  %v13596_v6 = vrot.slane %v13594_v3, 3 }
 0x39e   : > { %v21939_v42 = vadd.f32 %v10149_v13, %v9752_v4  ;;  %v9757_v53 = vadd.f32 %v18133_v20, %v21743_v15  ;;  %18487 = vmatprep.mubr.bf16.mxu1 %v13562_v59  ;;  %18535 = vmatprep.mubr.bf16.mxu0 %v14154_v8  ;;  %v14156_v15 = vsel %vm4821_vm4, %v14153_v44, %v14155_v16  ;;  %v13587_v13 = vrot.slane %v13585_v28, 3  ;;  %v19374_v59 = vld [vmem:[#allocation2 + $0x8c] sm:$0xff]   ;;  %v21953_v4 = vld [vmem:[#allocation2 + $0x94] sm:$0xff]  }
 0x39f   : > { %v9712_v61 = vpop.f32.mrf.mxu1  ;;  %v10162_v14 = vpop.f32.mrf.mxu0  ;;  %v13593_v17 = vrot.slane %v13591_v2, 2  ;;  %v13603_v52 = vshll.u32 %v19377_v43, 16 }
 0x3a0   : > { %v21943_v47 = vadd.f32 %v18181_v60, %v9757_v53  ;;  %v9755_v36 = vadd.f32 %v9712_v61, %v21748_v25  ;;  %v14158_v25 = vsel %vm4821_vm4, %v14155_v16, %v14157_v35  ;;  %v13600_v53 = vshrl.u32 %v19377_v43, 16 }
 0x3a1   : > { %v18134_v58 = vpop.f32.mrf.mxu1  ;;  %v18182_v40 = vpop.f32.mrf.mxu0  ;;  %v13588_v16 = vor.u32 %v13587_v13, %v13584_v50  ;;  %v14159_v61 = vrot.slane %v19374_v59, 3  ;;  %v13597_v3 = vor.u32 %v13596_v6, %v13593_v17 }
 0x3a2   : > { %v21948_v39 = vadd.f32 %v10162_v14, %v9755_v36  ;;  %v9758_v54 = vadd.f32 %v18134_v58, %v21759_v32  ;;  %v14161_v36 = vrot.slane %v21953_v4, 3  ;;  %v13612_v58 = vshll.u32 %v19379_v46, 16 }
 0x3a3   : > { %v9715_v8 = vpop.f32.mrf.mxu1  ;;  %v10165_v49 = vpop.f32.mrf.mxu0  ;;  %v13589_v13 = vsel %vm4214_vm5, %v13579_v48, %v13588_v16  ;;  %v14160_v59 = vsel %vm4821_vm4, %v14157_v35, %v14159_v61  ;;  %v13598_v6 = vsel %vm4214_vm5, %v13588_v16, %v13597_v3 }
 0x3a4   : > { %v21955_v44 = vadd.f32 %v18182_v40, %v9758_v54  ;;  %v9756_v20 = vadd.f32 %v9715_v8, %v21764_v62  ;;  %v13609_v62 = vshrl.u32 %v19379_v46, 16  ;;  %v13602_v54 = vrot.slane %v13600_v53, 2 }
 0x3a5   : > { %v18201_v60 = vpop.f32.mrf.mxu1  ;;  %v18249_v32 = vpop.f32.mrf.mxu0  ;;  %18488 = vmatmul.mubr.bf16.vlgmr.msra.gmra.mxu1 %v13571_v10  ;;  %18536 = vmatmul.mubr.bf16.vlgmr.msra.gmra.mxu0 %v14156_v15  ;;  %v13605_v8 = vrot.slane %v13603_v52, 3  ;;  %v13614_v46 = vrot.slane %v13612_v58, 3 }
 0x3a6   : > { %v21958_v28 = vadd.f32 %v10165_v49, %v9756_v20  ;;  %v10765_v45 = vadd.f32 %v18201_v60, %v21771_v63  ;;  %18491 = vmatprep.mubr.bf16.mxu1 %v13580_v9  ;;  %18539 = vmatprep.mubr.bf16.mxu0 %v14158_v25  ;;  %v19378_v63 = vld [vmem:[#allocation2 + $0x9c] sm:$0xff]   ;;  %v19381_v9 = vld [vmem:[#allocation2 + $0xac] sm:$0xff]   ;;  %v13611_v4 = vrot.slane %v13609_v62, 2  ;;  %v21972_v20 = vld [vmem:[#allocation2 + $0xa4] sm:$0xff]  }
 0x3a7   : > { %v10636_v14 = vpop.f32.mrf.mxu1  ;;  %v11123_v2 = vpop.f32.mrf.mxu0  ;;  %v19383_v60 = vld [vmem:[#allocation2 + $0xb4] sm:$0xff]   ;;  %v13606_v35 = vor.u32 %v13605_v8, %v13602_v54  ;;  %v14163_v52 = vrot.slane %v19378_v63, 3 }
 0x3a8   : > { %v21962_v40 = vadd.f32 %v18249_v32, %v10765_v45  ;;  %v10763_v10 = vadd.f32 %v10636_v14, %v21775_v23  ;;  %v14162_v23 = vsel %vm4821_vm4, %v14159_v61, %v14161_v36  ;;  %v13618_v61 = vshrl.u32 %v19381_v9, 16 }
 0x3a9   : > { %v18202_v15 = vpop.f32.mrf.mxu1  ;;  %v18250_v43 = vpop.f32.mrf.mxu0  ;;  %v13621_v14 = vshll.u32 %v19381_v9, 16  ;;  %v13615_v58 = vor.u32 %v13614_v46, %v13611_v4 }
 0x3aa   : > { %v21965_v49 = vadd.f32 %v11123_v2, %v10763_v10  ;;  %v10766_v50 = vadd.f32 %v18202_v15, %v21789_v30  ;;  %v14165_v10 = vrot.slane %v21972_v20, 3  ;;  %v13630_v15 = vshll.u32 %v19383_v60, 16 }
 0x3ab   : > { %v10639_v25 = vpop.f32.mrf.mxu1  ;;  %v11126_v17 = vpop.f32.mrf.mxu0  ;;  %v13616_v46 = vsel %vm4214_vm5, %v13606_v35, %v13615_v58 }
 0x3ac   : > { %v21974_v32 = vadd.f32 %v18250_v43, %v10766_v50  ;;  %v10764_v30 = vadd.f32 %v10639_v25, %v21792_v12  ;;  %v13627_v12 = vshrl.u32 %v19383_v60, 16  ;;  %v13607_v50 = vsel %vm4214_vm5, %v13597_v3, %v13606_v35  ;;  %v19387_v3 = vld [vmem:[#allocation2 + $0xc4] sm:$0xff]  }
 0x3ad   : > { %v18205_v53 = vpop.f32.mrf.mxu1  ;;  %v18253_v48 = vpop.f32.mrf.mxu0  ;;  %18492 = vmatmul.mubr.bf16.gmra.mxu1 %v13589_v13  ;;  %18540 = vmatmul.mubr.bf16.gmra.mxu0 %v14160_v59  ;;  %v19385_v13 = vld [vmem:[#allocation2 + $0xbc] sm:$0xff]   ;;  %v13620_v25 = vrot.slane %v13618_v61, 2  ;;  %v13632_v60 = vrot.slane %v13630_v15, 3 }
 0x3ae   : > { %v21977_v45 = vadd.f32 %v11126_v17, %v10764_v30  ;;  %v10769_v16 = vadd.f32 %v18205_v53, %v21797_v31  ;;  %18495 = vmatprep.mubr.bf16.mxu1 %v13598_v6  ;;  %18543 = vmatprep.mubr.bf16.mxu0 %v14162_v23  ;;  %v14164_v31 = vsel %vm4821_vm4, %v14161_v36, %v14163_v52  ;;  %v13623_v17 = vrot.slane %v13621_v14, 3  ;;  %v19382_v6 = vld [vmem:[#allocation2 + $0xac] sm:$0xff]   ;;  %v21991_v30 = vld [vmem:[#allocation2 + $0xb4] sm:$0xff]  }
 0x3af   : > { %v10652_v2 = vpop.f32.mrf.mxu1  ;;  %v11139_v62 = vpop.f32.mrf.mxu0  ;;  %v13629_v20 = vrot.slane %v13627_v12, 2  ;;  %v13639_v61 = vshll.u32 %v19385_v13, 16 }
 0x3b0   : > { %v21981_v43 = vadd.f32 %v18253_v48, %v10769_v16  ;;  %v10767_v54 = vadd.f32 %v10652_v2, %v21800_v26  ;;  %v14166_v26 = vsel %vm4821_vm4, %v14163_v52, %v14165_v10  ;;  %v13636_v16 = vshrl.u32 %v19385_v13, 16 }
 0x3b1   : > { %v18206_v8 = vpop.f32.mrf.mxu1  ;;  %v18254_v63 = vpop.f32.mrf.mxu0  ;;  %v13624_v52 = vor.u32 %v13623_v17, %v13620_v25  ;;  %v14167_v2 = vrot.slane %v19382_v6, 3  ;;  %v13633_v15 = vor.u32 %v13632_v60, %v13629_v20 }
 0x3b2   : > { %v21986_v59 = vadd.f32 %v11139_v62, %v10767_v54  ;;  %v10770_v9 = vadd.f32 %v18206_v8, %v21819_v34  ;;  %v14169_v54 = vrot.slane %v21991_v30, 3  ;;  %v13648_v8 = vshll.u32 %v19387_v3, 16 }
 0x3b3   : > { %v10655_v23 = vpop.f32.mrf.mxu1  ;;  %v11142_v4 = vpop.f32.mrf.mxu0  ;;  %v13625_v17 = vsel %vm4214_vm5, %v13615_v58, %v13624_v52  ;;  %v14168_v6 = vsel %vm4821_vm4, %v14165_v10, %v14167_v2  ;;  %v13634_v60 = vsel %vm4214_vm5, %v13624_v52, %v13633_v15 }
 0x3b4   : > { %v21993_v36 = vadd.f32 %v18254_v63, %v10770_v9  ;;  %v10768_v53 = vadd.f32 %v10655_v23, %v21822_v27  ;;  %v13645_v27 = vshrl.u32 %v19387_v3, 16  ;;  %v13638_v9 = vrot.slane %v13636_v16, 2 }
 0x3b5   : > { %v18209_v48 = vpop.f32.mrf.mxu1  ;;  %v18257_v34 = vpop.f32.mrf.mxu0  ;;  %18496 = vmatmul.mubr.bf16.gmra.mxu1 %v13607_v50  ;;  %18544 = vmatmul.mubr.bf16.gmra.mxu0 %v14164_v31  ;;  %v13641_v23 = vrot.slane %v13639_v61, 3  ;;  %v13650_v3 = vrot.slane %v13648_v8, 3 }
 0x3b6   : > { %v21996_v14 = vadd.f32 %v11142_v4, %v10768_v53  ;;  %v10773_v35 = vadd.f32 %v18209_v48, %v21827_v11  ;;  %18499 = vmatprep.mubr.bf16.mxu1 %v13616_v46  ;;  %18547 = vmatprep.mubr.bf16.mxu0 %v14166_v26  ;;  %v19386_v11 = vld [vmem:[#allocation2 + $0xbc] sm:$0xff]   ;;  %v19389_v46 = vld [vmem:[#allocation2 + $0xcc] sm:$0xff]   ;;  %v13647_v30 = vrot.slane %v13645_v27, 2  ;;  %v22010_v53 = vld [vmem:[#allocation2 + $0xc4] sm:$0xff]  }
 0x3b7   : > { %v10668_v62 = vpop.f32.mrf.mxu1  ;;  %v11155_v12 = vpop.f32.mrf.mxu0  ;;  %v19391_v48 = vld [vmem:[#allocation2 + $0xd4] sm:$0xff]   ;;  %v13642_v10 = vor.u32 %v13641_v23, %v13638_v9  ;;  %v14171_v61 = vrot.slane %v19386_v11, 3 }
 0x3b8   : > { %v22000_v63 = vadd.f32 %v18257_v34, %v10773_v35  ;;  %v10771_v50 = vadd.f32 %v10668_v62, %v21830_v51  ;;  %v14170_v51 = vsel %vm4821_vm4, %v14167_v2, %v14169_v54  ;;  %v13654_v2 = vshrl.u32 %v19389_v46, 16 }
 0x3b9   : > { %v18210_v31 = vpop.f32.mrf.mxu1  ;;  %v18258_v13 = vpop.f32.mrf.mxu0  ;;  %v13657_v62 = vshll.u32 %v19389_v46, 16  ;;  %v13651_v8 = vor.u32 %v13650_v3, %v13647_v30 }
 0x3ba   : > { %v22003_v4 = vadd.f32 %v11155_v12, %v10771_v50  ;;  %v10774_v25 = vadd.f32 %v18210_v31, %v21849_v55  ;;  %v14173_v50 = vrot.slane %v22010_v53, 3  ;;  %v13666_v31 = vshll.u32 %v19391_v48, 16 }
 0x3bb   : > { %v10671_v26 = vpop.f32.mrf.mxu1  ;;  %v11158_v20 = vpop.f32.mrf.mxu0  ;;  %v13652_v3 = vsel %vm4214_vm5, %v13642_v10, %v13651_v8 }
 0x3bc   : > { %v22012_v34 = vadd.f32 %v18258_v13, %v10774_v25  ;;  %v10772_v55 = vadd.f32 %v10671_v26, %v21852_v37  ;;  %v13663_v37 = vshrl.u32 %v19391_v48, 16  ;;  %v13643_v25 = vsel %vm4214_vm5, %v13633_v15, %v13642_v10  ;;  %v19395_v15 = vld [vmem:[#allocation2 + $0xe4] sm:$0xff]  }
 0x3bd   : > { %v18213_v16 = vpop.f32.mrf.mxu1  ;;  %v18261_v58 = vpop.f32.mrf.mxu0  ;;  %18500 = vmatmul.mubr.bf16.gmra.mxu1 %v13625_v17  ;;  %18548 = vmatmul.mubr.bf16.gmra.mxu0 %v14168_v6  ;;  %v19393_v17 = vld [vmem:[#allocation2 + $0xdc] sm:$0xff]   ;;  %v13656_v26 = vrot.slane %v13654_v2, 2  ;;  %v13668_v48 = vrot.slane %v13666_v31, 3 }
 0x3be   : > { %v22015_v35 = vadd.f32 %v11158_v20, %v10772_v55  ;;  %v10777_v52 = vadd.f32 %v18213_v16, %v21857_v56  ;;  %18503 = vmatprep.mubr.bf16.mxu1 %v13634_v60  ;;  %18551 = vmatprep.mubr.bf16.mxu0 %v14170_v51  ;;  %v14172_v56 = vsel %vm4821_vm4, %v14169_v54, %v14171_v61  ;;  %v13659_v20 = vrot.slane %v13657_v62, 3  ;;  %v19390_v60 = vld [vmem:[#allocation2 + $0xcc] sm:$0xff]   ;;  %v22029_v55 = vld [vmem:[#allocation2 + $0xd4] sm:$0xff]  }
 0x3bf   : > { %v10684_v12 = vpop.f32.mrf.mxu1  ;;  %v11171_v27 = vpop.f32.mrf.mxu0  ;;  %v13665_v53 = vrot.slane %v13663_v37, 2  ;;  %v13675_v2 = vshll.u32 %v19393_v17, 16 }
 0x3c0   : > { %v22019_v13 = vadd.f32 %v18261_v58, %v10777_v52  ;;  %v10775_v9 = vadd.f32 %v10684_v12, %v21860_v33  ;;  %v14174_v33 = vsel %vm4821_vm4, %v14171_v61, %v14173_v50  ;;  %v13672_v52 = vshrl.u32 %v19393_v17, 16 }
 0x3c1   : > { %v18214_v23 = vpop.f32.mrf.mxu1  ;;  %v18262_v11 = vpop.f32.mrf.mxu0  ;;  %v13660_v61 = vor.u32 %v13659_v20, %v13656_v26  ;;  %v14175_v12 = vrot.slane %v19390_v60, 3  ;;  %v13669_v31 = vor.u32 %v13668_v48, %v13665_v53 }
 0x3c2   : > { %v22024_v6 = vadd.f32 %v11171_v27, %v10775_v9  ;;  %v10778_v46 = vadd.f32 %v18214_v23, %v21875_v22  ;;  %v14177_v9 = vrot.slane %v22029_v55, 3  ;;  %v13684_v23 = vshll.u32 %v19395_v15, 16 }
 0x3c3   : > { %v10687_v51 = vpop.f32.mrf.mxu1  ;;  %v11174_v30 = vpop.f32.mrf.mxu0  ;;  %v13661_v20 = vsel %vm4214_vm5, %v13651_v8, %v13660_v61  ;;  %v14176_v60 = vsel %vm4821_vm4, %v14173_v50, %v14175_v12  ;;  %v13670_v48 = vsel %vm4214_vm5, %v13660_v61, %v13669_v31 }
 0x3c4   : > { %v22031_v54 = vadd.f32 %v18262_v11, %v10778_v46  ;;  %v10776_v16 = vadd.f32 %v10687_v51, %v21878_v57  ;;  %v13681_v57 = vshrl.u32 %v19395_v15, 16  ;;  %v13674_v46 = vrot.slane %v13672_v52, 2 }
 0x3c5   : > { %v18217_v58 = vpop.f32.mrf.mxu1  ;;  %v18265_v22 = vpop.f32.mrf.mxu0  ;;  %18504 = vmatmul.mubr.bf16.gmra.mxu1 %v13643_v25  ;;  %18552 = vmatmul.mubr.bf16.gmra.mxu0 %v14172_v56  ;;  %v13677_v51 = vrot.slane %v13675_v2, 3  ;;  %v13686_v15 = vrot.slane %v13684_v23, 3 }
 0x3c6   : > { %v22034_v62 = vadd.f32 %v11174_v30, %v10776_v16  ;;  %v10781_v10 = vadd.f32 %v18217_v58, %v21883_v0  ;;  %18507 = vmatprep.mubr.bf16.mxu1 %v13652_v3  ;;  %18555 = vmatprep.mubr.bf16.mxu0 %v14174_v33  ;;  %v19394_v0 = vld [vmem:[#allocation2 + $0xdc] sm:$0xff]   ;;  %v19397_v3 = vld [vmem:[#allocation2 + $0xec] ss:$0 sps:$4 sm:$0x77]   ;;  %v13683_v55 = vrot.slane %v13681_v57, 2  ;;  %v19396_v16 = vld [vmem:[#allocation2 + $0xe4] sm:$0xff]  }
 0x3c7   : > { %v10700_v27 = vpop.f32.mrf.mxu1  ;;  %v11187_v37 = vpop.f32.mrf.mxu0  ;;  %v13678_v8 = vor.u32 %v13677_v51, %v13674_v46  ;;  %v14179_v50 = vrot.slane %v19394_v0, 3  ;;  %v13690_v61 = vshrl.u32 %v19397_v3, 16  ;;  %v14181_v23 = vrot.slane %v19396_v16, 3 }
 0x3c8   : > { %v22038_v11 = vadd.f32 %v18265_v22, %v10781_v10  ;;  %v10779_v25 = vadd.f32 %v10700_v27, %v21886_v19  ;;  %v14178_v19 = vsel %vm4821_vm4, %v14175_v12, %v14177_v9  ;;  %v13693_v12 = vshll.u32 %v19397_v3, 16 }
 0x3c9   : > { %v18218_v56 = vpop.f32.mrf.mxu1  ;;  %v18266_v17 = vpop.f32.mrf.mxu0  ;;  %v13687_v57 = vor.u32 %v13686_v15, %v13683_v55  ;;  %v13679_v46 = vsel %vm4214_vm5, %v13669_v31, %v13678_v8  ;;  %v14180_v51 = vsel %vm4821_vm4, %v14177_v9, %v14179_v50 }
 0x3ca   : > { %v22041_v30 = vadd.f32 %v11187_v37, %v10779_v25  ;;  %v10782_v26 = vadd.f32 %v18218_v56, %v21897_v21 }
 0x3cb   : > { %v10703_v33 = vpop.f32.mrf.mxu1  ;;  %v11190_v53 = vpop.f32.mrf.mxu0 }
 0x3cc   : > { %v22048_v58 = vadd.f32 %v18266_v17, %v10782_v26  ;;  %v10780_v22 = vadd.f32 %v10703_v33, %v21900_v18  ;;  %v13692_v26 = vrot.slane %v13690_v61, 2 }
 0x3cd   : > { %v18221_v52 = vpop.f32.mrf.mxu1  ;;  %v18269_v21 = vpop.f32.mrf.mxu0  ;;  %18508 = vmatmul.mubr.bf16.gmra.mxu1 %v13661_v20  ;;  %18556 = vmatmul.mubr.bf16.gmra.mxu0 %v14176_v60  ;;  %v13695_v20 = vrot.slane %v13693_v12, 3  ;;  %v19398_v60 = vld [vmem:[#allocation2 + $0xec] ss:$0 sps:$4 sm:$0x77]  }
 0x3ce   : > { %v22051_v2 = vadd.f32 %v11190_v53, %v10780_v22  ;;  %v10785_v10 = vadd.f32 %v18221_v52, %v21905_v24  ;;  %18511 = vmatprep.mubr.bf16.mxu1 %v13670_v48  ;;  %18559 = vmatprep.mubr.bf16.mxu0 %v14178_v19  ;;  %v13688_v53 = vsel %vm4214_vm5, %v13678_v8, %v13687_v57  ;;  %v14183_v16 = vrot.slane %v19398_v60, 3 }
 0x3cf   : > { %v10716_v27 = vpop.f32.mrf.mxu1  ;;  %v11203_v37 = vpop.f32.mrf.mxu0  ;;  %v14182_v48 = vsel %vm4821_vm4, %v14179_v50, %v14181_v23  ;;  %v13696_v15 = vor.u32 %v13695_v20, %v13692_v26 }
 0x3d0   : > { %v22054_v25 = vadd.f32 %v18269_v21, %v10785_v10  ;;  %v10783_v18 = vadd.f32 %v10716_v27, %v21910_v1 }
 0x3d1   : > { %v18222_v56 = vpop.f32.mrf.mxu1  ;;  %v18270_v17 = vpop.f32.mrf.mxu0  ;;  %v13697_v12 = vsel %vm4214_vm5, %v13687_v57, %v13696_v15 }
 0x3d2   : > { %v22059_v0 = vadd.f32 %v11203_v37, %v10783_v18  ;;  %v10786_v24 = vadd.f32 %v18222_v56, %v21917_v29 }
 0x3d3   : > { %v10719_v3 = vpop.f32.mrf.mxu1  ;;  %v11206_v33 = vpop.f32.mrf.mxu0 }
 0x3d4   : > { %v22064_v1 = vadd.f32 %v18270_v17, %v10786_v24  ;;  %v10784_v19 = vadd.f32 %v10719_v3, %v21920_v38 }
 0x3d5   : > { %v18225_v31 = vpop.f32.mrf.mxu1  ;;  %v18273_v55 = vpop.f32.mrf.mxu0  ;;  %18512 = vmatmul.mubr.bf16.gmra.mxu1 %v13679_v46  ;;  %18560 = vmatmul.mubr.bf16.gmra.mxu0 %v14180_v51 }
 0x3d6   : > { %v22067_v9 = vadd.f32 %v11206_v33, %v10784_v19  ;;  %v10789_v29 = vadd.f32 %v18225_v31, %v21924_v7  ;;  %18515 = vmatprep.mubr.bf16.mxu1 %v13688_v53  ;;  %18563 = vmatprep.mubr.bf16.mxu0 %v14182_v48  ;;  %v14184_v7 = vsel %vm4821_vm4, %v14181_v23, %v14183_v16 }
 0x3d7   : > { %v10732_v22 = vpop.f32.mrf.mxu1  ;;  %v11219_v52 = vpop.f32.mrf.mxu0 }
 0x3d8   : > { %v22070_v21 = vadd.f32 %v18273_v55, %v10789_v29  ;;  %v10787_v8 = vadd.f32 %v10732_v22, %v21927_v41 }
 0x3d9   : > { %v18226_v50 = vpop.f32.mrf.mxu1  ;;  %v18274_v38 = vpop.f32.mrf.mxu0 }
 0x3da   : > { %v22073_v10 = vadd.f32 %v11219_v52, %v10787_v8  ;;  %v10790_v61 = vadd.f32 %v18226_v50, %v21936_v5 }
 0x3db   : > { %v10735_v27 = vpop.f32.mrf.mxu1  ;;  %v11222_v37 = vpop.f32.mrf.mxu0 }
 0x3dc   : > { %v22078_v18 = vadd.f32 %v18274_v38, %v10790_v61  ;;  %v10788_v56 = vadd.f32 %v10735_v27, %v21939_v42 }
 0x3dd   : > { %v18229_v17 = vpop.f32.mrf.mxu1  ;;  %v18277_v46 = vpop.f32.mrf.mxu0  ;;  %18516 = vmatmul.mubr.bf16.gmra.mxu1 %v13697_v12  ;;  %18564 = vmatmul.mubr.bf16.gmra.mxu0 %v14184_v7 }
 0x3de   : > { %v22081_v41 = vadd.f32 %v11222_v37, %v10788_v56  ;;  %v10793_v51 = vadd.f32 %v18229_v17, %v21943_v47 }
 0x3df   : > { %v10748_v24 = vpop.f32.mrf.mxu1  ;;  %v11235_v5 = vpop.f32.mrf.mxu0 }
 0x3e0   : > { %v22084_v26 = vadd.f32 %v18277_v46, %v10793_v51  ;;  %v10791_v57 = vadd.f32 %v10748_v24, %v21948_v39 }
 0x3e1   : > { %v18230_v23 = vpop.f32.mrf.mxu1  ;;  %v18278_v20 = vpop.f32.mrf.mxu0 }
 0x3e2   : > { %v22087_v60 = vadd.f32 %v11235_v5, %v10791_v57  ;;  %v10794_v42 = vadd.f32 %v18230_v23, %v21955_v44 }
 0x3e3   : > { %v10751_v3 = vpop.f32.mrf.mxu1  ;;  %v11238_v33 = vpop.f32.mrf.mxu0 }
 0x3e4   : > { %v22090_v53 = vadd.f32 %v18278_v20, %v10794_v42  ;;  %v10792_v48 = vadd.f32 %v10751_v3, %v21958_v28 }
 0x3e5   : > { %v18297_v19 = vpop.f32.mrf.mxu1  ;;  %v18345_v47 = vpop.f32.mrf.mxu0 }
 0x3e6   : > { %v22093_v31 = vadd.f32 %v11238_v33, %v10792_v48  ;;  %v11739_v55 = vadd.f32 %v18297_v19, %v21962_v40 }
 0x3e7   : > { %v11610_v29 = vpop.f32.mrf.mxu1  ;;  %v12216_v39 = vpop.f32.mrf.mxu0 }
 0x3e8   : > { %v22096_v15 = vadd.f32 %v18345_v47, %v11739_v55  ;;  %v11737_v16 = vadd.f32 %v11610_v29, %v21965_v49 }
 0x3e9   : > { %v18298_v22 = vpop.f32.mrf.mxu1  ;;  %v18346_v44 = vpop.f32.mrf.mxu0 }
 0x3ea   : > { %v22099_v52 = vadd.f32 %v12216_v39, %v11737_v16  ;;  %v11740_v8 = vadd.f32 %v18298_v22, %v21974_v32 }
 0x3eb   : > { %v11613_v50 = vpop.f32.mrf.mxu1  ;;  %v12219_v28 = vpop.f32.mrf.mxu0 }
 0x3ec   : > { %v22102_v38 = vadd.f32 %v18346_v44, %v11740_v8  ;;  %v11738_v61 = vadd.f32 %v11613_v50, %v21977_v45 }
 0x3ed   : > { %v18301_v12 = vpop.f32.mrf.mxu1  ;;  %v18349_v40 = vpop.f32.mrf.mxu0 }
 0x3ee   : > { %v22105_v7 = vadd.f32 %v12219_v28, %v11738_v61  ;;  %v11743_v27 = vadd.f32 %v18301_v12, %v21981_v43 }
 0x3ef   : > { %v11626_v37 = vpop.f32.mrf.mxu1  ;;  %v12232_v49 = vpop.f32.mrf.mxu0 }
 0x3f0   : > { %v22108_v56 = vadd.f32 %v18349_v40, %v11743_v27  ;;  %v11741_v17 = vadd.f32 %v11626_v37, %v21986_v59 }
 0x3f1   : > { %v18302_v46 = vpop.f32.mrf.mxu1  ;;  %v18350_v32 = vpop.f32.mrf.mxu0 }
 0x3f2   : > { %v22111_v51 = vadd.f32 %v12232_v49, %v11741_v17  ;;  %v11744_v24 = vadd.f32 %v18302_v46, %v21993_v36 }
 0x3f3   : > { %v11629_v5 = vpop.f32.mrf.mxu1  ;;  %v12235_v45 = vpop.f32.mrf.mxu0 }
 0x3f4   : > { %23295 = vst [vmem:[#allocation23_spill] sm:$0xff] %v22111_v51  ;;  %v22114_v57 = vadd.f32 %v18350_v32, %v11744_v24  ;;  %v11742_v23 = vadd.f32 %v11629_v5, %v21996_v14 }
 0x3f5   : > { %v18305_v20 = vpop.f32.mrf.mxu1  ;;  %v18353_v43 = vpop.f32.mrf.mxu0 }
 0x3f6   : > { %v22117_v42 = vadd.f32 %v12235_v45, %v11742_v23  ;;  %v11747_v3 = vadd.f32 %v18305_v20, %v22000_v63 }
 0x3f7   : > { %v11642_v33 = vpop.f32.mrf.mxu1  ;;  %v12248_v59 = vpop.f32.mrf.mxu0 }
 0x3f8   : > { %v22120_v48 = vadd.f32 %v18353_v43, %v11747_v3  ;;  %v11745_v19 = vadd.f32 %v11642_v33, %v22003_v4 }
 0x3f9   : > { %v18306_v47 = vpop.f32.mrf.mxu1  ;;  %v18354_v36 = vpop.f32.mrf.mxu0 }
 0x3fa   : > { %v22123_v55 = vadd.f32 %v12248_v59, %v11745_v19  ;;  %v11748_v29 = vadd.f32 %v18306_v47, %v22012_v34 }
 0x3fb   : > { %v11645_v39 = vpop.f32.mrf.mxu1  ;;  %v12251_v14 = vpop.f32.mrf.mxu0 }
 0x3fc   : > { %v22126_v16 = vadd.f32 %v18354_v36, %v11748_v29  ;;  %v11746_v22 = vadd.f32 %v11645_v39, %v22015_v35  ;;  %v22153_v36 = vpop.permute.xlu1 %14589 }
 0x3fd   : > { %v18309_v44 = vpop.f32.mrf.mxu1  ;;  %v18357_v63 = vpop.f32.mrf.mxu0 }
 0x3fe   : > { %v22129_v8 = vadd.f32 %v12251_v14, %v11746_v22  ;;  %v11751_v50 = vadd.f32 %v18309_v44, %v22019_v13 }
 0x3ff   : > { %v11658_v28 = vpop.f32.mrf.mxu1  ;;  %v12264_v4 = vpop.f32.mrf.mxu0 }
 0x400   : > { %v22132_v61 = vadd.f32 %v18357_v63, %v11751_v50  ;;  %v11749_v12 = vadd.f32 %v11658_v28, %v22024_v6 }
 0x401   : > { %v18310_v40 = vpop.f32.mrf.mxu1  ;;  %v18358_v34 = vpop.f32.mrf.mxu0 }
 0x402   : > { %v22135_v27 = vadd.f32 %v12264_v4, %v11749_v12  ;;  %v11752_v37 = vadd.f32 %v18310_v40, %v22031_v54  ;;  %v22166_v12 = vpop.permute.xlu1 %14594 }
 0x403   : > { %v11661_v49 = vpop.f32.mrf.mxu1  ;;  %v12267_v35 = vpop.f32.mrf.mxu0 }
 0x404   : > { %v22138_v17 = vadd.f32 %v18358_v34, %v11752_v37  ;;  %v11750_v46 = vadd.f32 %v11661_v49, %v22034_v62 }
 0x405   : > { %v18313_v32 = vpop.f32.mrf.mxu1  ;;  %v18361_v13 = vpop.f32.mrf.mxu0 }
 0x406   : > { %v22141_v24 = vadd.f32 %v12267_v35, %v11750_v46  ;;  %v11755_v5 = vadd.f32 %v18313_v32, %v22038_v11  ;;  %v22155_v11 = vpop.permute.xlu0 %18723 }
 0x407   : > { %v11674_v45 = vpop.f32.mrf.mxu1  ;;  %v12280_v6 = vpop.f32.mrf.mxu0 }
 0x408   : > { %v22144_v23 = vadd.f32 %v18361_v13, %v11755_v5  ;;  %v11753_v20 = vadd.f32 %v11674_v45, %v22041_v30 }
 0x409   : > { %v18314_v43 = vpop.f32.mrf.mxu1  ;;  %v18362_v54 = vpop.f32.mrf.mxu0 }
 0x40a   : > { %v22147_v3 = vadd.f32 %v12280_v6, %v11753_v20  ;;  %v11756_v33 = vadd.f32 %v18314_v43, %v22048_v58  ;;  %v22168_v40 = vpop.permute.xlu0 %14584  ;;  %v22179_v6 = vpop.permute.xlu1 %14604 }
 0x40b   : > { %v11677_v59 = vpop.f32.mrf.mxu1  ;;  %v12283_v62 = vpop.f32.mrf.mxu0  ;;  %23296 = vst [vmem:[#allocation25_spill] sm:$0xff] %v22179_v6 }
 0x40c   : > { %v22150_v19 = vadd.f32 %v18362_v54, %v11756_v33  ;;  %v11754_v47 = vadd.f32 %v11677_v59, %v22051_v2 }
 0x40d   : > { %v18317_v29 = vpop.f32.mrf.mxu1  ;;  %v18365_v39 = vpop.f32.mrf.mxu0 }
 0x40e   : > { %v22157_v14 = vadd.f32 %v12283_v62, %v11754_v47  ;;  %v11759_v30 = vadd.f32 %v18317_v29, %v22054_v25  ;;  %v22181_v20 = vpop.permute.xlu0 %14599 }
 0x40f   : > { %v11690_v22 = vpop.f32.mrf.mxu1  ;;  %v12296_v44 = vpop.f32.mrf.mxu0  ;;  %23297 = vst [vmem:[#allocation26_spill] sm:$0xff] %v22181_v20 }
 0x410   : > { %v22160_v63 = vadd.f32 %v18365_v39, %v11759_v30  ;;  %v11757_v58 = vadd.f32 %v11690_v22, %v22059_v0  ;;  %v22192_v22 = vpop.permute.xlu1 %14614 }
 0x411   : > { %v18318_v50 = vpop.f32.mrf.mxu1  ;;  %v18366_v28 = vpop.f32.mrf.mxu0 }
 0x412   : > { %v22163_v4 = vadd.f32 %v12296_v44, %v11757_v58  ;;  %v11760_v2 = vadd.f32 %v18318_v50, %v22064_v1  ;;  %v22194_v44 = vpop.permute.xlu0 %14609 }
 0x413   : > { %v11693_v34 = vpop.f32.mrf.mxu1  ;;  %v12299_v37 = vpop.f32.mrf.mxu0  ;;  %23298 = vst [vmem:[#allocation27_spill] sm:$0xff] %v22194_v44 }
 0x414   : > { %v22170_v49 = vadd.f32 %v18366_v28, %v11760_v2  ;;  %v11758_v25 = vadd.f32 %v11693_v34, %v22067_v9 }
 0x415   : > { %v18321_v35 = vpop.f32.mrf.mxu1  ;;  %v18369_v46 = vpop.f32.mrf.mxu0 }
 0x416   : > { %v22173_v32 = vadd.f32 %v12299_v37, %v11758_v25  ;;  %v11763_v0 = vadd.f32 %v18321_v35, %v22070_v21 }
 0x417   : > { %v11706_v13 = vpop.f32.mrf.mxu1  ;;  %v12312_v5 = vpop.f32.mrf.mxu0 }
 0x418   : > { %v22176_v45 = vadd.f32 %v18369_v46, %v11763_v0  ;;  %v11761_v1 = vadd.f32 %v11706_v13, %v22073_v10  ;;  %v22205_v0 = vpop.permute.xlu1 %14624  ;;  %v22207_v13 = vpop.permute.xlu0 %14619 }
 0x419   : > { %v18322_v43 = vpop.f32.mrf.mxu1  ;;  %v18370_v54 = vpop.f32.mrf.mxu0  ;;  %23299 = vst [vmem:[#allocation28_spill] sm:$0xff] %v22205_v0 }
 0x41a   : > { %v22183_v33 = vadd.f32 %v12312_v5, %v11761_v1  ;;  %v11764_v9 = vadd.f32 %v18322_v43, %v22078_v18 }
 0x41b   : > { %v11709_v59 = vpop.f32.mrf.mxu1  ;;  %v12315_v62 = vpop.f32.mrf.mxu0 }
 0x41c   : > { %v22186_v47 = vadd.f32 %v18370_v54, %v11764_v9  ;;  %v11762_v21 = vadd.f32 %v11709_v59, %v22081_v41 }
 0x41d   : > { %v18325_v29 = vpop.f32.mrf.mxu1  ;;  %v18373_v39 = vpop.f32.mrf.mxu0 }
 0x41e   : > { %v22189_v30 = vadd.f32 %v12315_v62, %v11762_v21  ;;  %v11767_v10 = vadd.f32 %v18325_v29, %v22084_v26  ;;  %v22221_v29 = vpop.permute.xlu1 %14634 }
 0x41f   : > { %v11722_v58 = vpop.f32.mrf.mxu1  ;;  %v12328_v50 = vpop.f32.mrf.mxu0  ;;  %23300 = vst [vmem:[#allocation29_spill] sm:$0xff] %v22221_v29 }
 0x420   : > { %v22196_v28 = vadd.f32 %v18373_v39, %v11767_v10  ;;  %v11765_v18 = vadd.f32 %v11722_v58, %v22087_v60  ;;  %v22223_v39 = vpop.permute.xlu0 %14629 }
 0x421   : > { %v18326_v2 = vpop.f32.mrf.mxu1  ;;  %v18374_v34 = vpop.f32.mrf.mxu0  ;;  %23301 = vst [vmem:[#allocation24_spill] sm:$0xff] %v22223_v39 }
 0x422   : > { %v22199_v37 = vadd.f32 %v12328_v50, %v11765_v18  ;;  %v11768_v41 = vadd.f32 %v18326_v2, %v22090_v53 }
 0x423   : > { %v11725_v25 = vpop.f32.mrf.mxu1  ;;  %v12331_v35 = vpop.f32.mrf.mxu0 }
 0x424   : > { %v22202_v46 = vadd.f32 %v18374_v34, %v11768_v41  ;;  %v11766_v26 = vadd.f32 %v11725_v25, %v22093_v31  ;;  %v22236_v41 = vpop.permute.xlu1 %14644  ;;  %v22238_v25 = vpop.permute.xlu0 %14639 }
 0x425   : > { %v18393_v5 = vpop.f32.mrf.mxu1  ;;  %v18441_v1 = vpop.f32.mrf.mxu0 }
 0x426   : > { %v22209_v43 = vadd.f32 %v12331_v35, %v11766_v26  ;;  %v12832_v60 = vadd.f32 %v18393_v5, %v22096_v15 }
 0x427   : > { %v12703_v54 = vpop.f32.mrf.mxu1  ;;  %v13190_v9 = vpop.f32.mrf.mxu0 }
 0x428   : > { %v22212_v59 = vadd.f32 %v18441_v1, %v12832_v60  ;;  %v12830_v53 = vadd.f32 %v12703_v54, %v22099_v52 }
 0x429   : > { %v22215_v62 = vpop.f32.mrf.mxu1  ;;  %v22217_v21 = vpop.f32.mrf.mxu0 }
 0x42a   : > { %v22219_v31 = vadd.f32 %v13190_v9, %v12830_v53 }
 0x42b   : > { %v22225_v10 = vpop.f32.mrf.mxu1  ;;  %v22227_v58 = vpop.f32.mrf.mxu0 }
 0x42d   : > { %v18397_v15 = vpop.f32.mrf.mxu1  ;;  %v18445_v50 = vpop.f32.mrf.mxu0 }
 0x42e   : > { %v12836_v18 = vadd.f32 %v18397_v15, %v22108_v56 }
 0x42f   : > { %v22230_v2 = vpop.f32.mrf.mxu1  ;;  %v22232_v52 = vpop.f32.mrf.mxu0 }
 0x430   : > { %23302 = vst [vmem:[#allocation30_spill] sm:$0xff] %v22230_v2  ;;  %23303 = vst [vmem:[#allocation31_spill] sm:$0xff] %v22232_v52  ;;  %v22234_v34 = vadd.f32 %v18445_v50, %v12836_v18  ;;  %v22247_v18 = vpop.permute.xlu1 %14654  ;;  %v22249_v52 = vpop.permute.xlu0 %14649 }
 0x431   : > { %v18398_v35 = vpop.f32.mrf.mxu1  ;;  %v18446_v26 = vpop.f32.mrf.mxu0  ;;  %23306 = vst [vmem:[#allocation34_spill] sm:$0xff] %v22247_v18 }
 0x432   : > { %23304 = vst [vmem:[#allocation32_spill] sm:$0xff] %v22234_v34  ;;  %v12837_v5 = vadd.f32 %v18398_v35, %v22114_v57 }
 0x433   : > { %v12722_v1 = vpop.f32.mrf.mxu1  ;;  %v13209_v60 = vpop.f32.mrf.mxu0 }
 0x434   : > { %v22241_v54 = vadd.f32 %v18446_v26, %v12837_v5  ;;  %v12835_v56 = vadd.f32 %v12722_v1, %v22117_v42 }
 0x435   : > { %v18401_v9 = vpop.f32.mrf.mxu1  ;;  %v18449_v53 = vpop.f32.mrf.mxu0 }
 0x436   : > { %v22244_v15 = vadd.f32 %v13209_v60, %v12835_v56  ;;  %v12840_v50 = vadd.f32 %v18401_v9, %v22120_v48  ;;  %v22260_v9 = vpop.permute.xlu1 %14664 }
 0x437   : > { %v12735_v34 = vpop.f32.mrf.mxu1  ;;  %v13222_v2 = vpop.f32.mrf.mxu0  ;;  %23309 = vst [vmem:[#allocation37_spill] sm:$0xff] %v22260_v9 }
 0x438   : > { %23305 = vst [vmem:[#allocation33_spill] sm:$0xff] %v22244_v15  ;;  %v22251_v51 = vadd.f32 %v18449_v53, %v12840_v50  ;;  %v12838_v57 = vadd.f32 %v12735_v34, %v22123_v55  ;;  %v22262_v15 = vpop.permute.xlu0 %14659 }
 0x439   : > { %v18402_v35 = vpop.f32.mrf.mxu1  ;;  %v18450_v26 = vpop.f32.mrf.mxu0  ;;  %23310 = vst [vmem:[#allocation38_spill] sm:$0xff] %v22262_v15 }
 0x43a   : > { %23307 = vst [vmem:[#allocation35_spill] sm:$0xff] %v22251_v51  ;;  %v22254_v5 = vadd.f32 %v13222_v2, %v12838_v57  ;;  %v12841_v42 = vadd.f32 %v18402_v35, %v22126_v16 }
 0x43b   : > { %v12738_v1 = vpop.f32.mrf.mxu1  ;;  %v13225_v60 = vpop.f32.mrf.mxu0 }
 0x43c   : > { %v22257_v56 = vadd.f32 %v18450_v26, %v12841_v42  ;;  %v12839_v48 = vadd.f32 %v12738_v1, %v22129_v8  ;;  %v22273_v1 = vpop.permute.xlu1 %14674 }
 0x43d   : > { %v18405_v53 = vpop.f32.mrf.mxu1  ;;  %v18453_v50 = vpop.f32.mrf.mxu0 }
 0x43e   : > { %23308 = vst [vmem:[#allocation36_spill] sm:$0xff] %v22257_v56  ;;  %v22264_v51 = vadd.f32 %v13225_v60, %v12839_v48  ;;  %v12844_v55 = vadd.f32 %v18405_v53, %v22132_v61  ;;  %v22275_v56 = vpop.permute.xlu0 %14669 }
 0x43f   : > { %v12751_v2 = vpop.f32.mrf.mxu1  ;;  %v13238_v34 = vpop.f32.mrf.mxu0  ;;  %23314 = vst [vmem:[#allocation42_spill] sm:$0xff] %v22275_v56 }
 0x440   : > { %23311 = vst [vmem:[#allocation39_spill] sm:$0xff] %v22264_v51  ;;  %v22267_v57 = vadd.f32 %v18453_v50, %v12844_v55  ;;  %v12842_v16 = vadd.f32 %v12751_v2, %v22135_v27 }
 0x441   : > { %v18406_v35 = vpop.f32.mrf.mxu1  ;;  %v18454_v26 = vpop.f32.mrf.mxu0 }
 0x442   : > { %23312 = vst [vmem:[#allocation40_spill] sm:$0xff] %v22267_v57  ;;  %v22270_v42 = vadd.f32 %v13238_v34, %v12842_v16  ;;  %v12845_v8 = vadd.f32 %v18406_v35, %v22138_v17  ;;  %v22286_v35 = vpop.permute.xlu1 %14684 }
 0x443   : > { %v12754_v60 = vpop.f32.mrf.mxu1  ;;  %v13241_v48 = vpop.f32.mrf.mxu0  ;;  %23318 = vst [vmem:[#allocation46_spill] sm:$0xff] %v22286_v35 }
 0x444   : > { %23313 = vst [vmem:[#allocation41_spill] sm:$0xff] %v22270_v42  ;;  %v22277_v51 = vadd.f32 %v18454_v26, %v12845_v8  ;;  %v12843_v61 = vadd.f32 %v12754_v60, %v22141_v24  ;;  %v22288_v42 = vpop.permute.xlu0 %14679 }
 0x445   : > { %v18409_v53 = vpop.f32.mrf.mxu1  ;;  %v18457_v50 = vpop.f32.mrf.mxu0  ;;  %23319 = vst [vmem:[#allocation47_spill] sm:$0xff] %v22288_v42 }
 0x446   : > { %23315 = vst [vmem:[#allocation43_spill] sm:$0xff] %v22277_v51  ;;  %v22280_v55 = vadd.f32 %v13241_v48, %v12843_v61  ;;  %v12848_v27 = vadd.f32 %v18409_v53, %v22144_v23 }
 0x447   : > { %v12767_v2 = vpop.f32.mrf.mxu1  ;;  %v13254_v34 = vpop.f32.mrf.mxu0 }
 0x448   : > { %23316 = vst [vmem:[#allocation44_spill] sm:$0xff] %v22280_v55  ;;  %v22283_v16 = vadd.f32 %v18457_v50, %v12848_v27  ;;  %v12846_v17 = vadd.f32 %v12767_v2, %v22147_v3  ;;  %v22299_v2 = vpop.permute.xlu1 %14694  ;;  %v23340_v55 = vlaneseq }
 0x449   : > { %v18410_v26 = vpop.f32.mrf.mxu1  ;;  %v18458_v8 = vpop.f32.mrf.mxu0  ;;  %23323 = vst [vmem:[#allocation51_spill] sm:$0xff] %v22299_v2 }
 0x44a   : > { %23317 = vst [vmem:[#allocation45_spill] sm:$0xff] %v22283_v16  ;;  %v22290_v51 = vadd.f32 %v13254_v34, %v12846_v17  ;;  %v12849_v24 = vadd.f32 %v18410_v26, %v22150_v19  ;;  %v22301_v16 = vpop.permute.xlu0 %14689 }
 0x44b   : > { %v12770_v60 = vpop.f32.mrf.mxu1  ;;  %v13257_v48 = vpop.f32.mrf.mxu0 }
 0x44c   : > { %23320 = vst [vmem:[#allocation48_spill] sm:$0xff] %v22290_v51  ;;  %v22293_v61 = vadd.f32 %v18458_v8, %v12849_v24  ;;  %v12847_v23 = vadd.f32 %v12770_v60, %v22157_v14  ;;  %v23189_v60 = vunpack.i.h.bf16 %v22155_v11 }
 0x44d   : > { %v18413_v53 = vpop.f32.mrf.mxu1  ;;  %v18461_v50 = vpop.f32.mrf.mxu0 }
 0x44e   : > { %23321 = vst [vmem:[#allocation49_spill] sm:$0xff] %v22293_v61  ;;  %v22296_v27 = vadd.f32 %v13257_v48, %v12847_v23  ;;  %v12852_v3 = vadd.f32 %v18413_v53, %v22160_v63 }
 0x44f   : > { %v12783_v34 = vpop.f32.mrf.mxu1  ;;  %v13270_v17 = vpop.f32.mrf.mxu0 }
 0x450   : > { %23322 = vst [vmem:[#allocation50_spill] sm:$0xff] %v22296_v27  ;;  %v22303_v51 = vadd.f32 %v18461_v50, %v12852_v3  ;;  %v12850_v19 = vadd.f32 %v12783_v34, %v22163_v4  ;;  %v22314_v50 = vpop.permute.xlu1 %14704  ;;  %v22316_v3 = vpop.permute.xlu0 %14699 }
 0x451   : > { %v18414_v26 = vpop.f32.mrf.mxu1  ;;  %v18462_v8 = vpop.f32.mrf.mxu0  ;;  %23327 = vst [vmem:[#allocation55_spill] sm:$0xff] %v22314_v50  ;;  %23328 = vst [vmem:[#allocation56_spill] sm:$0xff] %v22316_v3 }
 0x452   : > { %23324 = vst [vmem:[#allocation52_spill] sm:$0xff] %v22303_v51  ;;  %v22306_v24 = vadd.f32 %v13270_v17, %v12850_v19  ;;  %v12853_v14 = vadd.f32 %v18414_v26, %v22170_v49  ;;  %v14743_v19 = vrot.slane %v22153_v36, 7  ;;  %v14739_v26 = vrot.slane %v23189_v60, 7 }
 0x453   : > { %v12786_v48 = vpop.f32.mrf.mxu1  ;;  %v13273_v63 = vpop.f32.mrf.mxu0  ;;  %v14751_v51 = vrot.slane %v22194_v44, 7 }
 0x454   : > { %23325 = vst [vmem:[#allocation53_spill] sm:$0xff] %v22306_v24  ;;  %v22311_v53 = vadd.f32 %v18462_v8, %v12853_v14  ;;  %v12851_v27 = vadd.f32 %v12786_v48, %v22173_v32  ;;  %v23330_v14 = vunpack.i.l.bf16 %v22155_v11  ;;  %v14745_v48 = vrot.slane %v22166_v12, 7 }
 0x455   : > { %v18417_v4 = vpop.f32.mrf.mxu1  ;;  %v18465_v34 = vpop.f32.mrf.mxu0 }
 0x456   : > { %23326 = vst [vmem:[#allocation54_spill] sm:$0xff] %v22311_v53  ;;  %v22318_v17 = vadd.f32 %v13273_v63, %v12851_v27  ;;  %v12856_v49 = vadd.f32 %v18417_v4, %v22176_v45  ;;  %v14738_v32 = vrot.slane %v23330_v14, 7  ;;  %v14741_v27 = vrot.slane %v22168_v40, 7 }
 0x457   : > { %v12799_v23 = vpop.f32.mrf.mxu1  ;;  %v13286_v8 = vpop.f32.mrf.mxu0  ;;  %v14749_v45 = vrot.slane %v22179_v6, 7  ;;  %v14747_v63 = vrot.slane %v22181_v20, 7  ;;  %v14759_v4 = vrot.slane %v22223_v39, 7 }
 0x458   : > { %23329 = vst [vmem:[#allocation57_spill] sm:$0xff] %v22318_v17  ;;  %v22327_v53 = vadd.f32 %v18465_v34, %v12856_v49  ;;  %v12854_v24 = vadd.f32 %v12799_v23, %v22183_v33  ;;  %v22339_v49 = vpop.permute.xlu1 %14714  ;;  %v22341_v33 = vpop.permute.xlu0 %14709 }
 0x459   : > { %v18418_v60 = vpop.f32.mrf.mxu1  ;;  %v18466_v17 = vpop.f32.mrf.mxu0  ;;  %23333 = vst [vmem:[#allocation60_spill] sm:$0xff] %v22339_v49  ;;  %23334 = vst [vmem:[#allocation61_spill] sm:$0xff] %v22341_v33 }
 0x45a   : > { %23331 = vst [vmem:[#allocation58_spill] sm:$0xff] %v22327_v53  ;;  %v22336_v61 = vadd.f32 %v13286_v8, %v12854_v24  ;;  %v12857_v34 = vadd.f32 %v18418_v60, %v22186_v47  ;;  %v14746_v60 = vsel %vm14737_vm7, %v14743_v19, %v14745_v48 }
 0x45b   : > { %v12802_v57 = vpop.f32.mrf.mxu1  ;;  %v13289_v6 = vpop.f32.mrf.mxu0 }
 0x45c   : > { %23332 = vst [vmem:[#allocation59_spill] sm:$0xff] %v22336_v61  ;;  %v22349_v8 = vadd.f32 %v18466_v17, %v12857_v34  ;;  %v12855_v47 = vadd.f32 %v12802_v57, %v22189_v30  ;;  %v14740_v34 = vsel %vm14737_vm7, %v14738_v32, %v14739_v26  ;;  %v22375_v17 = vand.u32 127, %v23340_v55 }
 0x45d   : > { %v18421_v61 = vpop.f32.mrf.mxu1  ;;  %v18469_v53 = vpop.f32.mrf.mxu0  ;;  %v22389_v32 = vsel %vm14737_vm7, %v14745_v48, %v14747_v63  ;;  %v23342_v55 = vrot.slane %v22192_v22, 7  ;;  %v14791_v48 = vrot.slane %v22341_v33, 7  ;;  %v23355_v33 = vrot.slane %v22221_v29, 7 }
 0x45e   : > { %23335 = vst [vmem:[#allocation62_spill] sm:$0xff] %v22349_v8  ;;  %v22356_v44 = vadd.f32 %v13289_v6, %v12855_v47  ;;  %v12860_v24 = vadd.f32 %v18421_v61, %v22196_v28  ;;  %v22367_v6 = vpop.permute.xlu1 %14724  ;;  %v22369_v47 = vpop.permute.xlu0 %14719  ;;  %v14744_v28 = vsel %vm14737_vm7, %v14741_v27, %v14743_v19  ;;  %vm14982_vm8 = vcmp.eq.s32.totalorder %v22375_v17, 127 }
 0x45f   : > { %v12815_v23 = vpop.f32.mrf.mxu1  ;;  %v13302_v14 = vpop.f32.mrf.mxu0  ;;  %23338 = vst [vmem:[#allocation65_spill] sm:$0xff] %v22367_v6  ;;  %23339 = vst [vmem:[#allocation66_spill] sm:$0xff] %v22369_v47 }
 0x460   : > { %23336 = vst [vmem:[#allocation63_spill] sm:$0xff] %v22356_v44  ;;  %v22364_v39 = vadd.f32 %v18469_v53, %v12860_v24  ;;  %v12858_v20 = vadd.f32 %v12815_v23, %v22199_v37  ;;  %v22378_v53 = vsel %vm14737_vm7, %v14739_v26, %v14741_v27  ;;  %v22386_v44 = vsel %vm14737_vm7, %v14749_v45, %v14751_v51 }
 0x461   : > { %v18422_v30 = vpop.f32.mrf.mxu1  ;;  %v18470_v57 = vpop.f32.mrf.mxu0  ;;  %v22394_v26 = vsel %vm14737_vm7, %v14751_v51, %v23342_v55  ;;  %v23344_v51 = vrot.slane %v22205_v0, 7 }
 0x462   : > { %23337 = vst [vmem:[#allocation64_spill] sm:$0xff] %v22364_v39  ;;  %v22381_v23 = vadd.f32 %v13302_v14, %v12858_v20  ;;  %v12861_v24 = vadd.f32 %v18422_v30, %v22202_v46  ;;  %v22397_v20 = vsel %vm14737_vm7, %v14747_v63, %v14749_v45  ;;  %v12833_v46 = vadd.f32 %v22215_v62, %v22102_v38  ;;  %v22430_v19 = vpop.permute.xlu0 %14729 }
 0x463   : > { %v12818_v39 = vpop.f32.mrf.mxu1  ;;  %v13305_v61 = vpop.f32.mrf.mxu0  ;;  %v22410_v55 = vsel %vm14737_vm7, %v23344_v51, %v14759_v4  ;;  %v23345_v45 = vrot.slane %v22207_v13, 7  ;;  %v23346_v38 = vrot.slane %v22192_v22, 7  ;;  %23350 = vst [vmem:[#allocation71_spill] sm:$0xff] %v22430_v19 }
 0x464   : > { %23341 = vst [vmem:[#allocation67_spill] sm:$0xff] %v22381_v23  ;;  %v22402_v27 = vadd.f32 %v18470_v57, %v12861_v24  ;;  %v12859_v14 = vadd.f32 %v12818_v39, %v22209_v43  ;;  %v23347_v43 = vrot.slane %v22221_v29, 7  ;;  %v22428_v51 = vpop.permute.xlu1 %14734 }
 0x465   : > { %v18489_v30 = vpop.f32.mrf.mxu1  ;;  %v18537_v37 = vpop.f32.mrf.mxu0  ;;  %v22417_v62 = vsel %vm14737_vm7, %v23346_v38, %v23345_v45  ;;  %23349 = vst [vmem:[#allocation70_spill] sm:$0xff] %v22428_v51 }
 0x466   : > { %23343 = vst [vmem:[#allocation68_spill] sm:$0xff] %v22402_v27  ;;  %v22422_v39 = vsel %vm14737_vm7, %v14759_v4, %v23347_v43  ;;  %v22424_v63 = vadd.f32 %v13305_v61, %v12859_v14  ;;  %v13925_v24 = vadd.f32 %v18489_v30, %v22212_v59  ;;  %v23351_v27 = vrot.slane %v22205_v0, 7 }
 0x467   : > { %v12831_v4 = vadd.f32 %v22225_v10, %v22105_v7  ;;  %v13796_v14 = vpop.f32.mrf.mxu1  ;;  %v14283_v43 = vpop.f32.mrf.mxu0  ;;  %v23352_v59 = vrot.slane %v22249_v52, 7  ;;  %v23353_v30 = vrot.slane %v22236_v41, 7  ;;  %v13320_v7 = vadd.f32 %v22217_v21, %v12833_v46 }
 0x468   : > { %23348 = vst [vmem:[#allocation69_spill] sm:$0xff] %v22424_v63  ;;  %v22437_v38 = vsel %vm14737_vm7, %v23345_v45, %v23351_v27  ;;  %v23354_v63 = vrot.slane %v22238_v25, 7  ;;  %v14412_v10 = vadd.f32 %v18537_v37, %v13925_v24  ;;  %v13923_v45 = vadd.f32 %v13796_v14, %v22219_v31 }
 0x469   : > { %v22447_v57 = vsel %vm14737_vm7, %v23353_v30, %v23352_v59  ;;  %v23356_v61 = vrot.slane %v22247_v18, 7  ;;  %v23357_v23 = vmov %v23352_v59  ;;  %v18490_v29 = vpop.f32.mrf.mxu1  ;;  %v18538_v0 = vpop.f32.mrf.mxu0  ;;  %v23360_v31 = vrot.slane %v22275_v56, 7 }
 0x46a   : > { %v22454_v27 = vsel %vm14737_vm7, %v23355_v33, %v23354_v63  ;;  %v23358_v33 = vmov %v23353_v30  ;;  %v23359_v21 = vmov %v23354_v63  ;;  %v23361_v46 = vrot.slane %v22260_v9, 7 }
 0x46b   : > { %v22463_v8 = vsel %vm14737_vm7, %v23357_v23, %v23356_v61  ;;  %v22472_v37 = vsel %vm14737_vm7, %v23359_v21, %v23358_v33  ;;  %v14410_v63 = vadd.f32 %v14283_v43, %v13923_v45  ;;  %v13926_v24 = vadd.f32 %v18490_v29, %v13320_v7  ;;  %v13799_v29 = vpop.f32.mrf.mxu1  ;;  %v14286_v7 = vpop.f32.mrf.mxu0 }
 0x46c   : > { %v22479_v23 = vsel %vm14737_vm7, %v23361_v46, %v23360_v31  ;;  %v23362_v61 = vrot.slane %v22262_v15, 7  ;;  %v23363_v14 = vrot.slane %v22247_v18, 7  ;;  %v23364_v30 = vrot.slane %v22273_v1, 7  ;;  %v23368_v46 = vld [vmem:[#allocation30_spill] sm:$0xff] }
 0x46d   : > { %v23365_v33 = vmov %v23360_v31  ;;  %v13318_v51 = vadd.f32 %v22227_v58, %v12831_v4  ;;  %v23367_v31 = vld [vmem:[#allocation23_spill] sm:$0xff]  ;;  %v23369_v45 = vrot.slane %v22260_v9, 7  ;;  %v23373_v56 = vrot.slane %v22286_v35, 7 }
 0x46e   : > { %v22486_v59 = vsel %vm14737_vm7, %v23363_v14, %v23362_v61  ;;  %v22493_v21 = vsel %vm14737_vm7, %v23365_v33, %v23364_v30  ;;  %v12834_v43 = vadd.f32 %v23368_v46, %v23367_v31  ;;  %v23370_v18 = vmov %v23362_v61 }
 0x46f   : > { %23366 = vst [vmem:[#allocation72_spill] sm:$0xff] %v22493_v21  ;;  %v22503_v61 = vsel %vm14737_vm7, %v23370_v18, %v23369_v45  ;;  %v23372_v14 = vrot.slane %v22301_v16, 7  ;;  %v14837_v58 = vmul.f32 %v14744_v28, %v14412_v10  ;;  %v14835_v4 = vmul.f32 %v14740_v34, %v14410_v63  ;;  %v18493_v18 = vpop.f32.mrf.mxu1  ;;  %v18541_v45 = vpop.f32.mrf.mxu0 }
 0x470   : > { %23371 = vst [vmem:[#allocation23_spill] sm:$0xff] %v22503_v61  ;;  %v14413_v33 = vadd.f32 %v18538_v0, %v13926_v24  ;;  %v23374_v31 = vrot.slane %v22288_v42, 7  ;;  %v23375_v46 = vrot.slane %v22273_v1, 7  ;;  %v13924_v15 = vadd.f32 %v13799_v29, %v13318_v51  ;;  %v23382_v29 = vld [vmem:[#allocation32_spill] sm:$0xff] }
 0x471   : > { %v22510_v30 = vsel %vm14737_vm7, %v23373_v56, %v23372_v14  ;;  %v23376_v61 = vrot.slane %v22299_v2, 7  ;;  %v23377_v21 = vmov %v23372_v14  ;;  %v23378_v34 = vrot.slane %v22286_v35, 7  ;;  %v13812_v35 = vpop.f32.mrf.mxu1 }
 0x472   : > { %v22517_v9 = vsel %vm14737_vm7, %v23375_v46, %v23374_v31  ;;  %v23379_v0 = vmov %v23374_v31  ;;  %v23380_v10 = vrot.slane %v22314_v50, 7  ;;  %v15016_v63 = vrot.slane %v14835_v4, 1  ;;  %v23385_v46 = vld [vmem:[#allocation31_spill] sm:$0xff] }
 0x473   : > { %v22524_v56 = vsel %vm14737_vm7, %v23377_v21, %v23376_v61  ;;  %v22531_v28 = vsel %vm14737_vm7, %v23379_v0, %v23378_v34  ;;  %v22538_v24 = vmul.f32 %v14746_v60, %v14413_v33  ;;  %v13929_v14 = vadd.f32 %v18493_v18, %v23382_v29 }
 0x474   : > { %v22536_v51 = vsel %vm14737_vm7, %v23380_v10, %v14791_v48  ;;  %v23383_v21 = vrot.slane %v22316_v3, 7  ;;  %v13321_v34 = vadd.f32 %v23385_v46, %v12834_v43  ;;  %v14411_v0 = vadd.f32 %v14286_v7, %v13924_v15 }
 0x475   : > { %23381 = vst [vmem:[#allocation30_spill] sm:$0xff] %v22536_v51  ;;  %v23386_v42 = vrot.slane %v22339_v49, 7  ;;  %v23388_v60 = vrot.slane %v22314_v50, 7  ;;  %v15019_v29 = vrot.slane %v14837_v58, 1  ;;  %v15021_v15 = vrot.slane %v22538_v24, 1  ;;  %v18494_v50 = vpop.f32.mrf.mxu1 }
 0x476   : > { %v22546_v31 = vsel %vm14737_vm7, %v23376_v61, %v23383_v21  ;;  %v23389_v33 = vmov %v23383_v21  ;;  %v23391_v21 = vunpack.i.l.bf16 %v22155_v11  ;;  %v14416_v7 = vadd.f32 %v18541_v45, %v13929_v14  ;;  %v14299_v61 = vpop.f32.mrf.mxu0 }
 0x477   : > { %23384 = vst [vmem:[#allocation32_spill] sm:$0xff] %v22546_v31  ;;  %v22552_v10 = vsel %vm14737_vm7, %v14791_v48, %v23386_v42  ;;  %v22559_v18 = vsel %vm14737_vm7, %v23389_v33, %v23388_v60  ;;  %v14836_v42 = vmul.f32 %v22378_v53, %v14411_v0  ;;  %v13927_v48 = vadd.f32 %v13812_v35, %v13321_v34 }
 0x478   : > { %23387 = vst [vmem:[#allocation31_spill] sm:$0xff] %v22552_v10  ;;  %23390 = vst [vmem:[#allocation73_spill] sm:$0xff] %v22559_v18  ;;  %v15112_v43 = vsel %vm14982_vm8, %v23391_v21, %v15016_v63  ;;  %v23392_v3 = vrot.slane %v22430_v19, 7  ;;  %v23393_v60 = vrot.slane %v22367_v6, 7  ;;  %v14906_v18 = vmul.f32 %v14837_v58, %v14837_v58 }
 0x479   : > { %v16510_v46 = vpack.c.bf16 %v15112_v43, %v15112_v43  ;;  %v14904_v10 = vmul.f32 %v14835_v4, %v14835_v4  ;;  %v15022_v21 = vsel %vm1657_vm1, %v15019_v29, %v15021_v15  ;;  %v23395_v45 = vrot.slane %v22369_v47, 7  ;;  %v13815_v43 = vpop.f32.mrf.mxu1 }
 0x47a   : > { %v22572_v33 = vsel %vm14737_vm7, %v23393_v60, %v23392_v3  ;;  %v23396_v14 = vrot.slane %v22339_v49, 7  ;;  %v14907_v53 = vmul.f32 %v22538_v24, %v22538_v24  ;;  %v15115_v3 = vsel %vm14982_vm8, %v22153_v36, %v15022_v21 }
 0x47b   : > { %23394 = vst [vmem:[#allocation74_spill] sm:$0xff] %v22572_v33  ;;  %v14867_v34 = vadd.f32 %v14836_v42, %v14835_v4  ;;  %v14905_v0 = vmul.f32 %v14836_v42, %v14836_v42  ;;  %v16513_v60 = vpack.c.bf16 %v15115_v3, %v15115_v3  ;;  %v15017_v33 = vrot.slane %v14836_v42, 1  ;;  %v18497_v2 = vpop.f32.mrf.mxu1 }
 0x47c   : > { %v22580_v35 = vsel %vm14737_vm7, %v23396_v14, %v23395_v45  ;;  %v22588_v6 = vmul.f32 %v22386_v44, %v14416_v7  ;;  %v13930_v49 = vadd.f32 %v18494_v50, %v22241_v54  ;;  %v18542_v45 = vpop.f32.mrf.mxu0  ;;  %v15249_v14 = vshrl.u32 %v16510_v46, 16 }
 0x47d   : > { %23397 = vst [vmem:[#allocation75_spill] sm:$0xff] %v22580_v35  ;;  %v14868_v35 = vadd.f32 %v14867_v34, %v14837_v58  ;;  %v14936_v47 = vadd.f32 %v14905_v0, %v14904_v10  ;;  %v14414_v19 = vadd.f32 %v14299_v61, %v13927_v48  ;;  %v15272_v31 = vshrl.u32 %v16513_v60, 16 }
 0x47e   : > { %v15275_v51 = vshll.u32 %v16513_v60, 16  ;;  %v15018_v36 = vsel %vm1657_vm1, %v15016_v63, %v15017_v33  ;;  %v15020_v4 = vsel %vm1657_vm1, %v15017_v33, %v15019_v29  ;;  %v23398_v42 = vunpack.i.h.bf16 %v22155_v11  ;;  %v14302_v11 = vpop.f32.mrf.mxu0 }
 0x47f   : > { %v14937_v21 = vadd.f32 %v14936_v47, %v14906_v18  ;;  %v15114_v54 = vsel %vm14982_vm8, %v22168_v40, %v15020_v4  ;;  %v22601_v50 = vmul.f32 %v22389_v32, %v14414_v19  ;;  %v22603_v58 = vrot.slane %v15272_v31, 7  ;;  %v13828_v18 = vpop.f32.mrf.mxu1  ;;  %v23402_v4 = vld [vmem:[#allocation35_spill] sm:$0xff] }
 0x480   : > { %v15113_v44 = vsel %vm14982_vm8, %v23398_v42, %v15018_v36  ;;  %v16512_v10 = vpack.c.bf16 %v15114_v54, %v15114_v54  ;;  %v14869_v47 = vadd.f32 %v14868_v35, %v22538_v24  ;;  %v14417_v61 = vadd.f32 %v18542_v45, %v13930_v49  ;;  %v23399_v49 = vld [vmem:[#allocation33_spill] sm:$0xff] }
 0x481   : > { %v16511_v63 = vpack.c.bf16 %v15113_v44, %v15113_v44  ;;  %v14908_v29 = vmul.f32 %v22601_v50, %v22601_v50  ;;  %v14938_v7 = vadd.f32 %v14937_v21, %v14907_v53  ;;  %v15023_v40 = vrot.slane %v22601_v50, 1  ;;  %v22623_v60 = vpop.f32.mrf.mxu1 }
 0x482   : > { %v16502_v32 = vrot.slane %v15249_v14, 11  ;;  %v15277_v19 = vor.u32 %v15275_v51, %v22603_v58  ;;  %v15027_v46 = vrot.slane %v22588_v6, 1  ;;  %v15263_v33 = vshrl.u32 %v16512_v10, 16  ;;  %v18545_v51 = vpop.f32.mrf.mxu0 }
 0x483   : > { %v15254_v31 = vshrl.u32 %v16511_v63, 16  ;;  %v15257_v48 = vshll.u32 %v16511_v63, 16  ;;  %v14870_v24 = vadd.f32 %v14869_v47, %v22601_v50  ;;  %v14939_v35 = vadd.f32 %v14938_v7, %v14908_v29 }
 0x484   : > { %v15024_v53 = vsel %vm1657_vm1, %v15021_v15, %v15023_v40  ;;  %v22620_v34 = vmul.f32 %v22394_v26, %v14417_v61  ;;  %v13928_v0 = vadd.f32 %v13815_v43, %v23399_v49  ;;  %v15265_v14 = vrot.slane %v15263_v33, 7 }
 0x485   : > { %v15256_v3 = vrot.slane %v15254_v31, 7  ;;  %v15266_v36 = vshll.u32 %v16512_v10, 16  ;;  %v15116_v15 = vsel %vm14982_vm8, %v22166_v12, %v15024_v53  ;;  %v13933_v26 = vadd.f32 %v18497_v2, %v23402_v4  ;;  %v14315_v2 = vpop.f32.mrf.mxu0  ;;  %v13831_v31 = vpop.f32.mrf.mxu1 }
 0x486   : > { %v16514_v42 = vpack.c.bf16 %v15116_v15, %v15116_v15  ;;  %v13931_v44 = vadd.f32 %v13828_v18, %v22254_v5  ;;  %v15270_v63 = vrot.slane %v15265_v14, 4  ;;  %v15029_v47 = vrot.slane %v22620_v34, 1 }
 0x487   : > { %v15259_v21 = vor.u32 %v15257_v48, %v15256_v3  ;;  %v15261_v43 = vrot.slane %v15256_v3, 4  ;;  %v15268_v54 = vor.u32 %v15266_v36, %v15265_v14  ;;  %v14415_v29 = vadd.f32 %v14302_v11, %v13928_v0  ;;  %v23403_v3 = vld [vmem:[#allocation27_spill] sm:$0xff] }
 0x488   : > { %v14910_v7 = vmul.f32 %v22588_v6, %v22588_v6  ;;  %v15281_v12 = vshrl.u32 %v16514_v42, 16  ;;  %v14420_v61 = vadd.f32 %v18545_v51, %v13933_v26  ;;  %v15278_v5 = vsel %vm22627_vm11, %v15270_v63, %v15277_v19  ;;  %v18546_v26 = vpop.f32.mrf.mxu0 }
 0x489   : > { %v15260_v10 = vsel %vm22627_vm11, %v16502_v32, %v15259_v21  ;;  %v15269_v48 = vsel %vm22627_vm11, %v15261_v43, %v15268_v54  ;;  %v15030_v11 = vsel %vm1657_vm1, %v15027_v46, %v15029_v47  ;;  %v14840_v18 = vmul.f32 %v22397_v20, %v14415_v29  ;;  %15574 = vst [vmem:[%s22647_s10 + $0x8] sm:$0xf] %v15278_v5  ;;  %v18501_v21 = vpop.f32.mrf.mxu1 }
 0x48a   : > { %15572 = vst [vmem:[%s22647_s10] sm:$0xf] %v15260_v10  ;;  %15573 = vst [vmem:[%s22647_s10 + $0x4] sm:$0xf] %v15269_v48  ;;  %v22654_v32 = vrot.slane %v15281_v12, 7  ;;  %v15284_v33 = vshll.u32 %v16514_v42, 16  ;;  %v15119_v19 = vsel %vm14982_vm8, %v23403_v3, %v15030_v11  ;;  %v14418_v53 = vadd.f32 %v14315_v2, %v13931_v44  ;;  %v23404_v12 = vld [vmem:[#allocation26_spill] sm:$0xff] }
 0x48b   : > { %v16517_v49 = vpack.c.bf16 %v15119_v19, %v15119_v19  ;;  %v14871_v0 = vadd.f32 %v14870_v24, %v14840_v18  ;;  %v14909_v51 = vmul.f32 %v14840_v18, %v14840_v18  ;;  %v15025_v14 = vrot.slane %v14840_v18, 1  ;;  %v13844_v48 = vpop.f32.mrf.mxu1 }
 0x48c   : > { %v15279_v36 = vrot.slane %v22603_v58, 4  ;;  %v15286_v15 = vor.u32 %v15284_v33, %v22654_v32  ;;  %v14911_v20 = vmul.f32 %v22620_v34, %v22620_v34  ;;  %v22664_v4 = vmul.f32 %v22410_v55, %v14420_v61 }
 0x48d   : > { %v15308_v43 = vshrl.u32 %v16517_v49, 16  ;;  %v15311_v42 = vshll.u32 %v16517_v49, 16  ;;  %v14872_v44 = vadd.f32 %v14871_v0, %v22588_v6  ;;  %v14940_v24 = vadd.f32 %v14939_v35, %v14909_v51  ;;  %v23405_v35 = vld [vmem:[#allocation25_spill] sm:$0xff] }
 0x48e   : > { %v15287_v54 = vsel %vm22627_vm11, %v15279_v36, %v15286_v15  ;;  %v15026_v58 = vsel %vm1657_vm1, %v15023_v40, %v15025_v14  ;;  %v15028_v63 = vsel %vm1657_vm1, %v15025_v14, %v15027_v46  ;;  %v22674_v29 = vmul.f32 %v22417_v62, %v14418_v53  ;;  %v14318_v62 = vpop.f32.mrf.mxu0 }
 0x48f   : > { %15575 = vst [vmem:[%s22647_s10 + $0xc] sm:$0xf] %v15287_v54  ;;  %v22677_v55 = vrot.slane %v15308_v43, 7  ;;  %v14941_v10 = vadd.f32 %v14940_v24, %v14910_v7  ;;  %v15117_v6 = vsel %vm14982_vm8, %v23404_v12, %v15026_v58  ;;  %v15118_v61 = vsel %vm14982_vm8, %v23405_v35, %v15028_v63  ;;  %v23408_v58 = vld [vmem:[#allocation40_spill] sm:$0xff] }
 0x490   : > { %v15288_v50 = vrot.slane %v22654_v32, 4  ;;  %v16515_v40 = vpack.c.bf16 %v15117_v6, %v15117_v6  ;;  %v16516_v2 = vpack.c.bf16 %v15118_v61, %v15118_v61  ;;  %v14873_v46 = vadd.f32 %v14872_v44, %v22620_v34  ;;  %v23406_v34 = vld [vmem:[#allocation36_spill] sm:$0xff]  ;;  %v18502_v44 = vpop.f32.mrf.mxu1 }
 0x491   : > { %v15313_v5 = vor.u32 %v15311_v42, %v22677_v55  ;;  %v14912_v7 = vmul.f32 %v22674_v29, %v22674_v29  ;;  %v14942_v11 = vadd.f32 %v14941_v10, %v14911_v20  ;;  %v15031_v18 = vrot.slane %v22674_v29, 1  ;;  %v23407_v20 = vld [vmem:[#allocation39_spill] sm:$0xff]  ;;  %v18549_v42 = vpop.f32.mrf.mxu0 }
 0x492   : > { %v15290_v33 = vshrl.u32 %v16515_v40, 16  ;;  %v15293_v3 = vshll.u32 %v16515_v40, 16  ;;  %v15299_v19 = vshrl.u32 %v16516_v2, 16  ;;  %v15302_v53 = vshll.u32 %v16516_v2, 16 }
 0x493   : > { %v14874_v32 = vadd.f32 %v14873_v46, %v22674_v29  ;;  %v14943_v49 = vadd.f32 %v14942_v11, %v14912_v7  ;;  %v15032_v0 = vsel %vm1657_vm1, %v15029_v47, %v15031_v18  ;;  %v13934_v51 = vadd.f32 %v22623_v60, %v23406_v34  ;;  %v23409_v29 = vld [vmem:[#allocation41_spill] sm:$0xff]  ;;  %v14331_v46 = vpop.f32.mrf.mxu0 }
 0x494   : > { %v15292_v14 = vrot.slane %v15290_v33, 7  ;;  %v15301_v36 = vrot.slane %v15299_v19, 7  ;;  %v15120_v15 = vsel %vm14982_vm8, %v22192_v22, %v15032_v0  ;;  %v13932_v43 = vadd.f32 %v13831_v31, %v23407_v20 }
 0x495   : > { %v16518_v24 = vpack.c.bf16 %v15120_v15, %v15120_v15  ;;  %v14421_v54 = vadd.f32 %v18546_v26, %v13934_v51  ;;  %v13937_v63 = vadd.f32 %v18501_v21, %v23408_v58  ;;  %v13935_v47 = vadd.f32 %v13844_v48, %v23409_v29  ;;  %v13847_v48 = vpop.f32.mrf.mxu1  ;;  %v23410_v51 = vld [vmem:[#allocation24_spill] sm:$0xff]  ;;  %v18550_v20 = vpop.f32.mrf.mxu0 }
 0x496   : > { %v15295_v10 = vor.u32 %v15293_v3, %v15292_v14  ;;  %v15297_v60 = vrot.slane %v15292_v14, 4  ;;  %v15304_v12 = vor.u32 %v15302_v53, %v15301_v36  ;;  %v15306_v6 = vrot.slane %v15301_v36, 4  ;;  %v23411_v36 = vld [vmem:[#allocation43_spill] sm:$0xff] }
 0x497   : > { %v15035_v35 = vrot.slane %v22664_v4, 1  ;;  %v15317_v22 = vshrl.u32 %v16518_v24, 16  ;;  %v22703_v31 = vmul.f32 %v22422_v39, %v14421_v54  ;;  %v14419_v61 = vadd.f32 %v14318_v62, %v13932_v43  ;;  %v18505_v43 = vpop.f32.mrf.mxu1 }
 0x498   : > { %v15296_v26 = vsel %vm22627_vm11, %v15288_v50, %v15295_v10  ;;  %v15305_v21 = vsel %vm22627_vm11, %v15297_v60, %v15304_v12  ;;  %v15314_v40 = vsel %vm22627_vm11, %v15306_v6, %v15313_v5  ;;  %v14424_v2 = vadd.f32 %v18549_v42, %v13937_v63  ;;  %v23413_v12 = vld [vmem:[#allocation28_spill] sm:$0xff] }
 0x499   : > { %15576 = vst [vmem:[%s22647_s10 + $0x10] sm:$0xf] %v15296_v26  ;;  %15577 = vst [vmem:[%s22647_s10 + $0x14] sm:$0xf] %v15305_v21  ;;  %v22714_v7 = vrot.slane %v15317_v22, 7  ;;  %v15320_v39 = vshll.u32 %v16518_v24, 16  ;;  %v14844_v11 = vmul.f32 %v22437_v38, %v14419_v61  ;;  %v14914_v33 = vmul.f32 %v22664_v4, %v22664_v4  ;;  %v13860_v61 = vpop.f32.mrf.mxu1 }
 0x49a   : > { %15578 = vst [vmem:[%s22647_s10 + $0x18] sm:$0xf] %v15314_v40  ;;  %v15037_v62 = vrot.slane %v22703_v31, 1  ;;  %v15315_v50 = vrot.slane %v22677_v55, 4  ;;  %v14915_v5 = vmul.f32 %v22703_v31, %v22703_v31  ;;  %v14422_v3 = vadd.f32 %v14331_v46, %v13935_v47 }
 0x49b   : > { %v15322_v19 = vor.u32 %v15320_v39, %v22714_v7  ;;  %v14875_v0 = vadd.f32 %v14874_v32, %v14844_v11  ;;  %v22726_v34 = vmul.f32 %v22447_v57, %v14424_v2  ;;  %v14913_v55 = vmul.f32 %v14844_v11, %v14844_v11  ;;  %v23412_v32 = vld [vmem:[#allocation44_spill] sm:$0xff] }
 0x49c   : > { %v15038_v53 = vsel %vm1657_vm1, %v15035_v35, %v15037_v62  ;;  %v15033_v14 = vrot.slane %v14844_v11, 1  ;;  %v13938_v15 = vadd.f32 %v18502_v44, %v23411_v36  ;;  %v13936_v58 = vadd.f32 %v13847_v48, %v23412_v32  ;;  %v23415_v36 = vld [vmem:[#allocation45_spill] sm:$0xff] }
 0x49d   : > { %v15123_v38 = vsel %vm14982_vm8, %v23410_v51, %v15038_v53  ;;  %v15323_v42 = vsel %vm22627_vm11, %v15315_v50, %v15322_v19  ;;  %v14876_v54 = vadd.f32 %v14875_v0, %v22664_v4  ;;  %v14944_v57 = vadd.f32 %v14943_v49, %v14913_v55  ;;  %v18506_v0 = vpop.f32.mrf.mxu1 }
 0x49e   : > { %v16521_v24 = vpack.c.bf16 %v15123_v38, %v15123_v38  ;;  %15579 = vst [vmem:[%s22647_s10 + $0x1c] sm:$0xf] %v15323_v42  ;;  %v15034_v63 = vsel %vm1657_vm1, %v15031_v18, %v15033_v14  ;;  %v15036_v29 = vsel %vm1657_vm1, %v15033_v14, %v15035_v35  ;;  %v22740_v47 = vmul.f32 %v22454_v27, %v14422_v3  ;;  %v14334_v35 = vpop.f32.mrf.mxu0  ;;  %v23414_v38 = vld [vmem:[#allocation29_spill] sm:$0xff] }
 0x49f   : > { %v15324_v44 = vrot.slane %v22714_v7, 4  ;;  %v15121_v60 = vsel %vm14982_vm8, %v22207_v13, %v15034_v63  ;;  %v15122_v4 = vsel %vm14982_vm8, %v23413_v12, %v15036_v29  ;;  %v14945_v6 = vadd.f32 %v14944_v57, %v14914_v33 }
 0x4a0   : > { %v15344_v10 = vshrl.u32 %v16521_v24, 16  ;;  %v16519_v49 = vpack.c.bf16 %v15121_v60, %v15121_v60  ;;  %v16520_v22 = vpack.c.bf16 %v15122_v4, %v15122_v4  ;;  %v14877_v18 = vadd.f32 %v14876_v54, %v22703_v31  ;;  %v18553_v53 = vpop.f32.mrf.mxu0 }
 0x4a1   : > { %v15347_v26 = vshll.u32 %v16521_v24, 16  ;;  %v15039_v21 = vrot.slane %v22740_v47, 1  ;;  %v14425_v40 = vadd.f32 %v18550_v20, %v13938_v15  ;;  %v14916_v48 = vmul.f32 %v22740_v47, %v22740_v47 }
 0x4a2   : > { %v22750_v27 = vrot.slane %v15344_v10, 7  ;;  %v15326_v2 = vshrl.u32 %v16519_v49, 16  ;;  %v15329_v46 = vshll.u32 %v16519_v49, 16  ;;  %v15335_v13 = vshrl.u32 %v16520_v22, 16  ;;  %v14347_v29 = vpop.f32.mrf.mxu0 }
 0x4a3   : > { %v15338_v39 = vshll.u32 %v16520_v22, 16  ;;  %v14878_v11 = vadd.f32 %v14877_v18, %v22740_v47  ;;  %v14946_v31 = vadd.f32 %v14945_v6, %v14915_v5  ;;  %v15040_v3 = vsel %vm1657_vm1, %v15037_v62, %v15039_v21  ;;  %v13863_v47 = vpop.f32.mrf.mxu1 }
 0x4a4   : > { %v15349_v7 = vor.u32 %v15347_v26, %v22750_v27  ;;  %v15328_v50 = vrot.slane %v15326_v2, 7  ;;  %v15337_v33 = vrot.slane %v15335_v13, 7  ;;  %v22759_v19 = vmul.f32 %v22463_v8, %v14425_v40  ;;  %v23416_v13 = vld [vmem:[#allocation48_spill] sm:$0xff] }
 0x4a5   : > { %v14947_v51 = vadd.f32 %v14946_v31, %v14916_v48  ;;  %v15124_v55 = vsel %vm14982_vm8, %v23414_v38, %v15040_v3  ;;  %v14423_v14 = vadd.f32 %v14334_v35, %v13936_v58  ;;  %v13941_v15 = vadd.f32 %v18505_v43, %v23415_v36 }
 0x4a6   : > { %v15331_v5 = vor.u32 %v15329_v46, %v15328_v50  ;;  %v15333_v20 = vrot.slane %v15328_v50, 4  ;;  %v15340_v42 = vor.u32 %v15338_v39, %v15337_v33  ;;  %v15342_v62 = vrot.slane %v15337_v33, 4 }
 0x4a7   : > { %v15043_v8 = vrot.slane %v22726_v34, 1  ;;  %v16522_v24 = vpack.c.bf16 %v15124_v55, %v15124_v55  ;;  %v15045_v54 = vrot.slane %v22759_v19, 1  ;;  %v14848_v32 = vmul.f32 %v22472_v37, %v14423_v14  ;;  %v23417_v14 = vld [vmem:[#allocation49_spill] sm:$0xff] }
 0x4a8   : > { %v15332_v57 = vsel %vm22627_vm11, %v15324_v44, %v15331_v5  ;;  %v15341_v58 = vsel %vm22627_vm11, %v15333_v20, %v15340_v42  ;;  %v15350_v43 = vsel %vm22627_vm11, %v15342_v62, %v15349_v7  ;;  %v14428_v63 = vadd.f32 %v18553_v53, %v13941_v15  ;;  %v18554_v7 = vpop.f32.mrf.mxu0 }
 0x4a9   : > { %15580 = vst [vmem:[%s22647_s10 + $0x20] sm:$0xf] %v15332_v57  ;;  %15581 = vst [vmem:[%s22647_s10 + $0x24] sm:$0xf] %v15341_v58  ;;  %v14918_v10 = vmul.f32 %v22726_v34, %v22726_v34  ;;  %v15353_v60 = vshrl.u32 %v16522_v24, 16  ;;  %v15046_v37 = vsel %vm1657_vm1, %v15043_v8, %v15045_v54  ;;  %v14879_v44 = vadd.f32 %v14878_v11, %v14848_v32  ;;  %v23418_v58 = vld [vmem:[#allocation50_spill] sm:$0xff] }
 0x4aa   : > { %15582 = vst [vmem:[%s22647_s10 + $0x28] sm:$0xf] %v15350_v43  ;;  %v15127_v12 = vsel %vm14982_vm8, %v22249_v52, %v15046_v37  ;;  %v14917_v4 = vmul.f32 %v14848_v32, %v14848_v32  ;;  %v15041_v6 = vrot.slane %v14848_v32, 1  ;;  %v22786_v49 = vmul.f32 %v22479_v23, %v14428_v63  ;;  %v18509_v52 = vpop.f32.mrf.mxu1  ;;  %v14350_v15 = vpop.f32.mrf.mxu0  ;;  %v23419_v63 = vld [vmem:[#allocation52_spill] sm:$0xff] }
 0x4ab   : > { %v15355_v22 = vrot.slane %v15353_v60, 7  ;;  %v15356_v18 = vshll.u32 %v16522_v24, 16  ;;  %v16525_v35 = vpack.c.bf16 %v15127_v12, %v15127_v12  ;;  %v14880_v26 = vadd.f32 %v14879_v44, %v22726_v34 }
 0x4ac   : > { %v14948_v40 = vadd.f32 %v14947_v51, %v14917_v4  ;;  %v15042_v2 = vsel %vm1657_vm1, %v15039_v21, %v15041_v6  ;;  %v15044_v46 = vsel %vm1657_vm1, %v15041_v6, %v15043_v8  ;;  %v13939_v48 = vadd.f32 %v13860_v61, %v23416_v13  ;;  %v18557_v4 = vpop.f32.mrf.mxu0 }
 0x4ad   : > { %v15351_v39 = vrot.slane %v22750_v27, 4  ;;  %v15358_v11 = vor.u32 %v15356_v18, %v15355_v22  ;;  %v14919_v23 = vmul.f32 %v22759_v19, %v22759_v19  ;;  %v15380_v31 = vshrl.u32 %v16525_v35, 16  ;;  %v23421_v18 = vld [vmem:[#allocation72_spill] sm:$0xff] }
 0x4ae   : > { %v15383_v50 = vshll.u32 %v16525_v35, 16  ;;  %v14949_v33 = vadd.f32 %v14948_v40, %v14918_v10  ;;  %v15125_v34 = vsel %vm14982_vm8, %v22238_v25, %v15042_v2  ;;  %v15126_v21 = vsel %vm14982_vm8, %v22236_v41, %v15044_v46  ;;  %v13876_v25 = vpop.f32.mrf.mxu1  ;;  %v23420_v10 = vld [vmem:[#allocation53_spill] sm:$0xff] }
 0x4af   : > { %v15359_v61 = vsel %vm22627_vm11, %v15351_v39, %v15358_v11  ;;  %v22803_v3 = vrot.slane %v15380_v31, 7  ;;  %v16523_v27 = vpack.c.bf16 %v15125_v34, %v15125_v34  ;;  %v16524_v53 = vpack.c.bf16 %v15126_v21, %v15126_v21 }
 0x4b0   : > { %15583 = vst [vmem:[%s22647_s10 + $0x2c] sm:$0xf] %v15359_v61  ;;  %v14426_v51 = vadd.f32 %v14347_v29, %v13939_v48  ;;  %v14881_v38 = vadd.f32 %v14880_v26, %v22759_v19  ;;  %v14950_v55 = vadd.f32 %v14949_v33, %v14919_v23  ;;  %v13942_v36 = vadd.f32 %v18506_v0, %v23417_v14  ;;  %v23422_v48 = vld [vmem:[#allocation34_spill] sm:$0xff]  ;;  %v18510_v39 = vpop.f32.mrf.mxu1  ;;  %v23423_v23 = vld [vmem:[#allocation23_spill] sm:$0xff] }
 0x4b1   : > { %v15360_v5 = vrot.slane %v15355_v22, 4  ;;  %v15385_v20 = vor.u32 %v15383_v50, %v22803_v3  ;;  %v15362_v41 = vshrl.u32 %v16523_v27, 16  ;;  %v15365_v42 = vshll.u32 %v16523_v27, 16  ;;  %v14363_v50 = vpop.f32.mrf.mxu0 }
 0x4b2   : > { %v15371_v62 = vshrl.u32 %v16524_v53, 16  ;;  %v15374_v8 = vshll.u32 %v16524_v53, 16  ;;  %v14851_v24 = vmul.f32 %v22486_v59, %v14426_v51  ;;  %v14429_v32 = vadd.f32 %v18554_v7, %v13942_v36  ;;  %v23424_v53 = vld [vmem:[#allocation42_spill] sm:$0xff] }
 0x4b3   : > { %v15364_v57 = vrot.slane %v15362_v41, 7  ;;  %v13940_v43 = vadd.f32 %v13863_v47, %v23418_v58  ;;  %v13945_v29 = vadd.f32 %v18509_v52, %v23419_v63  ;;  %v13943_v60 = vadd.f32 %v13876_v25, %v23420_v10  ;;  %v23426_v10 = vld [vmem:[#allocation38_spill] sm:$0xff] }
 0x4b4   : > { %v15373_v0 = vrot.slane %v15371_v62, 7  ;;  %v14882_v37 = vadd.f32 %v14881_v38, %v14851_v24  ;;  %v14920_v44 = vmul.f32 %v14851_v24, %v14851_v24  ;;  %v15047_v12 = vrot.slane %v14851_v24, 1 }
 0x4b5   : > { %v15367_v6 = vor.u32 %v15365_v42, %v15364_v57  ;;  %v15369_v22 = vrot.slane %v15364_v57, 4  ;;  %v22814_v35 = vmul.f32 %v23421_v18, %v14429_v32  ;;  %v14427_v59 = vadd.f32 %v14350_v15, %v13940_v43  ;;  %v18558_v43 = vpop.f32.mrf.mxu0 }
 0x4b6   : > { %v15376_v26 = vor.u32 %v15374_v8, %v15373_v0  ;;  %v15378_v47 = vrot.slane %v15373_v0, 4  ;;  %v14951_v40 = vadd.f32 %v14950_v55, %v14920_v44  ;;  %v15048_v2 = vsel %vm1657_vm1, %v15045_v54, %v15047_v12  ;;  %v23425_v55 = vld [vmem:[#allocation54_spill] sm:$0xff]  ;;  %v13879_v8 = vpop.f32.mrf.mxu1 }
 0x4b7   : > { %v15368_v46 = vsel %vm22627_vm11, %v15360_v5, %v15367_v6  ;;  %v15051_v13 = vrot.slane %v22786_v49, 1  ;;  %v15128_v7 = vsel %vm14982_vm8, %v23422_v48, %v15048_v2  ;;  %v15053_v52 = vrot.slane %v22814_v35, 1 }
 0x4b8   : > { %v15377_v11 = vsel %vm22627_vm11, %v15369_v22, %v15376_v26  ;;  %v15386_v19 = vsel %vm22627_vm11, %v15378_v47, %v15385_v20  ;;  %15584 = vst [vmem:[%s22647_s10 + $0x30] sm:$0xf] %v15368_v46  ;;  %v16526_v54 = vpack.c.bf16 %v15128_v7, %v15128_v7  ;;  %v14852_v31 = vmul.f32 %v23423_v23, %v14427_v59  ;;  %v18513_v22 = vpop.f32.mrf.mxu1 }
 0x4b9   : > { %15585 = vst [vmem:[%s22647_s10 + $0x34] sm:$0xf] %v15377_v11  ;;  %15586 = vst [vmem:[%s22647_s10 + $0x38] sm:$0xf] %v15386_v19  ;;  %v14922_v33 = vmul.f32 %v22786_v49, %v22786_v49  ;;  %v15054_v34 = vsel %vm1657_vm1, %v15051_v13, %v15053_v52  ;;  %v14432_v21 = vadd.f32 %v18557_v4, %v13945_v29  ;;  %v15387_v24 = vrot.slane %v22803_v3, 4 }
 0x4ba   : > { %v14430_v61 = vadd.f32 %v14363_v50, %v13943_v60  ;;  %v15389_v27 = vshrl.u32 %v16526_v54, 16  ;;  %v15131_v51 = vsel %vm14982_vm8, %v23424_v53, %v15054_v34  ;;  %v14883_v38 = vadd.f32 %v14882_v37, %v14852_v31  ;;  %v23427_v60 = vld [vmem:[#allocation37_spill] sm:$0xff] }
 0x4bb   : > { %v13946_v14 = vadd.f32 %v18510_v39, %v23425_v55  ;;  %v16529_v36 = vpack.c.bf16 %v15131_v51, %v15131_v51  ;;  %v14921_v15 = vmul.f32 %v14852_v31, %v14852_v31  ;;  %v15049_v25 = vrot.slane %v14852_v31, 1  ;;  %v23428_v31 = vld [vmem:[#allocation57_spill] sm:$0xff] }
 0x4bc   : > { %v22844_v5 = vmul.f32 %v22510_v30, %v14432_v21  ;;  %v15391_v20 = vrot.slane %v15389_v27, 7  ;;  %v15392_v41 = vshll.u32 %v16526_v54, 16  ;;  %v14884_v42 = vadd.f32 %v14883_v38, %v22786_v49  ;;  %v13892_v21 = vpop.f32.mrf.mxu1 }
 0x4bd   : > { %v22848_v62 = vmul.f32 %v22517_v9, %v14430_v61  ;;  %v15416_v32 = vshrl.u32 %v16529_v36, 16  ;;  %v14952_v57 = vadd.f32 %v14951_v40, %v14921_v15  ;;  %v15050_v58 = vsel %vm1657_vm1, %v15047_v12, %v15049_v25  ;;  %v14366_v40 = vpop.f32.mrf.mxu0 }
 0x4be   : > { %v15394_v63 = vor.u32 %v15392_v41, %v15391_v20  ;;  %v14923_v30 = vmul.f32 %v22814_v35, %v22814_v35  ;;  %v15052_v29 = vsel %vm1657_vm1, %v15049_v25, %v15051_v13  ;;  %v15129_v9 = vsel %vm14982_vm8, %v23426_v10, %v15050_v58 }
 0x4bf   : > { %v14953_v49 = vadd.f32 %v14952_v57, %v14922_v33  ;;  %v15130_v3 = vsel %vm14982_vm8, %v23427_v60, %v15052_v29  ;;  %v16527_v0 = vpack.c.bf16 %v15129_v9, %v15129_v9  ;;  %v14433_v37 = vadd.f32 %v18558_v43, %v13946_v14  ;;  %v23429_v33 = vld [vmem:[#allocation58_spill] sm:$0xff]  ;;  %v18561_v38 = vpop.f32.mrf.mxu0 }
 0x4c0   : > { %v15395_v44 = vsel %vm22627_vm11, %v15387_v24, %v15394_v63  ;;  %v15396_v12 = vrot.slane %v15391_v20, 4  ;;  %v15419_v4 = vshll.u32 %v16529_v36, 16  ;;  %v16528_v6 = vpack.c.bf16 %v15130_v3, %v15130_v3  ;;  %v18514_v24 = vpop.f32.mrf.mxu1  ;;  %v23431_v29 = vld [vmem:[#allocation30_spill] sm:$0xff] }
 0x4c1   : > { %15587 = vst [vmem:[%s22647_s10 + $0x3c] sm:$0xf] %v15395_v44  ;;  %v22864_v18 = vrot.slane %v15416_v32, 7  ;;  %v15398_v59 = vshrl.u32 %v16527_v0, 16  ;;  %v15401_v26 = vshll.u32 %v16527_v0, 16  ;;  %v15059_v47 = vrot.slane %v22844_v5, 1  ;;  %v14379_v43 = vpop.f32.mrf.mxu0 }
 0x4c2   : > { %v15407_v2 = vshrl.u32 %v16528_v6, 16  ;;  %v15410_v46 = vshll.u32 %v16528_v6, 16  ;;  %v14885_v13 = vadd.f32 %v14884_v42, %v22814_v35  ;;  %v14924_v48 = vmul.f32 %v22848_v62, %v22848_v62  ;;  %v13895_v6 = vpop.f32.mrf.mxu1 }
 0x4c3   : > { %v15400_v7 = vrot.slane %v15398_v59, 7  ;;  %v14954_v39 = vadd.f32 %v14953_v49, %v14923_v30  ;;  %v15055_v11 = vrot.slane %v22848_v62, 1  ;;  %v22872_v19 = vmul.f32 %v22524_v56, %v14433_v37 }
 0x4c4   : > { %v15409_v54 = vrot.slane %v15407_v2, 7  ;;  %v14886_v23 = vadd.f32 %v14885_v13, %v22848_v62  ;;  %v13944_v50 = vadd.f32 %v13879_v8, %v23428_v31  ;;  %v13949_v34 = vadd.f32 %v18513_v22, %v23429_v33  ;;  %v23430_v62 = vld [vmem:[#allocation59_spill] sm:$0xff] }
 0x4c5   : > { %v15403_v61 = vor.u32 %v15401_v26, %v15400_v7  ;;  %v15405_v27 = vrot.slane %v15400_v7, 4  ;;  %v14955_v53 = vadd.f32 %v14954_v39, %v14924_v48  ;;  %v15056_v51 = vsel %vm1657_vm1, %v15053_v52, %v15055_v11  ;;  %v23433_v26 = vld [vmem:[#allocation62_spill] sm:$0xff]  ;;  %v23434_v39 = vld [vmem:[#allocation47_spill] sm:$0xff] }
 0x4c6   : > { %v15421_v56 = vor.u32 %v15419_v4, %v22864_v18  ;;  %v15412_v55 = vor.u32 %v15410_v46, %v15409_v54  ;;  %v15414_v14 = vrot.slane %v15409_v54, 4  ;;  %v15132_v36 = vsel %vm14982_vm8, %v22273_v1, %v15056_v51 }
 0x4c7   : > { %v15404_v15 = vsel %vm22627_vm11, %v15396_v12, %v15403_v61  ;;  %v16530_v25 = vpack.c.bf16 %v15132_v36, %v15132_v36  ;;  %v15061_v20 = vrot.slane %v22872_v19, 1  ;;  %v14431_v35 = vadd.f32 %v14366_v40, %v13944_v50  ;;  %v23432_v12 = vld [vmem:[#allocation32_spill] sm:$0xff]  ;;  %v18562_v50 = vpop.f32.mrf.mxu0 }
 0x4c8   : > { %v15413_v52 = vsel %vm22627_vm11, %v15405_v27, %v15412_v55  ;;  %v15422_v41 = vsel %vm22627_vm11, %v15414_v14, %v15421_v56  ;;  %15588 = vst [vmem:[%s22647_s10 + $0x40] sm:$0xf] %v15404_v15  ;;  %v14436_v42 = vadd.f32 %v18561_v38, %v13949_v34  ;;  %v13947_v8 = vadd.f32 %v13892_v21, %v23430_v62  ;;  %v18517_v34 = vpop.f32.mrf.mxu1  ;;  %v23437_v62 = vld [vmem:[#allocation63_spill] sm:$0xff] }
 0x4c9   : > { %15589 = vst [vmem:[%s22647_s10 + $0x44] sm:$0xf] %v15413_v52  ;;  %15590 = vst [vmem:[%s22647_s10 + $0x48] sm:$0xf] %v15422_v41  ;;  %v14926_v1 = vmul.f32 %v22844_v5, %v22844_v5  ;;  %v15425_v32 = vshrl.u32 %v16530_v25, 16  ;;  %v15062_v57 = vsel %vm1657_vm1, %v15059_v47, %v15061_v20  ;;  %v14856_v58 = vmul.f32 %v22531_v28, %v14431_v35  ;;  %v23436_v41 = vld [vmem:[#allocation51_spill] sm:$0xff] }
 0x4ca   : > { %v15428_v63 = vshll.u32 %v16530_v25, 16  ;;  %v15135_v30 = vsel %vm14982_vm8, %v22301_v16, %v15062_v57  ;;  %v22903_v10 = vmul.f32 %v23431_v29, %v14436_v42  ;;  %v14434_v9 = vadd.f32 %v14379_v43, %v13947_v8  ;;  %v23438_v57 = vld [vmem:[#allocation31_spill] sm:$0xff]  ;;  %v23439_v43 = vld [vmem:[#allocation64_spill] sm:$0xff] }
 0x4cb   : > { %v15427_v49 = vrot.slane %v15425_v32, 7  ;;  %v16533_v60 = vpack.c.bf16 %v15135_v30, %v15135_v30  ;;  %v14887_v3 = vadd.f32 %v14886_v23, %v14856_v58  ;;  %v14925_v0 = vmul.f32 %v14856_v58, %v14856_v58  ;;  %v23435_v23 = vld [vmem:[#allocation46_spill] sm:$0xff] }
 0x4cc   : > { %v15423_v37 = vrot.slane %v22864_v18, 4  ;;  %v14927_v44 = vmul.f32 %v22872_v19, %v22872_v19  ;;  %v15057_v28 = vrot.slane %v14856_v58, 1  ;;  %v22909_v4 = vmul.f32 %v23432_v12, %v14434_v9 }
 0x4cd   : > { %v15430_v16 = vor.u32 %v15428_v63, %v15427_v49  ;;  %v15452_v22 = vshrl.u32 %v16533_v60, 16  ;;  %v15455_v59 = vshll.u32 %v16533_v60, 16  ;;  %v13950_v40 = vadd.f32 %v18514_v24, %v23433_v26  ;;  %v13908_v24 = vpop.f32.mrf.mxu1  ;;  %v23440_v26 = vld [vmem:[#allocation67_spill] sm:$0xff] }
 0x4ce   : > { %v14888_v2 = vadd.f32 %v14887_v3, %v22844_v5  ;;  %v14956_v46 = vadd.f32 %v14955_v53, %v14925_v0  ;;  %v15058_v13 = vsel %vm1657_vm1, %v15055_v11, %v15057_v28  ;;  %v15060_v18 = vsel %vm1657_vm1, %v15057_v28, %v15059_v47 }
 0x4cf   : > { %v15431_v48 = vsel %vm22627_vm11, %v15423_v37, %v15430_v16  ;;  %v22917_v7 = vrot.slane %v15452_v22, 7  ;;  %v15133_v54 = vsel %vm14982_vm8, %v23434_v39, %v15058_v13  ;;  %v15134_v31 = vsel %vm14982_vm8, %v23435_v23, %v15060_v18  ;;  %v23442_v13 = vld [vmem:[#allocation73_spill] sm:$0xff] }
 0x4d0   : > { %15591 = vst [vmem:[%s22647_s10 + $0x4c] sm:$0xf] %v15431_v48  ;;  %v14957_v5 = vadd.f32 %v14956_v46, %v14926_v1  ;;  %v16531_v33 = vpack.c.bf16 %v15133_v54, %v15133_v54  ;;  %v16532_v11 = vpack.c.bf16 %v15134_v31, %v15134_v31  ;;  %v14889_v47 = vadd.f32 %v14888_v2, %v22872_v19  ;;  %v14382_v19 = vpop.f32.mrf.mxu0  ;;  %v23441_v2 = vld [vmem:[#allocation61_spill] sm:$0xff]  ;;  %v23443_v48 = vld [vmem:[#allocation70_spill] sm:$0xff]  ;;  %v23445_v54 = vld [vmem:[#allocation71_spill] sm:$0xff] }
 0x4d1   : > { %v15432_v21 = vrot.slane %v15427_v49, 4  ;;  %v15457_v61 = vor.u32 %v15455_v59, %v22917_v7  ;;  %v14928_v27 = vmul.f32 %v22909_v4, %v22909_v4  ;;  %v15063_v53 = vrot.slane %v22909_v4, 1 }
 0x4d2   : > { %v15434_v51 = vshrl.u32 %v16531_v33, 16  ;;  %v15437_v38 = vshll.u32 %v16531_v33, 16  ;;  %v15443_v56 = vshrl.u32 %v16532_v11, 16  ;;  %v15446_v55 = vshll.u32 %v16532_v11, 16  ;;  %v18565_v37 = vpop.f32.mrf.mxu0  ;;  %v23449_v33 = vld [vmem:[#allocation66_spill] sm:$0xff] }
 0x4d3   : > { %v14890_v14 = vadd.f32 %v14889_v47, %v22909_v4  ;;  %v14958_v36 = vadd.f32 %v14957_v5, %v14927_v44  ;;  %v15064_v15 = vsel %vm1657_vm1, %v15061_v20, %v15063_v53  ;;  %v14437_v25 = vadd.f32 %v18562_v50, %v13950_v40  ;;  %v23447_v50 = vld [vmem:[#allocation65_spill] sm:$0xff] }
 0x4d4   : > { %v15436_v35 = vrot.slane %v15434_v51, 7  ;;  %v15445_v52 = vrot.slane %v15443_v56, 7  ;;  %v15136_v42 = vsel %vm14982_vm8, %v23436_v41, %v15064_v15  ;;  %v13948_v8 = vadd.f32 %v13895_v6, %v23437_v62  ;;  %v18518_v6 = vpop.f32.mrf.mxu1 }
 0x4d5   : > { %v14959_v1 = vadd.f32 %v14958_v36, %v14928_v27  ;;  %v16534_v32 = vpack.c.bf16 %v15136_v42, %v15136_v42  ;;  %v22938_v58 = vmul.f32 %v23438_v57, %v14437_v25  ;;  %v13953_v63 = vadd.f32 %v18517_v34, %v23439_v43  ;;  %v23451_v27 = vld [vmem:[#allocation74_spill] sm:$0xff]  ;;  %v23454_v43 = vld [vmem:[#allocation55_spill] sm:$0xff] }
 0x4d6   : > { %v15439_v20 = vor.u32 %v15437_v38, %v15436_v35  ;;  %v15441_v30 = vrot.slane %v15436_v35, 4  ;;  %v15448_v29 = vor.u32 %v15446_v55, %v15445_v52  ;;  %v15450_v9 = vrot.slane %v15445_v52, 4  ;;  %v14395_v38 = vpop.f32.mrf.mxu0  ;;  %v13911_v25 = vpop.f32.mrf.mxu1 }
 0x4d7   : > { %v15067_v49 = vrot.slane %v22903_v10, 1  ;;  %v15461_v60 = vshrl.u32 %v16534_v32, 16  ;;  %v15464_v3 = vshll.u32 %v16534_v32, 16  ;;  %v15069_v0 = vrot.slane %v22938_v58, 1  ;;  %v23453_v32 = vld [vmem:[#allocation56_spill] sm:$0xff] }
 0x4d8   : > { %v15440_v44 = vsel %vm22627_vm11, %v15432_v21, %v15439_v20  ;;  %v15449_v28 = vsel %vm22627_vm11, %v15441_v30, %v15448_v29  ;;  %v15458_v12 = vsel %vm22627_vm11, %v15450_v9, %v15457_v61  ;;  %v14435_v4 = vadd.f32 %v14382_v19, %v13948_v8  ;;  %v18566_v20 = vpop.f32.mrf.mxu0  ;;  %v23455_v30 = vld [vmem:[#allocation69_spill] sm:$0xff] }
 0x4d9   : > { %15592 = vst [vmem:[%s22647_s10 + $0x50] sm:$0xf] %v15440_v44  ;;  %15593 = vst [vmem:[%s22647_s10 + $0x54] sm:$0xf] %v15449_v28  ;;  %v22952_v16 = vrot.slane %v15461_v60, 7  ;;  %v15070_v22 = vsel %vm1657_vm1, %v15067_v49, %v15069_v0  ;;  %v14440_v59 = vadd.f32 %v18565_v37, %v13953_v63  ;;  %v13951_v40 = vadd.f32 %v13908_v24, %v23440_v26 }
 0x4da   : > { %15594 = vst [vmem:[%s22647_s10 + $0x58] sm:$0xf] %v15458_v12  ;;  %v15139_v46 = vsel %vm14982_vm8, %v23441_v2, %v15070_v22  ;;  %v14860_v18 = vmul.f32 %v23442_v13, %v14435_v4  ;;  %v23444_v39 = vrot.slane %v23443_v48, 7  ;;  %v23446_v23 = vrot.slane %v23445_v54, 7  ;;  %v14398_v2 = vpop.f32.mrf.mxu0 }
 0x4db   : > { %v23448_v5 = vrot.slane %v23447_v50, 7  ;;  %v23450_v11 = vrot.slane %v23449_v33, 7  ;;  %v15459_v34 = vrot.slane %v22917_v7, 4  ;;  %v15466_v21 = vor.u32 %v15464_v3, %v22952_v16  ;;  %v23452_v7 = vld [vmem:[#allocation68_spill] sm:$0xff] }
 0x4dc   : > { %v14802_v31 = vsel %vm14737_vm7, %v23446_v23, %v23444_v39  ;;  %v16537_v61 = vpack.c.bf16 %v15139_v46, %v15139_v46  ;;  %v22975_v51 = vmul.f32 %v23451_v27, %v14440_v59  ;;  %v14891_v56 = vadd.f32 %v14890_v14, %v14860_v18 }
 0x4dd   : > { %v14798_v47 = vsel %vm14737_vm7, %v23450_v11, %v23448_v5  ;;  %v14929_v55 = vmul.f32 %v14860_v18, %v14860_v18  ;;  %v15065_v36 = vrot.slane %v14860_v18, 1  ;;  %v14438_v15 = vadd.f32 %v14395_v38, %v13951_v40 }
 0x4de   : > { %v14930_v19 = vmul.f32 %v22903_v10, %v22903_v10  ;;  %v15467_v35 = vsel %vm22627_vm11, %v15459_v34, %v15466_v21  ;;  %v15488_v52 = vshrl.u32 %v16537_v61, 16  ;;  %v13954_v41 = vadd.f32 %v18518_v6, %v23452_v7 }
 0x4df   : > { %15595 = vst [vmem:[%s22647_s10 + $0x5c] sm:$0xf] %v15467_v35  ;;  %v14892_v42 = vadd.f32 %v14891_v56, %v22903_v10  ;;  %v14960_v62 = vadd.f32 %v14959_v1, %v14929_v55  ;;  %v15066_v8 = vsel %vm1657_vm1, %v15063_v53, %v15065_v36  ;;  %v15068_v14 = vsel %vm1657_vm1, %v15065_v36, %v15067_v49  ;;  %v23456_v53 = vld [vmem:[#allocation75_spill] sm:$0xff] }
 0x4e0   : > { %v14931_v24 = vmul.f32 %v22938_v58, %v22938_v58  ;;  %v15137_v57 = vsel %vm14982_vm8, %v23453_v32, %v15066_v8  ;;  %v15138_v63 = vsel %vm14982_vm8, %v23454_v43, %v15068_v14  ;;  %v13952_v29 = vadd.f32 %v13911_v25, %v23455_v30 }
 0x4e1   : > { %v14961_v10 = vadd.f32 %v14960_v62, %v14930_v19  ;;  %v16535_v1 = vpack.c.bf16 %v15137_v57, %v15137_v57  ;;  %v16536_v9 = vpack.c.bf16 %v15138_v63, %v15138_v63  ;;  %v14863_v60 = vmul.f32 %v23456_v53, %v14438_v15 }
 0x4e2   : > { %v22996_v49 = vrot.slane %v15488_v52, 7  ;;  %v15491_v3 = vshll.u32 %v16537_v61, 16  ;;  %v14893_v37 = vadd.f32 %v14892_v42, %v22938_v58  ;;  %v14441_v44 = vadd.f32 %v18566_v20, %v13954_v41 }
 0x4e3   : > { %v15470_v28 = vshrl.u32 %v16535_v1, 16  ;;  %v15473_v12 = vshll.u32 %v16535_v1, 16  ;;  %v15479_v4 = vshrl.u32 %v16536_v9, 16  ;;  %v15482_v6 = vshll.u32 %v16536_v9, 16 }
 0x4e4   : > { %v14894_v22 = vadd.f32 %v14893_v37, %v14863_v60  ;;  %v14932_v59 = vmul.f32 %v14863_v60, %v14863_v60  ;;  %v14962_v26 = vadd.f32 %v14961_v10, %v14931_v24  ;;  %v15071_v40 = vrot.slane %v14863_v60, 1 }
 0x4e5   : > { %v15472_v46 = vrot.slane %v15470_v28, 7  ;;  %v15481_v13 = vrot.slane %v15479_v4, 7  ;;  %v14866_v18 = vmul.f32 %v14802_v31, %v14441_v44  ;;  %v14439_v39 = vadd.f32 %v14398_v2, %v13952_v29  ;;  %v23457_v31 = vld [vmem:[#allocation60_spill] sm:$0xff] }
 0x4e6   : > { %v15468_v23 = vrot.slane %v22952_v16, 4  ;;  %v15493_v5 = vor.u32 %v15491_v3, %v22996_v49  ;;  %v14963_v11 = vadd.f32 %v14962_v26, %v14932_v59  ;;  %v15072_v34 = vsel %vm1657_vm1, %v15069_v0, %v15071_v40 }
 0x4e7   : > { %v15475_v21 = vor.u32 %v15473_v12, %v15472_v46  ;;  %v15477_v61 = vrot.slane %v15472_v46, 4  ;;  %v15484_v27 = vor.u32 %v15482_v6, %v15481_v13  ;;  %v15486_v38 = vrot.slane %v15481_v13, 4 }
 0x4e8   : > { %v15075_v56 = vrot.slane %v22975_v51, 1  ;;  %v15140_v16 = vsel %vm14982_vm8, %v23457_v31, %v15072_v34  ;;  %v15077_v55 = vrot.slane %v14866_v18, 1  ;;  %v14864_v36 = vmul.f32 %v14798_v47, %v14439_v39 }
 0x4e9   : > { %v15476_v15 = vsel %vm22627_vm11, %v15468_v23, %v15475_v21  ;;  %v15485_v58 = vsel %vm22627_vm11, %v15477_v61, %v15484_v27  ;;  %v15494_v0 = vsel %vm22627_vm11, %v15486_v38, %v15493_v5  ;;  %v16538_v25 = vpack.c.bf16 %v15140_v16, %v15140_v16 }
 0x4ea   : > { %15596 = vst [vmem:[%s22647_s10 + $0x60] sm:$0xf] %v15476_v15  ;;  %15597 = vst [vmem:[%s22647_s10 + $0x64] sm:$0xf] %v15485_v58  ;;  %v15078_v19 = vsel %vm1657_vm1, %v15075_v56, %v15077_v55  ;;  %v15144_v35 = vsel %vm14982_vm8, %v23443_v48, %v15077_v55  ;;  %v14895_v47 = vadd.f32 %v14894_v22, %v14864_v36  ;;  %v15073_v32 = vrot.slane %v14864_v36, 1 }
 0x4eb   : > { %15598 = vst [vmem:[%s22647_s10 + $0x68] sm:$0xf] %v15494_v0  ;;  %v14933_v52 = vmul.f32 %v14864_v36, %v14864_v36  ;;  %v14934_v7 = vmul.f32 %v22975_v51, %v22975_v51  ;;  %v15497_v41 = vshrl.u32 %v16538_v25, 16  ;;  %v15143_v42 = vsel %vm14982_vm8, %v23445_v54, %v15078_v19 }
 0x4ec   : > { %v16542_v62 = vpack.c.bf16 %v15144_v35, %v15144_v35  ;;  %v16541_v8 = vpack.c.bf16 %v15143_v42, %v15143_v42  ;;  %v14896_v14 = vadd.f32 %v14895_v47, %v22975_v51  ;;  %v15495_v57 = vrot.slane %v22996_v49, 4 }
 0x4ed   : > { %v14964_v24 = vadd.f32 %v14963_v11, %v14933_v52  ;;  %v15499_v48 = vrot.slane %v15497_v41, 7  ;;  %v15500_v43 = vshll.u32 %v16538_v25, 16  ;;  %v14935_v20 = vmul.f32 %v14866_v18, %v14866_v18 }
 0x4ee   : > { %v15533_v63 = vshrl.u32 %v16542_v62, 16  ;;  %v15524_v30 = vshrl.u32 %v16541_v8, 16  ;;  %v14897_v29 = vadd.f32 %v14896_v14, %v14866_v18  ;;  %v15536_v9 = vshll.u32 %v16542_v62, 16 }
 0x4ef   : > { %v14965_v10 = vadd.f32 %v14964_v24, %v14934_v7  ;;  %v15502_v1 = vor.u32 %v15500_v43, %v15499_v48  ;;  %v15074_v53 = vsel %vm1657_vm1, %v15071_v40, %v15073_v32  ;;  %v15076_v49 = vsel %vm1657_vm1, %v15073_v32, %v15075_v56 }
 0x4f0   : > { %v15535_v54 = vrot.slane %v15533_v63, 7  ;;  %v15526_v51 = vrot.slane %v15524_v30, 7  ;;  %v14898_v60 = vrot.slane %v14897_v29, 4  ;;  %v15141_v28 = vsel %vm14982_vm8, %v23449_v33, %v15074_v53 }
 0x4f1   : > { %v14966_v3 = vadd.f32 %v14965_v10, %v14935_v20  ;;  %v15503_v37 = vsel %vm22627_vm11, %v15495_v57, %v15502_v1  ;;  %v15142_v12 = vsel %vm14982_vm8, %v23447_v50, %v15076_v49  ;;  %v16539_v59 = vpack.c.bf16 %v15141_v28, %v15141_v28 }
 0x4f2   : > { %v15538_v44 = vor.u32 %v15536_v9, %v15535_v54  ;;  %15599 = vst [vmem:[%s22647_s10 + $0x6c] sm:$0xf] %v15503_v37  ;;  %v15531_v4 = vrot.slane %v15526_v51, 4  ;;  %v14899_v6 = vadd.f32 %v14898_v60, %v14897_v29  ;;  %v16540_v26 = vpack.c.bf16 %v15142_v12, %v15142_v12 }
 0x4f3   : > { %v14967_v22 = vrot.slane %v14966_v3, 4  ;;  %v15506_v33 = vshrl.u32 %v16539_v59, 16  ;;  %v15527_v50 = vshll.u32 %v16541_v8, 16  ;;  %v23458_v39 = vlaneseq }
 0x4f4   : > { %v15539_v40 = vsel %vm22627_vm11, %v15531_v4, %v15538_v44  ;;  %v14900_v2 = vrot.slane %v14899_v6, 2  ;;  %v15515_v17 = vshrl.u32 %v16540_v26, 16  ;;  %v15509_v11 = vshll.u32 %v16539_v59, 16 }
 0x4f5   : > { %v14968_v46 = vadd.f32 %v14967_v22, %v14966_v3  ;;  %15603 = vst [vmem:[%s22647_s10 + $0x7c] sm:$0xf] %v15539_v40  ;;  %v23048_v23 = vshrl.u32 %v23458_v39, 7  ;;  %v15508_v5 = vrot.slane %v15506_v33, 7  ;;  %v15518_v21 = vshll.u32 %v16540_v26, 16 }
 0x4f6   : > { %v14901_v13 = vadd.f32 %v14900_v2, %v14899_v6  ;;  %v15517_v34 = vrot.slane %v15515_v17, 7  ;;  %v15504_v61 = vrot.slane %v15499_v48, 4  ;;  %v15529_v27 = vor.u32 %v15527_v50, %v15526_v51 }
 0x4f7   : > { %v14969_v18 = vrot.slane %v14968_v46, 2  ;;  %v15511_v31 = vor.u32 %v15509_v11, %v15508_v5  ;;  %v15513_v16 = vrot.slane %v15508_v5, 4  ;;  %vm14976_vm12 = vcmp.eq.s32.totalorder %v23048_v23, 1 }
 0x4f8   : > { %v14902_v38 = vrot.slane %v14901_v13, 1  ;;  %v15520_v55 = vor.u32 %v15518_v21, %v15517_v34  ;;  %v15522_v36 = vrot.slane %v15517_v34, 4  ;;  %vm14975_vm13 = vcmp.eq.s32.totalorder %v23048_v23, 0 }
 0x4f9   : > { %v14970_v56 = vadd.f32 %v14969_v18, %v14968_v46  ;;  %v15512_v58 = vsel %vm22627_vm11, %v15504_v61, %v15511_v31 }
 0x4fa   : > { %v15521_v0 = vsel %vm22627_vm11, %v15513_v16, %v15520_v55  ;;  %v15530_v25 = vsel %vm22627_vm11, %v15522_v36, %v15529_v27  ;;  %15600 = vst [vmem:[%s22647_s10 + $0x70] sm:$0xf] %v15512_v58 }
 0x4fb   : > { %v14971_v15 = vrot.slane %v14970_v56, 1  ;;  %15601 = vst [vmem:[%s22647_s10 + $0x74] sm:$0xf] %v15521_v0  ;;  %15602 = vst [vmem:[%s22647_s10 + $0x78] sm:$0xf] %v15530_v25 }
 0x4fd   : > { %v14972_v19 = vadd.f32 %v14971_v15, %v14970_v56 }
 0x4fe   : > { %19492 = shalt.err (!%p19489_p9)
}
 0x4ff   : > { %s19493_s10 = scalar_lea.hbm %s23058_s13, 2048  ;;  %s19497_s3 = scalar_lea.hbm %s23459_s11, 20480 }
 0x500   : > { %p19494_p11 = scmp.ne.s32.totalorder %s23058_s13, %s19493_s10  ;;  %p19498_p5 = scmp.lt.s32.totalorder %s23058_s13, %s23459_s11 }
 0x501   : > { %p19499_p0 = scmp.lt.s32.totalorder %s19497_s3, %s19493_s10 }
 0x502   : > { %p19495_p8 = pnand %p19494_p11, %p23461_p1 }
 0x503   : > { %p19500_p7 = por %p19499_p0, %p19498_p5 }
 0x504   : > { %p19496_p13 = pneg %p19495_p8 }
 0x506   : > { %p19501_p6 = pnand %p19500_p7, %p19496_p13 }
 0x508   : > { %19504 = shalt.err (!%p19501_p6)
}
 0x509   : > { %s19646_s15 = smov 64   ;;  %s19647_s6 = smov 4   ;;  %v14903_v45 = vadd.f32 %v14902_v38, %v14901_v13  ;;  %v14977_v35 = vsel %vm14976_vm12, %v14972_v19, 0.0 }
 0x50a   : > { %18598 = dma.vmem_to_hbm [thread:$0]  (%p23461_p1), %s23053_s0, 2048, %s23058_s13, %s15605_s9, %s19646_s15, %s19646_s15, %s19647_s6  }
 0x50b   : > { %s23462_s17 = sld [smem:[#allocation79_spill]]  ;;  %v14978_v47 = vsel %vm14975_vm13, %v14903_v45, %v14977_v35  ;;  %s15610_s14 = scalar_lea.sflag [#allocation12], %s22606_s28 }
 0x50c   : > { %14979 = vst [vmem:[%s23068_s4] sm:$0xff] %v14978_v47  ;;  %s19505_s30 = scalar_lea.vmem %s15644_s5, 128  ;;  %s19648_s0 = smov [#allocation11]  }
 0x50d   : > { %p19506_p4 = scmp.ne.s32.totalorder %s15644_s5, %s19505_s30  ;;  %s19509_s13 = sshll.u32 %s19648_s0, 4  ;;  %s19510_s13 = int_to_ptr.vmem [resolvable:$false] %s19509_s13 }
 0x50e   : > { %s19511_s24 = scalar_lea.vmem %s19510_s13, 256  ;;  %p19512_p12 = scmp.lt.s32.totalorder %s15644_s5, %s19510_s13 }
 0x50f   : > { %p19507_p3 = pnand %p19506_p4, %p23461_p1  ;;  %p19513_p2 = scmp.lt.s32.totalorder %s19511_s24, %s19505_s30 }
 0x511   : > { %s23105_s10 = scalar_lea.hbm %s23462_s17, %s16507_s20  ;;  %p19508_p10 = pneg %p19507_p3 }
 0x512   : > { %p19514_p9 = por %p19513_p2, %p19512_p12 }
 0x514   : > { %p19515_p11 = pnand %p19514_p9, %p19508_p10 }
 0x516   : > { %19518 = shalt.err (!%p19515_p11)
}
 0x517   : > { %s19519_s20 = scalar_lea.hbm %s23105_s10, 128  ;;  %s19523_s9 = scalar_lea.hbm %s23462_s17, 1280 }
 0x518   : > { %p19520_p8 = scmp.ne.s32.totalorder %s23105_s10, %s19519_s20  ;;  %p19524_p0 = scmp.lt.s32.totalorder %s23105_s10, %s23462_s17 }
 0x519   : > { %p19525_p7 = scmp.lt.s32.totalorder %s19523_s9, %s19519_s20 }
 0x51a   : > { %p19521_p13 = pnand %p19520_p8, %p23461_p1 }
 0x51b   : > { %p19526_p6 = por %p19525_p7, %p19524_p0 }
 0x51c   : > { %p19522_p5 = pneg %p19521_p13 }
 0x51e   : > { %p19527_p4 = pnand %p19526_p6, %p19522_p5 }
 0x520   : > { %19530 = shalt.err (!%p19527_p4)
}
 0x521   : > { %18599 = dma.vmem_to_hbm [thread:$0]  (%p23461_p1), %s15644_s5, 128, %s23105_s10, %s15610_s14  }
 0x522 PF: > { %s23463_s7 = sld [smem:[#allocation19_spill]] }
 0x523   : > { %s23464_s15 = sld [smem:[#allocation18_spill]] }
 0x524   : > { %s23465_s6 = sld [smem:[#allocation21_spill]] }
 0x528   : > { %p18625_p3 = scmp.ge.s32.totalorder %s23463_s7, 2 }
 0x529   : > { %s15655_s16 = sand.u32 1, %s23464_s15  }
 0x52a   : > { %p23466_p10 = scmp.ne.s32.totalorder %s23465_s6, 0  ;;  %s15656_s8 = scalar_lea.sflag [#allocation6], %s15655_s16 }
 0x52c   : > { %p18614_p12 = pnand %p18625_p3, %p23466_p10 }
 0x52e   : > { %p18615_p2 = pneg %p18614_p12 }
 0x530   : > { %19588 = dma.done.wait (%p18615_p2), %s15656_s8, 2048  }
 0x531   : > { %19590 = vsyncadd (%p18615_p2), %s15656_s8, 4294965248  ;;  %s15665_s30 = scalar_lea.sflag [#allocation12], %s15655_s16 }
 0x532   : > { %19592 = dma.done.wait (%p18615_p2), %s15665_s30, 128  }
 0x533   : > { %19594 = vsyncadd (%p18615_p2), %s15665_s30, 4294967168  ;;  %s26_s0 = sadd.s32 1, %s23463_s7   ;;  %s23467_s5 = sld [smem:[#allocation22_spill]] }
 0x534   : > { %p23_p9 = scmp.ge.s32.totalorder %s26_s0, 12   ;;  %s23468_s1 = smov %s19601_s18 }
 0x535   : > { %s23469_s18 = smov %s19605_s19  ;;  %s23470_s19 = smov %s19829_s12 }
 0x536   : > { %s23471_s20 = smov %s19613_s21  ;;  %s23472_s21 = smov %s19617_s22 }
 0x537   : > { %s23473_s22 = smov %s19826_s27  ;;  %s23474_s23 = smov %s19629_s25 }
 0x538   : > { %s23475_s24 = smov %s19633_s26  ;;  %s23477_s26 = smov %s23484_s29 }
 0x539   : > { %s23476_s25 = smov %s23467_s5  ;;  %s23478_s27 = smov %s26_s0 }
 0x53a   :  { %25 = sbr.rel (!%p23_p9) target bundleno = 17 (0x11), region = 134 }
 0x53f   :  { %15670 = vsyncpa [#allocation5], 1 }
 0x540   :  { %15672 = vsyncpa [#allocation5 + $0x1], 1 }
 0x541   :  { %15673 = vsyncpa [#allocation8], 1 }
 0x542   :  { %15675 = vsyncpa [#allocation8 + $0x1], 1 }
 0x543   :  { %15676 = vsyncpa [#allocation6], 1 }
 0x544   :  { %15678 = vsyncpa [#allocation6 + $0x1], 1 }
 0x545   :  { %15679 = vsyncpa [#allocation12], 1 }
 0x546   :  { %15681 = vsyncpa [#allocation12 + $0x1], 1 }

</bundles_post_ra>
